<compile_context>
chip_gen: v7x
topology: tpu7x:2x2x1
jax: 0.10.0
libtpu: 0.0.40
codegen_flags: <defaults>
</compile_context>

<pallas_src>
import jax
import jax.numpy as jnp
from jax import lax
from jax.experimental import pallas as pl
from jax.experimental.pallas import tpu as pltpu

C = 128            # lane-dense channel width: every layer zero-padded to 128
NUM_CLASSES = 10
K_STEM = 16        # stem im2col contraction: 9 taps zero-padded to 16


# --------------------------------------------------------------------------
# Fused whole-network Pallas kernel
# --------------------------------------------------------------------------
def _make_forward_kernel(H, W, b_tile, ch_rows):
    HW = H * W
    M0 = ch_rows * W            # rows per conv chunk (128 for 16x16 images)
    n_chunks = H // ch_rows

    def kernel(xp_ref, ws_ref, w3_ref, w1_ref, shift_ref, fcw_ref, fcb_ref,
               out_ref, prov_ref, act0_ref, act1_ref):
        # xp_ref   : (b_tile, HW, K_STEM) bf16  stem im2col patches
        # ws_ref   : (K_STEM, C)          bf16  stem weight (taps along K)
        # w3_ref   : (36, C, C)           bf16  4 conv layers x 9 taps, BN folded
        # w1_ref   : (2, C, C)            bf16  1x1 shortcut convs, BN folded
        # shift_ref: (7, 1, C)            f32   per-layer additive shift (bias/BN)
        # fcw_ref  : (C, C)               bf16  FC weight (padded)
        # fcb_ref  : (1, C)               f32   FC bias (padded)
        # out_ref  : (b_tile, 1, C)       f32   padded logits
        # prov_ref : (3, H+2, W, C)       bf16  x-1 / x / x+1 shifted providers,
        #                                       rows 0 and H+1 are the zero halo
        # act0_ref : (HW, C)              bf16  activation ping
        # act1_ref : (HW, C)              bf16  activation pong

        # Zero once per grid step: only interior rows 1..H are rewritten per
        # conv, so the top/bottom halo rows stay zero (== Conv2d padding=1).
        prov_ref[...] = jnp.zeros_like(prov_ref)

        def build_providers(src_ref):
            a2d = src_ref[...].reshape(H, W, C)
            zc = jnp.zeros((H, 1, C), jnp.bfloat16)
            prov_ref[0, 1:H + 1] = jnp.concatenate([zc, a2d[:, :W - 1, :]], axis=1)
            prov_ref[1, 1:H + 1] = a2d
            prov_ref[2, 1:H + 1] = jnp.concatenate([a2d[:, 1:, :], zc], axis=1)

        def conv_chunk(layer, chunk):
            """3x3 conv on one row chunk: 9 MXU matmuls, f32 register accumulation."""
            y0 = chunk * ch_rows
            acc = None
            for k in range(9):
                dy, dx = k // 3, k % 3
                patch = prov_ref[dx, y0 + dy:y0 + dy + ch_rows].reshape(M0, C)
                d = jnp.dot(patch, w3_ref[9 * layer + k],
                            preferred_element_type=jnp.float32)
                acc = d if acc is None else acc + d
            return acc

        for b in range(b_tile):
            # --- stem: conv(1->32) + bias + ReLU as one K=16 matmul per chunk ---
            for cnk in range(n_chunks):
                r0 = cnk * M0
                xp = xp_ref[b, r0:r0 + M0, :]
                acc = jnp.dot(xp, ws_ref[...], preferred_element_type=jnp.float32)
                acc = acc + shift_ref[0]
                act0_ref[r0:r0 + M0, :] = jnp.maximum(acc, 0.0).astype(jnp.bfloat16)

            # --- two residual blocks (input & output live in act0) ---
            for l1, l2, sci, s1, s2, ssc in ((0, 1, 0, 1, 2, 3), (2, 3, 1, 4, 5, 6)):
                # conv1 + bn1 + relu  (Dropout2d(p=0) is identity)
                build_providers(act0_ref)
                for cnk in range(n_chunks):
                    r0 = cnk * M0
                    h = conv_chunk(l1, cnk) + shift_ref[s1]
                    act1_ref[r0:r0 + M0, :] = jnp.maximum(h, 0.0).astype(jnp.bfloat16)
                # conv2 + bn2, 1x1 shortcut + bn (fused per chunk), add, relu
                build_providers(act1_ref)
                for cnk in range(n_chunks):
                    r0 = cnk * M0
                    h2 = conv_chunk(l2, cnk) + shift_ref[s2]
                    a_cnk = act0_ref[r0:r0 + M0, :]          # block input, still intact
                    sc = jnp.dot(a_cnk, w1_ref[sci],
                                 preferred_element_type=jnp.float32) + shift_ref[ssc]
                    out = jnp.maximum(h2 + sc, 0.0)
                    act0_ref[r0:r0 + M0, :] = out.astype(jnp.bfloat16)

            # --- global average pool (MXU matmul, f32 scale) + FC ---
            ones = jnp.full((1, HW), 1.0, jnp.bfloat16)
            pooled = jnp.dot(ones, act0_ref[...],
                             preferred_element_type=jnp.float32) * (1.0 / HW)
            logits = jnp.dot(pooled.astype(jnp.bfloat16), fcw_ref[...],
                             preferred_element_type=jnp.float32) + fcb_ref[...]
            out_ref[b] = logits

    return kernel


def _pick_batch_tile(n):
    for b in (8, 4, 2):
        if n % b == 0 and n // b >= 2:
            return b
    return 1


def _im2col_stem(x_nhwc):
    """(N, H, W, 1) f32 -> (N, HW, K_STEM) bf16 stem patches (tap k = dy*3 + dx)."""
    n, h, w, cin = x_nhwc.shape
    assert cin == 1, "ResNetLike stem takes a single input channel"
    xp = jnp.pad(x_nhwc[..., 0], ((0, 0), (1, 1), (1, 1)))
    taps = [xp[:, dy:dy + h, dx:dx + w] for dy in range(3) for dx in range(3)]
    pat = jnp.stack(taps, axis=-1).reshape(n, h * w, 9)
    pat = jnp.pad(pat, ((0, 0), (0, 0), (0, K_STEM - 9)))
    return pat.astype(jnp.bfloat16)


def resnetlike_forward_pallas(x_nhwc, prep):
    """Fused ResNetLike forward.  x_nhwc: (N, H, W, 1) f32 -> (N, 10) f32."""
    n, h, w, _ = x_nhwc.shape
    # TODO(synk): spatial sizes not divisible by 8 (e.g. 28x28) need a padded layout.
    assert h % 8 == 0 and w % 8 == 0
    hw = h * w
    ch_rows = min(h, max(1, 128 // w))
    assert h % ch_rows == 0
    b_tile = _pick_batch_tile(n)
    pat = _im2col_stem(x_nhwc)

    out = pl.pallas_call(
        _make_forward_kernel(h, w, b_tile, ch_rows),
        out_shape=jax.ShapeDtypeStruct((n, 1, C), jnp.float32),
        grid=(n // b_tile,),
        in_specs=[
            pl.BlockSpec((b_tile, hw, K_STEM), lambda i: (i, 0, 0)),
            pl.BlockSpec((K_STEM, C), lambda i: (0, 0)),
            pl.BlockSpec((36, C, C), lambda i: (0, 0, 0)),
            pl.BlockSpec((2, C, C), lambda i: (0, 0, 0)),
            pl.BlockSpec((7, 1, C), lambda i: (0, 0, 0)),
            pl.BlockSpec((C, C), lambda i: (0, 0)),
            pl.BlockSpec((1, C), lambda i: (0, 0)),
        ],
        out_specs=pl.BlockSpec((b_tile, 1, C), lambda i: (i, 0, 0)),
        scratch_shapes=[
            pltpu.VMEM((3, h + 2, w, C), jnp.bfloat16),   # shifted halo providers
            pltpu.VMEM((hw, C), jnp.bfloat16),            # activation ping
            pltpu.VMEM((hw, C), jnp.bfloat16),            # activation pong
        ],
        compiler_params=pltpu.CompilerParams(
            dimension_semantics=("parallel",),
            vmem_limit_bytes=32 * 1024 * 1024),
    )(pat, prep["ws"], prep["w3"], prep["w1"], prep["shifts"],
      prep["fcw"], prep["fcb"])
    return out[:, 0, :NUM_CLASSES]


# --------------------------------------------------------------------------
# Parameter preparation (PyTorch layout -> kernel layout, BN scale folded)
# --------------------------------------------------------------------------
def _fold_bn(p, eps=1e-5):
    scale = p["gamma"] / jnp.sqrt(p["var"] + eps)
    shift = p["beta"] - p["mean"] * scale
    return scale, shift


def _prep_stem(w):
    cout = w.shape[0]                                     # (Cout, 1, 3, 3)
    wk = jnp.transpose(w[:, 0], (1, 2, 0)).reshape(9, cout)
    wk = jnp.pad(wk, ((0, K_STEM - 9), (0, C - cout)))
    return wk.astype(jnp.bfloat16)


def _prep_conv3(w, scale):
    cout, cin = w.shape[0], w.shape[1]                    # (Cout, Cin, 3, 3)
    wk = jnp.transpose(w, (2, 3, 1, 0)).reshape(9, cin, cout) * scale[None, None, :]
    wk = jnp.pad(wk, ((0, 0), (0, C - cin), (0, C - cout)))
    return wk.astype(jnp.bfloat16)


def _prep_conv1(w, scale):
    cout, cin = w.shape[0], w.shape[1]                    # (Cout, Cin, 1, 1)
    wm = jnp.transpose(w[:, :, 0, 0], (1, 0)) * scale[None, :]
    wm = jnp.pad(wm, ((0, C - cin), (0, C - cout)))
    return wm.astype(jnp.bfloat16)


def _pad_vec(v):
    return jnp.pad(v, (0, C - v.shape[0])).reshape(1, C).astype(jnp.float32)


def prepare_params(raw):
    ws = _prep_stem(raw["conv0_w"])
    shifts = [_pad_vec(raw["conv0_b"])]
    w3, w1 = [], []
    for blk in ("res1", "res2"):
        p = raw[blk]
        s1, b1 = _fold_bn(p["bn1"])
        s2, b2 = _fold_bn(p["bn2"])
        ss, bs = _fold_bn(p["bn_s"])
        w3.append(_prep_conv3(p["conv1_w"], s1)); shifts.append(_pad_vec(b1))
        w3.append(_prep_conv3(p["conv2_w"], s2)); shifts.append(_pad_vec(b2))
        w1.append(_prep_conv1(p["sc_w"], ss));    shifts.append(_pad_vec(bs))
    fcw = jnp.pad(raw["fc_w"].T,
                  ((0, 0), (0, C - raw["fc_w"].shape[0]))).astype(jnp.bfloat16)
    return {
        "ws": ws,                                  # (16, 128)
        "w3": jnp.stack(w3).reshape(-1, C, C),     # (36, 128, 128)
        "w1": jnp.stack(w1),                       # (2, 128, 128)
        "shifts": jnp.stack(shifts),               # (7, 1, 128)
        "fcw": fcw,                                # (128, 128)
        "fcb": _pad_vec(raw["fc_b"]),              # (1, 128)
    }


# --------------------------------------------------------------------------
# References for verification
# --------------------------------------------------------------------------
def matched_ref_forward(x_nhwc, prep):
    """Plain-jnp reference mirroring the kernel's bf16/f32 op sequence."""
    n, h, w, _ = x_nhwc.shape
    hw = h * w
    pat = _im2col_stem(x_nhwc)
    ws, w3, w1, shifts = prep["ws"], prep["w3"], prep["w1"], prep["shifts"]

    a = jnp.einsum("npk,kc->npc", pat, ws, preferred_element_type=jnp.float32)
    a = jnp.maximum(a + shifts[0][None], 0.0).astype(jnp.bfloat16)

    def conv3x3(a_bf, layer):
        ap = jnp.pad(a_bf.reshape(n, h, w, C), ((0, 0), (1, 1), (1, 1), (0, 0)))
        acc = jnp.zeros((n, hw, C), jnp.float32)
        for k in range(9):
            dy, dx = k // 3, k % 3
            patch = ap[:, dy:dy + h, dx:dx + w, :].reshape(n, hw, C)
            acc = acc + jnp.einsum("npc,cd->npd", patch, w3[9 * layer + k],
                                   preferred_element_type=jnp.float32)
        return acc

    for l1, l2, sci, s1, s2, ssc in ((0, 1, 0, 1, 2, 3), (2, 3, 1, 4, 5, 6)):
        hmid = jnp.maximum(conv3x3(a, l1) + shifts[s1][None], 0.0).astype(jnp.bfloat16)
        h2 = conv3x3(hmid, l2) + shifts[s2][None]
        sc = jnp.einsum("npc,cd->npd", a, w1[sci],
                        preferred_element_type=jnp.float32) + shifts[ssc][None]
        a = jnp.maximum(h2 + sc, 0.0).astype(jnp.bfloat16)

    ones = jnp.full((n, 1, hw), 1.0, jnp.bfloat16)
    pooled = jnp.einsum("nqp,npc->nqc", ones, a,
                        preferred_element_type=jnp.float32) * (1.0 / hw)
    logits = jnp.einsum("nqc,cd->nqd", pooled.astype(jnp.bfloat16), prep["fcw"],
                        preferred_element_type=jnp.float32) + prep["fcb"][None]
    return logits[:, 0, :NUM_CLASSES]


def torch_style_ref(x_nchw, raw):
    """Full-precision f32 reference straight from the PyTorch-layout params."""
    def conv(x, w, pad):
        return lax.conv_general_dilated(x, w, (1, 1), pad,
                                        dimension_numbers=("NCHW", "OIHW", "NCHW"))

    def bn_eval(x, p, eps=1e-5):
        s = p["gamma"] / jnp.sqrt(p["var"] + eps)
        b = p["beta"] - p["mean"] * s
        return x * s[None, :, None, None] + b[None, :, None, None]

    x = conv(x_nchw, raw["conv0_w"], ((1, 1), (1, 1))) + raw["conv0_b"][None, :, None, None]
    x = jnp.maximum(x, 0.0)
    for blk in ("res1", "res2"):
        p = raw[blk]
        h = jnp.maximum(bn_eval(conv(x, p["conv1_w"], ((1, 1), (1, 1))), p["bn1"]), 0.0)
        h = bn_eval(conv(h, p["conv2_w"], ((1, 1), (1, 1))), p["bn2"])
        sc = bn_eval(conv(x, p["sc_w"], ((0, 0), (0, 0))), p["bn_s"])
        x = jnp.maximum(h + sc, 0.0)
    pooled = jnp.mean(x, axis=(2, 3))
    return pooled @ raw["fc_w"].T + raw["fc_b"][None, :]


# --------------------------------------------------------------------------
# Deterministic parameter init (PyTorch layouts / ResNetLike shapes)
# --------------------------------------------------------------------------
def init_raw_params(key):
    ks = iter(jax.random.split(key, 16))

    def conv_w(cout, cin, k):
        fan_in = cin * k * k
        return jax.random.normal(next(ks), (cout, cin, k, k), jnp.float32) * (2.0 / fan_in) ** 0.5

    def bn(c):
        # PyTorch eval-mode defaults: gamma=1, beta=0, running_mean=0, running_var=1.
        return {"gamma": jnp.ones((c,), jnp.float32), "beta": jnp.zeros((c,), jnp.float32),
                "mean": jnp.zeros((c,), jnp.float32), "var": jnp.ones((c,), jnp.float32)}

    return {
        "conv0_w": conv_w(32, 1, 3),
        "conv0_b": jax.random.normal(next(ks), (32,), jnp.float32) * 0.01,
        "res1": {"conv1_w": conv_w(64, 32, 3), "bn1": bn(64),
                 "conv2_w": conv_w(64, 64, 3), "bn2": bn(64),
                 "sc_w": conv_w(64, 32, 1), "bn_s": bn(64)},
        "res2": {"conv1_w": conv_w(128, 64, 3), "bn1": bn(128),
                 "conv2_w": conv_w(128, 128, 3), "bn2": bn(128),
                 "sc_w": conv_w(128, 64, 1), "bn_s": bn(128)},
        "fc_w": jax.random.normal(next(ks), (10, 128), jnp.float32) * (1.0 / 128.0) ** 0.5,
        "fc_b": jax.random.normal(next(ks), (10,), jnp.float32) * 0.01,
    }


if __name__ == "__main__":
    key = jax.random.PRNGKey(0)
    kx, kp = jax.random.split(key)

    # MNIST-like single-channel input at a small spatial size.
    x_nchw = jax.random.normal(kx, (2, 1, 16, 16), jnp.float32)
    x_nhwc = jnp.transpose(x_nchw, (0, 2, 3, 1))

    raw = init_raw_params(kp)
    prep = prepare_params(raw)

    fwd = jax.jit(resnetlike_forward_pallas)
    logits = jax.block_until_ready(fwd(x_nhwc, prep))
    assert logits.shape == (2, NUM_CLASSES)

    # 1) tight check vs. a jnp reference with identical bf16/f32 op sequence
    ref_m = jax.block_until_ready(matched_ref_forward(x_nhwc, prep))
    err_m = float(jnp.max(jnp.abs(logits - ref_m)))
    assert err_m < 2e-2, f"Pallas vs matched bf16 reference mismatch: {err_m}"

    # 2) loose check vs. a full-f32 reference built from the raw PyTorch params
    ref_f = jax.block_until_ready(torch_style_ref(x_nchw, raw))
    scale = max(1.0, float(jnp.max(jnp.abs(ref_f))))
    err_f = float(jnp.max(jnp.abs(logits - ref_f)))
    assert err_f < 0.1 * scale + 0.02, f"Pallas vs f32 reference mismatch: {err_f}"

    print("KERNEL_OK")
</pallas_src>

<mosaic_0001>
module attributes {stable_mosaic.version = 11 : i64} {
  func.func @kernel(%arg0: i32, %arg1: memref<1x256x16xbf16, #tpu.memory_space<vmem>>, %arg2: memref<16x128xbf16, #tpu.memory_space<vmem>>, %arg3: memref<36x128x128xbf16, #tpu.memory_space<vmem>>, %arg4: memref<2x128x128xbf16, #tpu.memory_space<vmem>>, %arg5: memref<7x1x128xf32, #tpu.memory_space<vmem>>, %arg6: memref<128x128xbf16, #tpu.memory_space<vmem>>, %arg7: memref<1x128xf32, #tpu.memory_space<vmem>>, %arg8: memref<1x1x128xf32, #tpu.memory_space<vmem>>, %arg9: memref<3x18x16x128xbf16, #tpu.memory_space<vmem>>, %arg10: memref<256x128xbf16, #tpu.memory_space<vmem>>, %arg11: memref<256x128xbf16, #tpu.memory_space<vmem>>) attributes {dimension_semantics = [#tpu.dimension_semantics<parallel>], iteration_bounds = array<i64: 2>, scalar_prefetch = 0 : i64, scratch_operands = 3 : i64, tpu.core_type = #tpu.core_type<tc>, window_params = [{transform_indices = @transform_0, window_bounds = array<i64: 1, 256, 16>}, {pipeline_mode = #tpu.pipeline_mode<synchronous>, transform_indices = @transform_1, window_bounds = array<i64: 16, 128>}, {pipeline_mode = #tpu.pipeline_mode<synchronous>, transform_indices = @transform_2, window_bounds = array<i64: 36, 128, 128>}, {pipeline_mode = #tpu.pipeline_mode<synchronous>, transform_indices = @transform_3, window_bounds = array<i64: 2, 128, 128>}, {pipeline_mode = #tpu.pipeline_mode<synchronous>, transform_indices = @transform_4, window_bounds = array<i64: 7, 1, 128>}, {pipeline_mode = #tpu.pipeline_mode<synchronous>, transform_indices = @transform_5, window_bounds = array<i64: 128, 128>}, {pipeline_mode = #tpu.pipeline_mode<synchronous>, transform_indices = @transform_6, window_bounds = array<i64: 1, 128>}, {transform_indices = @transform_7, window_bounds = array<i64: 1, 1, 128>}]} {
    %cst = arith.constant 0.000000e+00 : bf16
    %0 = vector.broadcast %cst : bf16 to vector<3x18x16x128xbf16>
    %c0 = arith.constant 0 : index
    %c0_0 = arith.constant 0 : index
    %c0_1 = arith.constant 0 : index
    %c0_2 = arith.constant 0 : index
    %1 = vector.load %arg9[%c0, %c0_0, %c0_1, %c0_2] : memref<3x18x16x128xbf16, #tpu.memory_space<vmem>>, vector<3x18x16x128xbf16>
    tpu.vector_store %arg9[%c0, %c0_0, %c0_1, %c0_2], %0 {strides = array<i32>} : memref<3x18x16x128xbf16, #tpu.memory_space<vmem>>, vector<3x18x16x128xbf16>,
    %c0_3 = arith.constant 0 : index
    %c0_4 = arith.constant 0 : index
    %c0_5 = arith.constant 0 : index
    %2 = vector.load %arg1[%c0_3, %c0_4, %c0_5] : memref<1x256x16xbf16, #tpu.memory_space<vmem>>, vector<1x128x16xbf16>
    %3 = vector.shape_cast %2 : vector<1x128x16xbf16> to vector<128x16xbf16>
    %c0_6 = arith.constant 0 : index
    %c0_7 = arith.constant 0 : index
    %4 = vector.load %arg2[%c0_6, %c0_7] : memref<16x128xbf16, #tpu.memory_space<vmem>>, vector<16x128xbf16>
    %cst_8 = arith.constant dense<0.000000e+00> : vector<128x128xf32>
    %5 = tpu.matmul %3, %4, %cst_8 {dimension_numbers = #tpu.dot_dimension_numbers<[1], [0], [0], [1], [0, 0, 1, 1], [], []>} : vector<128x16xbf16>, vector<16x128xbf16>, vector<128x128xf32> -> vector<128x128xf32>
    %c0_9 = arith.constant 0 : index
    %c0_10 = arith.constant 0 : index
    %c0_11 = arith.constant 0 : index
    %6 = vector.load %arg5[%c0_9, %c0_10, %c0_11] : memref<7x1x128xf32, #tpu.memory_space<vmem>>, vector<1x1x128xf32>
    %7 = vector.shape_cast %6 : vector<1x1x128xf32> to vector<1x128xf32>
    %8 = vector.broadcast %7 : vector<1x128xf32> to vector<128x128xf32>
    %9 = arith.addf %5, %8 : vector<128x128xf32>
    %cst_12 = arith.constant 0.000000e+00 : f32
    %10 = vector.broadcast %cst_12 : f32 to vector<128x128xf32>
    %11 = arith.maximumf %9, %10 : vector<128x128xf32>
    %12 = arith.truncf %11 : vector<128x128xf32> to vector<128x128xbf16>
    %c0_13 = arith.constant 0 : index
    %c0_14 = arith.constant 0 : index
    %13 = vector.load %arg10[%c0_13, %c0_14] : memref<256x128xbf16, #tpu.memory_space<vmem>>, vector<128x128xbf16>
    tpu.vector_store %arg10[%c0_13, %c0_14], %12 {strides = array<i32>} : memref<256x128xbf16, #tpu.memory_space<vmem>>, vector<128x128xbf16>,
    %c0_15 = arith.constant 0 : index
    %c128 = arith.constant 128 : index
    %c0_16 = arith.constant 0 : index
    %14 = vector.load %arg1[%c0_15, %c128, %c0_16] : memref<1x256x16xbf16, #tpu.memory_space<vmem>>, vector<1x128x16xbf16>
    %15 = vector.shape_cast %14 : vector<1x128x16xbf16> to vector<128x16xbf16>
    %c0_17 = arith.constant 0 : index
    %c0_18 = arith.constant 0 : index
    %16 = vector.load %arg2[%c0_17, %c0_18] : memref<16x128xbf16, #tpu.memory_space<vmem>>, vector<16x128xbf16>
    %cst_19 = arith.constant dense<0.000000e+00> : vector<128x128xf32>
    %17 = tpu.matmul %15, %16, %cst_19 {dimension_numbers = #tpu.dot_dimension_numbers<[1], [0], [0], [1], [0, 0, 1, 1], [], []>} : vector<128x16xbf16>, vector<16x128xbf16>, vector<128x128xf32> -> vector<128x128xf32>
    %c0_20 = arith.constant 0 : index
    %c0_21 = arith.constant 0 : index
    %c0_22 = arith.constant 0 : index
    %18 = vector.load %arg5[%c0_20, %c0_21, %c0_22] : memref<7x1x128xf32, #tpu.memory_space<vmem>>, vector<1x1x128xf32>
    %19 = vector.shape_cast %18 : vector<1x1x128xf32> to vector<1x128xf32>
    %20 = vector.broadcast %19 : vector<1x128xf32> to vector<128x128xf32>
    %21 = arith.addf %17, %20 : vector<128x128xf32>
    %cst_23 = arith.constant 0.000000e+00 : f32
    %22 = vector.broadcast %cst_23 : f32 to vector<128x128xf32>
    %23 = arith.maximumf %21, %22 : vector<128x128xf32>
    %24 = arith.truncf %23 : vector<128x128xf32> to vector<128x128xbf16>
    %c128_24 = arith.constant 128 : index
    %c0_25 = arith.constant 0 : index
    %25 = vector.load %arg10[%c128_24, %c0_25] : memref<256x128xbf16, #tpu.memory_space<vmem>>, vector<128x128xbf16>
    tpu.vector_store %arg10[%c128_24, %c0_25], %24 {strides = array<i32>} : memref<256x128xbf16, #tpu.memory_space<vmem>>, vector<128x128xbf16>,
    %c0_26 = arith.constant 0 : index
    %c0_27 = arith.constant 0 : index
    %26 = vector.load %arg10[%c0_26, %c0_27] : memref<256x128xbf16, #tpu.memory_space<vmem>>, vector<256x128xbf16>
    %27 = vector.shape_cast %26 : vector<256x128xbf16> to vector<16x16x128xbf16>
    %cst_28 = arith.constant 0.000000e+00 : bf16
    %28 = vector.broadcast %cst_28 : bf16 to vector<16x1x128xbf16>
    %29 = vector.extract_strided_slice %27 {offsets = [0, 0, 0], sizes = [16, 15, 128], strides = [1, 1, 1]} : vector<16x16x128xbf16> to vector<16x15x128xbf16>
    %30 = tpu.concatenate %28, %29 in 1 : vector<16x1x128xbf16>, vector<16x15x128xbf16> -> vector<16x16x128xbf16>
    %c0_29 = arith.constant 0 : index
    %c1 = arith.constant 1 : index
    %c0_30 = arith.constant 0 : index
    %c0_31 = arith.constant 0 : index
    %31 = vector.load %arg9[%c0_29, %c1, %c0_30, %c0_31] : memref<3x18x16x128xbf16, #tpu.memory_space<vmem>>, vector<1x16x16x128xbf16>
    %32 = vector.shape_cast %31 : vector<1x16x16x128xbf16> to vector<16x16x128xbf16>
    %33 = vector.shape_cast %30 : vector<16x16x128xbf16> to vector<1x16x16x128xbf16>
    tpu.vector_store %arg9[%c0_29, %c1, %c0_30, %c0_31], %33 {strides = array<i32>} : memref<3x18x16x128xbf16, #tpu.memory_space<vmem>>, vector<1x16x16x128xbf16>,
    %c1_32 = arith.constant 1 : index
    %c1_33 = arith.constant 1 : index
    %c0_34 = arith.constant 0 : index
    %c0_35 = arith.constant 0 : index
    %34 = vector.load %arg9[%c1_32, %c1_33, %c0_34, %c0_35] : memref<3x18x16x128xbf16, #tpu.memory_space<vmem>>, vector<1x16x16x128xbf16>
    %35 = vector.shape_cast %34 : vector<1x16x16x128xbf16> to vector<16x16x128xbf16>
    %36 = vector.shape_cast %27 : vector<16x16x128xbf16> to vector<1x16x16x128xbf16>
    tpu.vector_store %arg9[%c1_32, %c1_33, %c0_34, %c0_35], %36 {strides = array<i32>} : memref<3x18x16x128xbf16, #tpu.memory_space<vmem>>, vector<1x16x16x128xbf16>,
    %37 = vector.extract_strided_slice %27 {offsets = [0, 1, 0], sizes = [16, 15, 128], strides = [1, 1, 1]} : vector<16x16x128xbf16> to vector<16x15x128xbf16>
    %38 = tpu.concatenate %37, %28 in 1 : vector<16x15x128xbf16>, vector<16x1x128xbf16> -> vector<16x16x128xbf16>
    %c2 = arith.constant 2 : index
    %c1_36 = arith.constant 1 : index
    %c0_37 = arith.constant 0 : index
    %c0_38 = arith.constant 0 : index
    %39 = vector.load %arg9[%c2, %c1_36, %c0_37, %c0_38] : memref<3x18x16x128xbf16, #tpu.memory_space<vmem>>, vector<1x16x16x128xbf16>
    %40 = vector.shape_cast %39 : vector<1x16x16x128xbf16> to vector<16x16x128xbf16>
    %41 = vector.shape_cast %38 : vector<16x16x128xbf16> to vector<1x16x16x128xbf16>
    tpu.vector_store %arg9[%c2, %c1_36, %c0_37, %c0_38], %41 {strides = array<i32>} : memref<3x18x16x128xbf16, #tpu.memory_space<vmem>>, vector<1x16x16x128xbf16>,
    %c0_39 = arith.constant 0 : index
    %c0_40 = arith.constant 0 : index
    %c0_41 = arith.constant 0 : index
    %c0_42 = arith.constant 0 : index
    %42 = vector.load %arg9[%c0_39, %c0_40, %c0_41, %c0_42] : memref<3x18x16x128xbf16, #tpu.memory_space<vmem>>, vector<1x8x16x128xbf16>
    %43 = vector.shape_cast %42 : vector<1x8x16x128xbf16> to vector<8x16x128xbf16>
    %44 = vector.shape_cast %43 : vector<8x16x128xbf16> to vector<128x128xbf16>
    %c0_43 = arith.constant 0 : index
    %c0_44 = arith.constant 0 : index
    %c0_45 = arith.constant 0 : index
    %45 = vector.load %arg3[%c0_43, %c0_44, %c0_45] : memref<36x128x128xbf16, #tpu.memory_space<vmem>>, vector<1x128x128xbf16>
    %46 = vector.shape_cast %45 : vector<1x128x128xbf16> to vector<128x128xbf16>
    %cst_46 = arith.constant dense<0.000000e+00> : vector<128x128xf32>
    %47 = tpu.matmul %44, %46, %cst_46 {dimension_numbers = #tpu.dot_dimension_numbers<[1], [0], [0], [1], [0, 0, 1, 1], [], []>} : vector<128x128xbf16>, vector<128x128xbf16>, vector<128x128xf32> -> vector<128x128xf32>
    %c1_47 = arith.constant 1 : index
    %c0_48 = arith.constant 0 : index
    %c0_49 = arith.constant 0 : index
    %c0_50 = arith.constant 0 : index
    %48 = vector.load %arg9[%c1_47, %c0_48, %c0_49, %c0_50] : memref<3x18x16x128xbf16, #tpu.memory_space<vmem>>, vector<1x8x16x128xbf16>
    %49 = vector.shape_cast %48 : vector<1x8x16x128xbf16> to vector<8x16x128xbf16>
    %50 = vector.shape_cast %49 : vector<8x16x128xbf16> to vector<128x128xbf16>
    %c1_51 = arith.constant 1 : index
    %c0_52 = arith.constant 0 : index
    %c0_53 = arith.constant 0 : index
    %51 = vector.load %arg3[%c1_51, %c0_52, %c0_53] : memref<36x128x128xbf16, #tpu.memory_space<vmem>>, vector<1x128x128xbf16>
    %52 = vector.shape_cast %51 : vector<1x128x128xbf16> to vector<128x128xbf16>
    %cst_54 = arith.constant dense<0.000000e+00> : vector<128x128xf32>
    %53 = tpu.matmul %50, %52, %cst_54 {dimension_numbers = #tpu.dot_dimension_numbers<[1], [0], [0], [1], [0, 0, 1, 1], [], []>} : vector<128x128xbf16>, vector<128x128xbf16>, vector<128x128xf32> -> vector<128x128xf32>
    %54 = arith.addf %47, %53 : vector<128x128xf32>
    %c2_55 = arith.constant 2 : index
    %c0_56 = arith.constant 0 : index
    %c0_57 = arith.constant 0 : index
    %c0_58 = arith.constant 0 : index
    %55 = vector.load %arg9[%c2_55, %c0_56, %c0_57, %c0_58] : memref<3x18x16x128xbf16, #tpu.memory_space<vmem>>, vector<1x8x16x128xbf16>
    %56 = vector.shape_cast %55 : vector<1x8x16x128xbf16> to vector<8x16x128xbf16>
    %57 = vector.shape_cast %56 : vector<8x16x128xbf16> to vector<128x128xbf16>
    %c2_59 = arith.constant 2 : index
    %c0_60 = arith.constant 0 : index
    %c0_61 = arith.constant 0 : index
    %58 = vector.load %arg3[%c2_59, %c0_60, %c0_61] : memref<36x128x128xbf16, #tpu.memory_space<vmem>>, vector<1x128x128xbf16>
    %59 = vector.shape_cast %58 : vector<1x128x128xbf16> to vector<128x128xbf16>
    %cst_62 = arith.constant dense<0.000000e+00> : vector<128x128xf32>
    %60 = tpu.matmul %57, %59, %cst_62 {dimension_numbers = #tpu.dot_dimension_numbers<[1], [0], [0], [1], [0, 0, 1, 1], [], []>} : vector<128x128xbf16>, vector<128x128xbf16>, vector<128x128xf32> -> vector<128x128xf32>
    %61 = arith.addf %54, %60 : vector<128x128xf32>
    %c0_63 = arith.constant 0 : index
    %c1_64 = arith.constant 1 : index
    %c0_65 = arith.constant 0 : index
    %c0_66 = arith.constant 0 : index
    %62 = vector.load %arg9[%c0_63, %c1_64, %c0_65, %c0_66] : memref<3x18x16x128xbf16, #tpu.memory_space<vmem>>, vector<1x8x16x128xbf16>
    %63 = vector.shape_cast %62 : vector<1x8x16x128xbf16> to vector<8x16x128xbf16>
    %64 = vector.shape_cast %63 : vector<8x16x128xbf16> to vector<128x128xbf16>
    %c3 = arith.constant 3 : index
    %c0_67 = arith.constant 0 : index
    %c0_68 = arith.constant 0 : index
    %65 = vector.load %arg3[%c3, %c0_67, %c0_68] : memref<36x128x128xbf16, #tpu.memory_space<vmem>>, vector<1x128x128xbf16>
    %66 = vector.shape_cast %65 : vector<1x128x128xbf16> to vector<128x128xbf16>
    %cst_69 = arith.constant dense<0.000000e+00> : vector<128x128xf32>
    %67 = tpu.matmul %64, %66, %cst_69 {dimension_numbers = #tpu.dot_dimension_numbers<[1], [0], [0], [1], [0, 0, 1, 1], [], []>} : vector<128x128xbf16>, vector<128x128xbf16>, vector<128x128xf32> -> vector<128x128xf32>
    %68 = arith.addf %61, %67 : vector<128x128xf32>
    %c1_70 = arith.constant 1 : index
    %c1_71 = arith.constant 1 : index
    %c0_72 = arith.constant 0 : index
    %c0_73 = arith.constant 0 : index
    %69 = vector.load %arg9[%c1_70, %c1_71, %c0_72, %c0_73] : memref<3x18x16x128xbf16, #tpu.memory_space<vmem>>, vector<1x8x16x128xbf16>
    %70 = vector.shape_cast %69 : vector<1x8x16x128xbf16> to vector<8x16x128xbf16>
    %71 = vector.shape_cast %70 : vector<8x16x128xbf16> to vector<128x128xbf16>
    %c4 = arith.constant 4 : index
    %c0_74 = arith.constant 0 : index
    %c0_75 = arith.constant 0 : index
    %72 = vector.load %arg3[%c4, %c0_74, %c0_75] : memref<36x128x128xbf16, #tpu.memory_space<vmem>>, vector<1x128x128xbf16>
    %73 = vector.shape_cast %72 : vector<1x128x128xbf16> to vector<128x128xbf16>
    %cst_76 = arith.constant dense<0.000000e+00> : vector<128x128xf32>
    %74 = tpu.matmul %71, %73, %cst_76 {dimension_numbers = #tpu.dot_dimension_numbers<[1], [0], [0], [1], [0, 0, 1, 1], [], []>} : vector<128x128xbf16>, vector<128x128xbf16>, vector<128x128xf32> -> vector<128x128xf32>
    %75 = arith.addf %68, %74 : vector<128x128xf32>
    %c2_77 = arith.constant 2 : index
    %c1_78 = arith.constant 1 : index
    %c0_79 = arith.constant 0 : index
    %c0_80 = arith.constant 0 : index
    %76 = vector.load %arg9[%c2_77, %c1_78, %c0_79, %c0_80] : memref<3x18x16x128xbf16, #tpu.memory_space<vmem>>, vector<1x8x16x128xbf16>
    %77 = vector.shape_cast %76 : vector<1x8x16x128xbf16> to vector<8x16x128xbf16>
    %78 = vector.shape_cast %77 : vector<8x16x128xbf16> to vector<128x128xbf16>
    %c5 = arith.constant 5 : index
    %c0_81 = arith.constant 0 : index
    %c0_82 = arith.constant 0 : index
    %79 = vector.load %arg3[%c5, %c0_81, %c0_82] : memref<36x128x128xbf16, #tpu.memory_space<vmem>>, vector<1x128x128xbf16>
    %80 = vector.shape_cast %79 : vector<1x128x128xbf16> to vector<128x128xbf16>
    %cst_83 = arith.constant dense<0.000000e+00> : vector<128x128xf32>
    %81 = tpu.matmul %78, %80, %cst_83 {dimension_numbers = #tpu.dot_dimension_numbers<[1], [0], [0], [1], [0, 0, 1, 1], [], []>} : vector<128x128xbf16>, vector<128x128xbf16>, vector<128x128xf32> -> vector<128x128xf32>
    %82 = arith.addf %75, %81 : vector<128x128xf32>
    %c0_84 = arith.constant 0 : index
    %c2_85 = arith.constant 2 : index
    %c0_86 = arith.constant 0 : index
    %c0_87 = arith.constant 0 : index
    %83 = vector.load %arg9[%c0_84, %c2_85, %c0_86, %c0_87] : memref<3x18x16x128xbf16, #tpu.memory_space<vmem>>, vector<1x8x16x128xbf16>
    %84 = vector.shape_cast %83 : vector<1x8x16x128xbf16> to vector<8x16x128xbf16>
    %85 = vector.shape_cast %84 : vector<8x16x128xbf16> to vector<128x128xbf16>
    %c6 = arith.constant 6 : index
    %c0_88 = arith.constant 0 : index
    %c0_89 = arith.constant 0 : index
    %86 = vector.load %arg3[%c6, %c0_88, %c0_89] : memref<36x128x128xbf16, #tpu.memory_space<vmem>>, vector<1x128x128xbf16>
    %87 = vector.shape_cast %86 : vector<1x128x128xbf16> to vector<128x128xbf16>
    %cst_90 = arith.constant dense<0.000000e+00> : vector<128x128xf32>
    %88 = tpu.matmul %85, %87, %cst_90 {dimension_numbers = #tpu.dot_dimension_numbers<[1], [0], [0], [1], [0, 0, 1, 1], [], []>} : vector<128x128xbf16>, vector<128x128xbf16>, vector<128x128xf32> -> vector<128x128xf32>
    %89 = arith.addf %82, %88 : vector<128x128xf32>
    %c1_91 = arith.constant 1 : index
    %c2_92 = arith.constant 2 : index
    %c0_93 = arith.constant 0 : index
    %c0_94 = arith.constant 0 : index
    %90 = vector.load %arg9[%c1_91, %c2_92, %c0_93, %c0_94] : memref<3x18x16x128xbf16, #tpu.memory_space<vmem>>, vector<1x8x16x128xbf16>
    %91 = vector.shape_cast %90 : vector<1x8x16x128xbf16> to vector<8x16x128xbf16>
    %92 = vector.shape_cast %91 : vector<8x16x128xbf16> to vector<128x128xbf16>
    %c7 = arith.constant 7 : index
    %c0_95 = arith.constant 0 : index
    %c0_96 = arith.constant 0 : index
    %93 = vector.load %arg3[%c7, %c0_95, %c0_96] : memref<36x128x128xbf16, #tpu.memory_space<vmem>>, vector<1x128x128xbf16>
    %94 = vector.shape_cast %93 : vector<1x128x128xbf16> to vector<128x128xbf16>
    %cst_97 = arith.constant dense<0.000000e+00> : vector<128x128xf32>
    %95 = tpu.matmul %92, %94, %cst_97 {dimension_numbers = #tpu.dot_dimension_numbers<[1], [0], [0], [1], [0, 0, 1, 1], [], []>} : vector<128x128xbf16>, vector<128x128xbf16>, vector<128x128xf32> -> vector<128x128xf32>
    %96 = arith.addf %89, %95 : vector<128x128xf32>
    %c2_98 = arith.constant 2 : index
    %c2_99 = arith.constant 2 : index
    %c0_100 = arith.constant 0 : index
    %c0_101 = arith.constant 0 : index
    %97 = vector.load %arg9[%c2_98, %c2_99, %c0_100, %c0_101] : memref<3x18x16x128xbf16, #tpu.memory_space<vmem>>, vector<1x8x16x128xbf16>
    %98 = vector.shape_cast %97 : vector<1x8x16x128xbf16> to vector<8x16x128xbf16>
    %99 = vector.shape_cast %98 : vector<8x16x128xbf16> to vector<128x128xbf16>
    %c8 = arith.constant 8 : index
    %c0_102 = arith.constant 0 : index
    %c0_103 = arith.constant 0 : index
    %100 = vector.load %arg3[%c8, %c0_102, %c0_103] : memref<36x128x128xbf16, #tpu.memory_space<vmem>>, vector<1x128x128xbf16>
    %101 = vector.shape_cast %100 : vector<1x128x128xbf16> to vector<128x128xbf16>
    %cst_104 = arith.constant dense<0.000000e+00> : vector<128x128xf32>
    %102 = tpu.matmul %99, %101, %cst_104 {dimension_numbers = #tpu.dot_dimension_numbers<[1], [0], [0], [1], [0, 0, 1, 1], [], []>} : vector<128x128xbf16>, vector<128x128xbf16>, vector<128x128xf32> -> vector<128x128xf32>
    %103 = arith.addf %96, %102 : vector<128x128xf32>
    %c1_105 = arith.constant 1 : index
    %c0_106 = arith.constant 0 : index
    %c0_107 = arith.constant 0 : index
    %104 = vector.load %arg5[%c1_105, %c0_106, %c0_107] : memref<7x1x128xf32, #tpu.memory_space<vmem>>, vector<1x1x128xf32>
    %105 = vector.shape_cast %104 : vector<1x1x128xf32> to vector<1x128xf32>
    %106 = vector.broadcast %105 : vector<1x128xf32> to vector<128x128xf32>
    %107 = arith.addf %103, %106 : vector<128x128xf32>
    %cst_108 = arith.constant 0.000000e+00 : f32
    %108 = vector.broadcast %cst_108 : f32 to vector<128x128xf32>
    %109 = arith.maximumf %107, %108 : vector<128x128xf32>
    %110 = arith.truncf %109 : vector<128x128xf32> to vector<128x128xbf16>
    %c0_109 = arith.constant 0 : index
    %c0_110 = arith.constant 0 : index
    %111 = vector.load %arg11[%c0_109, %c0_110] : memref<256x128xbf16, #tpu.memory_space<vmem>>, vector<128x128xbf16>
    tpu.vector_store %arg11[%c0_109, %c0_110], %110 {strides = array<i32>} : memref<256x128xbf16, #tpu.memory_space<vmem>>, vector<128x128xbf16>,
    %c0_111 = arith.constant 0 : index
    %c8_112 = arith.constant 8 : index
    %c0_113 = arith.constant 0 : index
    %c0_114 = arith.constant 0 : index
    %112 = vector.load %arg9[%c0_111, %c8_112, %c0_113, %c0_114] : memref<3x18x16x128xbf16, #tpu.memory_space<vmem>>, vector<1x8x16x128xbf16>
    %113 = vector.shape_cast %112 : vector<1x8x16x128xbf16> to vector<8x16x128xbf16>
    %114 = vector.shape_cast %113 : vector<8x16x128xbf16> to vector<128x128xbf16>
    %c0_115 = arith.constant 0 : index
    %c0_116 = arith.constant 0 : index
    %c0_117 = arith.constant 0 : index
    %115 = vector.load %arg3[%c0_115, %c0_116, %c0_117] : memref<36x128x128xbf16, #tpu.memory_space<vmem>>, vector<1x128x128xbf16>
    %116 = vector.shape_cast %115 : vector<1x128x128xbf16> to vector<128x128xbf16>
    %cst_118 = arith.constant dense<0.000000e+00> : vector<128x128xf32>
    %117 = tpu.matmul %114, %116, %cst_118 {dimension_numbers = #tpu.dot_dimension_numbers<[1], [0], [0], [1], [0, 0, 1, 1], [], []>} : vector<128x128xbf16>, vector<128x128xbf16>, vector<128x128xf32> -> vector<128x128xf32>
    %c1_119 = arith.constant 1 : index
    %c8_120 = arith.constant 8 : index
    %c0_121 = arith.constant 0 : index
    %c0_122 = arith.constant 0 : index
    %118 = vector.load %arg9[%c1_119, %c8_120, %c0_121, %c0_122] : memref<3x18x16x128xbf16, #tpu.memory_space<vmem>>, vector<1x8x16x128xbf16>
    %119 = vector.shape_cast %118 : vector<1x8x16x128xbf16> to vector<8x16x128xbf16>
    %120 = vector.shape_cast %119 : vector<8x16x128xbf16> to vector<128x128xbf16>
    %c1_123 = arith.constant 1 : index
    %c0_124 = arith.constant 0 : index
    %c0_125 = arith.constant 0 : index
    %121 = vector.load %arg3[%c1_123, %c0_124, %c0_125] : memref<36x128x128xbf16, #tpu.memory_space<vmem>>, vector<1x128x128xbf16>
    %122 = vector.shape_cast %121 : vector<1x128x128xbf16> to vector<128x128xbf16>
    %cst_126 = arith.constant dense<0.000000e+00> : vector<128x128xf32>
    %123 = tpu.matmul %120, %122, %cst_126 {dimension_numbers = #tpu.dot_dimension_numbers<[1], [0], [0], [1], [0, 0, 1, 1], [], []>} : vector<128x128xbf16>, vector<128x128xbf16>, vector<128x128xf32> -> vector<128x128xf32>
    %124 = arith.addf %117, %123 : vector<128x128xf32>
    %c2_127 = arith.constant 2 : index
    %c8_128 = arith.constant 8 : index
    %c0_129 = arith.constant 0 : index
    %c0_130 = arith.constant 0 : index
    %125 = vector.load %arg9[%c2_127, %c8_128, %c0_129, %c0_130] : memref<3x18x16x128xbf16, #tpu.memory_space<vmem>>, vector<1x8x16x128xbf16>
    %126 = vector.shape_cast %125 : vector<1x8x16x128xbf16> to vector<8x16x128xbf16>
    %127 = vector.shape_cast %126 : vector<8x16x128xbf16> to vector<128x128xbf16>
    %c2_131 = arith.constant 2 : index
    %c0_132 = arith.constant 0 : index
    %c0_133 = arith.constant 0 : index
    %128 = vector.load %arg3[%c2_131, %c0_132, %c0_133] : memref<36x128x128xbf16, #tpu.memory_space<vmem>>, vector<1x128x128xbf16>
    %129 = vector.shape_cast %128 : vector<1x128x128xbf16> to vector<128x128xbf16>
    %cst_134 = arith.constant dense<0.000000e+00> : vector<128x128xf32>
    %130 = tpu.matmul %127, %129, %cst_134 {dimension_numbers = #tpu.dot_dimension_numbers<[1], [0], [0], [1], [0, 0, 1, 1], [], []>} : vector<128x128xbf16>, vector<128x128xbf16>, vector<128x128xf32> -> vector<128x128xf32>
    %131 = arith.addf %124, %130 : vector<128x128xf32>
    %c0_135 = arith.constant 0 : index
    %c9 = arith.constant 9 : index
    %c0_136 = arith.constant 0 : index
    %c0_137 = arith.constant 0 : index
    %132 = vector.load %arg9[%c0_135, %c9, %c0_136, %c0_137] : memref<3x18x16x128xbf16, #tpu.memory_space<vmem>>, vector<1x8x16x128xbf16>
    %133 = vector.shape_cast %132 : vector<1x8x16x128xbf16> to vector<8x16x128xbf16>
    %134 = vector.shape_cast %133 : vector<8x16x128xbf16> to vector<128x128xbf16>
    %c3_138 = arith.constant 3 : index
    %c0_139 = arith.constant 0 : index
    %c0_140 = arith.constant 0 : index
    %135 = vector.load %arg3[%c3_138, %c0_139, %c0_140] : memref<36x128x128xbf16, #tpu.memory_space<vmem>>, vector<1x128x128xbf16>
    %136 = vector.shape_cast %135 : vector<1x128x128xbf16> to vector<128x128xbf16>
    %cst_141 = arith.constant dense<0.000000e+00> : vector<128x128xf32>
    %137 = tpu.matmul %134, %136, %cst_141 {dimension_numbers = #tpu.dot_dimension_numbers<[1], [0], [0], [1], [0, 0, 1, 1], [], []>} : vector<128x128xbf16>, vector<128x128xbf16>, vector<128x128xf32> -> vector<128x128xf32>
    %138 = arith.addf %131, %137 : vector<128x128xf32>
    %c1_142 = arith.constant 1 : index
    %c9_143 = arith.constant 9 : index
    %c0_144 = arith.constant 0 : index
    %c0_145 = arith.constant 0 : index
    %139 = vector.load %arg9[%c1_142, %c9_143, %c0_144, %c0_145] : memref<3x18x16x128xbf16, #tpu.memory_space<vmem>>, vector<1x8x16x128xbf16>
    %140 = vector.shape_cast %139 : vector<1x8x16x128xbf16> to vector<8x16x128xbf16>
    %141 = vector.shape_cast %140 : vector<8x16x128xbf16> to vector<128x128xbf16>
    %c4_146 = arith.constant 4 : index
    %c0_147 = arith.constant 0 : index
    %c0_148 = arith.constant 0 : index
    %142 = vector.load %arg3[%c4_146, %c0_147, %c0_148] : memref<36x128x128xbf16, #tpu.memory_space<vmem>>, vector<1x128x128xbf16>
    %143 = vector.shape_cast %142 : vector<1x128x128xbf16> to vector<128x128xbf16>
    %cst_149 = arith.constant dense<0.000000e+00> : vector<128x128xf32>
    %144 = tpu.matmul %141, %143, %cst_149 {dimension_numbers = #tpu.dot_dimension_numbers<[1], [0], [0], [1], [0, 0, 1, 1], [], []>} : vector<128x128xbf16>, vector<128x128xbf16>, vector<128x128xf32> -> vector<128x128xf32>
    %145 = arith.addf %138, %144 : vector<128x128xf32>
    %c2_150 = arith.constant 2 : index
    %c9_151 = arith.constant 9 : index
    %c0_152 = arith.constant 0 : index
    %c0_153 = arith.constant 0 : index
    %146 = vector.load %arg9[%c2_150, %c9_151, %c0_152, %c0_153] : memref<3x18x16x128xbf16, #tpu.memory_space<vmem>>, vector<1x8x16x128xbf16>
    %147 = vector.shape_cast %146 : vector<1x8x16x128xbf16> to vector<8x16x128xbf16>
    %148 = vector.shape_cast %147 : vector<8x16x128xbf16> to vector<128x128xbf16>
    %c5_154 = arith.constant 5 : index
    %c0_155 = arith.constant 0 : index
    %c0_156 = arith.constant 0 : index
    %149 = vector.load %arg3[%c5_154, %c0_155, %c0_156] : memref<36x128x128xbf16, #tpu.memory_space<vmem>>, vector<1x128x128xbf16>
    %150 = vector.shape_cast %149 : vector<1x128x128xbf16> to vector<128x128xbf16>
    %cst_157 = arith.constant dense<0.000000e+00> : vector<128x128xf32>
    %151 = tpu.matmul %148, %150, %cst_157 {dimension_numbers = #tpu.dot_dimension_numbers<[1], [0], [0], [1], [0, 0, 1, 1], [], []>} : vector<128x128xbf16>, vector<128x128xbf16>, vector<128x128xf32> -> vector<128x128xf32>
    %152 = arith.addf %145, %151 : vector<128x128xf32>
    %c0_158 = arith.constant 0 : index
    %c10 = arith.constant 10 : index
    %c0_159 = arith.constant 0 : index
    %c0_160 = arith.constant 0 : index
    %153 = vector.load %arg9[%c0_158, %c10, %c0_159, %c0_160] : memref<3x18x16x128xbf16, #tpu.memory_space<vmem>>, vector<1x8x16x128xbf16>
    %154 = vector.shape_cast %153 : vector<1x8x16x128xbf16> to vector<8x16x128xbf16>
    %155 = vector.shape_cast %154 : vector<8x16x128xbf16> to vector<128x128xbf16>
    %c6_161 = arith.constant 6 : index
    %c0_162 = arith.constant 0 : index
    %c0_163 = arith.constant 0 : index
    %156 = vector.load %arg3[%c6_161, %c0_162, %c0_163] : memref<36x128x128xbf16, #tpu.memory_space<vmem>>, vector<1x128x128xbf16>
    %157 = vector.shape_cast %156 : vector<1x128x128xbf16> to vector<128x128xbf16>
    %cst_164 = arith.constant dense<0.000000e+00> : vector<128x128xf32>
    %158 = tpu.matmul %155, %157, %cst_164 {dimension_numbers = #tpu.dot_dimension_numbers<[1], [0], [0], [1], [0, 0, 1, 1], [], []>} : vector<128x128xbf16>, vector<128x128xbf16>, vector<128x128xf32> -> vector<128x128xf32>
    %159 = arith.addf %152, %158 : vector<128x128xf32>
    %c1_165 = arith.constant 1 : index
    %c10_166 = arith.constant 10 : index
    %c0_167 = arith.constant 0 : index
    %c0_168 = arith.constant 0 : index
    %160 = vector.load %arg9[%c1_165, %c10_166, %c0_167, %c0_168] : memref<3x18x16x128xbf16, #tpu.memory_space<vmem>>, vector<1x8x16x128xbf16>
    %161 = vector.shape_cast %160 : vector<1x8x16x128xbf16> to vector<8x16x128xbf16>
    %162 = vector.shape_cast %161 : vector<8x16x128xbf16> to vector<128x128xbf16>
    %c7_169 = arith.constant 7 : index
    %c0_170 = arith.constant 0 : index
    %c0_171 = arith.constant 0 : index
    %163 = vector.load %arg3[%c7_169, %c0_170, %c0_171] : memref<36x128x128xbf16, #tpu.memory_space<vmem>>, vector<1x128x128xbf16>
    %164 = vector.shape_cast %163 : vector<1x128x128xbf16> to vector<128x128xbf16>
    %cst_172 = arith.constant dense<0.000000e+00> : vector<128x128xf32>
    %165 = tpu.matmul %162, %164, %cst_172 {dimension_numbers = #tpu.dot_dimension_numbers<[1], [0], [0], [1], [0, 0, 1, 1], [], []>} : vector<128x128xbf16>, vector<128x128xbf16>, vector<128x128xf32> -> vector<128x128xf32>
    %166 = arith.addf %159, %165 : vector<128x128xf32>
    %c2_173 = arith.constant 2 : index
    %c10_174 = arith.constant 10 : index
    %c0_175 = arith.constant 0 : index
    %c0_176 = arith.constant 0 : index
    %167 = vector.load %arg9[%c2_173, %c10_174, %c0_175, %c0_176] : memref<3x18x16x128xbf16, #tpu.memory_space<vmem>>, vector<1x8x16x128xbf16>
    %168 = vector.shape_cast %167 : vector<1x8x16x128xbf16> to vector<8x16x128xbf16>
    %169 = vector.shape_cast %168 : vector<8x16x128xbf16> to vector<128x128xbf16>
    %c8_177 = arith.constant 8 : index
    %c0_178 = arith.constant 0 : index
    %c0_179 = arith.constant 0 : index
    %170 = vector.load %arg3[%c8_177, %c0_178, %c0_179] : memref<36x128x128xbf16, #tpu.memory_space<vmem>>, vector<1x128x128xbf16>
    %171 = vector.shape_cast %170 : vector<1x128x128xbf16> to vector<128x128xbf16>
    %cst_180 = arith.constant dense<0.000000e+00> : vector<128x128xf32>
    %172 = tpu.matmul %169, %171, %cst_180 {dimension_numbers = #tpu.dot_dimension_numbers<[1], [0], [0], [1], [0, 0, 1, 1], [], []>} : vector<128x128xbf16>, vector<128x128xbf16>, vector<128x128xf32> -> vector<128x128xf32>
    %173 = arith.addf %166, %172 : vector<128x128xf32>
    %c1_181 = arith.constant 1 : index
    %c0_182 = arith.constant 0 : index
    %c0_183 = arith.constant 0 : index
    %174 = vector.load %arg5[%c1_181, %c0_182, %c0_183] : memref<7x1x128xf32, #tpu.memory_space<vmem>>, vector<1x1x128xf32>
    %175 = vector.shape_cast %174 : vector<1x1x128xf32> to vector<1x128xf32>
    %176 = vector.broadcast %175 : vector<1x128xf32> to vector<128x128xf32>
    %177 = arith.addf %173, %176 : vector<128x128xf32>
    %cst_184 = arith.constant 0.000000e+00 : f32
    %178 = vector.broadcast %cst_184 : f32 to vector<128x128xf32>
    %179 = arith.maximumf %177, %178 : vector<128x128xf32>
    %180 = arith.truncf %179 : vector<128x128xf32> to vector<128x128xbf16>
    %c128_185 = arith.constant 128 : index
    %c0_186 = arith.constant 0 : index
    %181 = vector.load %arg11[%c128_185, %c0_186] : memref<256x128xbf16, #tpu.memory_space<vmem>>, vector<128x128xbf16>
    tpu.vector_store %arg11[%c128_185, %c0_186], %180 {strides = array<i32>} : memref<256x128xbf16, #tpu.memory_space<vmem>>, vector<128x128xbf16>,
    %c0_187 = arith.constant 0 : index
    %c0_188 = arith.constant 0 : index
    %182 = vector.load %arg11[%c0_187, %c0_188] : memref<256x128xbf16, #tpu.memory_space<vmem>>, vector<256x128xbf16>
    %183 = vector.shape_cast %182 : vector<256x128xbf16> to vector<16x16x128xbf16>
    %cst_189 = arith.constant 0.000000e+00 : bf16
    %184 = vector.broadcast %cst_189 : bf16 to vector<16x1x128xbf16>
    %185 = vector.extract_strided_slice %183 {offsets = [0, 0, 0], sizes = [16, 15, 128], strides = [1, 1, 1]} : vector<16x16x128xbf16> to vector<16x15x128xbf16>
    %186 = tpu.concatenate %184, %185 in 1 : vector<16x1x128xbf16>, vector<16x15x128xbf16> -> vector<16x16x128xbf16>
    %c0_190 = arith.constant 0 : index
    %c1_191 = arith.constant 1 : index
    %c0_192 = arith.constant 0 : index
    %c0_193 = arith.constant 0 : index
    %187 = vector.load %arg9[%c0_190, %c1_191, %c0_192, %c0_193] : memref<3x18x16x128xbf16, #tpu.memory_space<vmem>>, vector<1x16x16x128xbf16>
    %188 = vector.shape_cast %187 : vector<1x16x16x128xbf16> to vector<16x16x128xbf16>
    %189 = vector.shape_cast %186 : vector<16x16x128xbf16> to vector<1x16x16x128xbf16>
    tpu.vector_store %arg9[%c0_190, %c1_191, %c0_192, %c0_193], %189 {strides = array<i32>} : memref<3x18x16x128xbf16, #tpu.memory_space<vmem>>, vector<1x16x16x128xbf16>,
    %c1_194 = arith.constant 1 : index
    %c1_195 = arith.constant 1 : index
    %c0_196 = arith.constant 0 : index
    %c0_197 = arith.constant 0 : index
    %190 = vector.load %arg9[%c1_194, %c1_195, %c0_196, %c0_197] : memref<3x18x16x128xbf16, #tpu.memory_space<vmem>>, vector<1x16x16x128xbf16>
    %191 = vector.shape_cast %190 : vector<1x16x16x128xbf16> to vector<16x16x128xbf16>
    %192 = vector.shape_cast %183 : vector<16x16x128xbf16> to vector<1x16x16x128xbf16>
    tpu.vector_store %arg9[%c1_194, %c1_195, %c0_196, %c0_197], %192 {strides = array<i32>} : memref<3x18x16x128xbf16, #tpu.memory_space<vmem>>, vector<1x16x16x128xbf16>,
    %193 = vector.extract_strided_slice %183 {offsets = [0, 1, 0], sizes = [16, 15, 128], strides = [1, 1, 1]} : vector<16x16x128xbf16> to vector<16x15x128xbf16>
    %194 = tpu.concatenate %193, %184 in 1 : vector<16x15x128xbf16>, vector<16x1x128xbf16> -> vector<16x16x128xbf16>
    %c2_198 = arith.constant 2 : index
    %c1_199 = arith.constant 1 : index
    %c0_200 = arith.constant 0 : index
    %c0_201 = arith.constant 0 : index
    %195 = vector.load %arg9[%c2_198, %c1_199, %c0_200, %c0_201] : memref<3x18x16x128xbf16, #tpu.memory_space<vmem>>, vector<1x16x16x128xbf16>
    %196 = vector.shape_cast %195 : vector<1x16x16x128xbf16> to vector<16x16x128xbf16>
    %197 = vector.shape_cast %194 : vector<16x16x128xbf16> to vector<1x16x16x128xbf16>
    tpu.vector_store %arg9[%c2_198, %c1_199, %c0_200, %c0_201], %197 {strides = array<i32>} : memref<3x18x16x128xbf16, #tpu.memory_space<vmem>>, vector<1x16x16x128xbf16>,
    %c0_202 = arith.constant 0 : index
    %c0_203 = arith.constant 0 : index
    %c0_204 = arith.constant 0 : index
    %c0_205 = arith.constant 0 : index
    %198 = vector.load %arg9[%c0_202, %c0_203, %c0_204, %c0_205] : memref<3x18x16x128xbf16, #tpu.memory_space<vmem>>, vector<1x8x16x128xbf16>
    %199 = vector.shape_cast %198 : vector<1x8x16x128xbf16> to vector<8x16x128xbf16>
    %200 = vector.shape_cast %199 : vector<8x16x128xbf16> to vector<128x128xbf16>
    %c9_206 = arith.constant 9 : index
    %c0_207 = arith.constant 0 : index
    %c0_208 = arith.constant 0 : index
    %201 = vector.load %arg3[%c9_206, %c0_207, %c0_208] : memref<36x128x128xbf16, #tpu.memory_space<vmem>>, vector<1x128x128xbf16>
    %202 = vector.shape_cast %201 : vector<1x128x128xbf16> to vector<128x128xbf16>
    %cst_209 = arith.constant dense<0.000000e+00> : vector<128x128xf32>
    %203 = tpu.matmul %200, %202, %cst_209 {dimension_numbers = #tpu.dot_dimension_numbers<[1], [0], [0], [1], [0, 0, 1, 1], [], []>} : vector<128x128xbf16>, vector<128x128xbf16>, vector<128x128xf32> -> vector<128x128xf32>
    %c1_210 = arith.constant 1 : index
    %c0_211 = arith.constant 0 : index
    %c0_212 = arith.constant 0 : index
    %c0_213 = arith.constant 0 : index
    %204 = vector.load %arg9[%c1_210, %c0_211, %c0_212, %c0_213] : memref<3x18x16x128xbf16, #tpu.memory_space<vmem>>, vector<1x8x16x128xbf16>
    %205 = vector.shape_cast %204 : vector<1x8x16x128xbf16> to vector<8x16x128xbf16>
    %206 = vector.shape_cast %205 : vector<8x16x128xbf16> to vector<128x128xbf16>
    %c10_214 = arith.constant 10 : index
    %c0_215 = arith.constant 0 : index
    %c0_216 = arith.constant 0 : index
    %207 = vector.load %arg3[%c10_214, %c0_215, %c0_216] : memref<36x128x128xbf16, #tpu.memory_space<vmem>>, vector<1x128x128xbf16>
    %208 = vector.shape_cast %207 : vector<1x128x128xbf16> to vector<128x128xbf16>
    %cst_217 = arith.constant dense<0.000000e+00> : vector<128x128xf32>
    %209 = tpu.matmul %206, %208, %cst_217 {dimension_numbers = #tpu.dot_dimension_numbers<[1], [0], [0], [1], [0, 0, 1, 1], [], []>} : vector<128x128xbf16>, vector<128x128xbf16>, vector<128x128xf32> -> vector<128x128xf32>
    %210 = arith.addf %203, %209 : vector<128x128xf32>
    %c2_218 = arith.constant 2 : index
    %c0_219 = arith.constant 0 : index
    %c0_220 = arith.constant 0 : index
    %c0_221 = arith.constant 0 : index
    %211 = vector.load %arg9[%c2_218, %c0_219, %c0_220, %c0_221] : memref<3x18x16x128xbf16, #tpu.memory_space<vmem>>, vector<1x8x16x128xbf16>
    %212 = vector.shape_cast %211 : vector<1x8x16x128xbf16> to vector<8x16x128xbf16>
    %213 = vector.shape_cast %212 : vector<8x16x128xbf16> to vector<128x128xbf16>
    %c11 = arith.constant 11 : index
    %c0_222 = arith.constant 0 : index
    %c0_223 = arith.constant 0 : index
    %214 = vector.load %arg3[%c11, %c0_222, %c0_223] : memref<36x128x128xbf16, #tpu.memory_space<vmem>>, vector<1x128x128xbf16>
    %215 = vector.shape_cast %214 : vector<1x128x128xbf16> to vector<128x128xbf16>
    %cst_224 = arith.constant dense<0.000000e+00> : vector<128x128xf32>
    %216 = tpu.matmul %213, %215, %cst_224 {dimension_numbers = #tpu.dot_dimension_numbers<[1], [0], [0], [1], [0, 0, 1, 1], [], []>} : vector<128x128xbf16>, vector<128x128xbf16>, vector<128x128xf32> -> vector<128x128xf32>
    %217 = arith.addf %210, %216 : vector<128x128xf32>
    %c0_225 = arith.constant 0 : index
    %c1_226 = arith.constant 1 : index
    %c0_227 = arith.constant 0 : index
    %c0_228 = arith.constant 0 : index
    %218 = vector.load %arg9[%c0_225, %c1_226, %c0_227, %c0_228] : memref<3x18x16x128xbf16, #tpu.memory_space<vmem>>, vector<1x8x16x128xbf16>
    %219 = vector.shape_cast %218 : vector<1x8x16x128xbf16> to vector<8x16x128xbf16>
    %220 = vector.shape_cast %219 : vector<8x16x128xbf16> to vector<128x128xbf16>
    %c12 = arith.constant 12 : index
    %c0_229 = arith.constant 0 : index
    %c0_230 = arith.constant 0 : index
    %221 = vector.load %arg3[%c12, %c0_229, %c0_230] : memref<36x128x128xbf16, #tpu.memory_space<vmem>>, vector<1x128x128xbf16>
    %222 = vector.shape_cast %221 : vector<1x128x128xbf16> to vector<128x128xbf16>
    %cst_231 = arith.constant dense<0.000000e+00> : vector<128x128xf32>
    %223 = tpu.matmul %220, %222, %cst_231 {dimension_numbers = #tpu.dot_dimension_numbers<[1], [0], [0], [1], [0, 0, 1, 1], [], []>} : vector<128x128xbf16>, vector<128x128xbf16>, vector<128x128xf32> -> vector<128x128xf32>
    %224 = arith.addf %217, %223 : vector<128x128xf32>
    %c1_232 = arith.constant 1 : index
    %c1_233 = arith.constant 1 : index
    %c0_234 = arith.constant 0 : index
    %c0_235 = arith.constant 0 : index
    %225 = vector.load %arg9[%c1_232, %c1_233, %c0_234, %c0_235] : memref<3x18x16x128xbf16, #tpu.memory_space<vmem>>, vector<1x8x16x128xbf16>
    %226 = vector.shape_cast %225 : vector<1x8x16x128xbf16> to vector<8x16x128xbf16>
    %227 = vector.shape_cast %226 : vector<8x16x128xbf16> to vector<128x128xbf16>
    %c13 = arith.constant 13 : index
    %c0_236 = arith.constant 0 : index
    %c0_237 = arith.constant 0 : index
    %228 = vector.load %arg3[%c13, %c0_236, %c0_237] : memref<36x128x128xbf16, #tpu.memory_space<vmem>>, vector<1x128x128xbf16>
    %229 = vector.shape_cast %228 : vector<1x128x128xbf16> to vector<128x128xbf16>
    %cst_238 = arith.constant dense<0.000000e+00> : vector<128x128xf32>
    %230 = tpu.matmul %227, %229, %cst_238 {dimension_numbers = #tpu.dot_dimension_numbers<[1], [0], [0], [1], [0, 0, 1, 1], [], []>} : vector<128x128xbf16>, vector<128x128xbf16>, vector<128x128xf32> -> vector<128x128xf32>
    %231 = arith.addf %224, %230 : vector<128x128xf32>
    %c2_239 = arith.constant 2 : index
    %c1_240 = arith.constant 1 : index
    %c0_241 = arith.constant 0 : index
    %c0_242 = arith.constant 0 : index
    %232 = vector.load %arg9[%c2_239, %c1_240, %c0_241, %c0_242] : memref<3x18x16x128xbf16, #tpu.memory_space<vmem>>, vector<1x8x16x128xbf16>
    %233 = vector.shape_cast %232 : vector<1x8x16x128xbf16> to vector<8x16x128xbf16>
    %234 = vector.shape_cast %233 : vector<8x16x128xbf16> to vector<128x128xbf16>
    %c14 = arith.constant 14 : index
    %c0_243 = arith.constant 0 : index
    %c0_244 = arith.constant 0 : index
    %235 = vector.load %arg3[%c14, %c0_243, %c0_244] : memref<36x128x128xbf16, #tpu.memory_space<vmem>>, vector<1x128x128xbf16>
    %236 = vector.shape_cast %235 : vector<1x128x128xbf16> to vector<128x128xbf16>
    %cst_245 = arith.constant dense<0.000000e+00> : vector<128x128xf32>
    %237 = tpu.matmul %234, %236, %cst_245 {dimension_numbers = #tpu.dot_dimension_numbers<[1], [0], [0], [1], [0, 0, 1, 1], [], []>} : vector<128x128xbf16>, vector<128x128xbf16>, vector<128x128xf32> -> vector<128x128xf32>
    %238 = arith.addf %231, %237 : vector<128x128xf32>
    %c0_246 = arith.constant 0 : index
    %c2_247 = arith.constant 2 : index
    %c0_248 = arith.constant 0 : index
    %c0_249 = arith.constant 0 : index
    %239 = vector.load %arg9[%c0_246, %c2_247, %c0_248, %c0_249] : memref<3x18x16x128xbf16, #tpu.memory_space<vmem>>, vector<1x8x16x128xbf16>
    %240 = vector.shape_cast %239 : vector<1x8x16x128xbf16> to vector<8x16x128xbf16>
    %241 = vector.shape_cast %240 : vector<8x16x128xbf16> to vector<128x128xbf16>
    %c15 = arith.constant 15 : index
    %c0_250 = arith.constant 0 : index
    %c0_251 = arith.constant 0 : index
    %242 = vector.load %arg3[%c15, %c0_250, %c0_251] : memref<36x128x128xbf16, #tpu.memory_space<vmem>>, vector<1x128x128xbf16>
    %243 = vector.shape_cast %242 : vector<1x128x128xbf16> to vector<128x128xbf16>
    %cst_252 = arith.constant dense<0.000000e+00> : vector<128x128xf32>
    %244 = tpu.matmul %241, %243, %cst_252 {dimension_numbers = #tpu.dot_dimension_numbers<[1], [0], [0], [1], [0, 0, 1, 1], [], []>} : vector<128x128xbf16>, vector<128x128xbf16>, vector<128x128xf32> -> vector<128x128xf32>
    %245 = arith.addf %238, %244 : vector<128x128xf32>
    %c1_253 = arith.constant 1 : index
    %c2_254 = arith.constant 2 : index
    %c0_255 = arith.constant 0 : index
    %c0_256 = arith.constant 0 : index
    %246 = vector.load %arg9[%c1_253, %c2_254, %c0_255, %c0_256] : memref<3x18x16x128xbf16, #tpu.memory_space<vmem>>, vector<1x8x16x128xbf16>
    %247 = vector.shape_cast %246 : vector<1x8x16x128xbf16> to vector<8x16x128xbf16>
    %248 = vector.shape_cast %247 : vector<8x16x128xbf16> to vector<128x128xbf16>
    %c16 = arith.constant 16 : index
    %c0_257 = arith.constant 0 : index
    %c0_258 = arith.constant 0 : index
    %249 = vector.load %arg3[%c16, %c0_257, %c0_258] : memref<36x128x128xbf16, #tpu.memory_space<vmem>>, vector<1x128x128xbf16>
    %250 = vector.shape_cast %249 : vector<1x128x128xbf16> to vector<128x128xbf16>
    %cst_259 = arith.constant dense<0.000000e+00> : vector<128x128xf32>
    %251 = tpu.matmul %248, %250, %cst_259 {dimension_numbers = #tpu.dot_dimension_numbers<[1], [0], [0], [1], [0, 0, 1, 1], [], []>} : vector<128x128xbf16>, vector<128x128xbf16>, vector<128x128xf32> -> vector<128x128xf32>
    %252 = arith.addf %245, %251 : vector<128x128xf32>
    %c2_260 = arith.constant 2 : index
    %c2_261 = arith.constant 2 : index
    %c0_262 = arith.constant 0 : index
    %c0_263 = arith.constant 0 : index
    %253 = vector.load %arg9[%c2_260, %c2_261, %c0_262, %c0_263] : memref<3x18x16x128xbf16, #tpu.memory_space<vmem>>, vector<1x8x16x128xbf16>
    %254 = vector.shape_cast %253 : vector<1x8x16x128xbf16> to vector<8x16x128xbf16>
    %255 = vector.shape_cast %254 : vector<8x16x128xbf16> to vector<128x128xbf16>
    %c17 = arith.constant 17 : index
    %c0_264 = arith.constant 0 : index
    %c0_265 = arith.constant 0 : index
    %256 = vector.load %arg3[%c17, %c0_264, %c0_265] : memref<36x128x128xbf16, #tpu.memory_space<vmem>>, vector<1x128x128xbf16>
    %257 = vector.shape_cast %256 : vector<1x128x128xbf16> to vector<128x128xbf16>
    %cst_266 = arith.constant dense<0.000000e+00> : vector<128x128xf32>
    %258 = tpu.matmul %255, %257, %cst_266 {dimension_numbers = #tpu.dot_dimension_numbers<[1], [0], [0], [1], [0, 0, 1, 1], [], []>} : vector<128x128xbf16>, vector<128x128xbf16>, vector<128x128xf32> -> vector<128x128xf32>
    %259 = arith.addf %252, %258 : vector<128x128xf32>
    %c2_267 = arith.constant 2 : index
    %c0_268 = arith.constant 0 : index
    %c0_269 = arith.constant 0 : index
    %260 = vector.load %arg5[%c2_267, %c0_268, %c0_269] : memref<7x1x128xf32, #tpu.memory_space<vmem>>, vector<1x1x128xf32>
    %261 = vector.shape_cast %260 : vector<1x1x128xf32> to vector<1x128xf32>
    %262 = vector.broadcast %261 : vector<1x128xf32> to vector<128x128xf32>
    %263 = arith.addf %259, %262 : vector<128x128xf32>
    %c0_270 = arith.constant 0 : index
    %c0_271 = arith.constant 0 : index
    %264 = vector.load %arg10[%c0_270, %c0_271] : memref<256x128xbf16, #tpu.memory_space<vmem>>, vector<128x128xbf16>
    %c0_272 = arith.constant 0 : index
    %c0_273 = arith.constant 0 : index
    %c0_274 = arith.constant 0 : index
    %265 = vector.load %arg4[%c0_272, %c0_273, %c0_274] : memref<2x128x128xbf16, #tpu.memory_space<vmem>>, vector<1x128x128xbf16>
    %266 = vector.shape_cast %265 : vector<1x128x128xbf16> to vector<128x128xbf16>
    %cst_275 = arith.constant dense<0.000000e+00> : vector<128x128xf32>
    %267 = tpu.matmul %264, %266, %cst_275 {dimension_numbers = #tpu.dot_dimension_numbers<[1], [0], [0], [1], [0, 0, 1, 1], [], []>} : vector<128x128xbf16>, vector<128x128xbf16>, vector<128x128xf32> -> vector<128x128xf32>
    %c3_276 = arith.constant 3 : index
    %c0_277 = arith.constant 0 : index
    %c0_278 = arith.constant 0 : index
    %268 = vector.load %arg5[%c3_276, %c0_277, %c0_278] : memref<7x1x128xf32, #tpu.memory_space<vmem>>, vector<1x1x128xf32>
    %269 = vector.shape_cast %268 : vector<1x1x128xf32> to vector<1x128xf32>
    %270 = vector.broadcast %269 : vector<1x128xf32> to vector<128x128xf32>
    %271 = arith.addf %267, %270 : vector<128x128xf32>
    %272 = arith.addf %263, %271 : vector<128x128xf32>
    %cst_279 = arith.constant 0.000000e+00 : f32
    %273 = vector.broadcast %cst_279 : f32 to vector<128x128xf32>
    %274 = arith.maximumf %272, %273 : vector<128x128xf32>
    %275 = arith.truncf %274 : vector<128x128xf32> to vector<128x128xbf16>
    %c0_280 = arith.constant 0 : index
    %c0_281 = arith.constant 0 : index
    %276 = vector.load %arg10[%c0_280, %c0_281] : memref<256x128xbf16, #tpu.memory_space<vmem>>, vector<128x128xbf16>
    tpu.vector_store %arg10[%c0_280, %c0_281], %275 {strides = array<i32>} : memref<256x128xbf16, #tpu.memory_space<vmem>>, vector<128x128xbf16>,
    %c0_282 = arith.constant 0 : index
    %c8_283 = arith.constant 8 : index
    %c0_284 = arith.constant 0 : index
    %c0_285 = arith.constant 0 : index
    %277 = vector.load %arg9[%c0_282, %c8_283, %c0_284, %c0_285] : memref<3x18x16x128xbf16, #tpu.memory_space<vmem>>, vector<1x8x16x128xbf16>
    %278 = vector.shape_cast %277 : vector<1x8x16x128xbf16> to vector<8x16x128xbf16>
    %279 = vector.shape_cast %278 : vector<8x16x128xbf16> to vector<128x128xbf16>
    %c9_286 = arith.constant 9 : index
    %c0_287 = arith.constant 0 : index
    %c0_288 = arith.constant 0 : index
    %280 = vector.load %arg3[%c9_286, %c0_287, %c0_288] : memref<36x128x128xbf16, #tpu.memory_space<vmem>>, vector<1x128x128xbf16>
    %281 = vector.shape_cast %280 : vector<1x128x128xbf16> to vector<128x128xbf16>
    %cst_289 = arith.constant dense<0.000000e+00> : vector<128x128xf32>
    %282 = tpu.matmul %279, %281, %cst_289 {dimension_numbers = #tpu.dot_dimension_numbers<[1], [0], [0], [1], [0, 0, 1, 1], [], []>} : vector<128x128xbf16>, vector<128x128xbf16>, vector<128x128xf32> -> vector<128x128xf32>
    %c1_290 = arith.constant 1 : index
    %c8_291 = arith.constant 8 : index
    %c0_292 = arith.constant 0 : index
    %c0_293 = arith.constant 0 : index
    %283 = vector.load %arg9[%c1_290, %c8_291, %c0_292, %c0_293] : memref<3x18x16x128xbf16, #tpu.memory_space<vmem>>, vector<1x8x16x128xbf16>
    %284 = vector.shape_cast %283 : vector<1x8x16x128xbf16> to vector<8x16x128xbf16>
    %285 = vector.shape_cast %284 : vector<8x16x128xbf16> to vector<128x128xbf16>
    %c10_294 = arith.constant 10 : index
    %c0_295 = arith.constant 0 : index
    %c0_296 = arith.constant 0 : index
    %286 = vector.load %arg3[%c10_294, %c0_295, %c0_296] : memref<36x128x128xbf16, #tpu.memory_space<vmem>>, vector<1x128x128xbf16>
    %287 = vector.shape_cast %286 : vector<1x128x128xbf16> to vector<128x128xbf16>
    %cst_297 = arith.constant dense<0.000000e+00> : vector<128x128xf32>
    %288 = tpu.matmul %285, %287, %cst_297 {dimension_numbers = #tpu.dot_dimension_numbers<[1], [0], [0], [1], [0, 0, 1, 1], [], []>} : vector<128x128xbf16>, vector<128x128xbf16>, vector<128x128xf32> -> vector<128x128xf32>
    %289 = arith.addf %282, %288 : vector<128x128xf32>
    %c2_298 = arith.constant 2 : index
    %c8_299 = arith.constant 8 : index
    %c0_300 = arith.constant 0 : index
    %c0_301 = arith.constant 0 : index
    %290 = vector.load %arg9[%c2_298, %c8_299, %c0_300, %c0_301] : memref<3x18x16x128xbf16, #tpu.memory_space<vmem>>, vector<1x8x16x128xbf16>
    %291 = vector.shape_cast %290 : vector<1x8x16x128xbf16> to vector<8x16x128xbf16>
    %292 = vector.shape_cast %291 : vector<8x16x128xbf16> to vector<128x128xbf16>
    %c11_302 = arith.constant 11 : index
    %c0_303 = arith.constant 0 : index
    %c0_304 = arith.constant 0 : index
    %293 = vector.load %arg3[%c11_302, %c0_303, %c0_304] : memref<36x128x128xbf16, #tpu.memory_space<vmem>>, vector<1x128x128xbf16>
    %294 = vector.shape_cast %293 : vector<1x128x128xbf16> to vector<128x128xbf16>
    %cst_305 = arith.constant dense<0.000000e+00> : vector<128x128xf32>
    %295 = tpu.matmul %292, %294, %cst_305 {dimension_numbers = #tpu.dot_dimension_numbers<[1], [0], [0], [1], [0, 0, 1, 1], [], []>} : vector<128x128xbf16>, vector<128x128xbf16>, vector<128x128xf32> -> vector<128x128xf32>
    %296 = arith.addf %289, %295 : vector<128x128xf32>
    %c0_306 = arith.constant 0 : index
    %c9_307 = arith.constant 9 : index
    %c0_308 = arith.constant 0 : index
    %c0_309 = arith.constant 0 : index
    %297 = vector.load %arg9[%c0_306, %c9_307, %c0_308, %c0_309] : memref<3x18x16x128xbf16, #tpu.memory_space<vmem>>, vector<1x8x16x128xbf16>
    %298 = vector.shape_cast %297 : vector<1x8x16x128xbf16> to vector<8x16x128xbf16>
    %299 = vector.shape_cast %298 : vector<8x16x128xbf16> to vector<128x128xbf16>
    %c12_310 = arith.constant 12 : index
    %c0_311 = arith.constant 0 : index
    %c0_312 = arith.constant 0 : index
    %300 = vector.load %arg3[%c12_310, %c0_311, %c0_312] : memref<36x128x128xbf16, #tpu.memory_space<vmem>>, vector<1x128x128xbf16>
    %301 = vector.shape_cast %300 : vector<1x128x128xbf16> to vector<128x128xbf16>
    %cst_313 = arith.constant dense<0.000000e+00> : vector<128x128xf32>
    %302 = tpu.matmul %299, %301, %cst_313 {dimension_numbers = #tpu.dot_dimension_numbers<[1], [0], [0], [1], [0, 0, 1, 1], [], []>} : vector<128x128xbf16>, vector<128x128xbf16>, vector<128x128xf32> -> vector<128x128xf32>
    %303 = arith.addf %296, %302 : vector<128x128xf32>
    %c1_314 = arith.constant 1 : index
    %c9_315 = arith.constant 9 : index
    %c0_316 = arith.constant 0 : index
    %c0_317 = arith.constant 0 : index
    %304 = vector.load %arg9[%c1_314, %c9_315, %c0_316, %c0_317] : memref<3x18x16x128xbf16, #tpu.memory_space<vmem>>, vector<1x8x16x128xbf16>
    %305 = vector.shape_cast %304 : vector<1x8x16x128xbf16> to vector<8x16x128xbf16>
    %306 = vector.shape_cast %305 : vector<8x16x128xbf16> to vector<128x128xbf16>
    %c13_318 = arith.constant 13 : index
    %c0_319 = arith.constant 0 : index
    %c0_320 = arith.constant 0 : index
    %307 = vector.load %arg3[%c13_318, %c0_319, %c0_320] : memref<36x128x128xbf16, #tpu.memory_space<vmem>>, vector<1x128x128xbf16>
    %308 = vector.shape_cast %307 : vector<1x128x128xbf16> to vector<128x128xbf16>
    %cst_321 = arith.constant dense<0.000000e+00> : vector<128x128xf32>
    %309 = tpu.matmul %306, %308, %cst_321 {dimension_numbers = #tpu.dot_dimension_numbers<[1], [0], [0], [1], [0, 0, 1, 1], [], []>} : vector<128x128xbf16>, vector<128x128xbf16>, vector<128x128xf32> -> vector<128x128xf32>
    %310 = arith.addf %303, %309 : vector<128x128xf32>
    %c2_322 = arith.constant 2 : index
    %c9_323 = arith.constant 9 : index
    %c0_324 = arith.constant 0 : index
    %c0_325 = arith.constant 0 : index
    %311 = vector.load %arg9[%c2_322, %c9_323, %c0_324, %c0_325] : memref<3x18x16x128xbf16, #tpu.memory_space<vmem>>, vector<1x8x16x128xbf16>
    %312 = vector.shape_cast %311 : vector<1x8x16x128xbf16> to vector<8x16x128xbf16>
    %313 = vector.shape_cast %312 : vector<8x16x128xbf16> to vector<128x128xbf16>
    %c14_326 = arith.constant 14 : index
    %c0_327 = arith.constant 0 : index
    %c0_328 = arith.constant 0 : index
    %314 = vector.load %arg3[%c14_326, %c0_327, %c0_328] : memref<36x128x128xbf16, #tpu.memory_space<vmem>>, vector<1x128x128xbf16>
    %315 = vector.shape_cast %314 : vector<1x128x128xbf16> to vector<128x128xbf16>
    %cst_329 = arith.constant dense<0.000000e+00> : vector<128x128xf32>
    %316 = tpu.matmul %313, %315, %cst_329 {dimension_numbers = #tpu.dot_dimension_numbers<[1], [0], [0], [1], [0, 0, 1, 1], [], []>} : vector<128x128xbf16>, vector<128x128xbf16>, vector<128x128xf32> -> vector<128x128xf32>
    %317 = arith.addf %310, %316 : vector<128x128xf32>
    %c0_330 = arith.constant 0 : index
    %c10_331 = arith.constant 10 : index
    %c0_332 = arith.constant 0 : index
    %c0_333 = arith.constant 0 : index
    %318 = vector.load %arg9[%c0_330, %c10_331, %c0_332, %c0_333] : memref<3x18x16x128xbf16, #tpu.memory_space<vmem>>, vector<1x8x16x128xbf16>
    %319 = vector.shape_cast %318 : vector<1x8x16x128xbf16> to vector<8x16x128xbf16>
    %320 = vector.shape_cast %319 : vector<8x16x128xbf16> to vector<128x128xbf16>
    %c15_334 = arith.constant 15 : index
    %c0_335 = arith.constant 0 : index
    %c0_336 = arith.constant 0 : index
    %321 = vector.load %arg3[%c15_334, %c0_335, %c0_336] : memref<36x128x128xbf16, #tpu.memory_space<vmem>>, vector<1x128x128xbf16>
    %322 = vector.shape_cast %321 : vector<1x128x128xbf16> to vector<128x128xbf16>
    %cst_337 = arith.constant dense<0.000000e+00> : vector<128x128xf32>
    %323 = tpu.matmul %320, %322, %cst_337 {dimension_numbers = #tpu.dot_dimension_numbers<[1], [0], [0], [1], [0, 0, 1, 1], [], []>} : vector<128x128xbf16>, vector<128x128xbf16>, vector<128x128xf32> -> vector<128x128xf32>
    %324 = arith.addf %317, %323 : vector<128x128xf32>
    %c1_338 = arith.constant 1 : index
    %c10_339 = arith.constant 10 : index
    %c0_340 = arith.constant 0 : index
    %c0_341 = arith.constant 0 : index
    %325 = vector.load %arg9[%c1_338, %c10_339, %c0_340, %c0_341] : memref<3x18x16x128xbf16, #tpu.memory_space<vmem>>, vector<1x8x16x128xbf16>
    %326 = vector.shape_cast %325 : vector<1x8x16x128xbf16> to vector<8x16x128xbf16>
    %327 = vector.shape_cast %326 : vector<8x16x128xbf16> to vector<128x128xbf16>
    %c16_342 = arith.constant 16 : index
    %c0_343 = arith.constant 0 : index
    %c0_344 = arith.constant 0 : index
    %328 = vector.load %arg3[%c16_342, %c0_343, %c0_344] : memref<36x128x128xbf16, #tpu.memory_space<vmem>>, vector<1x128x128xbf16>
    %329 = vector.shape_cast %328 : vector<1x128x128xbf16> to vector<128x128xbf16>
    %cst_345 = arith.constant dense<0.000000e+00> : vector<128x128xf32>
    %330 = tpu.matmul %327, %329, %cst_345 {dimension_numbers = #tpu.dot_dimension_numbers<[1], [0], [0], [1], [0, 0, 1, 1], [], []>} : vector<128x128xbf16>, vector<128x128xbf16>, vector<128x128xf32> -> vector<128x128xf32>
    %331 = arith.addf %324, %330 : vector<128x128xf32>
    %c2_346 = arith.constant 2 : index
    %c10_347 = arith.constant 10 : index
    %c0_348 = arith.constant 0 : index
    %c0_349 = arith.constant 0 : index
    %332 = vector.load %arg9[%c2_346, %c10_347, %c0_348, %c0_349] : memref<3x18x16x128xbf16, #tpu.memory_space<vmem>>, vector<1x8x16x128xbf16>
    %333 = vector.shape_cast %332 : vector<1x8x16x128xbf16> to vector<8x16x128xbf16>
    %334 = vector.shape_cast %333 : vector<8x16x128xbf16> to vector<128x128xbf16>
    %c17_350 = arith.constant 17 : index
    %c0_351 = arith.constant 0 : index
    %c0_352 = arith.constant 0 : index
    %335 = vector.load %arg3[%c17_350, %c0_351, %c0_352] : memref<36x128x128xbf16, #tpu.memory_space<vmem>>, vector<1x128x128xbf16>
    %336 = vector.shape_cast %335 : vector<1x128x128xbf16> to vector<128x128xbf16>
    %cst_353 = arith.constant dense<0.000000e+00> : vector<128x128xf32>
    %337 = tpu.matmul %334, %336, %cst_353 {dimension_numbers = #tpu.dot_dimension_numbers<[1], [0], [0], [1], [0, 0, 1, 1], [], []>} : vector<128x128xbf16>, vector<128x128xbf16>, vector<128x128xf32> -> vector<128x128xf32>
    %338 = arith.addf %331, %337 : vector<128x128xf32>
    %c2_354 = arith.constant 2 : index
    %c0_355 = arith.constant 0 : index
    %c0_356 = arith.constant 0 : index
    %339 = vector.load %arg5[%c2_354, %c0_355, %c0_356] : memref<7x1x128xf32, #tpu.memory_space<vmem>>, vector<1x1x128xf32>
    %340 = vector.shape_cast %339 : vector<1x1x128xf32> to vector<1x128xf32>
    %341 = vector.broadcast %340 : vector<1x128xf32> to vector<128x128xf32>
    %342 = arith.addf %338, %341 : vector<128x128xf32>
    %c128_357 = arith.constant 128 : index
    %c0_358 = arith.constant 0 : index
    %343 = vector.load %arg10[%c128_357, %c0_358] : memref<256x128xbf16, #tpu.memory_space<vmem>>, vector<128x128xbf16>
    %c0_359 = arith.constant 0 : index
    %c0_360 = arith.constant 0 : index
    %c0_361 = arith.constant 0 : index
    %344 = vector.load %arg4[%c0_359, %c0_360, %c0_361] : memref<2x128x128xbf16, #tpu.memory_space<vmem>>, vector<1x128x128xbf16>
    %345 = vector.shape_cast %344 : vector<1x128x128xbf16> to vector<128x128xbf16>
    %cst_362 = arith.constant dense<0.000000e+00> : vector<128x128xf32>
    %346 = tpu.matmul %343, %345, %cst_362 {dimension_numbers = #tpu.dot_dimension_numbers<[1], [0], [0], [1], [0, 0, 1, 1], [], []>} : vector<128x128xbf16>, vector<128x128xbf16>, vector<128x128xf32> -> vector<128x128xf32>
    %c3_363 = arith.constant 3 : index
    %c0_364 = arith.constant 0 : index
    %c0_365 = arith.constant 0 : index
    %347 = vector.load %arg5[%c3_363, %c0_364, %c0_365] : memref<7x1x128xf32, #tpu.memory_space<vmem>>, vector<1x1x128xf32>
    %348 = vector.shape_cast %347 : vector<1x1x128xf32> to vector<1x128xf32>
    %349 = vector.broadcast %348 : vector<1x128xf32> to vector<128x128xf32>
    %350 = arith.addf %346, %349 : vector<128x128xf32>
    %351 = arith.addf %342, %350 : vector<128x128xf32>
    %cst_366 = arith.constant 0.000000e+00 : f32
    %352 = vector.broadcast %cst_366 : f32 to vector<128x128xf32>
    %353 = arith.maximumf %351, %352 : vector<128x128xf32>
    %354 = arith.truncf %353 : vector<128x128xf32> to vector<128x128xbf16>
    %c128_367 = arith.constant 128 : index
    %c0_368 = arith.constant 0 : index
    %355 = vector.load %arg10[%c128_367, %c0_368] : memref<256x128xbf16, #tpu.memory_space<vmem>>, vector<128x128xbf16>
    tpu.vector_store %arg10[%c128_367, %c0_368], %354 {strides = array<i32>} : memref<256x128xbf16, #tpu.memory_space<vmem>>, vector<128x128xbf16>,
    %c0_369 = arith.constant 0 : index
    %c0_370 = arith.constant 0 : index
    %356 = vector.load %arg10[%c0_369, %c0_370] : memref<256x128xbf16, #tpu.memory_space<vmem>>, vector<256x128xbf16>
    %357 = vector.shape_cast %356 : vector<256x128xbf16> to vector<16x16x128xbf16>
    %cst_371 = arith.constant 0.000000e+00 : bf16
    %358 = vector.broadcast %cst_371 : bf16 to vector<16x1x128xbf16>
    %359 = vector.extract_strided_slice %357 {offsets = [0, 0, 0], sizes = [16, 15, 128], strides = [1, 1, 1]} : vector<16x16x128xbf16> to vector<16x15x128xbf16>
    %360 = tpu.concatenate %358, %359 in 1 : vector<16x1x128xbf16>, vector<16x15x128xbf16> -> vector<16x16x128xbf16>
    %c0_372 = arith.constant 0 : index
    %c1_373 = arith.constant 1 : index
    %c0_374 = arith.constant 0 : index
    %c0_375 = arith.constant 0 : index
    %361 = vector.load %arg9[%c0_372, %c1_373, %c0_374, %c0_375] : memref<3x18x16x128xbf16, #tpu.memory_space<vmem>>, vector<1x16x16x128xbf16>
    %362 = vector.shape_cast %361 : vector<1x16x16x128xbf16> to vector<16x16x128xbf16>
    %363 = vector.shape_cast %360 : vector<16x16x128xbf16> to vector<1x16x16x128xbf16>
    tpu.vector_store %arg9[%c0_372, %c1_373, %c0_374, %c0_375], %363 {strides = array<i32>} : memref<3x18x16x128xbf16, #tpu.memory_space<vmem>>, vector<1x16x16x128xbf16>,
    %c1_376 = arith.constant 1 : index
    %c1_377 = arith.constant 1 : index
    %c0_378 = arith.constant 0 : index
    %c0_379 = arith.constant 0 : index
    %364 = vector.load %arg9[%c1_376, %c1_377, %c0_378, %c0_379] : memref<3x18x16x128xbf16, #tpu.memory_space<vmem>>, vector<1x16x16x128xbf16>
    %365 = vector.shape_cast %364 : vector<1x16x16x128xbf16> to vector<16x16x128xbf16>
    %366 = vector.shape_cast %357 : vector<16x16x128xbf16> to vector<1x16x16x128xbf16>
    tpu.vector_store %arg9[%c1_376, %c1_377, %c0_378, %c0_379], %366 {strides = array<i32>} : memref<3x18x16x128xbf16, #tpu.memory_space<vmem>>, vector<1x16x16x128xbf16>,
    %367 = vector.extract_strided_slice %357 {offsets = [0, 1, 0], sizes = [16, 15, 128], strides = [1, 1, 1]} : vector<16x16x128xbf16> to vector<16x15x128xbf16>
    %368 = tpu.concatenate %367, %358 in 1 : vector<16x15x128xbf16>, vector<16x1x128xbf16> -> vector<16x16x128xbf16>
    %c2_380 = arith.constant 2 : index
    %c1_381 = arith.constant 1 : index
    %c0_382 = arith.constant 0 : index
    %c0_383 = arith.constant 0 : index
    %369 = vector.load %arg9[%c2_380, %c1_381, %c0_382, %c0_383] : memref<3x18x16x128xbf16, #tpu.memory_space<vmem>>, vector<1x16x16x128xbf16>
    %370 = vector.shape_cast %369 : vector<1x16x16x128xbf16> to vector<16x16x128xbf16>
    %371 = vector.shape_cast %368 : vector<16x16x128xbf16> to vector<1x16x16x128xbf16>
    tpu.vector_store %arg9[%c2_380, %c1_381, %c0_382, %c0_383], %371 {strides = array<i32>} : memref<3x18x16x128xbf16, #tpu.memory_space<vmem>>, vector<1x16x16x128xbf16>,
    %c0_384 = arith.constant 0 : index
    %c0_385 = arith.constant 0 : index
    %c0_386 = arith.constant 0 : index
    %c0_387 = arith.constant 0 : index
    %372 = vector.load %arg9[%c0_384, %c0_385, %c0_386, %c0_387] : memref<3x18x16x128xbf16, #tpu.memory_space<vmem>>, vector<1x8x16x128xbf16>
    %373 = vector.shape_cast %372 : vector<1x8x16x128xbf16> to vector<8x16x128xbf16>
    %374 = vector.shape_cast %373 : vector<8x16x128xbf16> to vector<128x128xbf16>
    %c18 = arith.constant 18 : index
    %c0_388 = arith.constant 0 : index
    %c0_389 = arith.constant 0 : index
    %375 = vector.load %arg3[%c18, %c0_388, %c0_389] : memref<36x128x128xbf16, #tpu.memory_space<vmem>>, vector<1x128x128xbf16>
    %376 = vector.shape_cast %375 : vector<1x128x128xbf16> to vector<128x128xbf16>
    %cst_390 = arith.constant dense<0.000000e+00> : vector<128x128xf32>
    %377 = tpu.matmul %374, %376, %cst_390 {dimension_numbers = #tpu.dot_dimension_numbers<[1], [0], [0], [1], [0, 0, 1, 1], [], []>} : vector<128x128xbf16>, vector<128x128xbf16>, vector<128x128xf32> -> vector<128x128xf32>
    %c1_391 = arith.constant 1 : index
    %c0_392 = arith.constant 0 : index
    %c0_393 = arith.constant 0 : index
    %c0_394 = arith.constant 0 : index
    %378 = vector.load %arg9[%c1_391, %c0_392, %c0_393, %c0_394] : memref<3x18x16x128xbf16, #tpu.memory_space<vmem>>, vector<1x8x16x128xbf16>
    %379 = vector.shape_cast %378 : vector<1x8x16x128xbf16> to vector<8x16x128xbf16>
    %380 = vector.shape_cast %379 : vector<8x16x128xbf16> to vector<128x128xbf16>
    %c19 = arith.constant 19 : index
    %c0_395 = arith.constant 0 : index
    %c0_396 = arith.constant 0 : index
    %381 = vector.load %arg3[%c19, %c0_395, %c0_396] : memref<36x128x128xbf16, #tpu.memory_space<vmem>>, vector<1x128x128xbf16>
    %382 = vector.shape_cast %381 : vector<1x128x128xbf16> to vector<128x128xbf16>
    %cst_397 = arith.constant dense<0.000000e+00> : vector<128x128xf32>
    %383 = tpu.matmul %380, %382, %cst_397 {dimension_numbers = #tpu.dot_dimension_numbers<[1], [0], [0], [1], [0, 0, 1, 1], [], []>} : vector<128x128xbf16>, vector<128x128xbf16>, vector<128x128xf32> -> vector<128x128xf32>
    %384 = arith.addf %377, %383 : vector<128x128xf32>
    %c2_398 = arith.constant 2 : index
    %c0_399 = arith.constant 0 : index
    %c0_400 = arith.constant 0 : index
    %c0_401 = arith.constant 0 : index
    %385 = vector.load %arg9[%c2_398, %c0_399, %c0_400, %c0_401] : memref<3x18x16x128xbf16, #tpu.memory_space<vmem>>, vector<1x8x16x128xbf16>
    %386 = vector.shape_cast %385 : vector<1x8x16x128xbf16> to vector<8x16x128xbf16>
    %387 = vector.shape_cast %386 : vector<8x16x128xbf16> to vector<128x128xbf16>
    %c20 = arith.constant 20 : index
    %c0_402 = arith.constant 0 : index
    %c0_403 = arith.constant 0 : index
    %388 = vector.load %arg3[%c20, %c0_402, %c0_403] : memref<36x128x128xbf16, #tpu.memory_space<vmem>>, vector<1x128x128xbf16>
    %389 = vector.shape_cast %388 : vector<1x128x128xbf16> to vector<128x128xbf16>
    %cst_404 = arith.constant dense<0.000000e+00> : vector<128x128xf32>
    %390 = tpu.matmul %387, %389, %cst_404 {dimension_numbers = #tpu.dot_dimension_numbers<[1], [0], [0], [1], [0, 0, 1, 1], [], []>} : vector<128x128xbf16>, vector<128x128xbf16>, vector<128x128xf32> -> vector<128x128xf32>
    %391 = arith.addf %384, %390 : vector<128x128xf32>
    %c0_405 = arith.constant 0 : index
    %c1_406 = arith.constant 1 : index
    %c0_407 = arith.constant 0 : index
    %c0_408 = arith.constant 0 : index
    %392 = vector.load %arg9[%c0_405, %c1_406, %c0_407, %c0_408] : memref<3x18x16x128xbf16, #tpu.memory_space<vmem>>, vector<1x8x16x128xbf16>
    %393 = vector.shape_cast %392 : vector<1x8x16x128xbf16> to vector<8x16x128xbf16>
    %394 = vector.shape_cast %393 : vector<8x16x128xbf16> to vector<128x128xbf16>
    %c21 = arith.constant 21 : index
    %c0_409 = arith.constant 0 : index
    %c0_410 = arith.constant 0 : index
    %395 = vector.load %arg3[%c21, %c0_409, %c0_410] : memref<36x128x128xbf16, #tpu.memory_space<vmem>>, vector<1x128x128xbf16>
    %396 = vector.shape_cast %395 : vector<1x128x128xbf16> to vector<128x128xbf16>
    %cst_411 = arith.constant dense<0.000000e+00> : vector<128x128xf32>
    %397 = tpu.matmul %394, %396, %cst_411 {dimension_numbers = #tpu.dot_dimension_numbers<[1], [0], [0], [1], [0, 0, 1, 1], [], []>} : vector<128x128xbf16>, vector<128x128xbf16>, vector<128x128xf32> -> vector<128x128xf32>
    %398 = arith.addf %391, %397 : vector<128x128xf32>
    %c1_412 = arith.constant 1 : index
    %c1_413 = arith.constant 1 : index
    %c0_414 = arith.constant 0 : index
    %c0_415 = arith.constant 0 : index
    %399 = vector.load %arg9[%c1_412, %c1_413, %c0_414, %c0_415] : memref<3x18x16x128xbf16, #tpu.memory_space<vmem>>, vector<1x8x16x128xbf16>
    %400 = vector.shape_cast %399 : vector<1x8x16x128xbf16> to vector<8x16x128xbf16>
    %401 = vector.shape_cast %400 : vector<8x16x128xbf16> to vector<128x128xbf16>
    %c22 = arith.constant 22 : index
    %c0_416 = arith.constant 0 : index
    %c0_417 = arith.constant 0 : index
    %402 = vector.load %arg3[%c22, %c0_416, %c0_417] : memref<36x128x128xbf16, #tpu.memory_space<vmem>>, vector<1x128x128xbf16>
    %403 = vector.shape_cast %402 : vector<1x128x128xbf16> to vector<128x128xbf16>
    %cst_418 = arith.constant dense<0.000000e+00> : vector<128x128xf32>
    %404 = tpu.matmul %401, %403, %cst_418 {dimension_numbers = #tpu.dot_dimension_numbers<[1], [0], [0], [1], [0, 0, 1, 1], [], []>} : vector<128x128xbf16>, vector<128x128xbf16>, vector<128x128xf32> -> vector<128x128xf32>
    %405 = arith.addf %398, %404 : vector<128x128xf32>
    %c2_419 = arith.constant 2 : index
    %c1_420 = arith.constant 1 : index
    %c0_421 = arith.constant 0 : index
    %c0_422 = arith.constant 0 : index
    %406 = vector.load %arg9[%c2_419, %c1_420, %c0_421, %c0_422] : memref<3x18x16x128xbf16, #tpu.memory_space<vmem>>, vector<1x8x16x128xbf16>
    %407 = vector.shape_cast %406 : vector<1x8x16x128xbf16> to vector<8x16x128xbf16>
    %408 = vector.shape_cast %407 : vector<8x16x128xbf16> to vector<128x128xbf16>
    %c23 = arith.constant 23 : index
    %c0_423 = arith.constant 0 : index
    %c0_424 = arith.constant 0 : index
    %409 = vector.load %arg3[%c23, %c0_423, %c0_424] : memref<36x128x128xbf16, #tpu.memory_space<vmem>>, vector<1x128x128xbf16>
    %410 = vector.shape_cast %409 : vector<1x128x128xbf16> to vector<128x128xbf16>
    %cst_425 = arith.constant dense<0.000000e+00> : vector<128x128xf32>
    %411 = tpu.matmul %408, %410, %cst_425 {dimension_numbers = #tpu.dot_dimension_numbers<[1], [0], [0], [1], [0, 0, 1, 1], [], []>} : vector<128x128xbf16>, vector<128x128xbf16>, vector<128x128xf32> -> vector<128x128xf32>
    %412 = arith.addf %405, %411 : vector<128x128xf32>
    %c0_426 = arith.constant 0 : index
    %c2_427 = arith.constant 2 : index
    %c0_428 = arith.constant 0 : index
    %c0_429 = arith.constant 0 : index
    %413 = vector.load %arg9[%c0_426, %c2_427, %c0_428, %c0_429] : memref<3x18x16x128xbf16, #tpu.memory_space<vmem>>, vector<1x8x16x128xbf16>
    %414 = vector.shape_cast %413 : vector<1x8x16x128xbf16> to vector<8x16x128xbf16>
    %415 = vector.shape_cast %414 : vector<8x16x128xbf16> to vector<128x128xbf16>
    %c24 = arith.constant 24 : index
    %c0_430 = arith.constant 0 : index
    %c0_431 = arith.constant 0 : index
    %416 = vector.load %arg3[%c24, %c0_430, %c0_431] : memref<36x128x128xbf16, #tpu.memory_space<vmem>>, vector<1x128x128xbf16>
    %417 = vector.shape_cast %416 : vector<1x128x128xbf16> to vector<128x128xbf16>
    %cst_432 = arith.constant dense<0.000000e+00> : vector<128x128xf32>
    %418 = tpu.matmul %415, %417, %cst_432 {dimension_numbers = #tpu.dot_dimension_numbers<[1], [0], [0], [1], [0, 0, 1, 1], [], []>} : vector<128x128xbf16>, vector<128x128xbf16>, vector<128x128xf32> -> vector<128x128xf32>
    %419 = arith.addf %412, %418 : vector<128x128xf32>
    %c1_433 = arith.constant 1 : index
    %c2_434 = arith.constant 2 : index
    %c0_435 = arith.constant 0 : index
    %c0_436 = arith.constant 0 : index
    %420 = vector.load %arg9[%c1_433, %c2_434, %c0_435, %c0_436] : memref<3x18x16x128xbf16, #tpu.memory_space<vmem>>, vector<1x8x16x128xbf16>
    %421 = vector.shape_cast %420 : vector<1x8x16x128xbf16> to vector<8x16x128xbf16>
    %422 = vector.shape_cast %421 : vector<8x16x128xbf16> to vector<128x128xbf16>
    %c25 = arith.constant 25 : index
    %c0_437 = arith.constant 0 : index
    %c0_438 = arith.constant 0 : index
    %423 = vector.load %arg3[%c25, %c0_437, %c0_438] : memref<36x128x128xbf16, #tpu.memory_space<vmem>>, vector<1x128x128xbf16>
    %424 = vector.shape_cast %423 : vector<1x128x128xbf16> to vector<128x128xbf16>
    %cst_439 = arith.constant dense<0.000000e+00> : vector<128x128xf32>
    %425 = tpu.matmul %422, %424, %cst_439 {dimension_numbers = #tpu.dot_dimension_numbers<[1], [0], [0], [1], [0, 0, 1, 1], [], []>} : vector<128x128xbf16>, vector<128x128xbf16>, vector<128x128xf32> -> vector<128x128xf32>
    %426 = arith.addf %419, %425 : vector<128x128xf32>
    %c2_440 = arith.constant 2 : index
    %c2_441 = arith.constant 2 : index
    %c0_442 = arith.constant 0 : index
    %c0_443 = arith.constant 0 : index
    %427 = vector.load %arg9[%c2_440, %c2_441, %c0_442, %c0_443] : memref<3x18x16x128xbf16, #tpu.memory_space<vmem>>, vector<1x8x16x128xbf16>
    %428 = vector.shape_cast %427 : vector<1x8x16x128xbf16> to vector<8x16x128xbf16>
    %429 = vector.shape_cast %428 : vector<8x16x128xbf16> to vector<128x128xbf16>
    %c26 = arith.constant 26 : index
    %c0_444 = arith.constant 0 : index
    %c0_445 = arith.constant 0 : index
    %430 = vector.load %arg3[%c26, %c0_444, %c0_445] : memref<36x128x128xbf16, #tpu.memory_space<vmem>>, vector<1x128x128xbf16>
    %431 = vector.shape_cast %430 : vector<1x128x128xbf16> to vector<128x128xbf16>
    %cst_446 = arith.constant dense<0.000000e+00> : vector<128x128xf32>
    %432 = tpu.matmul %429, %431, %cst_446 {dimension_numbers = #tpu.dot_dimension_numbers<[1], [0], [0], [1], [0, 0, 1, 1], [], []>} : vector<128x128xbf16>, vector<128x128xbf16>, vector<128x128xf32> -> vector<128x128xf32>
    %433 = arith.addf %426, %432 : vector<128x128xf32>
    %c4_447 = arith.constant 4 : index
    %c0_448 = arith.constant 0 : index
    %c0_449 = arith.constant 0 : index
    %434 = vector.load %arg5[%c4_447, %c0_448, %c0_449] : memref<7x1x128xf32, #tpu.memory_space<vmem>>, vector<1x1x128xf32>
    %435 = vector.shape_cast %434 : vector<1x1x128xf32> to vector<1x128xf32>
    %436 = vector.broadcast %435 : vector<1x128xf32> to vector<128x128xf32>
    %437 = arith.addf %433, %436 : vector<128x128xf32>
    %cst_450 = arith.constant 0.000000e+00 : f32
    %438 = vector.broadcast %cst_450 : f32 to vector<128x128xf32>
    %439 = arith.maximumf %437, %438 : vector<128x128xf32>
    %440 = arith.truncf %439 : vector<128x128xf32> to vector<128x128xbf16>
    %c0_451 = arith.constant 0 : index
    %c0_452 = arith.constant 0 : index
    %441 = vector.load %arg11[%c0_451, %c0_452] : memref<256x128xbf16, #tpu.memory_space<vmem>>, vector<128x128xbf16>
    tpu.vector_store %arg11[%c0_451, %c0_452], %440 {strides = array<i32>} : memref<256x128xbf16, #tpu.memory_space<vmem>>, vector<128x128xbf16>,
    %c0_453 = arith.constant 0 : index
    %c8_454 = arith.constant 8 : index
    %c0_455 = arith.constant 0 : index
    %c0_456 = arith.constant 0 : index
    %442 = vector.load %arg9[%c0_453, %c8_454, %c0_455, %c0_456] : memref<3x18x16x128xbf16, #tpu.memory_space<vmem>>, vector<1x8x16x128xbf16>
    %443 = vector.shape_cast %442 : vector<1x8x16x128xbf16> to vector<8x16x128xbf16>
    %444 = vector.shape_cast %443 : vector<8x16x128xbf16> to vector<128x128xbf16>
    %c18_457 = arith.constant 18 : index
    %c0_458 = arith.constant 0 : index
    %c0_459 = arith.constant 0 : index
    %445 = vector.load %arg3[%c18_457, %c0_458, %c0_459] : memref<36x128x128xbf16, #tpu.memory_space<vmem>>, vector<1x128x128xbf16>
    %446 = vector.shape_cast %445 : vector<1x128x128xbf16> to vector<128x128xbf16>
    %cst_460 = arith.constant dense<0.000000e+00> : vector<128x128xf32>
    %447 = tpu.matmul %444, %446, %cst_460 {dimension_numbers = #tpu.dot_dimension_numbers<[1], [0], [0], [1], [0, 0, 1, 1], [], []>} : vector<128x128xbf16>, vector<128x128xbf16>, vector<128x128xf32> -> vector<128x128xf32>
    %c1_461 = arith.constant 1 : index
    %c8_462 = arith.constant 8 : index
    %c0_463 = arith.constant 0 : index
    %c0_464 = arith.constant 0 : index
    %448 = vector.load %arg9[%c1_461, %c8_462, %c0_463, %c0_464] : memref<3x18x16x128xbf16, #tpu.memory_space<vmem>>, vector<1x8x16x128xbf16>
    %449 = vector.shape_cast %448 : vector<1x8x16x128xbf16> to vector<8x16x128xbf16>
    %450 = vector.shape_cast %449 : vector<8x16x128xbf16> to vector<128x128xbf16>
    %c19_465 = arith.constant 19 : index
    %c0_466 = arith.constant 0 : index
    %c0_467 = arith.constant 0 : index
    %451 = vector.load %arg3[%c19_465, %c0_466, %c0_467] : memref<36x128x128xbf16, #tpu.memory_space<vmem>>, vector<1x128x128xbf16>
    %452 = vector.shape_cast %451 : vector<1x128x128xbf16> to vector<128x128xbf16>
    %cst_468 = arith.constant dense<0.000000e+00> : vector<128x128xf32>
    %453 = tpu.matmul %450, %452, %cst_468 {dimension_numbers = #tpu.dot_dimension_numbers<[1], [0], [0], [1], [0, 0, 1, 1], [], []>} : vector<128x128xbf16>, vector<128x128xbf16>, vector<128x128xf32> -> vector<128x128xf32>
    %454 = arith.addf %447, %453 : vector<128x128xf32>
    %c2_469 = arith.constant 2 : index
    %c8_470 = arith.constant 8 : index
    %c0_471 = arith.constant 0 : index
    %c0_472 = arith.constant 0 : index
    %455 = vector.load %arg9[%c2_469, %c8_470, %c0_471, %c0_472] : memref<3x18x16x128xbf16, #tpu.memory_space<vmem>>, vector<1x8x16x128xbf16>
    %456 = vector.shape_cast %455 : vector<1x8x16x128xbf16> to vector<8x16x128xbf16>
    %457 = vector.shape_cast %456 : vector<8x16x128xbf16> to vector<128x128xbf16>
    %c20_473 = arith.constant 20 : index
    %c0_474 = arith.constant 0 : index
    %c0_475 = arith.constant 0 : index
    %458 = vector.load %arg3[%c20_473, %c0_474, %c0_475] : memref<36x128x128xbf16, #tpu.memory_space<vmem>>, vector<1x128x128xbf16>
    %459 = vector.shape_cast %458 : vector<1x128x128xbf16> to vector<128x128xbf16>
    %cst_476 = arith.constant dense<0.000000e+00> : vector<128x128xf32>
    %460 = tpu.matmul %457, %459, %cst_476 {dimension_numbers = #tpu.dot_dimension_numbers<[1], [0], [0], [1], [0, 0, 1, 1], [], []>} : vector<128x128xbf16>, vector<128x128xbf16>, vector<128x128xf32> -> vector<128x128xf32>
    %461 = arith.addf %454, %460 : vector<128x128xf32>
    %c0_477 = arith.constant 0 : index
    %c9_478 = arith.constant 9 : index
    %c0_479 = arith.constant 0 : index
    %c0_480 = arith.constant 0 : index
    %462 = vector.load %arg9[%c0_477, %c9_478, %c0_479, %c0_480] : memref<3x18x16x128xbf16, #tpu.memory_space<vmem>>, vector<1x8x16x128xbf16>
    %463 = vector.shape_cast %462 : vector<1x8x16x128xbf16> to vector<8x16x128xbf16>
    %464 = vector.shape_cast %463 : vector<8x16x128xbf16> to vector<128x128xbf16>
    %c21_481 = arith.constant 21 : index
    %c0_482 = arith.constant 0 : index
    %c0_483 = arith.constant 0 : index
    %465 = vector.load %arg3[%c21_481, %c0_482, %c0_483] : memref<36x128x128xbf16, #tpu.memory_space<vmem>>, vector<1x128x128xbf16>
    %466 = vector.shape_cast %465 : vector<1x128x128xbf16> to vector<128x128xbf16>
    %cst_484 = arith.constant dense<0.000000e+00> : vector<128x128xf32>
    %467 = tpu.matmul %464, %466, %cst_484 {dimension_numbers = #tpu.dot_dimension_numbers<[1], [0], [0], [1], [0, 0, 1, 1], [], []>} : vector<128x128xbf16>, vector<128x128xbf16>, vector<128x128xf32> -> vector<128x128xf32>
    %468 = arith.addf %461, %467 : vector<128x128xf32>
    %c1_485 = arith.constant 1 : index
    %c9_486 = arith.constant 9 : index
    %c0_487 = arith.constant 0 : index
    %c0_488 = arith.constant 0 : index
    %469 = vector.load %arg9[%c1_485, %c9_486, %c0_487, %c0_488] : memref<3x18x16x128xbf16, #tpu.memory_space<vmem>>, vector<1x8x16x128xbf16>
    %470 = vector.shape_cast %469 : vector<1x8x16x128xbf16> to vector<8x16x128xbf16>
    %471 = vector.shape_cast %470 : vector<8x16x128xbf16> to vector<128x128xbf16>
    %c22_489 = arith.constant 22 : index
    %c0_490 = arith.constant 0 : index
    %c0_491 = arith.constant 0 : index
    %472 = vector.load %arg3[%c22_489, %c0_490, %c0_491] : memref<36x128x128xbf16, #tpu.memory_space<vmem>>, vector<1x128x128xbf16>
    %473 = vector.shape_cast %472 : vector<1x128x128xbf16> to vector<128x128xbf16>
    %cst_492 = arith.constant dense<0.000000e+00> : vector<128x128xf32>
    %474 = tpu.matmul %471, %473, %cst_492 {dimension_numbers = #tpu.dot_dimension_numbers<[1], [0], [0], [1], [0, 0, 1, 1], [], []>} : vector<128x128xbf16>, vector<128x128xbf16>, vector<128x128xf32> -> vector<128x128xf32>
    %475 = arith.addf %468, %474 : vector<128x128xf32>
    %c2_493 = arith.constant 2 : index
    %c9_494 = arith.constant 9 : index
    %c0_495 = arith.constant 0 : index
    %c0_496 = arith.constant 0 : index
    %476 = vector.load %arg9[%c2_493, %c9_494, %c0_495, %c0_496] : memref<3x18x16x128xbf16, #tpu.memory_space<vmem>>, vector<1x8x16x128xbf16>
    %477 = vector.shape_cast %476 : vector<1x8x16x128xbf16> to vector<8x16x128xbf16>
    %478 = vector.shape_cast %477 : vector<8x16x128xbf16> to vector<128x128xbf16>
    %c23_497 = arith.constant 23 : index
    %c0_498 = arith.constant 0 : index
    %c0_499 = arith.constant 0 : index
    %479 = vector.load %arg3[%c23_497, %c0_498, %c0_499] : memref<36x128x128xbf16, #tpu.memory_space<vmem>>, vector<1x128x128xbf16>
    %480 = vector.shape_cast %479 : vector<1x128x128xbf16> to vector<128x128xbf16>
    %cst_500 = arith.constant dense<0.000000e+00> : vector<128x128xf32>
    %481 = tpu.matmul %478, %480, %cst_500 {dimension_numbers = #tpu.dot_dimension_numbers<[1], [0], [0], [1], [0, 0, 1, 1], [], []>} : vector<128x128xbf16>, vector<128x128xbf16>, vector<128x128xf32> -> vector<128x128xf32>
    %482 = arith.addf %475, %481 : vector<128x128xf32>
    %c0_501 = arith.constant 0 : index
    %c10_502 = arith.constant 10 : index
    %c0_503 = arith.constant 0 : index
    %c0_504 = arith.constant 0 : index
    %483 = vector.load %arg9[%c0_501, %c10_502, %c0_503, %c0_504] : memref<3x18x16x128xbf16, #tpu.memory_space<vmem>>, vector<1x8x16x128xbf16>
    %484 = vector.shape_cast %483 : vector<1x8x16x128xbf16> to vector<8x16x128xbf16>
    %485 = vector.shape_cast %484 : vector<8x16x128xbf16> to vector<128x128xbf16>
    %c24_505 = arith.constant 24 : index
    %c0_506 = arith.constant 0 : index
    %c0_507 = arith.constant 0 : index
    %486 = vector.load %arg3[%c24_505, %c0_506, %c0_507] : memref<36x128x128xbf16, #tpu.memory_space<vmem>>, vector<1x128x128xbf16>
    %487 = vector.shape_cast %486 : vector<1x128x128xbf16> to vector<128x128xbf16>
    %cst_508 = arith.constant dense<0.000000e+00> : vector<128x128xf32>
    %488 = tpu.matmul %485, %487, %cst_508 {dimension_numbers = #tpu.dot_dimension_numbers<[1], [0], [0], [1], [0, 0, 1, 1], [], []>} : vector<128x128xbf16>, vector<128x128xbf16>, vector<128x128xf32> -> vector<128x128xf32>
    %489 = arith.addf %482, %488 : vector<128x128xf32>
    %c1_509 = arith.constant 1 : index
    %c10_510 = arith.constant 10 : index
    %c0_511 = arith.constant 0 : index
    %c0_512 = arith.constant 0 : index
    %490 = vector.load %arg9[%c1_509, %c10_510, %c0_511, %c0_512] : memref<3x18x16x128xbf16, #tpu.memory_space<vmem>>, vector<1x8x16x128xbf16>
    %491 = vector.shape_cast %490 : vector<1x8x16x128xbf16> to vector<8x16x128xbf16>
    %492 = vector.shape_cast %491 : vector<8x16x128xbf16> to vector<128x128xbf16>
    %c25_513 = arith.constant 25 : index
    %c0_514 = arith.constant 0 : index
    %c0_515 = arith.constant 0 : index
    %493 = vector.load %arg3[%c25_513, %c0_514, %c0_515] : memref<36x128x128xbf16, #tpu.memory_space<vmem>>, vector<1x128x128xbf16>
    %494 = vector.shape_cast %493 : vector<1x128x128xbf16> to vector<128x128xbf16>
    %cst_516 = arith.constant dense<0.000000e+00> : vector<128x128xf32>
    %495 = tpu.matmul %492, %494, %cst_516 {dimension_numbers = #tpu.dot_dimension_numbers<[1], [0], [0], [1], [0, 0, 1, 1], [], []>} : vector<128x128xbf16>, vector<128x128xbf16>, vector<128x128xf32> -> vector<128x128xf32>
    %496 = arith.addf %489, %495 : vector<128x128xf32>
    %c2_517 = arith.constant 2 : index
    %c10_518 = arith.constant 10 : index
    %c0_519 = arith.constant 0 : index
    %c0_520 = arith.constant 0 : index
    %497 = vector.load %arg9[%c2_517, %c10_518, %c0_519, %c0_520] : memref<3x18x16x128xbf16, #tpu.memory_space<vmem>>, vector<1x8x16x128xbf16>
    %498 = vector.shape_cast %497 : vector<1x8x16x128xbf16> to vector<8x16x128xbf16>
    %499 = vector.shape_cast %498 : vector<8x16x128xbf16> to vector<128x128xbf16>
    %c26_521 = arith.constant 26 : index
    %c0_522 = arith.constant 0 : index
    %c0_523 = arith.constant 0 : index
    %500 = vector.load %arg3[%c26_521, %c0_522, %c0_523] : memref<36x128x128xbf16, #tpu.memory_space<vmem>>, vector<1x128x128xbf16>
    %501 = vector.shape_cast %500 : vector<1x128x128xbf16> to vector<128x128xbf16>
    %cst_524 = arith.constant dense<0.000000e+00> : vector<128x128xf32>
    %502 = tpu.matmul %499, %501, %cst_524 {dimension_numbers = #tpu.dot_dimension_numbers<[1], [0], [0], [1], [0, 0, 1, 1], [], []>} : vector<128x128xbf16>, vector<128x128xbf16>, vector<128x128xf32> -> vector<128x128xf32>
    %503 = arith.addf %496, %502 : vector<128x128xf32>
    %c4_525 = arith.constant 4 : index
    %c0_526 = arith.constant 0 : index
    %c0_527 = arith.constant 0 : index
    %504 = vector.load %arg5[%c4_525, %c0_526, %c0_527] : memref<7x1x128xf32, #tpu.memory_space<vmem>>, vector<1x1x128xf32>
    %505 = vector.shape_cast %504 : vector<1x1x128xf32> to vector<1x128xf32>
    %506 = vector.broadcast %505 : vector<1x128xf32> to vector<128x128xf32>
    %507 = arith.addf %503, %506 : vector<128x128xf32>
    %cst_528 = arith.constant 0.000000e+00 : f32
    %508 = vector.broadcast %cst_528 : f32 to vector<128x128xf32>
    %509 = arith.maximumf %507, %508 : vector<128x128xf32>
    %510 = arith.truncf %509 : vector<128x128xf32> to vector<128x128xbf16>
    %c128_529 = arith.constant 128 : index
    %c0_530 = arith.constant 0 : index
    %511 = vector.load %arg11[%c128_529, %c0_530] : memref<256x128xbf16, #tpu.memory_space<vmem>>, vector<128x128xbf16>
    tpu.vector_store %arg11[%c128_529, %c0_530], %510 {strides = array<i32>} : memref<256x128xbf16, #tpu.memory_space<vmem>>, vector<128x128xbf16>,
    %c0_531 = arith.constant 0 : index
    %c0_532 = arith.constant 0 : index
    %512 = vector.load %arg11[%c0_531, %c0_532] : memref<256x128xbf16, #tpu.memory_space<vmem>>, vector<256x128xbf16>
    %513 = vector.shape_cast %512 : vector<256x128xbf16> to vector<16x16x128xbf16>
    %cst_533 = arith.constant 0.000000e+00 : bf16
    %514 = vector.broadcast %cst_533 : bf16 to vector<16x1x128xbf16>
    %515 = vector.extract_strided_slice %513 {offsets = [0, 0, 0], sizes = [16, 15, 128], strides = [1, 1, 1]} : vector<16x16x128xbf16> to vector<16x15x128xbf16>
    %516 = tpu.concatenate %514, %515 in 1 : vector<16x1x128xbf16>, vector<16x15x128xbf16> -> vector<16x16x128xbf16>
    %c0_534 = arith.constant 0 : index
    %c1_535 = arith.constant 1 : index
    %c0_536 = arith.constant 0 : index
    %c0_537 = arith.constant 0 : index
    %517 = vector.load %arg9[%c0_534, %c1_535, %c0_536, %c0_537] : memref<3x18x16x128xbf16, #tpu.memory_space<vmem>>, vector<1x16x16x128xbf16>
    %518 = vector.shape_cast %517 : vector<1x16x16x128xbf16> to vector<16x16x128xbf16>
    %519 = vector.shape_cast %516 : vector<16x16x128xbf16> to vector<1x16x16x128xbf16>
    tpu.vector_store %arg9[%c0_534, %c1_535, %c0_536, %c0_537], %519 {strides = array<i32>} : memref<3x18x16x128xbf16, #tpu.memory_space<vmem>>, vector<1x16x16x128xbf16>,
    %c1_538 = arith.constant 1 : index
    %c1_539 = arith.constant 1 : index
    %c0_540 = arith.constant 0 : index
    %c0_541 = arith.constant 0 : index
    %520 = vector.load %arg9[%c1_538, %c1_539, %c0_540, %c0_541] : memref<3x18x16x128xbf16, #tpu.memory_space<vmem>>, vector<1x16x16x128xbf16>
    %521 = vector.shape_cast %520 : vector<1x16x16x128xbf16> to vector<16x16x128xbf16>
    %522 = vector.shape_cast %513 : vector<16x16x128xbf16> to vector<1x16x16x128xbf16>
    tpu.vector_store %arg9[%c1_538, %c1_539, %c0_540, %c0_541], %522 {strides = array<i32>} : memref<3x18x16x128xbf16, #tpu.memory_space<vmem>>, vector<1x16x16x128xbf16>,
    %523 = vector.extract_strided_slice %513 {offsets = [0, 1, 0], sizes = [16, 15, 128], strides = [1, 1, 1]} : vector<16x16x128xbf16> to vector<16x15x128xbf16>
    %524 = tpu.concatenate %523, %514 in 1 : vector<16x15x128xbf16>, vector<16x1x128xbf16> -> vector<16x16x128xbf16>
    %c2_542 = arith.constant 2 : index
    %c1_543 = arith.constant 1 : index
    %c0_544 = arith.constant 0 : index
    %c0_545 = arith.constant 0 : index
    %525 = vector.load %arg9[%c2_542, %c1_543, %c0_544, %c0_545] : memref<3x18x16x128xbf16, #tpu.memory_space<vmem>>, vector<1x16x16x128xbf16>
    %526 = vector.shape_cast %525 : vector<1x16x16x128xbf16> to vector<16x16x128xbf16>
    %527 = vector.shape_cast %524 : vector<16x16x128xbf16> to vector<1x16x16x128xbf16>
    tpu.vector_store %arg9[%c2_542, %c1_543, %c0_544, %c0_545], %527 {strides = array<i32>} : memref<3x18x16x128xbf16, #tpu.memory_space<vmem>>, vector<1x16x16x128xbf16>,
    %c0_546 = arith.constant 0 : index
    %c0_547 = arith.constant 0 : index
    %c0_548 = arith.constant 0 : index
    %c0_549 = arith.constant 0 : index
    %528 = vector.load %arg9[%c0_546, %c0_547, %c0_548, %c0_549] : memref<3x18x16x128xbf16, #tpu.memory_space<vmem>>, vector<1x8x16x128xbf16>
    %529 = vector.shape_cast %528 : vector<1x8x16x128xbf16> to vector<8x16x128xbf16>
    %530 = vector.shape_cast %529 : vector<8x16x128xbf16> to vector<128x128xbf16>
    %c27 = arith.constant 27 : index
    %c0_550 = arith.constant 0 : index
    %c0_551 = arith.constant 0 : index
    %531 = vector.load %arg3[%c27, %c0_550, %c0_551] : memref<36x128x128xbf16, #tpu.memory_space<vmem>>, vector<1x128x128xbf16>
    %532 = vector.shape_cast %531 : vector<1x128x128xbf16> to vector<128x128xbf16>
    %cst_552 = arith.constant dense<0.000000e+00> : vector<128x128xf32>
    %533 = tpu.matmul %530, %532, %cst_552 {dimension_numbers = #tpu.dot_dimension_numbers<[1], [0], [0], [1], [0, 0, 1, 1], [], []>} : vector<128x128xbf16>, vector<128x128xbf16>, vector<128x128xf32> -> vector<128x128xf32>
    %c1_553 = arith.constant 1 : index
    %c0_554 = arith.constant 0 : index
    %c0_555 = arith.constant 0 : index
    %c0_556 = arith.constant 0 : index
    %534 = vector.load %arg9[%c1_553, %c0_554, %c0_555, %c0_556] : memref<3x18x16x128xbf16, #tpu.memory_space<vmem>>, vector<1x8x16x128xbf16>
    %535 = vector.shape_cast %534 : vector<1x8x16x128xbf16> to vector<8x16x128xbf16>
    %536 = vector.shape_cast %535 : vector<8x16x128xbf16> to vector<128x128xbf16>
    %c28 = arith.constant 28 : index
    %c0_557 = arith.constant 0 : index
    %c0_558 = arith.constant 0 : index
    %537 = vector.load %arg3[%c28, %c0_557, %c0_558] : memref<36x128x128xbf16, #tpu.memory_space<vmem>>, vector<1x128x128xbf16>
    %538 = vector.shape_cast %537 : vector<1x128x128xbf16> to vector<128x128xbf16>
    %cst_559 = arith.constant dense<0.000000e+00> : vector<128x128xf32>
    %539 = tpu.matmul %536, %538, %cst_559 {dimension_numbers = #tpu.dot_dimension_numbers<[1], [0], [0], [1], [0, 0, 1, 1], [], []>} : vector<128x128xbf16>, vector<128x128xbf16>, vector<128x128xf32> -> vector<128x128xf32>
    %540 = arith.addf %533, %539 : vector<128x128xf32>
    %c2_560 = arith.constant 2 : index
    %c0_561 = arith.constant 0 : index
    %c0_562 = arith.constant 0 : index
    %c0_563 = arith.constant 0 : index
    %541 = vector.load %arg9[%c2_560, %c0_561, %c0_562, %c0_563] : memref<3x18x16x128xbf16, #tpu.memory_space<vmem>>, vector<1x8x16x128xbf16>
    %542 = vector.shape_cast %541 : vector<1x8x16x128xbf16> to vector<8x16x128xbf16>
    %543 = vector.shape_cast %542 : vector<8x16x128xbf16> to vector<128x128xbf16>
    %c29 = arith.constant 29 : index
    %c0_564 = arith.constant 0 : index
    %c0_565 = arith.constant 0 : index
    %544 = vector.load %arg3[%c29, %c0_564, %c0_565] : memref<36x128x128xbf16, #tpu.memory_space<vmem>>, vector<1x128x128xbf16>
    %545 = vector.shape_cast %544 : vector<1x128x128xbf16> to vector<128x128xbf16>
    %cst_566 = arith.constant dense<0.000000e+00> : vector<128x128xf32>
    %546 = tpu.matmul %543, %545, %cst_566 {dimension_numbers = #tpu.dot_dimension_numbers<[1], [0], [0], [1], [0, 0, 1, 1], [], []>} : vector<128x128xbf16>, vector<128x128xbf16>, vector<128x128xf32> -> vector<128x128xf32>
    %547 = arith.addf %540, %546 : vector<128x128xf32>
    %c0_567 = arith.constant 0 : index
    %c1_568 = arith.constant 1 : index
    %c0_569 = arith.constant 0 : index
    %c0_570 = arith.constant 0 : index
    %548 = vector.load %arg9[%c0_567, %c1_568, %c0_569, %c0_570] : memref<3x18x16x128xbf16, #tpu.memory_space<vmem>>, vector<1x8x16x128xbf16>
    %549 = vector.shape_cast %548 : vector<1x8x16x128xbf16> to vector<8x16x128xbf16>
    %550 = vector.shape_cast %549 : vector<8x16x128xbf16> to vector<128x128xbf16>
    %c30 = arith.constant 30 : index
    %c0_571 = arith.constant 0 : index
    %c0_572 = arith.constant 0 : index
    %551 = vector.load %arg3[%c30, %c0_571, %c0_572] : memref<36x128x128xbf16, #tpu.memory_space<vmem>>, vector<1x128x128xbf16>
    %552 = vector.shape_cast %551 : vector<1x128x128xbf16> to vector<128x128xbf16>
    %cst_573 = arith.constant dense<0.000000e+00> : vector<128x128xf32>
    %553 = tpu.matmul %550, %552, %cst_573 {dimension_numbers = #tpu.dot_dimension_numbers<[1], [0], [0], [1], [0, 0, 1, 1], [], []>} : vector<128x128xbf16>, vector<128x128xbf16>, vector<128x128xf32> -> vector<128x128xf32>
    %554 = arith.addf %547, %553 : vector<128x128xf32>
    %c1_574 = arith.constant 1 : index
    %c1_575 = arith.constant 1 : index
    %c0_576 = arith.constant 0 : index
    %c0_577 = arith.constant 0 : index
    %555 = vector.load %arg9[%c1_574, %c1_575, %c0_576, %c0_577] : memref<3x18x16x128xbf16, #tpu.memory_space<vmem>>, vector<1x8x16x128xbf16>
    %556 = vector.shape_cast %555 : vector<1x8x16x128xbf16> to vector<8x16x128xbf16>
    %557 = vector.shape_cast %556 : vector<8x16x128xbf16> to vector<128x128xbf16>
    %c31 = arith.constant 31 : index
    %c0_578 = arith.constant 0 : index
    %c0_579 = arith.constant 0 : index
    %558 = vector.load %arg3[%c31, %c0_578, %c0_579] : memref<36x128x128xbf16, #tpu.memory_space<vmem>>, vector<1x128x128xbf16>
    %559 = vector.shape_cast %558 : vector<1x128x128xbf16> to vector<128x128xbf16>
    %cst_580 = arith.constant dense<0.000000e+00> : vector<128x128xf32>
    %560 = tpu.matmul %557, %559, %cst_580 {dimension_numbers = #tpu.dot_dimension_numbers<[1], [0], [0], [1], [0, 0, 1, 1], [], []>} : vector<128x128xbf16>, vector<128x128xbf16>, vector<128x128xf32> -> vector<128x128xf32>
    %561 = arith.addf %554, %560 : vector<128x128xf32>
    %c2_581 = arith.constant 2 : index
    %c1_582 = arith.constant 1 : index
    %c0_583 = arith.constant 0 : index
    %c0_584 = arith.constant 0 : index
    %562 = vector.load %arg9[%c2_581, %c1_582, %c0_583, %c0_584] : memref<3x18x16x128xbf16, #tpu.memory_space<vmem>>, vector<1x8x16x128xbf16>
    %563 = vector.shape_cast %562 : vector<1x8x16x128xbf16> to vector<8x16x128xbf16>
    %564 = vector.shape_cast %563 : vector<8x16x128xbf16> to vector<128x128xbf16>
    %c32 = arith.constant 32 : index
    %c0_585 = arith.constant 0 : index
    %c0_586 = arith.constant 0 : index
    %565 = vector.load %arg3[%c32, %c0_585, %c0_586] : memref<36x128x128xbf16, #tpu.memory_space<vmem>>, vector<1x128x128xbf16>
    %566 = vector.shape_cast %565 : vector<1x128x128xbf16> to vector<128x128xbf16>
    %cst_587 = arith.constant dense<0.000000e+00> : vector<128x128xf32>
    %567 = tpu.matmul %564, %566, %cst_587 {dimension_numbers = #tpu.dot_dimension_numbers<[1], [0], [0], [1], [0, 0, 1, 1], [], []>} : vector<128x128xbf16>, vector<128x128xbf16>, vector<128x128xf32> -> vector<128x128xf32>
    %568 = arith.addf %561, %567 : vector<128x128xf32>
    %c0_588 = arith.constant 0 : index
    %c2_589 = arith.constant 2 : index
    %c0_590 = arith.constant 0 : index
    %c0_591 = arith.constant 0 : index
    %569 = vector.load %arg9[%c0_588, %c2_589, %c0_590, %c0_591] : memref<3x18x16x128xbf16, #tpu.memory_space<vmem>>, vector<1x8x16x128xbf16>
    %570 = vector.shape_cast %569 : vector<1x8x16x128xbf16> to vector<8x16x128xbf16>
    %571 = vector.shape_cast %570 : vector<8x16x128xbf16> to vector<128x128xbf16>
    %c33 = arith.constant 33 : index
    %c0_592 = arith.constant 0 : index
    %c0_593 = arith.constant 0 : index
    %572 = vector.load %arg3[%c33, %c0_592, %c0_593] : memref<36x128x128xbf16, #tpu.memory_space<vmem>>, vector<1x128x128xbf16>
    %573 = vector.shape_cast %572 : vector<1x128x128xbf16> to vector<128x128xbf16>
    %cst_594 = arith.constant dense<0.000000e+00> : vector<128x128xf32>
    %574 = tpu.matmul %571, %573, %cst_594 {dimension_numbers = #tpu.dot_dimension_numbers<[1], [0], [0], [1], [0, 0, 1, 1], [], []>} : vector<128x128xbf16>, vector<128x128xbf16>, vector<128x128xf32> -> vector<128x128xf32>
    %575 = arith.addf %568, %574 : vector<128x128xf32>
    %c1_595 = arith.constant 1 : index
    %c2_596 = arith.constant 2 : index
    %c0_597 = arith.constant 0 : index
    %c0_598 = arith.constant 0 : index
    %576 = vector.load %arg9[%c1_595, %c2_596, %c0_597, %c0_598] : memref<3x18x16x128xbf16, #tpu.memory_space<vmem>>, vector<1x8x16x128xbf16>
    %577 = vector.shape_cast %576 : vector<1x8x16x128xbf16> to vector<8x16x128xbf16>
    %578 = vector.shape_cast %577 : vector<8x16x128xbf16> to vector<128x128xbf16>
    %c34 = arith.constant 34 : index
    %c0_599 = arith.constant 0 : index
    %c0_600 = arith.constant 0 : index
    %579 = vector.load %arg3[%c34, %c0_599, %c0_600] : memref<36x128x128xbf16, #tpu.memory_space<vmem>>, vector<1x128x128xbf16>
    %580 = vector.shape_cast %579 : vector<1x128x128xbf16> to vector<128x128xbf16>
    %cst_601 = arith.constant dense<0.000000e+00> : vector<128x128xf32>
    %581 = tpu.matmul %578, %580, %cst_601 {dimension_numbers = #tpu.dot_dimension_numbers<[1], [0], [0], [1], [0, 0, 1, 1], [], []>} : vector<128x128xbf16>, vector<128x128xbf16>, vector<128x128xf32> -> vector<128x128xf32>
    %582 = arith.addf %575, %581 : vector<128x128xf32>
    %c2_602 = arith.constant 2 : index
    %c2_603 = arith.constant 2 : index
    %c0_604 = arith.constant 0 : index
    %c0_605 = arith.constant 0 : index
    %583 = vector.load %arg9[%c2_602, %c2_603, %c0_604, %c0_605] : memref<3x18x16x128xbf16, #tpu.memory_space<vmem>>, vector<1x8x16x128xbf16>
    %584 = vector.shape_cast %583 : vector<1x8x16x128xbf16> to vector<8x16x128xbf16>
    %585 = vector.shape_cast %584 : vector<8x16x128xbf16> to vector<128x128xbf16>
    %c35 = arith.constant 35 : index
    %c0_606 = arith.constant 0 : index
    %c0_607 = arith.constant 0 : index
    %586 = vector.load %arg3[%c35, %c0_606, %c0_607] : memref<36x128x128xbf16, #tpu.memory_space<vmem>>, vector<1x128x128xbf16>
    %587 = vector.shape_cast %586 : vector<1x128x128xbf16> to vector<128x128xbf16>
    %cst_608 = arith.constant dense<0.000000e+00> : vector<128x128xf32>
    %588 = tpu.matmul %585, %587, %cst_608 {dimension_numbers = #tpu.dot_dimension_numbers<[1], [0], [0], [1], [0, 0, 1, 1], [], []>} : vector<128x128xbf16>, vector<128x128xbf16>, vector<128x128xf32> -> vector<128x128xf32>
    %589 = arith.addf %582, %588 : vector<128x128xf32>
    %c5_609 = arith.constant 5 : index
    %c0_610 = arith.constant 0 : index
    %c0_611 = arith.constant 0 : index
    %590 = vector.load %arg5[%c5_609, %c0_610, %c0_611] : memref<7x1x128xf32, #tpu.memory_space<vmem>>, vector<1x1x128xf32>
    %591 = vector.shape_cast %590 : vector<1x1x128xf32> to vector<1x128xf32>
    %592 = vector.broadcast %591 : vector<1x128xf32> to vector<128x128xf32>
    %593 = arith.addf %589, %592 : vector<128x128xf32>
    %c0_612 = arith.constant 0 : index
    %c0_613 = arith.constant 0 : index
    %594 = vector.load %arg10[%c0_612, %c0_613] : memref<256x128xbf16, #tpu.memory_space<vmem>>, vector<128x128xbf16>
    %c1_614 = arith.constant 1 : index
    %c0_615 = arith.constant 0 : index
    %c0_616 = arith.constant 0 : index
    %595 = vector.load %arg4[%c1_614, %c0_615, %c0_616] : memref<2x128x128xbf16, #tpu.memory_space<vmem>>, vector<1x128x128xbf16>
    %596 = vector.shape_cast %595 : vector<1x128x128xbf16> to vector<128x128xbf16>
    %cst_617 = arith.constant dense<0.000000e+00> : vector<128x128xf32>
    %597 = tpu.matmul %594, %596, %cst_617 {dimension_numbers = #tpu.dot_dimension_numbers<[1], [0], [0], [1], [0, 0, 1, 1], [], []>} : vector<128x128xbf16>, vector<128x128xbf16>, vector<128x128xf32> -> vector<128x128xf32>
    %c6_618 = arith.constant 6 : index
    %c0_619 = arith.constant 0 : index
    %c0_620 = arith.constant 0 : index
    %598 = vector.load %arg5[%c6_618, %c0_619, %c0_620] : memref<7x1x128xf32, #tpu.memory_space<vmem>>, vector<1x1x128xf32>
    %599 = vector.shape_cast %598 : vector<1x1x128xf32> to vector<1x128xf32>
    %600 = vector.broadcast %599 : vector<1x128xf32> to vector<128x128xf32>
    %601 = arith.addf %597, %600 : vector<128x128xf32>
    %602 = arith.addf %593, %601 : vector<128x128xf32>
    %cst_621 = arith.constant 0.000000e+00 : f32
    %603 = vector.broadcast %cst_621 : f32 to vector<128x128xf32>
    %604 = arith.maximumf %602, %603 : vector<128x128xf32>
    %605 = arith.truncf %604 : vector<128x128xf32> to vector<128x128xbf16>
    %c0_622 = arith.constant 0 : index
    %c0_623 = arith.constant 0 : index
    %606 = vector.load %arg10[%c0_622, %c0_623] : memref<256x128xbf16, #tpu.memory_space<vmem>>, vector<128x128xbf16>
    tpu.vector_store %arg10[%c0_622, %c0_623], %605 {strides = array<i32>} : memref<256x128xbf16, #tpu.memory_space<vmem>>, vector<128x128xbf16>,
    %c0_624 = arith.constant 0 : index
    %c8_625 = arith.constant 8 : index
    %c0_626 = arith.constant 0 : index
    %c0_627 = arith.constant 0 : index
    %607 = vector.load %arg9[%c0_624, %c8_625, %c0_626, %c0_627] : memref<3x18x16x128xbf16, #tpu.memory_space<vmem>>, vector<1x8x16x128xbf16>
    %608 = vector.shape_cast %607 : vector<1x8x16x128xbf16> to vector<8x16x128xbf16>
    %609 = vector.shape_cast %608 : vector<8x16x128xbf16> to vector<128x128xbf16>
    %c27_628 = arith.constant 27 : index
    %c0_629 = arith.constant 0 : index
    %c0_630 = arith.constant 0 : index
    %610 = vector.load %arg3[%c27_628, %c0_629, %c0_630] : memref<36x128x128xbf16, #tpu.memory_space<vmem>>, vector<1x128x128xbf16>
    %611 = vector.shape_cast %610 : vector<1x128x128xbf16> to vector<128x128xbf16>
    %cst_631 = arith.constant dense<0.000000e+00> : vector<128x128xf32>
    %612 = tpu.matmul %609, %611, %cst_631 {dimension_numbers = #tpu.dot_dimension_numbers<[1], [0], [0], [1], [0, 0, 1, 1], [], []>} : vector<128x128xbf16>, vector<128x128xbf16>, vector<128x128xf32> -> vector<128x128xf32>
    %c1_632 = arith.constant 1 : index
    %c8_633 = arith.constant 8 : index
    %c0_634 = arith.constant 0 : index
    %c0_635 = arith.constant 0 : index
    %613 = vector.load %arg9[%c1_632, %c8_633, %c0_634, %c0_635] : memref<3x18x16x128xbf16, #tpu.memory_space<vmem>>, vector<1x8x16x128xbf16>
    %614 = vector.shape_cast %613 : vector<1x8x16x128xbf16> to vector<8x16x128xbf16>
    %615 = vector.shape_cast %614 : vector<8x16x128xbf16> to vector<128x128xbf16>
    %c28_636 = arith.constant 28 : index
    %c0_637 = arith.constant 0 : index
    %c0_638 = arith.constant 0 : index
    %616 = vector.load %arg3[%c28_636, %c0_637, %c0_638] : memref<36x128x128xbf16, #tpu.memory_space<vmem>>, vector<1x128x128xbf16>
    %617 = vector.shape_cast %616 : vector<1x128x128xbf16> to vector<128x128xbf16>
    %cst_639 = arith.constant dense<0.000000e+00> : vector<128x128xf32>
    %618 = tpu.matmul %615, %617, %cst_639 {dimension_numbers = #tpu.dot_dimension_numbers<[1], [0], [0], [1], [0, 0, 1, 1], [], []>} : vector<128x128xbf16>, vector<128x128xbf16>, vector<128x128xf32> -> vector<128x128xf32>
    %619 = arith.addf %612, %618 : vector<128x128xf32>
    %c2_640 = arith.constant 2 : index
    %c8_641 = arith.constant 8 : index
    %c0_642 = arith.constant 0 : index
    %c0_643 = arith.constant 0 : index
    %620 = vector.load %arg9[%c2_640, %c8_641, %c0_642, %c0_643] : memref<3x18x16x128xbf16, #tpu.memory_space<vmem>>, vector<1x8x16x128xbf16>
    %621 = vector.shape_cast %620 : vector<1x8x16x128xbf16> to vector<8x16x128xbf16>
    %622 = vector.shape_cast %621 : vector<8x16x128xbf16> to vector<128x128xbf16>
    %c29_644 = arith.constant 29 : index
    %c0_645 = arith.constant 0 : index
    %c0_646 = arith.constant 0 : index
    %623 = vector.load %arg3[%c29_644, %c0_645, %c0_646] : memref<36x128x128xbf16, #tpu.memory_space<vmem>>, vector<1x128x128xbf16>
    %624 = vector.shape_cast %623 : vector<1x128x128xbf16> to vector<128x128xbf16>
    %cst_647 = arith.constant dense<0.000000e+00> : vector<128x128xf32>
    %625 = tpu.matmul %622, %624, %cst_647 {dimension_numbers = #tpu.dot_dimension_numbers<[1], [0], [0], [1], [0, 0, 1, 1], [], []>} : vector<128x128xbf16>, vector<128x128xbf16>, vector<128x128xf32> -> vector<128x128xf32>
    %626 = arith.addf %619, %625 : vector<128x128xf32>
    %c0_648 = arith.constant 0 : index
    %c9_649 = arith.constant 9 : index
    %c0_650 = arith.constant 0 : index
    %c0_651 = arith.constant 0 : index
    %627 = vector.load %arg9[%c0_648, %c9_649, %c0_650, %c0_651] : memref<3x18x16x128xbf16, #tpu.memory_space<vmem>>, vector<1x8x16x128xbf16>
    %628 = vector.shape_cast %627 : vector<1x8x16x128xbf16> to vector<8x16x128xbf16>
    %629 = vector.shape_cast %628 : vector<8x16x128xbf16> to vector<128x128xbf16>
    %c30_652 = arith.constant 30 : index
    %c0_653 = arith.constant 0 : index
    %c0_654 = arith.constant 0 : index
    %630 = vector.load %arg3[%c30_652, %c0_653, %c0_654] : memref<36x128x128xbf16, #tpu.memory_space<vmem>>, vector<1x128x128xbf16>
    %631 = vector.shape_cast %630 : vector<1x128x128xbf16> to vector<128x128xbf16>
    %cst_655 = arith.constant dense<0.000000e+00> : vector<128x128xf32>
    %632 = tpu.matmul %629, %631, %cst_655 {dimension_numbers = #tpu.dot_dimension_numbers<[1], [0], [0], [1], [0, 0, 1, 1], [], []>} : vector<128x128xbf16>, vector<128x128xbf16>, vector<128x128xf32> -> vector<128x128xf32>
    %633 = arith.addf %626, %632 : vector<128x128xf32>
    %c1_656 = arith.constant 1 : index
    %c9_657 = arith.constant 9 : index
    %c0_658 = arith.constant 0 : index
    %c0_659 = arith.constant 0 : index
    %634 = vector.load %arg9[%c1_656, %c9_657, %c0_658, %c0_659] : memref<3x18x16x128xbf16, #tpu.memory_space<vmem>>, vector<1x8x16x128xbf16>
    %635 = vector.shape_cast %634 : vector<1x8x16x128xbf16> to vector<8x16x128xbf16>
    %636 = vector.shape_cast %635 : vector<8x16x128xbf16> to vector<128x128xbf16>
    %c31_660 = arith.constant 31 : index
    %c0_661 = arith.constant 0 : index
    %c0_662 = arith.constant 0 : index
    %637 = vector.load %arg3[%c31_660, %c0_661, %c0_662] : memref<36x128x128xbf16, #tpu.memory_space<vmem>>, vector<1x128x128xbf16>
    %638 = vector.shape_cast %637 : vector<1x128x128xbf16> to vector<128x128xbf16>
    %cst_663 = arith.constant dense<0.000000e+00> : vector<128x128xf32>
    %639 = tpu.matmul %636, %638, %cst_663 {dimension_numbers = #tpu.dot_dimension_numbers<[1], [0], [0], [1], [0, 0, 1, 1], [], []>} : vector<128x128xbf16>, vector<128x128xbf16>, vector<128x128xf32> -> vector<128x128xf32>
    %640 = arith.addf %633, %639 : vector<128x128xf32>
    %c2_664 = arith.constant 2 : index
    %c9_665 = arith.constant 9 : index
    %c0_666 = arith.constant 0 : index
    %c0_667 = arith.constant 0 : index
    %641 = vector.load %arg9[%c2_664, %c9_665, %c0_666, %c0_667] : memref<3x18x16x128xbf16, #tpu.memory_space<vmem>>, vector<1x8x16x128xbf16>
    %642 = vector.shape_cast %641 : vector<1x8x16x128xbf16> to vector<8x16x128xbf16>
    %643 = vector.shape_cast %642 : vector<8x16x128xbf16> to vector<128x128xbf16>
    %c32_668 = arith.constant 32 : index
    %c0_669 = arith.constant 0 : index
    %c0_670 = arith.constant 0 : index
    %644 = vector.load %arg3[%c32_668, %c0_669, %c0_670] : memref<36x128x128xbf16, #tpu.memory_space<vmem>>, vector<1x128x128xbf16>
    %645 = vector.shape_cast %644 : vector<1x128x128xbf16> to vector<128x128xbf16>
    %cst_671 = arith.constant dense<0.000000e+00> : vector<128x128xf32>
    %646 = tpu.matmul %643, %645, %cst_671 {dimension_numbers = #tpu.dot_dimension_numbers<[1], [0], [0], [1], [0, 0, 1, 1], [], []>} : vector<128x128xbf16>, vector<128x128xbf16>, vector<128x128xf32> -> vector<128x128xf32>
    %647 = arith.addf %640, %646 : vector<128x128xf32>
    %c0_672 = arith.constant 0 : index
    %c10_673 = arith.constant 10 : index
    %c0_674 = arith.constant 0 : index
    %c0_675 = arith.constant 0 : index
    %648 = vector.load %arg9[%c0_672, %c10_673, %c0_674, %c0_675] : memref<3x18x16x128xbf16, #tpu.memory_space<vmem>>, vector<1x8x16x128xbf16>
    %649 = vector.shape_cast %648 : vector<1x8x16x128xbf16> to vector<8x16x128xbf16>
    %650 = vector.shape_cast %649 : vector<8x16x128xbf16> to vector<128x128xbf16>
    %c33_676 = arith.constant 33 : index
    %c0_677 = arith.constant 0 : index
    %c0_678 = arith.constant 0 : index
    %651 = vector.load %arg3[%c33_676, %c0_677, %c0_678] : memref<36x128x128xbf16, #tpu.memory_space<vmem>>, vector<1x128x128xbf16>
    %652 = vector.shape_cast %651 : vector<1x128x128xbf16> to vector<128x128xbf16>
    %cst_679 = arith.constant dense<0.000000e+00> : vector<128x128xf32>
    %653 = tpu.matmul %650, %652, %cst_679 {dimension_numbers = #tpu.dot_dimension_numbers<[1], [0], [0], [1], [0, 0, 1, 1], [], []>} : vector<128x128xbf16>, vector<128x128xbf16>, vector<128x128xf32> -> vector<128x128xf32>
    %654 = arith.addf %647, %653 : vector<128x128xf32>
    %c1_680 = arith.constant 1 : index
    %c10_681 = arith.constant 10 : index
    %c0_682 = arith.constant 0 : index
    %c0_683 = arith.constant 0 : index
    %655 = vector.load %arg9[%c1_680, %c10_681, %c0_682, %c0_683] : memref<3x18x16x128xbf16, #tpu.memory_space<vmem>>, vector<1x8x16x128xbf16>
    %656 = vector.shape_cast %655 : vector<1x8x16x128xbf16> to vector<8x16x128xbf16>
    %657 = vector.shape_cast %656 : vector<8x16x128xbf16> to vector<128x128xbf16>
    %c34_684 = arith.constant 34 : index
    %c0_685 = arith.constant 0 : index
    %c0_686 = arith.constant 0 : index
    %658 = vector.load %arg3[%c34_684, %c0_685, %c0_686] : memref<36x128x128xbf16, #tpu.memory_space<vmem>>, vector<1x128x128xbf16>
    %659 = vector.shape_cast %658 : vector<1x128x128xbf16> to vector<128x128xbf16>
    %cst_687 = arith.constant dense<0.000000e+00> : vector<128x128xf32>
    %660 = tpu.matmul %657, %659, %cst_687 {dimension_numbers = #tpu.dot_dimension_numbers<[1], [0], [0], [1], [0, 0, 1, 1], [], []>} : vector<128x128xbf16>, vector<128x128xbf16>, vector<128x128xf32> -> vector<128x128xf32>
    %661 = arith.addf %654, %660 : vector<128x128xf32>
    %c2_688 = arith.constant 2 : index
    %c10_689 = arith.constant 10 : index
    %c0_690 = arith.constant 0 : index
    %c0_691 = arith.constant 0 : index
    %662 = vector.load %arg9[%c2_688, %c10_689, %c0_690, %c0_691] : memref<3x18x16x128xbf16, #tpu.memory_space<vmem>>, vector<1x8x16x128xbf16>
    %663 = vector.shape_cast %662 : vector<1x8x16x128xbf16> to vector<8x16x128xbf16>
    %664 = vector.shape_cast %663 : vector<8x16x128xbf16> to vector<128x128xbf16>
    %c35_692 = arith.constant 35 : index
    %c0_693 = arith.constant 0 : index
    %c0_694 = arith.constant 0 : index
    %665 = vector.load %arg3[%c35_692, %c0_693, %c0_694] : memref<36x128x128xbf16, #tpu.memory_space<vmem>>, vector<1x128x128xbf16>
    %666 = vector.shape_cast %665 : vector<1x128x128xbf16> to vector<128x128xbf16>
    %cst_695 = arith.constant dense<0.000000e+00> : vector<128x128xf32>
    %667 = tpu.matmul %664, %666, %cst_695 {dimension_numbers = #tpu.dot_dimension_numbers<[1], [0], [0], [1], [0, 0, 1, 1], [], []>} : vector<128x128xbf16>, vector<128x128xbf16>, vector<128x128xf32> -> vector<128x128xf32>
    %668 = arith.addf %661, %667 : vector<128x128xf32>
    %c5_696 = arith.constant 5 : index
    %c0_697 = arith.constant 0 : index
    %c0_698 = arith.constant 0 : index
    %669 = vector.load %arg5[%c5_696, %c0_697, %c0_698] : memref<7x1x128xf32, #tpu.memory_space<vmem>>, vector<1x1x128xf32>
    %670 = vector.shape_cast %669 : vector<1x1x128xf32> to vector<1x128xf32>
    %671 = vector.broadcast %670 : vector<1x128xf32> to vector<128x128xf32>
    %672 = arith.addf %668, %671 : vector<128x128xf32>
    %c128_699 = arith.constant 128 : index
    %c0_700 = arith.constant 0 : index
    %673 = vector.load %arg10[%c128_699, %c0_700] : memref<256x128xbf16, #tpu.memory_space<vmem>>, vector<128x128xbf16>
    %c1_701 = arith.constant 1 : index
    %c0_702 = arith.constant 0 : index
    %c0_703 = arith.constant 0 : index
    %674 = vector.load %arg4[%c1_701, %c0_702, %c0_703] : memref<2x128x128xbf16, #tpu.memory_space<vmem>>, vector<1x128x128xbf16>
    %675 = vector.shape_cast %674 : vector<1x128x128xbf16> to vector<128x128xbf16>
    %cst_704 = arith.constant dense<0.000000e+00> : vector<128x128xf32>
    %676 = tpu.matmul %673, %675, %cst_704 {dimension_numbers = #tpu.dot_dimension_numbers<[1], [0], [0], [1], [0, 0, 1, 1], [], []>} : vector<128x128xbf16>, vector<128x128xbf16>, vector<128x128xf32> -> vector<128x128xf32>
    %c6_705 = arith.constant 6 : index
    %c0_706 = arith.constant 0 : index
    %c0_707 = arith.constant 0 : index
    %677 = vector.load %arg5[%c6_705, %c0_706, %c0_707] : memref<7x1x128xf32, #tpu.memory_space<vmem>>, vector<1x1x128xf32>
    %678 = vector.shape_cast %677 : vector<1x1x128xf32> to vector<1x128xf32>
    %679 = vector.broadcast %678 : vector<1x128xf32> to vector<128x128xf32>
    %680 = arith.addf %676, %679 : vector<128x128xf32>
    %681 = arith.addf %672, %680 : vector<128x128xf32>
    %cst_708 = arith.constant 0.000000e+00 : f32
    %682 = vector.broadcast %cst_708 : f32 to vector<128x128xf32>
    %683 = arith.maximumf %681, %682 : vector<128x128xf32>
    %684 = arith.truncf %683 : vector<128x128xf32> to vector<128x128xbf16>
    %c128_709 = arith.constant 128 : index
    %c0_710 = arith.constant 0 : index
    %685 = vector.load %arg10[%c128_709, %c0_710] : memref<256x128xbf16, #tpu.memory_space<vmem>>, vector<128x128xbf16>
    tpu.vector_store %arg10[%c128_709, %c0_710], %684 {strides = array<i32>} : memref<256x128xbf16, #tpu.memory_space<vmem>>, vector<128x128xbf16>,
    %cst_711 = arith.constant 1.000000e+00 : bf16
    %686 = vector.broadcast %cst_711 : bf16 to vector<1x256xbf16>
    %c0_712 = arith.constant 0 : index
    %c0_713 = arith.constant 0 : index
    %687 = vector.load %arg10[%c0_712, %c0_713] : memref<256x128xbf16, #tpu.memory_space<vmem>>, vector<256x128xbf16>
    %cst_714 = arith.constant dense<0.000000e+00> : vector<1x128xf32>
    %688 = tpu.matmul %686, %687, %cst_714 {dimension_numbers = #tpu.dot_dimension_numbers<[1], [0], [0], [1], [0, 0, 1, 1], [], []>} : vector<1x256xbf16>, vector<256x128xbf16>, vector<1x128xf32> -> vector<1x128xf32>
    %cst_715 = arith.constant 3.906250e-03 : f32
    %689 = vector.broadcast %cst_715 : f32 to vector<1x128xf32>
    %690 = arith.mulf %688, %689 : vector<1x128xf32>
    %691 = arith.truncf %690 : vector<1x128xf32> to vector<1x128xbf16>
    %c0_716 = arith.constant 0 : index
    %c0_717 = arith.constant 0 : index
    %692 = vector.load %arg6[%c0_716, %c0_717] : memref<128x128xbf16, #tpu.memory_space<vmem>>, vector<128x128xbf16>
    %cst_718 = arith.constant dense<0.000000e+00> : vector<1x128xf32>
    %693 = tpu.matmul %691, %692, %cst_718 {dimension_numbers = #tpu.dot_dimension_numbers<[1], [0], [0], [1], [0, 0, 1, 1], [], []>} : vector<1x128xbf16>, vector<128x128xbf16>, vector<1x128xf32> -> vector<1x128xf32>
    %c0_719 = arith.constant 0 : index
    %c0_720 = arith.constant 0 : index
    %694 = vector.load %arg7[%c0_719, %c0_720] : memref<1x128xf32, #tpu.memory_space<vmem>>, vector<1x128xf32>
    %695 = arith.addf %693, %694 : vector<1x128xf32>
    %c0_721 = arith.constant 0 : index
    %c0_722 = arith.constant 0 : index
    %c0_723 = arith.constant 0 : index
    %696 = vector.load %arg8[%c0_721, %c0_722, %c0_723] : memref<1x1x128xf32, #tpu.memory_space<vmem>>, vector<1x1x128xf32>
    %697 = vector.shape_cast %696 : vector<1x1x128xf32> to vector<1x128xf32>
    %698 = vector.shape_cast %695 : vector<1x128xf32> to vector<1x1x128xf32>
    tpu.vector_store %arg8[%c0_721, %c0_722, %c0_723], %698 {strides = array<i32>} : memref<1x1x128xf32, #tpu.memory_space<vmem>>, vector<1x1x128xf32>,
    return
  }
  func.func @transform_0(%arg0: i32) -> (i32, i32, i32) {
    %c0_i32 = arith.constant 0 : i32
    %c0_i32_0 = arith.constant 0 : i32
    %c0_i32_1 = arith.constant 0 : i32
    return %arg0, %c0_i32, %c0_i32_0 : i32, i32, i32
  }
  func.func @transform_1(%arg0: i32) -> (i32, i32) {
    %c0_i32 = arith.constant 0 : i32
    %c0_i32_0 = arith.constant 0 : i32
    %c0_i32_1 = arith.constant 0 : i32
    return %c0_i32, %c0_i32_0 : i32, i32
  }
  func.func @transform_2(%arg0: i32) -> (i32, i32, i32) {
    %c0_i32 = arith.constant 0 : i32
    %c0_i32_0 = arith.constant 0 : i32
    %c0_i32_1 = arith.constant 0 : i32
    %c0_i32_2 = arith.constant 0 : i32
    return %c0_i32, %c0_i32_0, %c0_i32_1 : i32, i32, i32
  }
  func.func @transform_3(%arg0: i32) -> (i32, i32, i32) {
    %c0_i32 = arith.constant 0 : i32
    %c0_i32_0 = arith.constant 0 : i32
    %c0_i32_1 = arith.constant 0 : i32
    %c0_i32_2 = arith.constant 0 : i32
    return %c0_i32, %c0_i32_0, %c0_i32_1 : i32, i32, i32
  }
  func.func @transform_4(%arg0: i32) -> (i32, i32, i32) {
    %c0_i32 = arith.constant 0 : i32
    %c0_i32_0 = arith.constant 0 : i32
    %c0_i32_1 = arith.constant 0 : i32
    %c0_i32_2 = arith.constant 0 : i32
    return %c0_i32, %c0_i32_0, %c0_i32_1 : i32, i32, i32
  }
  func.func @transform_5(%arg0: i32) -> (i32, i32) {
    %c0_i32 = arith.constant 0 : i32
    %c0_i32_0 = arith.constant 0 : i32
    %c0_i32_1 = arith.constant 0 : i32
    return %c0_i32, %c0_i32_0 : i32, i32
  }
  func.func @transform_6(%arg0: i32) -> (i32, i32) {
    %c0_i32 = arith.constant 0 : i32
    %c0_i32_0 = arith.constant 0 : i32
    %c0_i32_1 = arith.constant 0 : i32
    return %c0_i32, %c0_i32_0 : i32, i32
  }
  func.func @transform_7(%arg0: i32) -> (i32, i32, i32) {
    %c0_i32 = arith.constant 0 : i32
    %c0_i32_0 = arith.constant 0 : i32
    %c0_i32_1 = arith.constant 0 : i32
    return %arg0, %c0_i32, %c0_i32_0 : i32, i32, i32
  }
}

</mosaic_0001>

<bundles_post_ra>
// kernel: resnetlike_forward_pallas.1
= control target key start
LH: loop header
LB: loop body
LE: loop exit
PB: predicated region body
PF: predicated region fallthrough
CT: control target
= control target key end

     0   :  { %s25734_s0 = inlined_call_operand.vmem [shape: bf16[2,256,16], index: 0, kind: input, shape index: {}]   ;;  %s25735_s1 = inlined_call_operand.hbm [shape: bf16[16,128], index: 1, kind: input, shape index: {}]   ;;  %s25736_s2 = inlined_call_operand.hbm [shape: bf16[36,128,128], index: 2, kind: input, shape index: {}]   ;;  %s25737_s3 = inlined_call_operand.hbm [shape: bf16[2,128,128], index: 3, kind: input, shape index: {}]   ;;  %s25738_s4 = inlined_call_operand.hbm [shape: f32[7,1,128], index: 4, kind: input, shape index: {}]   ;;  %s25739_s5 = inlined_call_operand.hbm [shape: bf16[128,128], index: 5, kind: input, shape index: {}]   ;;  %s25740_s6 = inlined_call_operand.hbm [shape: f32[1,128], index: 6, kind: input, shape index: {}]   ;;  %s25741_s7 = inlined_call_operand.hbm [shape: f32[2,1,128], index: 7, kind: output, shape index: {}]  }
   0x1   :  { %25854 = sst [smem:[#allocation37_spill]] %s25736_s2 }
   0x2   :  { %12 = vsyncpa [#allocation6], 0 }
   0x3   :  { %13 = vsyncpa [#allocation9], 0 }
   0x4   :  { %14 = vsyncpa [#allocation12], 0 }
   0x5   :  { %15 = vsyncpa [#allocation15], 0 }
   0x6   :  { %16 = vsyncpa [#allocation7], 0 }
   0x7   :  { %18 = vsyncpa [#allocation7 + $0x1], 0  ;;  %s23284_s24 = smov 0   ;;  %s23286_s25 = smov 0  }
   0x8   :  { %s23288_s26 = smov 0   ;;  %s23290_s27 = smov 0  }
   0x9 LB: > { %25855 = sst [smem:[#allocation22_spill]] %s23223_s26  ;;  %s23305_s28 = sadd.s32 4294967295, %s23227_s27   ;;  %s23227_s27 = sphi %s23290_s27, %s26013_s27   ;;  %s23223_s26 = sphi %s23288_s26, %s26010_s26   ;;  %s23219_s25 = sphi %s23286_s25, %s26012_s25   ;;  %s23215_s24 = sphi %s23284_s24, %s26011_s24  }
   0xa   : > { %s16584_s29 = sadd.s32 4294967294, %s23227_s27   ;;  %s23309_s30 = sadd.s32 1, %s23227_s27  }
   0xb   : > { %s183_s8 = sadd.s32 1, %s23223_s26  ;;  %s180_s9 = ssub.s32 %s23227_s27, %s23309_s30 }
   0xc   : > { %p193_p0 = scmp.ne.s32.totalorder %s23223_s26, %s23219_s25  ;;  %p181_p1 = scmp.eq.s32.totalorder %s180_s9, 0 }
   0xd   : > { %p194_p2 = scmp.eq.s32.totalorder %s23305_s28, 1  ;;  %p199_p3 = scmp.ne.s32.totalorder %s23219_s25, %s23215_s24 }
   0xe   : > { %p200_p4 = scmp.eq.s32.totalorder %s16584_s29, 1  ;;  %p16585_p7 = scmp.ge.s32.totalorder %s23227_s27, 1 }
   0xf   : > { %s23320_s10 = scalar_select %p181_p1, %s23223_s26, %s183_s8  }
  0x10   : > { %p23322_p5 = por %p194_p2, %p193_p0  ;;  %p23326_p6 = por %p200_p4, %p199_p3 }
  0x11   : > { %25856 = sst [smem:[#allocation23_spill]] %s23320_s10  ;;  %p207_p8 = scmp.lt.s32.totalorder %s23227_s27, 3 }
  0x12   : > { %s25857_s11 = scalar_select %p23322_p5, 1, 0 }
  0x13   : > { %s25858_s12 = scalar_select %p23326_p6, 1, 0 }
  0x14   : > { %p25742_p9 = scmp.eq.s32.totalorder %s23305_s28, 0  ;;  %p23333_p10 = pnand %p16585_p7, %p207_p8 }
  0x15   : > { %s23229_s14 = smov [#allocation8]   ;;  %s23230_s17 = smov [#allocation11]  }
  0x16   : > { %s25859_s13 = scalar_select %p23333_p10, 1, 0 }
  0x17   : > { %p22265_p11 = pneg %p23333_p10  ;;  %s232_s15 = sshll.u32 %s23229_s14, 4  ;;  %s233_s15 = int_to_ptr.vmem [resolvable:$true] %s232_s15 }
  0x18   : > { %s258_s18 = sshll.u32 %s23230_s17, 4  ;;  %s25861_s2 = sld [smem:[#allocation37_spill]]  ;;  %s23345_s18 = int_to_ptr.vmem [resolvable:$true] %s258_s18 }
  0x19   : > { %p23341_p12 = pnand %p25742_p9, %p22265_p11 }
  0x1b   : > { %p23355_p0 = pneg %p23341_p12 }
  0x1e   : > { %s22981_s21 = scalar_lea.hbm %s25861_s2, 36864 }
  0x1f   : > { %p22982_p13 = scmp.ne.s32.totalorder %s25861_s2, %s22981_s21  ;;  %p22988_p3 = scmp.lt.u32.totalorder %s22981_s21, %s25861_s2 }
  0x21   : > { %p22984_p1 = pnand %p23355_p0, %p22982_p13 }
  0x23   : > { %p22985_p2 = pneg %p22984_p1 }
  0x25   : > { %p22990_p4 = pnand %p22988_p3, %p22985_p2 }
  0x27   : > { %22993 = shalt.err (!%p22990_p4)
}
  0x28   : > { %s22994_s14 = scalar_lea.vmem %s233_s15, 36864  ;;  %p23002_p9 = scmp.lt.s32.totalorder %s233_s15, %s233_s15 }
  0x29   : > { %p22995_p7 = scmp.ne.s32.totalorder %s233_s15, %s22994_s14  ;;  %p23003_p6 = scmp.lt.s32.totalorder %s22994_s14, %s22994_s14 }
  0x2b   : > { %p22997_p8 = pnand %p22995_p7, %p23355_p0  ;;  %p23004_p5 = por %p23003_p6, %p23002_p9 }
  0x2d   : > { %p22998_p11 = pneg %p22997_p8 }
  0x2f   : > { %p23005_p10 = pnand %p23004_p5, %p22998_p11 }
  0x31   : > { %23008 = shalt.err (!%p23005_p10)
}
  0x32   : > { %s25746_s17 = smov 64   ;;  %s25748_s19 = smov 4  }
  0x33   : > { %22271 = dma.hbm_to_vmem [thread:$0]  (!%p23341_p12), %s25861_s2, 36864, %s233_s15, [#allocation9], %s25746_s17, %s25746_s17, %s25748_s19  }
  0x34   : > { %s23009_s8 = scalar_lea.hbm %s25738_s4, 112 }
  0x35   : > { %p23010_p5 = scmp.ne.s32.totalorder %s25738_s4, %s23009_s8  ;;  %p23016_p10 = scmp.lt.u32.totalorder %s23009_s8, %s25738_s4 }
  0x37   : > { %p23012_p6 = pnand %p23010_p5, %p23355_p0 }
  0x39   : > { %p23013_p9 = pneg %p23012_p6 }
  0x3b   : > { %p23018_p13 = pnand %p23016_p10, %p23013_p9 }
  0x3d   : > { %23021 = shalt.err (!%p23018_p13)
}
  0x3e   : > { %s23022_s15 = scalar_lea.vmem %s23345_s18, 112  ;;  %s23029_s20 = scalar_lea.vmem %s23345_s18, 128 }
  0x3f   : > { %p23023_p1 = scmp.ne.s32.totalorder %s23345_s18, %s23022_s15  ;;  %p23030_p4 = scmp.lt.s32.totalorder %s23345_s18, %s23345_s18 }
  0x40   : > { %p23031_p7 = scmp.lt.s32.totalorder %s23029_s20, %s23022_s15 }
  0x41   : > { %p23025_p2 = pnand %p23023_p1, %p23355_p0 }
  0x42   : > { %p23032_p8 = por %p23031_p7, %p23030_p4 }
  0x43   : > { %p23026_p3 = pneg %p23025_p2 }
  0x45   : > { %p23033_p11 = pnand %p23032_p8, %p23026_p3 }
  0x47   : > { %23036 = shalt.err (!%p23033_p11)
}
  0x48   : > { %s23233_s26 = smov 16   ;;  %s23234_s10 = smov 1  }
  0x49   : > { %22277 = dma.hbm_to_vmem [thread:$0]  (!%p23341_p12), %s25738_s4, 112, %s23345_s18, [#allocation12], %s23233_s26, %s23233_s26, %s23234_s10  }
  0x4a   : > { %s23235_s23 = smov [#allocation5]   ;;  %s23236_s9 = smov [#allocation10]  }
  0x4b   : > { %s219_s8 = sshll.u32 %s23235_s23, 4  ;;  %s245_s14 = sshll.u32 %s23236_s9, 4  ;;  %s220_s8 = int_to_ptr.vmem [resolvable:$true] %s219_s8  ;;  %s23398_s14 = int_to_ptr.vmem [resolvable:$true] %s245_s14 }
  0x4c   : > { %s23037_s17 = scalar_lea.hbm %s25735_s1, 128 }
  0x4d   : > { %p23038_p5 = scmp.ne.s32.totalorder %s25735_s1, %s23037_s17  ;;  %p23044_p10 = scmp.lt.u32.totalorder %s23037_s17, %s25735_s1 }
  0x4f   : > { %p23040_p6 = pnand %p23038_p5, %p23355_p0 }
  0x51   : > { %p23041_p9 = pneg %p23040_p6 }
  0x53   : > { %p23046_p13 = pnand %p23044_p10, %p23041_p9 }
  0x55   : > { %23049 = shalt.err (!%p23046_p13)
}
  0x56   : > { %s23050_s26 = scalar_lea.vmem %s220_s8, 128  ;;  %p23058_p4 = scmp.lt.s32.totalorder %s220_s8, %s220_s8 }
  0x57   : > { %p23051_p1 = scmp.ne.s32.totalorder %s220_s8, %s23050_s26  ;;  %p23059_p7 = scmp.lt.s32.totalorder %s23050_s26, %s23050_s26 }
  0x59   : > { %p23053_p2 = pnand %p23051_p1, %p23355_p0  ;;  %p23060_p8 = por %p23059_p7, %p23058_p4 }
  0x5b   : > { %p23054_p3 = pneg %p23053_p2 }
  0x5d   : > { %p23061_p11 = pnand %p23060_p8, %p23054_p3 }
  0x5f   : > { %23064 = shalt.err (!%p23061_p11)
}
  0x60   : > { %s25863_s2 = smov 4   ;;  %s25864_s19 = smov 64  }
  0x61   : > { %22268 = dma.hbm_to_vmem [thread:$0]  (!%p23341_p12), %s25735_s1, 128, %s220_s8, [#allocation6], %s25864_s19, %s25864_s19, %s25863_s2  }
  0x62   : > { %s23065_s9 = scalar_lea.hbm %s25737_s3, 2048 }
  0x63   : > { %p23066_p5 = scmp.ne.s32.totalorder %s25737_s3, %s23065_s9  ;;  %p23072_p10 = scmp.lt.u32.totalorder %s23065_s9, %s25737_s3 }
  0x65   : > { %p23068_p6 = pnand %p23066_p5, %p23355_p0 }
  0x67   : > { %p23069_p9 = pneg %p23068_p6 }
  0x69   : > { %p23074_p13 = pnand %p23072_p10, %p23069_p9 }
  0x6b   : > { %23077 = shalt.err (!%p23074_p13)
}
  0x6c   : > { %s23078_s8 = scalar_lea.vmem %s23398_s14, 2048  ;;  %p23086_p4 = scmp.lt.s32.totalorder %s23398_s14, %s23398_s14 }
  0x6d   : > { %p23079_p1 = scmp.ne.s32.totalorder %s23398_s14, %s23078_s8  ;;  %p23087_p7 = scmp.lt.s32.totalorder %s23078_s8, %s23078_s8 }
  0x6f   : > { %p23081_p2 = pnand %p23079_p1, %p23355_p0  ;;  %p23088_p8 = por %p23087_p7, %p23086_p4 }
  0x71   : > { %p23082_p3 = pneg %p23081_p2 }
  0x73   : > { %p23089_p11 = pnand %p23088_p8, %p23082_p3 }
  0x75   : > { %23092 = shalt.err (!%p23089_p11)
}
  0x76   : > { %22274 = dma.hbm_to_vmem [thread:$0]  (!%p23341_p12), %s25737_s3, 2048, %s23398_s14, [#allocation9], %s25864_s19, %s25864_s19, %s25863_s2  }
  0x77   : > { %s23237_s17 = smov [#allocation13]   ;;  %s23238_s23 = smov [#allocation14]  }
  0x78   : > { %s271_s22 = sshll.u32 %s23237_s17, 4  ;;  %s285_s9 = sshll.u32 %s23238_s23, 4  ;;  %s272_s22 = int_to_ptr.vmem [resolvable:$true] %s271_s22  ;;  %s23447_s9 = int_to_ptr.vmem [resolvable:$true] %s285_s9 }
  0x79   : > { %s23093_s21 = scalar_lea.hbm %s25739_s5, 1024 }
  0x7a   : > { %p23094_p5 = scmp.ne.s32.totalorder %s25739_s5, %s23093_s21  ;;  %p23100_p10 = scmp.lt.u32.totalorder %s23093_s21, %s25739_s5 }
  0x7c   : > { %p23096_p6 = pnand %p23094_p5, %p23355_p0 }
  0x7e   : > { %p23097_p9 = pneg %p23096_p6 }
  0x80   : > { %p23102_p13 = pnand %p23100_p10, %p23097_p9 }
  0x82   : > { %23105 = shalt.err (!%p23102_p13)
}
  0x83   : > { %s23106_s10 = scalar_lea.vmem %s272_s22, 1024  ;;  %p23114_p4 = scmp.lt.s32.totalorder %s272_s22, %s272_s22 }
  0x84   : > { %p23107_p1 = scmp.ne.s32.totalorder %s272_s22, %s23106_s10  ;;  %p23115_p7 = scmp.lt.s32.totalorder %s23106_s10, %s23106_s10 }
  0x86   : > { %p23109_p2 = pnand %p23107_p1, %p23355_p0  ;;  %p23116_p8 = por %p23115_p7, %p23114_p4 }
  0x88   : > { %p23110_p3 = pneg %p23109_p2 }
  0x8a   : > { %p23117_p11 = pnand %p23116_p8, %p23110_p3 }
  0x8c   : > { %23120 = shalt.err (!%p23117_p11)
}
  0x8d   : > { %22280 = dma.hbm_to_vmem [thread:$0]  (!%p23341_p12), %s25739_s5, 1024, %s272_s22, [#allocation12], %s25864_s19, %s25864_s19, %s25863_s2  }
  0x8e   : > { %s23121_s21 = scalar_lea.hbm %s25740_s6, 16 }
  0x8f   : > { %p23122_p5 = scmp.ne.s32.totalorder %s25740_s6, %s23121_s21  ;;  %p23128_p10 = scmp.lt.u32.totalorder %s23121_s21, %s25740_s6 }
  0x91   : > { %p23124_p6 = pnand %p23122_p5, %p23355_p0 }
  0x93   : > { %p23125_p9 = pneg %p23124_p6 }
  0x95   : > { %p23130_p13 = pnand %p23128_p10, %p23125_p9 }
  0x97   : > { %23133 = shalt.err (!%p23130_p13)
}
  0x98   : > { %s23134_s2 = scalar_lea.vmem %s23447_s9, 16  ;;  %s23141_s19 = scalar_lea.vmem %s23447_s9, 32 }
  0x99   : > { %p23135_p1 = scmp.ne.s32.totalorder %s23447_s9, %s23134_s2  ;;  %p23142_p4 = scmp.lt.s32.totalorder %s23447_s9, %s23447_s9 }
  0x9a   : > { %p23143_p7 = scmp.lt.s32.totalorder %s23141_s19, %s23134_s2 }
  0x9b   : > { %p23137_p2 = pnand %p23135_p1, %p23355_p0 }
  0x9c   : > { %p23144_p8 = por %p23143_p7, %p23142_p4 }
  0x9d   : > { %p23138_p3 = pneg %p23137_p2 }
  0x9f   : > { %p23145_p11 = pnand %p23144_p8, %p23138_p3 }
  0xa1   : > { %23148 = shalt.err (!%p23145_p11)
}
  0xa2   : > { %22283 = dma.hbm_to_vmem [thread:$0]  (!%p23341_p12), %s25740_s6, 16, %s23447_s9, [#allocation15]  }
  0xa3   : > { %p25865_p5 = scmp.ne.s32.totalorder %s25859_s13, 0 }
  0xa5   : > { %306 = sbr.rel (%p25865_p5) target bundleno = 2918 (0xb66), region = 48 }
  0xac   : > { %p25866_p0 = scmp.eq.s32.totalorder %s23305_s28, 0 }
  0xae   : > { %23194 = dma.done.wait (%p25866_p0), [#allocation6], 128   ;;  %p25867_p6 = pmov %p25866_p0 }
  0xaf   : > { %p25868_p9 = pmov %p25866_p0 }
  0xb0   : > { %23196 = vsyncadd (%p25867_p6), [#allocation6], 4294967168 }
  0xb1   : > { %23198 = dma.done.wait (%p25868_p9), [#allocation9], 38912   ;;  %p25869_p10 = pmov %p25866_p0 }
  0xb2   : > { %p25870_p13 = pmov %p25866_p0 }
  0xb3   : > { %23200 = vsyncadd (%p25869_p10), [#allocation9], 4294928384 }
  0xb4   : > { %23202 = dma.done.wait (%p25870_p13), [#allocation12], 1136   ;;  %p25871_p12 = pmov %p25866_p0 }
  0xb5   : > { %p25872_p1 = pmov %p25866_p0 }
  0xb6   : > { %23204 = vsyncadd (%p25871_p12), [#allocation12], 4294966160 }
  0xb7   : > { %23206 = dma.done.wait (%p25872_p1), [#allocation15], 16   ;;  %p25873_p2 = pmov %p25866_p0 }
  0xb8   : > { %p357_p3 = scmp.lt.s32.totalorder %s23305_s28, 1  ;;  %v22347_v0 = vld [vmem:[#allocation5] sm:$0xff]   ;;  %vm489_vm0 = vcmask 130048   ;;  %v22365_v14 = vld [vmem:[#allocation8 + $0x40] sm:$0xff]   ;;  %v22366_v15 = vld [vmem:[#allocation8 + $0x48] sm:$0xff]   ;;  %v25756_v30 = vmov 0  }
  0xb9   : > { %23208 = vsyncadd (%p25873_p2), [#allocation15], 4294967280  ;;  %18535 = vmatprep.subr.bf16.mxu0 %v22347_v0  ;;  %v22353_v4 = vld [vmem:[#allocation5] sm:$0xff]   ;;  %v22367_v17 = vld [vmem:[#allocation8 + $0x50] sm:$0xff]   ;;  %vm1012_vm1 = vsmask.f32 256 }
  0xba   : > { %s358_s13 = scalar_select %p357_p3, %s23305_s28, 1  ;;  %18536 = vmatpush3.bf16.msra.mxu0 %v22347_v0  ;;  %18553 = vmatprep.subr.bf16.mxu1 %v22353_v4  ;;  %v22368_v20 = vld [vmem:[#allocation8 + $0x58] sm:$0xff]   ;;  %v22369_v21 = vld [vmem:[#allocation8 + $0x60] sm:$0xff]   ;;  %v22370_v23 = vld [vmem:[#allocation8 + $0x68] sm:$0xff]   ;;  %vm1011_vm2 = vcmask 1040384   ;;  %vm1112_vm4 = vcmask 1047552  }
  0xbb   : > { %18554 = vmatpush3.bf16.msra.mxu1 %v22353_v4  ;;  %18571 = vmatprep.subr.bf16.mxu0 %v22365_v14  ;;  %v22371_v24 = vld [vmem:[#allocation8 + $0x70] sm:$0xff]   ;;  %v22372_v25 = vld [vmem:[#allocation8 + $0x40] sm:$0xff]   ;;  %v22373_v26 = vld [vmem:[#allocation8 + $0x78] sm:$0xff]   ;;  %vm1113_vm5 = vsmask.f32 7424  ;;  %vm23242_vm7 = vmmov 0  }
  0xbc   : > { %s17269_s16 = sshll.u32 %s358_s13, 7  ;;  %18859 = vmatprep.subr.bf16.mxu1 %v22372_v25  ;;  %v22374_v27 = vld [vmem:[#allocation8 + $0x48] sm:$0xff]   ;;  %v22375_v28 = vld [vmem:[#allocation8] sm:$0xff]   ;;  %v22376_v29 = vld [vmem:[#allocation8 + $0x50] sm:$0xff]   ;;  %s355_s23 = sand.u32 1, %s23219_s25  }
  0xbd   : > { %s23517_s17 = scalar_lea.vmem %s25734_s0, %s17269_s16  ;;  %v22378_v31 = vld [vmem:[#allocation8 + $0x58] sm:$0xff]   ;;  %v22380_v32 = vld [vmem:[#allocation8 + $0x60] sm:$0xff]   ;;  %v22382_v33 = vld [vmem:[#allocation8 + $0x68] sm:$0xff]   ;;  %s17266_s15 = sshll.u32 %s23305_s28, 4 }
  0xbe   : > { %v22348_v1 = vld [vmem:[%s23517_s17] sm:$0xff]   ;;  %v22349_v2 = vld [vmem:[%s23517_s17 + $0x8] sm:$0xff]   ;;  %v22350_v3 = vld [vmem:[%s23517_s17 + $0x10] sm:$0xff]   ;;  %s356_s20 = scalar_lea.vmem [#allocation16], %s355_s23  ;;  %s25692_s26 = scalar_lea.hbm %s25741_s7, %s17266_s15 }
  0xbf   : > { %18537 = vmatprep.mubr.msk.bf16.mxu0 %vm489_vm0, %v22348_v1  ;;  %v22355_v5 = vld [vmem:[%s23517_s17 + $0x40] sm:$0xff]   ;;  %v22356_v6 = vld [vmem:[%s23517_s17 + $0x48] sm:$0xff]   ;;  %v22351_v7 = vld [vmem:[%s23517_s17 + $0x18] sm:$0xff]   ;;  %s16469_s21 = sshll.u32 %s356_s20, 4  ;;  %s16457_s14 = scalar_lea.sflag [#allocation7], %s355_s23  ;;  %s25694_s21 = int_to_ptr.vmem [resolvable:$true] %s16469_s21 }
  0xc0   : > { %18538 = vmatmul.mubr.msk.bf16.vlgmr.msra.gmra.mrb[0].mxu0 %vm489_vm0, %v22349_v2  ;;  %18555 = vmatprep.mubr.msk.bf16.mxu1 %vm489_vm0, %v22355_v5  ;;  %v22352_v8 = vld [vmem:[%s23517_s17 + $0x20] sm:$0xff]   ;;  %v22359_v9 = vld [vmem:[%s23517_s17 + $0x50] sm:$0xff]   ;;  %v22354_v10 = vld [vmem:[%s23517_s17 + $0x28] sm:$0xff]   ;;  %s23149_s28 = scalar_lea.vmem %s25694_s21, 16  ;;  %p26007_p7 = scmp.ne.s32.totalorder %s25857_s11, 0 }
  0xc1   : > { %18541 = vmatprep.mubr.msk.bf16.mxu0 %vm489_vm0, %v22350_v3  ;;  %18556 = vmatmul.mubr.msk.bf16.vlgmr.msra.gmra.mrb[0].mxu1 %vm489_vm0, %v22356_v6  ;;  %v22360_v11 = vld [vmem:[%s23517_s17 + $0x58] sm:$0xff]   ;;  %v22357_v12 = vld [vmem:[%s23517_s17 + $0x30] sm:$0xff]   ;;  %v22361_v13 = vld [vmem:[%s23517_s17 + $0x60] sm:$0xff]   ;;  %p23150_p4 = scmp.ne.s32.totalorder %s25694_s21, %s23149_s28  ;;  %s23243_s2 = smov [#allocation16]  }
  0xc2   : > { %18559 = vmatprep.mubr.msk.bf16.mxu1 %vm489_vm0, %v22359_v9  ;;  %18572 = vmatpush3.bf16.msra.mxu0 %v22365_v14  ;;  %v22362_v16 = vld [vmem:[%s23517_s17 + $0x68] sm:$0xff]   ;;  %v22363_v18 = vld [vmem:[%s23517_s17 + $0x70] sm:$0xff]   ;;  %v22358_v19 = vld [vmem:[%s23517_s17 + $0x38] sm:$0xff]   ;;  %s23153_s19 = sshll.u32 %s23243_s2, 4  ;;  %s23154_s19 = int_to_ptr.vmem [resolvable:$false] %s23153_s19 }
  0xc3   : > { %18573 = vmatprep.subr.bf16.mxu0 %v22366_v15  ;;  %v22364_v22 = vld [vmem:[%s23517_s17 + $0x78] sm:$0xff]   ;;  %18860 = vmatpush3.bf16.msra.mxu1 %v22372_v25  ;;  %v22386_v35 = vld [vmem:[#allocation8 + $0x78] sm:$0xff]   ;;  %v23552_v36 = vld [vmem:[#allocation8] sm:$0xff]   ;;  %p23151_p8 = pnand %p23150_p4, %p26007_p7  ;;  %s23155_s22 = scalar_lea.vmem %s23154_s19, 32 }
  0xc4   : > { %18861 = vmatprep.subr.bf16.mxu1 %v22374_v27  ;;  %v22384_v34 = vld [vmem:[#allocation8 + $0x70] sm:$0xff]   ;;  %v23555_v37 = vld [vmem:[#allocation11] ss:$0 sm:$0xff]  ;;  %v22377_v52 = vld [vmem:[#allocation8 + $0x8] sm:$0xff]   ;;  %p23156_p5 = scmp.lt.s32.totalorder %s25694_s21, %s23154_s19  ;;  %p23157_p0 = scmp.lt.s32.totalorder %s23155_s22, %s23149_s28 }
  0xc5   : > { %vm23640_vm3 = vmand %vm1011_vm2, %vm1012_vm1  ;;  %p23152_p11 = pneg %p23151_p8 }
  0xc6   : > { %18574 = vmatpush3.bf16.msra.mxu0 %v22366_v15  ;;  %vm23724_vm6 = vmand %vm1112_vm4, %vm1113_vm5  ;;  %p23158_p6 = por %p23157_p0, %p23156_p5 }
  0xc7   : > { %18575 = vmatprep.subr.bf16.mxu0 %v22367_v17  ;;  %18862 = vmatpush3.bf16.msra.mxu1 %v22374_v27 }
  0xc8   : > { %18542 = vmatmul.mubr.msk.bf16.gmra.mrb[4].mxu0 %vm489_vm0, %v22351_v7  ;;  %18863 = vmatprep.subr.bf16.mxu1 %v22376_v29  ;;  %p23159_p9 = pnand %p23158_p6, %p23152_p11 }
  0xc9   : > { %18545 = vmatprep.mubr.msk.bf16.mxu0 %vm489_vm0, %v22352_v8  ;;  %18560 = vmatmul.mubr.msk.bf16.gmra.mrb[4].mxu1 %vm489_vm0, %v22360_v11  ;;  %v22379_v8 = vld [vmem:[#allocation8 + $0x10] sm:$0xff]  }
  0xca   : > { %18563 = vmatprep.mubr.msk.bf16.mxu1 %vm489_vm0, %v22361_v13  ;;  %18576 = vmatpush3.bf16.msra.mxu0 %v22367_v17 }
  0xcb   : > { %18577 = vmatprep.subr.bf16.mxu0 %v22368_v20  ;;  %18864 = vmatpush3.bf16.msra.mxu1 %v22376_v29 }
  0xcc   : > { %18865 = vmatprep.subr.bf16.mxu1 %v22378_v31 }
  0xce   : > { %18578 = vmatpush3.bf16.msra.mxu0 %v22368_v20 }
  0xcf   : > { %18579 = vmatprep.subr.bf16.mxu0 %v22369_v21  ;;  %18866 = vmatpush3.bf16.msra.mxu1 %v22378_v31 }
  0xd0   : > { %18546 = vmatmul.mubr.msk.bf16.gmra.mrb[8].mxu0 %vm489_vm0, %v22354_v10  ;;  %18867 = vmatprep.subr.bf16.mxu1 %v22380_v32 }
  0xd1   : > { %18549 = vmatprep.mubr.msk.bf16.mxu0 %vm489_vm0, %v22357_v12  ;;  %18564 = vmatmul.mubr.msk.bf16.gmra.mrb[8].mxu1 %vm489_vm0, %v22362_v16 }
  0xd2   : > { %18567 = vmatprep.mubr.msk.bf16.mxu1 %vm489_vm0, %v22363_v18  ;;  %18580 = vmatpush3.bf16.msra.mxu0 %v22369_v21 }
  0xd3   : > { %18581 = vmatprep.subr.bf16.mxu0 %v22370_v23  ;;  %18868 = vmatpush3.bf16.msra.mxu1 %v22380_v32 }
  0xd4   : > { %18869 = vmatprep.subr.bf16.mxu1 %v22382_v33 }
  0xd6   : > { %18582 = vmatpush3.bf16.msra.mxu0 %v22370_v23 }
  0xd7   : > { %18583 = vmatprep.subr.bf16.mxu0 %v22371_v24  ;;  %18870 = vmatpush3.bf16.msra.mxu1 %v22382_v33 }
  0xd8   : > { %18550 = vmatmul.mubr.msk.bf16.gmra.mrb[12].mxu0 %vm489_vm0, %v22358_v19  ;;  %18871 = vmatprep.subr.bf16.mxu1 %v22384_v34 }
  0xd9   : > { %18568 = vmatmul.mubr.msk.bf16.gmra.mrb[12].mxu1 %vm489_vm0, %v22364_v22  ;;  %18587 = vmatprep.mubr.bf16.mxu0 %v25756_v30  ;;  %v22381_v22 = vld [vmem:[#allocation8 + $0x18] sm:$0xff]  }
  0xda   : > { %18584 = vmatpush3.bf16.msra.mxu0 %v22371_v24 }
  0xdb   : > { %18585 = vmatprep.subr.bf16.mxu0 %v22373_v26  ;;  %18872 = vmatpush3.bf16.msra.mxu1 %v22384_v34 }
  0xdc   : > { %18873 = vmatprep.subr.bf16.mxu1 %v22386_v35 }
  0xde   : > { %18586 = vmatpush3.bf16.msra.mxu0 %v22373_v26 }
  0xdf   : > { %18603 = vmatprep.subr.bf16.mxu0 %v22375_v28  ;;  %18874 = vmatpush3.bf16.msra.mxu1 %v22386_v35 }
  0xe0   : > { %18891 = vmatprep.subr.bf16.mxu1 %v23552_v36 }
 0x193   : > { %v18539_v38 = vpop.f32.mrb[0].mxu0 }
 0x194   : > { %v557_v39 = vadd.f32 %v18539_v38, %v23555_v37  ;;  %v548_v40 = vpop.f32.mrb[1].mxu0  ;;  %v18557_v50 = vpop.f32.mrb[0].mxu1 }
 0x195   : > { %v549_v41 = vadd.f32 %v23555_v37, %v548_v40  ;;  %v18540_v42 = vpop.f32.mrb[2].mxu0  ;;  %v781_v53 = vadd.f32 %v18557_v50, %v23555_v37  ;;  %v772_v54 = vpop.f32.mrb[1].mxu1 }
 0x196   : > { %v560_v43 = vadd.f32 %v18540_v42, %v23555_v37  ;;  %v551_v44 = vpop.f32.mrb[3].mxu0  ;;  %v613_v46 = vmax.f32 %v557_v39, 0.0  ;;  %v773_v57 = vadd.f32 %v23555_v37, %v772_v54  ;;  %v18558_v58 = vpop.f32.mrb[2].mxu1 }
 0x197   : > { %v552_v45 = vadd.f32 %v23555_v37, %v551_v44  ;;  %v611_v48 = vmax.f32 %v549_v41, 0.0  ;;  %v837_v61 = vmax.f32 %v781_v53, 0.0  ;;  %v784_v62 = vadd.f32 %v18558_v58, %v23555_v37  ;;  %v775_v63 = vpop.f32.mrb[3].mxu1  ;;  %v22383_v41 = vld [vmem:[#allocation8 + $0x20] sm:$0xff]  }
 0x198   : > { %v614_v47 = vmax.f32 %v560_v43, 0.0  ;;  %v835_v2 = vmax.f32 %v773_v57, 0.0  ;;  %v776_v3 = vadd.f32 %v23555_v37, %v775_v63  ;;  %v22385_v57 = vld [vmem:[#allocation8 + $0x28] sm:$0xff]  }
 0x199   : > { %v612_v49 = vmax.f32 %v552_v45, 0.0  ;;  %v838_v6 = vmax.f32 %v784_v62, 0.0 }
 0x19a   : > { %v23561_v51 = vpack.c.bf16 %v614_v47, %v613_v46  ;;  %v836_v9 = vmax.f32 %v776_v3, 0.0 }
 0x19b   : > { %v23564_v55 = vpack.c.bf16 %v612_v49, %v611_v48  ;;  %v18543_v56 = vpop.f32.mrb[4].mxu0  ;;  %v23575_v12 = vpack.c.bf16 %v838_v6, %v837_v61 }
 0x19c   : > { %v573_v59 = vadd.f32 %v18543_v56, %v23555_v37  ;;  %v564_v60 = vpop.f32.mrb[5].mxu0  ;;  %v23577_v15 = vpack.c.bf16 %v836_v9, %v835_v2  ;;  %v18561_v16 = vpop.f32.mrb[4].mxu1  ;;  %v22387_v9 = vld [vmem:[#allocation8 + $0x30] sm:$0xff]  }
 0x19d   : > { %v565_v0 = vadd.f32 %v23555_v37, %v564_v60  ;;  %v18544_v1 = vpop.f32.mrb[6].mxu0  ;;  %18588 = vmatmul.mubr.bf16.vlgmr.msra.gmra.mrb[16].mxu0 %v23564_v55  ;;  %25874 = vst [vmem:[#allocation24_spill] sm:$0xff] %v23575_v12  ;;  %v797_v18 = vadd.f32 %v18561_v16, %v23555_v37  ;;  %v788_v19 = vpop.f32.mrb[5].mxu1 }
 0x19e   : > { %v576_v4 = vadd.f32 %v18544_v1, %v23555_v37  ;;  %v567_v5 = vpop.f32.mrb[7].mxu0  ;;  %18591 = vmatprep.mubr.bf16.mxu0 %v23561_v51  ;;  %18604 = vmatpush3.bf16.msra.mxu0 %v22375_v28  ;;  %v617_v10 = vmax.f32 %v573_v59, 0.0  ;;  %25875 = vst [vmem:[#allocation25_spill] sm:$0xff] %v23577_v15  ;;  %v789_v23 = vadd.f32 %v23555_v37, %v788_v19  ;;  %v18562_v24 = vpop.f32.mrb[6].mxu1 }
 0x19f   : > { %v568_v7 = vadd.f32 %v23555_v37, %v567_v5  ;;  %18605 = vmatprep.subr.bf16.mxu0 %v22377_v52  ;;  %v615_v13 = vmax.f32 %v565_v0, 0.0  ;;  %v841_v27 = vmax.f32 %v797_v18, 0.0  ;;  %v800_v28 = vadd.f32 %v18562_v24, %v23555_v37  ;;  %v791_v29 = vpop.f32.mrb[7].mxu1 }
 0x1a0   : > { %v618_v11 = vmax.f32 %v576_v4, 0.0  ;;  %v839_v33 = vmax.f32 %v789_v23, 0.0  ;;  %v792_v34 = vadd.f32 %v23555_v37, %v791_v29  ;;  %v891_v23 = vshrl.u32 %v23561_v51, 16 }
 0x1a1   : > { %v616_v14 = vmax.f32 %v568_v7, 0.0  ;;  %v842_v39 = vmax.f32 %v800_v28, 0.0  ;;  %v22389_v28 = vld [vmem:[#allocation8 + $0x38] sm:$0xff]  }
 0x1a2   : > { %v23579_v17 = vpack.c.bf16 %v618_v11, %v617_v10  ;;  %18606 = vmatpush3.bf16.msra.mxu0 %v22377_v52  ;;  %v840_v42 = vmax.f32 %v792_v34, 0.0  ;;  %v884_v11 = vshrl.u32 %v23564_v55, 16 }
 0x1a3   : > { %v23582_v20 = vpack.c.bf16 %v616_v14, %v615_v13  ;;  %v18547_v21 = vpop.f32.mrb[8].mxu0  ;;  %18607 = vmatprep.subr.bf16.mxu0 %v22379_v8  ;;  %v23593_v45 = vpack.c.bf16 %v842_v39, %v841_v27  ;;  %v887_v39 = vshll.u32 %v23564_v55, 16 }
 0x1a4   : > { %25876 = vst [vmem:[#allocation26_spill] sm:$0xff] %v23579_v17  ;;  %v589_v25 = vadd.f32 %v18547_v21, %v23555_v37  ;;  %v580_v26 = vpop.f32.mrb[9].mxu0  ;;  %v23595_v48 = vpack.c.bf16 %v840_v42, %v839_v33  ;;  %v18565_v49 = vpop.f32.mrb[8].mxu1  ;;  %v886_v29 = vrot.slane %v884_v11, 7  ;;  %v22390_v33 = vld [vmem:[#allocation8 + $0x8] sm:$0xff]  }
 0x1a5   : > { %v581_v31 = vadd.f32 %v23555_v37, %v580_v26  ;;  %v18548_v32 = vpop.f32.mrb[10].mxu0  ;;  %18592 = vmatmul.mubr.bf16.gmra.mrb[20].mxu0 %v23582_v20  ;;  %25877 = vst [vmem:[#allocation27_spill] sm:$0xff] %v23593_v45  ;;  %v813_v52 = vadd.f32 %v18565_v49, %v23555_v37  ;;  %v804_v53 = vpop.f32.mrb[9].mxu1 }
 0x1a6   : > { %v592_v35 = vadd.f32 %v18548_v32, %v23555_v37  ;;  %v583_v38 = vpop.f32.mrb[11].mxu0  ;;  %18595 = vmatprep.mubr.bf16.mxu0 %v23579_v17  ;;  %18608 = vmatpush3.bf16.msra.mxu0 %v22379_v8  ;;  %v621_v43 = vmax.f32 %v589_v25, 0.0  ;;  %25878 = vst [vmem:[#allocation28_spill] sm:$0xff] %v23595_v48  ;;  %v805_v58 = vadd.f32 %v23555_v37, %v804_v53  ;;  %v18566_v59 = vpop.f32.mrb[10].mxu1  ;;  %v22392_v53 = vld [vmem:[#allocation8 + $0x10] sm:$0xff]  }
 0x1a7   : > { %v584_v40 = vadd.f32 %v23555_v37, %v583_v38  ;;  %18609 = vmatprep.subr.bf16.mxu0 %v22381_v22  ;;  %v619_v46 = vmax.f32 %v581_v31, 0.0  ;;  %v845_v62 = vmax.f32 %v813_v52, 0.0  ;;  %v816_v63 = vadd.f32 %v18566_v59, %v23555_v37  ;;  %v807_v0 = vpop.f32.mrb[11].mxu1 }
 0x1a8   : > { %v622_v44 = vmax.f32 %v592_v35, 0.0  ;;  %v843_v3 = vmax.f32 %v805_v58, 0.0  ;;  %v808_v4 = vadd.f32 %v23555_v37, %v807_v0  ;;  %v898_v52 = vshrl.u32 %v23582_v20, 16 }
 0x1a9   : > { %v620_v47 = vmax.f32 %v584_v40, 0.0  ;;  %v846_v7 = vmax.f32 %v816_v63, 0.0  ;;  %v893_v40 = vrot.slane %v891_v23, 7  ;;  %v940_v0 = vshrl.u32 %v23577_v15, 16 }
 0x1aa   : > { %v23597_v50 = vpack.c.bf16 %v622_v44, %v621_v43  ;;  %18610 = vmatpush3.bf16.msra.mxu0 %v22381_v22  ;;  %v844_v10 = vmax.f32 %v808_v4, 0.0  ;;  %v889_v44 = vor.u32 %v887_v39, %v886_v29  ;;  %v22398_v29 = vld [vmem:[#allocation8 + $0x28] sm:$0xff]  }
 0x1ab   : > { %v23600_v54 = vpack.c.bf16 %v620_v47, %v619_v46  ;;  %v18551_v56 = vpop.f32.mrb[12].mxu0  ;;  %18611 = vmatprep.subr.bf16.mxu0 %v22383_v41  ;;  %v23612_v16 = vpack.c.bf16 %v846_v7, %v845_v62  ;;  %v22391_v46 = vld [vmem:[#allocation8 + $0x80] sm:$0xff]   ;;  %v894_v47 = vshll.u32 %v23561_v51, 16  ;;  %v900_v62 = vrot.slane %v898_v52, 7  ;;  %v22395_v7 = vld [vmem:[#allocation8 + $0x90] sm:$0xff]  }
 0x1ac   : > { %25879 = vst [vmem:[#allocation29_spill] sm:$0xff] %v23597_v50  ;;  %v605_v60 = vadd.f32 %v18551_v56, %v23555_v37  ;;  %v596_v61 = vpop.f32.mrb[13].mxu0  ;;  %v23614_v21 = vpack.c.bf16 %v844_v10, %v843_v3  ;;  %v18569_v22 = vpop.f32.mrb[12].mxu1  ;;  %v23653_v59 = vsel %vm23640_vm3, 0, %v889_v44  ;;  %v919_v4 = vshrl.u32 %v23597_v50, 16  ;;  %v22399_v44 = vld [vmem:[#allocation8 + $0xa0] sm:$0xff]  }
 0x1ad   : > { %25880 = vst [vmem:[#allocation30_spill] sm:$0xff] %v23600_v54  ;;  %v597_v1 = vadd.f32 %v23555_v37, %v596_v61  ;;  %v18552_v2 = vpop.f32.mrb[14].mxu0  ;;  %18596 = vmatmul.mubr.bf16.gmra.mrb[24].mxu0 %v23600_v54  ;;  %25881 = vst [vmem:[#allocation31_spill] sm:$0xff] %v23612_v16  ;;  %v829_v25 = vadd.f32 %v18569_v22, %v23555_v37  ;;  %v820_v26 = vpop.f32.mrb[13].mxu1  ;;  %v22394_v61 = vld [vmem:[#allocation8 + $0x18] sm:$0xff]   ;;  %v912_v3 = vshrl.u32 %v23600_v54, 16 }
 0x1ae   : > { %v608_v5 = vadd.f32 %v18552_v2, %v23555_v37  ;;  %v599_v6 = vpop.f32.mrb[15].mxu0  ;;  %18599 = vmatprep.mubr.bf16.mxu0 %v23597_v50  ;;  %18612 = vmatpush3.bf16.msra.mxu0 %v22383_v41  ;;  %v625_v13 = vmax.f32 %v605_v60, 0.0  ;;  %25882 = vst [vmem:[#allocation32_spill] sm:$0xff] %v23614_v21  ;;  %v821_v31 = vadd.f32 %v23555_v37, %v820_v26  ;;  %v18570_v32 = vpop.f32.mrb[14].mxu1  ;;  %v22393_v60 = vld [vmem:[#allocation8 + $0x88] sm:$0xff]   ;;  %v901_v2 = vshll.u32 %v23582_v20, 16 }
 0x1af   : > { %v600_v8 = vadd.f32 %v23555_v37, %v599_v6  ;;  %18613 = vmatprep.subr.bf16.mxu0 %v22385_v57  ;;  %v623_v18 = vmax.f32 %v597_v1, 0.0  ;;  %v849_v34 = vmax.f32 %v829_v25, 0.0  ;;  %v832_v35 = vadd.f32 %v18570_v32, %v23555_v37  ;;  %v823_v38 = vpop.f32.mrb[15].mxu1 }
 0x1b0   : > { %v626_v14 = vmax.f32 %v608_v5, 0.0  ;;  %v847_v41 = vmax.f32 %v821_v31, 0.0  ;;  %v824_v42 = vadd.f32 %v23555_v37, %v823_v38  ;;  %v908_v5 = vshll.u32 %v23579_v17, 16  ;;  %v22901_v37 = vld [vmem:[#allocation8 + $0x838] sm:$0xff]  }
 0x1b1   : > { %v624_v19 = vmax.f32 %v600_v8, 0.0  ;;  %v850_v43 = vmax.f32 %v832_v35, 0.0  ;;  %v903_v6 = vor.u32 %v901_v2, %v900_v62  ;;  %v25753_v8 = vshrl.u32 %v23575_v12, 16 }
 0x1b2   : > { %v23617_v24 = vpack.c.bf16 %v626_v14, %v625_v13  ;;  %18614 = vmatpush3.bf16.msra.mxu0 %v22385_v57  ;;  %v848_v49 = vmax.f32 %v824_v42, 0.0  ;;  %v896_v57 = vor.u32 %v894_v47, %v893_v40  ;;  %v942_v14 = vrot.slane %v940_v0, 7 }
 0x1b3   : > { %v23620_v27 = vpack.c.bf16 %v624_v19, %v623_v18  ;;  %18615 = vmatprep.subr.bf16.mxu0 %v22387_v9  ;;  %v23644_v56 = vpack.c.bf16 %v850_v43, %v849_v34  ;;  %v914_v18 = vrot.slane %v912_v3, 7  ;;  %v921_v19 = vrot.slane %v919_v4, 7 }
 0x1b4   : > { %25883 = vst [vmem:[#allocation33_spill] sm:$0xff] %v23617_v24  ;;  %18875 = vmatprep.mubr.bf16.mxu1 %v23617_v24  ;;  %v23649_v58 = vpack.c.bf16 %v848_v49, %v847_v41  ;;  %v23664_v1 = vsel %vm23640_vm3, 0, %v896_v57  ;;  %v933_v13 = vshrl.u32 %v23617_v24, 16  ;;  %v943_v22 = vshll.u32 %v23577_v15, 16 }
 0x1b5   : > { %25884 = vst [vmem:[#allocation34_spill] sm:$0xff] %v23620_v27  ;;  %18600 = vmatmul.mubr.bf16.gmra.mrb[28].mxu0 %v23620_v27  ;;  %18876 = vmatmul.mubr.bf16.vlgmr.msra.gmra.mrb[16].mxu1 %v23577_v15  ;;  %25887 = vst [vmem:[#allocation35_spill] sm:$0xff] %v23644_v56  ;;  %v1064_v25 = vrot.slane %v887_v39, 1  ;;  %v23687_v26 = vsel %vm23640_vm3, 0, %v903_v6  ;;  %v915_v31 = vshll.u32 %v23600_v54, 16  ;;  %v922_v32 = vshll.u32 %v23597_v50, 16 }
 0x1b6   : > { %18616 = vmatpush3.bf16.msra.mxu0 %v22387_v9  ;;  %18879 = vmatprep.mubr.bf16.mxu1 %v23575_v12  ;;  %25888 = vst [vmem:[#allocation36_spill] sm:$0xff] %v23649_v58  ;;  %v22396_v9 = vld [vmem:[#allocation8 + $0x20] sm:$0xff]   ;;  %v935_v35 = vrot.slane %v933_v13, 7  ;;  %v945_v38 = vor.u32 %v943_v22, %v942_v14  ;;  %v926_v41 = vshrl.u32 %v23620_v27, 16  ;;  %v950_v42 = vshll.u32 %v23575_v12, 16  ;;  %v22401_v14 = vld [vmem:[#allocation8 + $0xa8] sm:$0xff]  }
 0x1b7   : > { %18892 = vmatpush3.bf16.msra.mxu1 %v23552_v36  ;;  %18617 = vmatprep.subr.bf16.mxu0 %v22389_v28  ;;  %v905_v36 = vshrl.u32 %v23579_v17, 16  ;;  %v917_v39 = vor.u32 %v915_v31, %v914_v18  ;;  %v924_v40 = vor.u32 %v922_v32, %v921_v19  ;;  %v936_v43 = vshll.u32 %v23617_v24, 16  ;;  %v22402_v18 = vld [vmem:[#allocation8 + $0x38] sm:$0xff]  }
 0x1b8   : > { %18893 = vmatprep.subr.bf16.mxu1 %v22390_v33  ;;  %18619 = vmatprep.mubr.bf16.mxu0 %v25756_v30  ;;  %v1065_v49 = vor.u32 %v1064_v25, %v884_v11  ;;  %v25752_v62 = vshrl.u32 %v23595_v48, 16  ;;  %v928_v6 = vrot.slane %v926_v41, 7 }
 0x1b9   : > { %v907_v63 = vrot.slane %v905_v36, 7  ;;  %v938_v57 = vor.u32 %v936_v43, %v935_v35  ;;  %v23731_v11 = vsel %vm23640_vm3, 0, %v917_v39  ;;  %v22403_v39 = vld [vmem:[#allocation8 + $0xb0] sm:$0xff]  }
 0x1ba   : > { %18618 = vmatpush3.bf16.msra.mxu0 %v22389_v28  ;;  %v22397_v28 = vld [vmem:[#allocation8 + $0x98] sm:$0xff]   ;;  %v23748_v25 = vsel %vm23724_vm6, %v1065_v49, 0  ;;  %v956_v35 = vrot.slane %v25752_v62, 7  ;;  %v25754_v49 = vshrl.u32 %v23593_v45, 16 }
 0x1bb   : > { %18894 = vmatpush3.bf16.msra.mxu1 %v22390_v33  ;;  %18635 = vmatprep.subr.bf16.mxu0 %v22391_v46  ;;  %v910_v10 = vor.u32 %v908_v5, %v907_v63  ;;  %v949_v33 = vrot.slane %v25753_v8, 7  ;;  %v23735_v63 = vsel %vm23640_vm3, 0, %v924_v40  ;;  %v971_v8 = vshll.u32 %v23614_v21, 16 }
 0x1bc   : > { %18895 = vmatprep.subr.bf16.mxu1 %v22392_v53  ;;  %v963_v62 = vrot.slane %v25754_v49, 7 }
 0x1bd   : > { %18620 = vmatmul.mubr.bf16.vlgmr.msra.gmra.mrb[16].mxu0 %v23653_v59  ;;  %18880 = vmatmul.mubr.bf16.gmra.mrb[20].mxu1 %v23595_v48  ;;  %v23695_v34 = vsel %vm23640_vm3, 0, %v910_v10  ;;  %v957_v10 = vshll.u32 %v23595_v48, 16 }
 0x1be   : > { %18623 = vmatprep.mubr.bf16.mxu0 %v23664_v1  ;;  %18636 = vmatpush3.bf16.msra.mxu0 %v22391_v46  ;;  %v952_v46 = vor.u32 %v950_v42, %v949_v33  ;;  %v25751_v33 = vshrl.u32 %v23644_v56, 16 }
 0x1bf   : > { %18883 = vmatprep.mubr.bf16.mxu1 %v23593_v45  ;;  %18896 = vmatpush3.bf16.msra.mxu1 %v22392_v53  ;;  %v22400_v53 = vld [vmem:[#allocation8 + $0x30] sm:$0xff]  }
 0x1c0   : > { %18637 = vmatprep.subr.bf16.mxu0 %v22393_v60  ;;  %18897 = vmatprep.subr.bf16.mxu1 %v22394_v61  ;;  %v23744_v19 = vsel %vm23640_vm3, 0, %v952_v46  ;;  %v22404_v46 = vld [vmem:[#allocation8 + $0x80] sm:$0xff]  }
 0x1c2   : > { %18638 = vmatpush3.bf16.msra.mxu0 %v22393_v60  ;;  %v23720_v60 = vsel %vm23640_vm3, 0, %v945_v38 }
 0x1c3   : > { %18898 = vmatpush3.bf16.msra.mxu1 %v22394_v61  ;;  %18639 = vmatprep.subr.bf16.mxu0 %v22395_v7  ;;  %v22933_v61 = vld [vmem:[#allocation8 + $0x8b8] sm:$0xff]  }
 0x1c4   : > { %18899 = vmatprep.subr.bf16.mxu1 %v22396_v9 }
 0x1c5   : > { %18624 = vmatmul.mubr.bf16.gmra.mrb[20].mxu0 %v23687_v26  ;;  %18884 = vmatmul.mubr.bf16.gmra.mrb[24].mxu1 %v23614_v21 }
 0x1c6   : > { %18627 = vmatprep.mubr.bf16.mxu0 %v23695_v34  ;;  %18640 = vmatpush3.bf16.msra.mxu0 %v22395_v7  ;;  %v25750_v7 = vshll.u32 %v23644_v56, 16 }
 0x1c7   : > { %18887 = vmatprep.mubr.bf16.mxu1 %v23612_v16  ;;  %18900 = vmatpush3.bf16.msra.mxu1 %v22396_v9  ;;  %v929_v9 = vshll.u32 %v23620_v27, 16 }
 0x1c8   : > { %18641 = vmatprep.subr.bf16.mxu0 %v22397_v28  ;;  %18901 = vmatprep.subr.bf16.mxu1 %v22398_v29 }
 0x1c9   : > { %v931_v38 = vor.u32 %v929_v9, %v928_v6  ;;  %v1066_v6 = vrot.slane %v894_v47, 1 }
 0x1ca   : > { %18642 = vmatpush3.bf16.msra.mxu0 %v22397_v28  ;;  %v1094_v28 = vrot.slane %v25750_v7, 1  ;;  %v964_v7 = vshll.u32 %v23593_v45, 16 }
 0x1cb   : > { %18902 = vmatpush3.bf16.msra.mxu1 %v22398_v29  ;;  %18643 = vmatprep.subr.bf16.mxu0 %v22399_v44  ;;  %v23755_v29 = vsel %vm23640_vm3, 0, %v938_v57  ;;  %v25755_v57 = vshrl.u32 %v23614_v21, 16  ;;  %v1067_v49 = vor.u32 %v1066_v6, %v891_v23  ;;  %v22410_v6 = vld [vmem:[#allocation8 + $0x98] sm:$0xff]  }
 0x1cc   : > { %18903 = vmatprep.subr.bf16.mxu1 %v22400_v53  ;;  %v23765_v40 = vor.u32 %v1094_v28, %v25751_v33  ;;  %v23776_v28 = vsel %vm23640_vm3, 0, %v931_v38  ;;  %v22406_v33 = vld [vmem:[#allocation8 + $0x88] sm:$0xff]   ;;  %v1070_v38 = vrot.slane %v908_v5, 1  ;;  %v966_v5 = vor.u32 %v964_v7, %v963_v62 }
 0x1cd   : > { %18628 = vmatmul.mubr.bf16.gmra.mrb[24].mxu0 %v23731_v11  ;;  %18888 = vmatmul.mubr.bf16.gmra.mrb[28].mxu1 %v23649_v58  ;;  %v970_v47 = vrot.slane %v25755_v57, 7  ;;  %v23806_v23 = vsel %vm23724_vm6, %v1067_v49, 0  ;;  %v25759_v49 = vshrl.u32 %v23649_v58, 16 }
 0x1ce   : > { %18631 = vmatprep.mubr.bf16.mxu0 %v23735_v63  ;;  %18644 = vmatpush3.bf16.msra.mxu0 %v22399_v44  ;;  %v1068_v44 = vrot.slane %v901_v2, 1  ;;  %v959_v2 = vor.u32 %v957_v10, %v956_v35  ;;  %v23814_v62 = vsel %vm23640_vm3, 0, %v966_v5  ;;  %v22412_v5 = vld [vmem:[#allocation8 + $0xa0] sm:$0xff]  }
 0x1cf   : > { %18904 = vmatpush3.bf16.msra.mxu1 %v22400_v53  ;;  %18907 = vmatprep.mubr.bf16.mxu1 %v23755_v29  ;;  %v22405_v53 = vld [vmem:[#allocation8 + $0xb8] sm:$0xff]  }
 0x1d0   : > { %18645 = vmatprep.subr.bf16.mxu0 %v22401_v14  ;;  %18905 = vmatprep.subr.bf16.mxu1 %v22402_v18  ;;  %v1069_v57 = vor.u32 %v1068_v44, %v898_v52  ;;  %v23800_v35 = vsel %vm23640_vm3, 0, %v959_v2  ;;  %v22409_v52 = vld [vmem:[#allocation8 + $0xc8] sm:$0xff]   ;;  %v25760_v44 = vshll.u32 %v23612_v16, 16  ;;  %v1071_v2 = vor.u32 %v1070_v38, %v905_v36  ;;  %v22413_v38 = vld [vmem:[#allocation8 + $0xd8] sm:$0xff]  }
 0x1d2   : > { %18646 = vmatpush3.bf16.msra.mxu0 %v22401_v14  ;;  %v22407_v14 = vld [vmem:[#allocation8 + $0xc0] sm:$0xff]   ;;  %v23838_v36 = vsel %vm23724_vm6, %v1071_v2, 0  ;;  %v1078_v2 = vrot.slane %v936_v43, 1 }
 0x1d3   : > { %18906 = vmatpush3.bf16.msra.mxu1 %v22402_v18  ;;  %18647 = vmatprep.subr.bf16.mxu0 %v22403_v39  ;;  %v22408_v18 = vld [vmem:[#allocation8 + $0x90] sm:$0xff]  }
 0x1d4   : > { %18923 = vmatprep.subr.bf16.mxu1 %v22404_v46 }
 0x1d5   : > { %18632 = vmatmul.mubr.bf16.gmra.mrb[28].mxu0 %v23776_v28 }
 0x1d6   : > { %18908 = vmatmul.mubr.bf16.vlgmr.msra.gmra.mrb[16].mxu1 %v23720_v60  ;;  %18648 = vmatpush3.bf16.msra.mxu0 %v22403_v39  ;;  %v25758_v39 = vshrl.u32 %v23612_v16, 16 }
 0x1d7   : > { %18911 = vmatprep.mubr.bf16.mxu1 %v23744_v19  ;;  %18924 = vmatpush3.bf16.msra.mxu1 %v22404_v46  ;;  %v23810_v46 = vsel %vm23724_vm6, %v1069_v57, 0  ;;  %v973_v57 = vor.u32 %v971_v8, %v970_v47 }
 0x1d8   : > { %18649 = vmatprep.subr.bf16.mxu0 %v22405_v53  ;;  %18925 = vmatprep.subr.bf16.mxu1 %v22406_v33 }
 0x1d9   : > { %18651 = vmatprep.mubr.bf16.mxu0 %v25756_v30  ;;  %v23832_v47 = vsel %vm23640_vm3, 0, %v973_v57  ;;  %v984_v57 = vrot.slane %v25759_v49, 7  ;;  %v22416_v49 = vld [vmem:[#allocation8 + $0xb0] sm:$0xff]  }
 0x1da   : > { %18650 = vmatpush3.bf16.msra.mxu0 %v22405_v53  ;;  %v977_v53 = vrot.slane %v25758_v39, 7  ;;  %v1072_v39 = vrot.slane %v915_v31, 1  ;;  %v1074_v31 = vrot.slane %v922_v32, 1 }
 0x1db   : > { %18926 = vmatpush3.bf16.msra.mxu1 %v22406_v33  ;;  %18667 = vmatprep.subr.bf16.mxu0 %v22407_v14  ;;  %v22411_v33 = vld [vmem:[#allocation8 + $0xd0] sm:$0xff]  }
 0x1dc   : > { %18927 = vmatprep.subr.bf16.mxu1 %v22408_v18  ;;  %v980_v30 = vor.u32 %v25760_v44, %v977_v53  ;;  %v1075_v43 = vor.u32 %v1074_v31, %v919_v4  ;;  %v22417_v44 = vld [vmem:[#allocation8 + $0xe8] sm:$0xff]  }
 0x1dd   : > { %18652 = vmatmul.mubr.bf16.vlgmr.msra.gmra.mrb[16].mxu0 %v23748_v25 }
 0x1de   : > { %18912 = vmatmul.mubr.bf16.gmra.mrb[20].mxu1 %v23800_v35  ;;  %18655 = vmatprep.mubr.bf16.mxu0 %v23806_v23  ;;  %v23843_v53 = vsel %vm23640_vm3, 0, %v980_v30  ;;  %v1073_v30 = vor.u32 %v1072_v39, %v912_v3  ;;  %v1080_v3 = vrot.slane %v943_v22, 1  ;;  %v1082_v39 = vrot.slane %v950_v42, 1  ;;  %v22419_v42 = vld [vmem:[#allocation8 + $0xf0] sm:$0xff]  }
 0x1df   : > { %18668 = vmatpush3.bf16.msra.mxu0 %v22407_v14  ;;  %18915 = vmatprep.mubr.bf16.mxu1 %v23814_v62  ;;  %v985_v14 = vshll.u32 %v23649_v58, 16 }
 0x1e0   : > { %18928 = vmatpush3.bf16.msra.mxu1 %v22408_v18  ;;  %18669 = vmatprep.subr.bf16.mxu0 %v22409_v52  ;;  %v22414_v18 = vld [vmem:[#allocation8 + $0xa8] sm:$0xff]   ;;  %v23871_v4 = vsel %vm23724_vm6, %v1073_v30, 0  ;;  %v1084_v30 = vrot.slane %v957_v10, 1  ;;  %v1086_v10 = vrot.slane %v964_v7, 1  ;;  %v25893_v7 = vshrl.u32 %v23593_v45, 16 }
 0x1e1   : > { %18929 = vmatprep.subr.bf16.mxu1 %v22410_v6  ;;  %v987_v32 = vor.u32 %v985_v14, %v984_v57  ;;  %v25891_v57 = vshrl.u32 %v23575_v12, 16 }
 0x1e3   : > { %18670 = vmatpush3.bf16.msra.mxu0 %v22409_v52  ;;  %v22415_v52 = vld [vmem:[#allocation8 + $0xe0] sm:$0xff]   ;;  %v1083_v31 = vor.u32 %v1082_v39, %v25891_v57  ;;  %v22425_v39 = vld [vmem:[#allocation8 + $0x108] sm:$0xff]  }
 0x1e4   : > { %18930 = vmatpush3.bf16.msra.mxu1 %v22410_v6  ;;  %18671 = vmatprep.subr.bf16.mxu0 %v22411_v33  ;;  %v1079_v6 = vor.u32 %v1078_v2, %v933_v13  ;;  %v23875_v13 = vsel %vm23640_vm3, 0, %v987_v32  ;;  %v22420_v2 = vld [vmem:[#allocation8 + $0xc0] sm:$0xff]   ;;  %v22422_v32 = vld [vmem:[#allocation8 + $0xc8] sm:$0xff]  }
 0x1e5   : > { %18656 = vmatmul.mubr.bf16.gmra.mrb[20].mxu0 %v23810_v46  ;;  %18931 = vmatprep.subr.bf16.mxu1 %v22412_v5 }
 0x1e6   : > { %18916 = vmatmul.mubr.bf16.gmra.mrb[24].mxu1 %v23832_v47  ;;  %18659 = vmatprep.mubr.bf16.mxu0 %v23838_v36  ;;  %v23883_v22 = vsel %vm23724_vm6, %v1079_v6, 0 }
 0x1e7   : > { %18672 = vmatpush3.bf16.msra.mxu0 %v22411_v33  ;;  %18919 = vmatprep.mubr.bf16.mxu1 %v23843_v53  ;;  %v1076_v33 = vrot.slane %v929_v9, 1  ;;  %v23879_v9 = vsel %vm23724_vm6, %v1075_v43, 0  ;;  %v25892_v43 = vshrl.u32 %v23595_v48, 16 }
 0x1e8   : > { %18932 = vmatpush3.bf16.msra.mxu1 %v22412_v5  ;;  %18673 = vmatprep.subr.bf16.mxu0 %v22413_v38  ;;  %v22418_v5 = vld [vmem:[#allocation8 + $0xb8] sm:$0xff]  }
 0x1e9   : > { %18933 = vmatprep.subr.bf16.mxu1 %v22414_v18  ;;  %v1085_v6 = vor.u32 %v1084_v30, %v25892_v43  ;;  %v25896_v30 = vshrl.u32 %v23612_v16, 16 }
 0x1eb   : > { %18674 = vmatpush3.bf16.msra.mxu0 %v22413_v38  ;;  %v1077_v38 = vor.u32 %v1076_v33, %v926_v41  ;;  %v23907_v41 = vsel %vm23724_vm6, %v1083_v31, 0  ;;  %v22424_v33 = vld [vmem:[#allocation8 + $0xd0] sm:$0xff]  }
 0x1ec   : > { %18934 = vmatpush3.bf16.msra.mxu1 %v22414_v18  ;;  %18675 = vmatprep.subr.bf16.mxu0 %v22415_v52  ;;  %v1081_v18 = vor.u32 %v1080_v3, %v940_v0  ;;  %v1087_v3 = vor.u32 %v1086_v10, %v25893_v7  ;;  %v22427_v31 = vld [vmem:[#allocation8 + $0x110] sm:$0xff]   ;;  %v22429_v10 = vld [vmem:[#allocation8 + $0x118] sm:$0xff]   ;;  %v22431_v7 = vld [vmem:[#allocation8 + $0x120] sm:$0xff]  }
 0x1ed   : > { %18660 = vmatmul.mubr.bf16.gmra.mrb[24].mxu0 %v23871_v4  ;;  %18935 = vmatprep.subr.bf16.mxu1 %v22416_v49 }
 0x1ee   : > { %18920 = vmatmul.mubr.bf16.gmra.mrb[28].mxu1 %v23875_v13  ;;  %18663 = vmatprep.mubr.bf16.mxu0 %v23879_v9  ;;  %v23903_v0 = vsel %vm23724_vm6, %v1081_v18, 0  ;;  %v23925_v18 = vsel %vm23724_vm6, %v1085_v6, 0  ;;  %v23929_v57 = vsel %vm23724_vm6, %v1087_v3, 0  ;;  %v22430_v6 = vld [vmem:[#allocation8 + $0xe8] sm:$0xff]   ;;  %v25897_v3 = vshrl.u32 %v23649_v58, 16 }
 0x1ef   : > { %18676 = vmatpush3.bf16.msra.mxu0 %v22415_v52  ;;  %18939 = vmatprep.mubr.bf16.mxu1 %v23883_v22  ;;  %v22421_v52 = vld [vmem:[#allocation8 + $0xf8] sm:$0xff]  }
 0x1f0   : > { %18936 = vmatpush3.bf16.msra.mxu1 %v22416_v49  ;;  %18677 = vmatprep.subr.bf16.mxu0 %v22417_v44  ;;  %v23899_v49 = vsel %vm23724_vm6, %v1077_v38, 0 }
 0x1f1   : > { %18937 = vmatprep.subr.bf16.mxu1 %v22418_v5 }
 0x1f3   : > { %18678 = vmatpush3.bf16.msra.mxu0 %v22417_v44  ;;  %v22423_v44 = vld [vmem:[#allocation8 + $0x100] sm:$0xff]  }
 0x1f4   : > { %18938 = vmatpush3.bf16.msra.mxu1 %v22418_v5  ;;  %18679 = vmatprep.subr.bf16.mxu0 %v22419_v42  ;;  %v1088_v5 = vrot.slane %v971_v8, 1  ;;  %v25895_v8 = vshrl.u32 %v23614_v21, 16 }
 0x1f5   : > { %18664 = vmatmul.mubr.bf16.gmra.mrb[28].mxu0 %v23899_v49  ;;  %18955 = vmatprep.subr.bf16.mxu1 %v22420_v2 }
 0x1f6   : > { %18683 = vmatprep.mubr.bf16.mxu0 %v23653_v59  ;;  %v22426_v59 = vld [vmem:[#allocation8 + $0xd8] sm:$0xff]  }
 0x1f7   : > { %18940 = vmatmul.mubr.bf16.vlgmr.msra.gmra.mrb[16].mxu1 %v23903_v0  ;;  %18680 = vmatpush3.bf16.msra.mxu0 %v22419_v42  ;;  %v25894_v42 = vshll.u32 %v23612_v16, 16 }
 0x1f8   : > { %18943 = vmatprep.mubr.bf16.mxu1 %v23907_v41  ;;  %18956 = vmatpush3.bf16.msra.mxu1 %v22420_v2  ;;  %v1089_v2 = vor.u32 %v1088_v5, %v25895_v8  ;;  %v22433_v5 = vld [vmem:[#allocation8 + $0x128] sm:$0xff]   ;;  %v22437_v8 = vld [vmem:[#allocation8 + $0x138] sm:$0xff]  }
 0x1f9   : > { %18681 = vmatprep.subr.bf16.mxu0 %v22421_v52  ;;  %18957 = vmatprep.subr.bf16.mxu1 %v22422_v32  ;;  %v1090_v38 = vrot.slane %v25894_v42, 1  ;;  %v22434_v42 = vld [vmem:[#allocation8 + $0xf8] sm:$0xff]  }
 0x1fa   : > { %v23941_v43 = vsel %vm23724_vm6, %v1089_v2, 0  ;;  %v22438_v2 = vld [vmem:[#allocation8 + $0x108] sm:$0xff]  }
 0x1fb   : > { %18682 = vmatpush3.bf16.msra.mxu0 %v22421_v52  ;;  %v1091_v52 = vor.u32 %v1090_v38, %v25896_v30  ;;  %v22435_v38 = vld [vmem:[#allocation8 + $0x130] sm:$0xff]   ;;  %v22439_v30 = vld [vmem:[#allocation8 + $0x140] sm:$0xff]  }
 0x1fc   : > { %18958 = vmatpush3.bf16.msra.mxu1 %v22422_v32  ;;  %18699 = vmatprep.subr.bf16.mxu0 %v22423_v44  ;;  %v22428_v32 = vld [vmem:[#allocation8 + $0xe0] sm:$0xff]  }
 0x1fd   : > { %18959 = vmatprep.subr.bf16.mxu1 %v22424_v33 }
 0x1fe   : > { %18684 = vmatmul.mubr.bf16.vlgmr.msra.gmra.mrb[16].mxu0 %v23664_v1 }
 0x1ff   : > { %18944 = vmatmul.mubr.bf16.gmra.mrb[20].mxu1 %v23925_v18  ;;  %18687 = vmatprep.mubr.bf16.mxu0 %v23687_v26 }
 0x200   : > { %18700 = vmatpush3.bf16.msra.mxu0 %v22423_v44  ;;  %18947 = vmatprep.mubr.bf16.mxu1 %v23929_v57  ;;  %v23945_v44 = vsel %vm23724_vm6, %v1091_v52, 0  ;;  %v22440_v52 = vld [vmem:[#allocation8 + $0x110] sm:$0xff]  }
 0x201   : > { %18960 = vmatpush3.bf16.msra.mxu1 %v22424_v33  ;;  %18701 = vmatprep.subr.bf16.mxu0 %v22425_v39  ;;  %v1092_v33 = vrot.slane %v985_v14, 1 }
 0x202   : > { %18961 = vmatprep.subr.bf16.mxu1 %v22426_v59 }
 0x204   : > { %18702 = vmatpush3.bf16.msra.mxu0 %v22425_v39  ;;  %v1093_v39 = vor.u32 %v1092_v33, %v25897_v3  ;;  %v22444_v33 = vld [vmem:[#allocation8 + $0x120] sm:$0xff]   ;;  %v22446_v3 = vld [vmem:[#allocation8 + $0x128] sm:$0xff]  }
 0x205   : > { %18962 = vmatpush3.bf16.msra.mxu1 %v22426_v59  ;;  %18703 = vmatprep.subr.bf16.mxu0 %v22427_v31  ;;  %v22432_v59 = vld [vmem:[#allocation8 + $0xf0] sm:$0xff]  }
 0x206   : > { %18688 = vmatmul.mubr.bf16.gmra.mrb[20].mxu0 %v23695_v34  ;;  %18963 = vmatprep.subr.bf16.mxu1 %v22428_v32  ;;  %v23957_v14 = vsel %vm23724_vm6, %v1093_v39, 0  ;;  %v25898_v39 = vshrl.u32 %v23644_v56, 16 }
 0x207   : > { %18948 = vmatmul.mubr.bf16.gmra.mrb[24].mxu1 %v23941_v43  ;;  %18691 = vmatprep.mubr.bf16.mxu0 %v23731_v11 }
 0x208   : > { %18704 = vmatpush3.bf16.msra.mxu0 %v22427_v31  ;;  %18951 = vmatprep.mubr.bf16.mxu1 %v23945_v44  ;;  %v22436_v31 = vld [vmem:[#allocation8 + $0x100] sm:$0xff]  }
 0x209   : > { %18964 = vmatpush3.bf16.msra.mxu1 %v22428_v32  ;;  %18705 = vmatprep.subr.bf16.mxu0 %v22429_v10  ;;  %v22441_v32 = vld [vmem:[#allocation8 + $0x148] sm:$0xff]  }
 0x20a   : > { %18965 = vmatprep.subr.bf16.mxu1 %v22430_v6 }
 0x20c   : > { %18706 = vmatpush3.bf16.msra.mxu0 %v22429_v10  ;;  %v22442_v10 = vld [vmem:[#allocation8 + $0x118] sm:$0xff]  }
 0x20d   : > { %18966 = vmatpush3.bf16.msra.mxu1 %v22430_v6  ;;  %18707 = vmatprep.subr.bf16.mxu0 %v22431_v7  ;;  %v22443_v6 = vld [vmem:[#allocation8 + $0x150] sm:$0xff]  }
 0x20e   : > { %18692 = vmatmul.mubr.bf16.gmra.mrb[24].mxu0 %v23735_v63  ;;  %18967 = vmatprep.subr.bf16.mxu1 %v22432_v59 }
 0x20f   : > { %18952 = vmatmul.mubr.bf16.gmra.mrb[28].mxu1 %v23957_v14  ;;  %18695 = vmatprep.mubr.bf16.mxu0 %v23776_v28 }
 0x210   : > { %18708 = vmatpush3.bf16.msra.mxu0 %v22431_v7  ;;  %18971 = vmatprep.mubr.bf16.mxu1 %v23720_v60  ;;  %v22445_v7 = vld [vmem:[#allocation8 + $0x158] sm:$0xff]  }
 0x211   : > { %18968 = vmatpush3.bf16.msra.mxu1 %v22432_v59  ;;  %18709 = vmatprep.subr.bf16.mxu0 %v22433_v5  ;;  %v991_v59 = vrot.slane %v25898_v39, 7  ;;  %v22458_v39 = vld [vmem:[#allocation8 + $0x158] sm:$0xff]  }
 0x212   : > { %18969 = vmatprep.subr.bf16.mxu1 %v22434_v42 }
 0x214   : > { %18710 = vmatpush3.bf16.msra.mxu0 %v22433_v5  ;;  %v22447_v5 = vld [vmem:[#allocation8 + $0x160] sm:$0xff]  }
 0x215   : > { %18970 = vmatpush3.bf16.msra.mxu1 %v22434_v42  ;;  %18711 = vmatprep.subr.bf16.mxu0 %v22435_v38  ;;  %v25899_v42 = vshll.u32 %v23644_v56, 16 }
 0x216   : > { %18696 = vmatmul.mubr.bf16.gmra.mrb[28].mxu0 %v23755_v29  ;;  %18987 = vmatprep.subr.bf16.mxu1 %v22436_v31 }
 0x217   : > { %18715 = vmatprep.mubr.bf16.mxu0 %v23564_v55 }
 0x218   : > { %18972 = vmatmul.mubr.bf16.vlgmr.msra.gmra.mrb[16].mxu1 %v23744_v19  ;;  %18712 = vmatpush3.bf16.msra.mxu0 %v22435_v38  ;;  %v994_v38 = vor.u32 %v25899_v42, %v991_v59  ;;  %v22460_v59 = vld [vmem:[#allocation8 + $0x160] sm:$0xff]   ;;  %v22462_v42 = vld [vmem:[#allocation8 + $0x168] sm:$0xff]  }
 0x219   : > { %18975 = vmatprep.mubr.bf16.mxu1 %v23800_v35  ;;  %18988 = vmatpush3.bf16.msra.mxu1 %v22436_v31  ;;  %v22448_v31 = vld [vmem:[#allocation8 + $0x130] sm:$0xff]  }
 0x21a   : > { %18713 = vmatprep.subr.bf16.mxu0 %v22437_v8  ;;  %18989 = vmatprep.subr.bf16.mxu1 %v22438_v2 }
 0x21c   : > { %18714 = vmatpush3.bf16.msra.mxu0 %v22437_v8  ;;  %v22449_v8 = vld [vmem:[#allocation8 + $0x168] sm:$0xff]  }
 0x21d   : > { %18990 = vmatpush3.bf16.msra.mxu1 %v22438_v2  ;;  %18731 = vmatprep.subr.bf16.mxu0 %v22439_v30  ;;  %v23981_v2 = vsel %vm23640_vm3, 0, %v994_v38  ;;  %v22463_v38 = vld [vmem:[#allocation8 + $0x1a0] sm:$0xff]  }
 0x21e   : > { %18991 = vmatprep.subr.bf16.mxu1 %v22440_v52 }
 0x21f   : > { %18716 = vmatmul.mubr.bf16.vlgmr.msra.gmra.mrb[16].mxu0 %v23561_v51 }
 0x220   : > { %18976 = vmatmul.mubr.bf16.gmra.mrb[20].mxu1 %v23814_v62  ;;  %18719 = vmatprep.mubr.bf16.mxu0 %v23582_v20 }
 0x221   : > { %18732 = vmatpush3.bf16.msra.mxu0 %v22439_v30  ;;  %18979 = vmatprep.mubr.bf16.mxu1 %v23832_v47  ;;  %v22450_v30 = vld [vmem:[#allocation8 + $0x138] sm:$0xff]  }
 0x222   : > { %18992 = vmatpush3.bf16.msra.mxu1 %v22440_v52  ;;  %18733 = vmatprep.subr.bf16.mxu0 %v22441_v32  ;;  %v22451_v52 = vld [vmem:[#allocation8 + $0x170] sm:$0xff]  }
 0x223   : > { %18993 = vmatprep.subr.bf16.mxu1 %v22442_v10 }
 0x225   : > { %18734 = vmatpush3.bf16.msra.mxu0 %v22441_v32  ;;  %v22452_v32 = vld [vmem:[#allocation8 + $0x140] sm:$0xff]  }
 0x226   : > { %18994 = vmatpush3.bf16.msra.mxu1 %v22442_v10  ;;  %18735 = vmatprep.subr.bf16.mxu0 %v22443_v6  ;;  %v22453_v10 = vld [vmem:[#allocation8 + $0x178] sm:$0xff]  }
 0x227   : > { %18720 = vmatmul.mubr.bf16.gmra.mrb[20].mxu0 %v23579_v17  ;;  %18995 = vmatprep.subr.bf16.mxu1 %v22444_v33 }
 0x228   : > { %18980 = vmatmul.mubr.bf16.gmra.mrb[24].mxu1 %v23843_v53  ;;  %18723 = vmatprep.mubr.bf16.mxu0 %v23600_v54 }
 0x229   : > { %18736 = vmatpush3.bf16.msra.mxu0 %v22443_v6  ;;  %18983 = vmatprep.mubr.bf16.mxu1 %v23875_v13  ;;  %v22454_v6 = vld [vmem:[#allocation8 + $0x148] sm:$0xff]  }
 0x22a   : > { %18996 = vmatpush3.bf16.msra.mxu1 %v22444_v33  ;;  %18737 = vmatprep.subr.bf16.mxu0 %v22445_v7  ;;  %v22455_v33 = vld [vmem:[#allocation8 + $0x180] sm:$0xff]  }
 0x22b   : > { %18997 = vmatprep.subr.bf16.mxu1 %v22446_v3 }
 0x22d   : > { %18738 = vmatpush3.bf16.msra.mxu0 %v22445_v7  ;;  %v22456_v7 = vld [vmem:[#allocation8 + $0x150] sm:$0xff]  }
 0x22e   : > { %18998 = vmatpush3.bf16.msra.mxu1 %v22446_v3  ;;  %18739 = vmatprep.subr.bf16.mxu0 %v22447_v5  ;;  %v22457_v3 = vld [vmem:[#allocation8 + $0x188] sm:$0xff]  }
 0x22f   : > { %18724 = vmatmul.mubr.bf16.gmra.mrb[24].mxu0 %v23597_v50  ;;  %18999 = vmatprep.subr.bf16.mxu1 %v22448_v31 }
 0x230   : > { %18984 = vmatmul.mubr.bf16.gmra.mrb[28].mxu1 %v23981_v2  ;;  %18727 = vmatprep.mubr.bf16.mxu0 %v23620_v27 }
 0x231   : > { %18740 = vmatpush3.bf16.msra.mxu0 %v22447_v5  ;;  %19003 = vmatprep.mubr.bf16.mxu1 %v23577_v15  ;;  %v22461_v5 = vld [vmem:[#allocation8 + $0x198] sm:$0xff]  }
 0x232   : > { %19000 = vmatpush3.bf16.msra.mxu1 %v22448_v31  ;;  %18741 = vmatprep.subr.bf16.mxu0 %v22449_v8  ;;  %v22464_v31 = vld [vmem:[#allocation8 + $0x170] sm:$0xff]  }
 0x233   : > { %19001 = vmatprep.subr.bf16.mxu1 %v22450_v30 }
 0x235   : > { %18742 = vmatpush3.bf16.msra.mxu0 %v22449_v8  ;;  %v22465_v8 = vld [vmem:[#allocation8 + $0x1a8] sm:$0xff]  }
 0x236   : > { %19002 = vmatpush3.bf16.msra.mxu1 %v22450_v30  ;;  %18743 = vmatprep.subr.bf16.mxu0 %v22451_v52  ;;  %v22466_v30 = vld [vmem:[#allocation8 + $0x178] sm:$0xff]  }
 0x237   : > { %18728 = vmatmul.mubr.bf16.gmra.mrb[28].mxu0 %v23617_v24  ;;  %19019 = vmatprep.subr.bf16.mxu1 %v22452_v32 }
 0x238   : > { %18747 = vmatprep.mubr.bf16.mxu0 %v23748_v25  ;;  %v22459_v25 = vld [vmem:[#allocation8 + $0x190] sm:$0xff]  }
 0x239   : > { %19004 = vmatmul.mubr.bf16.vlgmr.msra.gmra.mrb[16].mxu1 %v23575_v12  ;;  %18744 = vmatpush3.bf16.msra.mxu0 %v22451_v52  ;;  %v22467_v52 = vld [vmem:[#allocation8 + $0x1b0] sm:$0xff]  }
 0x23a   : > { %19007 = vmatprep.mubr.bf16.mxu1 %v23595_v48  ;;  %19020 = vmatpush3.bf16.msra.mxu1 %v22452_v32  ;;  %v22468_v32 = vld [vmem:[#allocation8 + $0x180] sm:$0xff]  }
 0x23b   : > { %18745 = vmatprep.subr.bf16.mxu0 %v22453_v10  ;;  %19021 = vmatprep.subr.bf16.mxu1 %v22454_v6 }
 0x23d   : > { %18746 = vmatpush3.bf16.msra.mxu0 %v22453_v10  ;;  %v24006_v10 = vsel %vm23724_vm6, %v23765_v40, 0  ;;  %v22473_v40 = vld [vmem:[#allocation8 + $0x1c8] sm:$0xff]  }
 0x23e   : > { %19022 = vmatpush3.bf16.msra.mxu1 %v22454_v6  ;;  %18763 = vmatprep.subr.bf16.mxu0 %v22455_v33  ;;  %v22469_v6 = vld [vmem:[#allocation8 + $0x1b8] sm:$0xff]  }
 0x23f   : > { %19023 = vmatprep.subr.bf16.mxu1 %v22456_v7 }
 0x240   : > { %18748 = vmatmul.mubr.bf16.vlgmr.msra.gmra.mrb[16].mxu0 %v23806_v23 }
 0x241   : > { %19008 = vmatmul.mubr.bf16.gmra.mrb[20].mxu1 %v23593_v45  ;;  %18751 = vmatprep.mubr.bf16.mxu0 %v23810_v46 }
 0x242   : > { %18764 = vmatpush3.bf16.msra.mxu0 %v22455_v33  ;;  %19011 = vmatprep.mubr.bf16.mxu1 %v23614_v21  ;;  %v22470_v33 = vld [vmem:[#allocation8 + $0x188] sm:$0xff]  }
 0x243   : > { %19024 = vmatpush3.bf16.msra.mxu1 %v22456_v7  ;;  %18765 = vmatprep.subr.bf16.mxu0 %v22457_v3  ;;  %v22471_v7 = vld [vmem:[#allocation8 + $0x1c0] sm:$0xff]  }
 0x244   : > { %19025 = vmatprep.subr.bf16.mxu1 %v22458_v39 }
 0x246   : > { %18766 = vmatpush3.bf16.msra.mxu0 %v22457_v3  ;;  %v22472_v3 = vld [vmem:[#allocation8 + $0x190] sm:$0xff]  }
 0x247   : > { %19026 = vmatpush3.bf16.msra.mxu1 %v22458_v39  ;;  %18767 = vmatprep.subr.bf16.mxu0 %v22459_v25  ;;  %v22474_v39 = vld [vmem:[#allocation8 + $0x198] sm:$0xff]  }
 0x248   : > { %18752 = vmatmul.mubr.bf16.gmra.mrb[20].mxu0 %v23838_v36  ;;  %19027 = vmatprep.subr.bf16.mxu1 %v22460_v59 }
 0x249   : > { %19012 = vmatmul.mubr.bf16.gmra.mrb[24].mxu1 %v23612_v16  ;;  %18755 = vmatprep.mubr.bf16.mxu0 %v23871_v4 }
 0x24a   : > { %18768 = vmatpush3.bf16.msra.mxu0 %v22459_v25  ;;  %19015 = vmatprep.mubr.bf16.mxu1 %v23649_v58  ;;  %v22476_v25 = vld [vmem:[#allocation8 + $0x1a0] sm:$0xff]  }
 0x24b   : > { %19028 = vmatpush3.bf16.msra.mxu1 %v22460_v59  ;;  %18769 = vmatprep.subr.bf16.mxu0 %v22461_v5  ;;  %v22477_v59 = vld [vmem:[#allocation8 + $0x1d8] sm:$0xff]  }
 0x24c   : > { %19029 = vmatprep.subr.bf16.mxu1 %v22462_v42 }
 0x24e   : > { %18770 = vmatpush3.bf16.msra.mxu0 %v22461_v5  ;;  %v22478_v5 = vld [vmem:[#allocation8 + $0x1a8] sm:$0xff]  }
 0x24f   : > { %19030 = vmatpush3.bf16.msra.mxu1 %v22462_v42  ;;  %18771 = vmatprep.subr.bf16.mxu0 %v22463_v38  ;;  %v22481_v42 = vld [vmem:[#allocation8 + $0x1e8] sm:$0xff]  }
 0x250   : > { %18756 = vmatmul.mubr.bf16.gmra.mrb[24].mxu0 %v23879_v9  ;;  %19031 = vmatprep.subr.bf16.mxu1 %v22464_v31 }
 0x251   : > { %19016 = vmatmul.mubr.bf16.gmra.mrb[28].mxu1 %v23644_v56  ;;  %18759 = vmatprep.mubr.bf16.mxu0 %v23899_v49 }
 0x252   : > { %18772 = vmatpush3.bf16.msra.mxu0 %v22463_v38  ;;  %19035 = vmatprep.mubr.bf16.mxu1 %v23903_v0  ;;  %v22482_v38 = vld [vmem:[#allocation8 + $0x1b8] sm:$0xff]  }
 0x253   : > { %19032 = vmatpush3.bf16.msra.mxu1 %v22464_v31  ;;  %18773 = vmatprep.subr.bf16.mxu0 %v22465_v8  ;;  %v22485_v31 = vld [vmem:[#allocation8 + $0x1f8] sm:$0xff]  }
 0x254   : > { %19033 = vmatprep.subr.bf16.mxu1 %v22466_v30 }
 0x256   : > { %18774 = vmatpush3.bf16.msra.mxu0 %v22465_v8  ;;  %v22486_v8 = vld [vmem:[#allocation8 + $0x1c8] sm:$0xff]  }
 0x257   : > { %19034 = vmatpush3.bf16.msra.mxu1 %v22466_v30  ;;  %18775 = vmatprep.subr.bf16.mxu0 %v22467_v52  ;;  %v22490_v30 = vld [vmem:[#allocation8 + $0x1d8] sm:$0xff]  }
 0x258   : > { %18760 = vmatmul.mubr.bf16.gmra.mrb[28].mxu0 %v23883_v22  ;;  %19051 = vmatprep.subr.bf16.mxu1 %v22468_v32 }
 0x259   : > { %18779 = vmatprep.mubr.bf16.mxu0 %v23664_v1  ;;  %v22475_v1 = vld [vmem:[#allocation8 + $0x1d0] sm:$0xff]  }
 0x25a   : > { %19036 = vmatmul.mubr.bf16.vlgmr.msra.gmra.mrb[16].mxu1 %v23907_v41  ;;  %18776 = vmatpush3.bf16.msra.mxu0 %v22467_v52  ;;  %v22494_v52 = vld [vmem:[#allocation8 + $0x1e8] sm:$0xff]  }
 0x25b   : > { %19039 = vmatprep.mubr.bf16.mxu1 %v23925_v18  ;;  %19052 = vmatpush3.bf16.msra.mxu1 %v22468_v32  ;;  %v22497_v32 = vld [vmem:[#allocation8 + $0x228] sm:$0xff]  }
 0x25c   : > { %18777 = vmatprep.subr.bf16.mxu0 %v22469_v6  ;;  %19053 = vmatprep.subr.bf16.mxu1 %v22470_v33 }
 0x25e   : > { %18778 = vmatpush3.bf16.msra.mxu0 %v22469_v6  ;;  %v22498_v6 = vld [vmem:[#allocation8 + $0x1f8] sm:$0xff]  }
 0x25f   : > { %19054 = vmatpush3.bf16.msra.mxu1 %v22470_v33  ;;  %18795 = vmatprep.subr.bf16.mxu0 %v22471_v7  ;;  %v25900_v33 = vmov 0  }
 0x260   : > { %19055 = vmatprep.subr.bf16.mxu1 %v22472_v3 }
 0x261   : > { %18780 = vmatmul.mubr.bf16.vlgmr.msra.gmra.mrb[16].mxu0 %v23687_v26  ;;  %v22479_v26 = vld [vmem:[#allocation8 + $0x1e0] sm:$0xff]  }
 0x262   : > { %19040 = vmatmul.mubr.bf16.gmra.mrb[20].mxu1 %v23929_v57  ;;  %18783 = vmatprep.mubr.bf16.mxu0 %v23695_v34  ;;  %v22480_v34 = vld [vmem:[#allocation8 + $0x1b0] sm:$0xff]  }
 0x263   : > { %18796 = vmatpush3.bf16.msra.mxu0 %v22471_v7  ;;  %19043 = vmatprep.mubr.bf16.mxu1 %v23941_v43  ;;  %v22501_v7 = vld [vmem:[#allocation8 + $0x238] sm:$0xff]  }
 0x264   : > { %19056 = vmatpush3.bf16.msra.mxu1 %v22472_v3  ;;  %18797 = vmatprep.subr.bf16.mxu0 %v22473_v40  ;;  %v22502_v3 = vld [vmem:[#allocation8 + $0x208] sm:$0xff]  }
 0x265   : > { %19057 = vmatprep.subr.bf16.mxu1 %v22474_v39 }
 0x267   : > { %18798 = vmatpush3.bf16.msra.mxu0 %v22473_v40  ;;  %v22509_v40 = vld [vmem:[#allocation8 + $0x280] sm:$0xff]  }
 0x268   : > { %19058 = vmatpush3.bf16.msra.mxu1 %v22474_v39  ;;  %18799 = vmatprep.subr.bf16.mxu0 %v22475_v1  ;;  %v22503_v39 = vld [vmem:[#allocation8 + $0x210] sm:$0xff]  }
 0x269   : > { %18784 = vmatmul.mubr.bf16.gmra.mrb[20].mxu0 %v23731_v11  ;;  %19059 = vmatprep.subr.bf16.mxu1 %v22476_v25  ;;  %v22483_v11 = vld [vmem:[#allocation8 + $0x1f0] sm:$0xff]  }
 0x26a   : > { %19044 = vmatmul.mubr.bf16.gmra.mrb[24].mxu1 %v23945_v44  ;;  %18787 = vmatprep.mubr.bf16.mxu0 %v23735_v63  ;;  %v22484_v63 = vld [vmem:[#allocation8 + $0x1c0] sm:$0xff]  }
 0x26b   : > { %18800 = vmatpush3.bf16.msra.mxu0 %v22475_v1  ;;  %19047 = vmatprep.mubr.bf16.mxu1 %v23957_v14  ;;  %v22504_v1 = vld [vmem:[#allocation8 + $0x218] sm:$0xff]  }
 0x26c   : > { %19060 = vmatpush3.bf16.msra.mxu1 %v22476_v25  ;;  %18801 = vmatprep.subr.bf16.mxu0 %v22477_v59  ;;  %v22510_v25 = vld [vmem:[#allocation8 + $0x288] sm:$0xff]  }
 0x26d   : > { %19061 = vmatprep.subr.bf16.mxu1 %v22478_v5 }
 0x26f   : > { %18802 = vmatpush3.bf16.msra.mxu0 %v22477_v59  ;;  %v22511_v59 = vld [vmem:[#allocation8 + $0x290] sm:$0xff]  }
 0x270   : > { %19062 = vmatpush3.bf16.msra.mxu1 %v22478_v5  ;;  %18803 = vmatprep.subr.bf16.mxu0 %v22479_v26  ;;  %v22506_v5 = vld [vmem:[#allocation8 + $0x228] sm:$0xff]  }
 0x271   : > { %18788 = vmatmul.mubr.bf16.gmra.mrb[24].mxu0 %v23776_v28  ;;  %19063 = vmatprep.subr.bf16.mxu1 %v22480_v34  ;;  %v22487_v28 = vld [vmem:[#allocation8 + $0x200] sm:$0xff]  }
 0x272   : > { %19048 = vmatmul.mubr.bf16.gmra.mrb[28].mxu1 %v24006_v10  ;;  %18791 = vmatprep.mubr.bf16.mxu0 %v23755_v29  ;;  %v22488_v29 = vld [vmem:[#allocation8 + $0x1d0] sm:$0xff]  }
 0x273   : > { %18804 = vmatpush3.bf16.msra.mxu0 %v22479_v26  ;;  %19067 = vmatprep.mubr.bf16.mxu1 %v23744_v19  ;;  %v22489_v19 = vld [vmem:[#allocation8 + $0x208] sm:$0xff]   ;;  %v22512_v26 = vld [vmem:[#allocation8 + $0x298] sm:$0xff]  }
 0x274   : > { %19064 = vmatpush3.bf16.msra.mxu1 %v22480_v34  ;;  %18805 = vmatprep.subr.bf16.mxu0 %v22481_v42  ;;  %v22508_v34 = vld [vmem:[#allocation8 + $0x238] sm:$0xff]  }
 0x275   : > { %19065 = vmatprep.subr.bf16.mxu1 %v22482_v38 }
 0x277   : > { %18806 = vmatpush3.bf16.msra.mxu0 %v22481_v42  ;;  %v22514_v42 = vld [vmem:[#allocation8 + $0x2a8] sm:$0xff]  }
 0x278   : > { %19066 = vmatpush3.bf16.msra.mxu1 %v22482_v38  ;;  %18807 = vmatprep.subr.bf16.mxu0 %v22483_v11  ;;  %v24068_v38 = vld [vmem:[#allocation11 + $0x1] ss:$0 sm:$0xff] }
 0x279   : > { %18792 = vmatmul.mubr.bf16.gmra.mrb[28].mxu0 %v23720_v60  ;;  %19083 = vmatprep.subr.bf16.mxu1 %v22484_v63  ;;  %v22491_v60 = vld [vmem:[#allocation8 + $0x210] sm:$0xff]  }
 0x27a   : > { %18811 = vmatprep.mubr.bf16.mxu0 %v23561_v51 }
 0x27b   : > { %19068 = vmatmul.mubr.bf16.vlgmr.msra.gmra.mrb[16].mxu1 %v23800_v35  ;;  %18808 = vmatpush3.bf16.msra.mxu0 %v22483_v11  ;;  %v22492_v35 = vld [vmem:[#allocation8 + $0x1e0] sm:$0xff]  }
 0x27c   : > { %19071 = vmatprep.mubr.bf16.mxu1 %v23814_v62  ;;  %19084 = vmatpush3.bf16.msra.mxu1 %v22484_v63  ;;  %v22493_v62 = vld [vmem:[#allocation8 + $0x218] sm:$0xff]  }
 0x27d   : > { %18809 = vmatprep.subr.bf16.mxu0 %v22485_v31  ;;  %19085 = vmatprep.subr.bf16.mxu1 %v22486_v8 }
 0x27f   : > { %18810 = vmatpush3.bf16.msra.mxu0 %v22485_v31 }
 0x280   : > { %19086 = vmatpush3.bf16.msra.mxu1 %v22486_v8  ;;  %18827 = vmatprep.subr.bf16.mxu0 %v22487_v28 }
 0x281   : > { %19087 = vmatprep.subr.bf16.mxu1 %v22488_v29 }
 0x282   : > { %18812 = vmatmul.mubr.bf16.vlgmr.msra.gmra.mrb[16].mxu0 %v23582_v20 }
 0x283   : > { %19072 = vmatmul.mubr.bf16.gmra.mrb[20].mxu1 %v23832_v47  ;;  %18815 = vmatprep.mubr.bf16.mxu0 %v23579_v17  ;;  %v22495_v47 = vld [vmem:[#allocation8 + $0x220] sm:$0xff]  }
 0x284   : > { %18828 = vmatpush3.bf16.msra.mxu0 %v22487_v28  ;;  %19075 = vmatprep.mubr.bf16.mxu1 %v23843_v53  ;;  %v22496_v53 = vld [vmem:[#allocation8 + $0x1f0] sm:$0xff]  }
 0x285   : > { %19088 = vmatpush3.bf16.msra.mxu1 %v22488_v29  ;;  %18829 = vmatprep.subr.bf16.mxu0 %v22489_v19 }
 0x286   : > { %19089 = vmatprep.subr.bf16.mxu1 %v22490_v30 }
 0x288   : > { %18830 = vmatpush3.bf16.msra.mxu0 %v22489_v19 }
 0x289   : > { %19090 = vmatpush3.bf16.msra.mxu1 %v22490_v30  ;;  %18831 = vmatprep.subr.bf16.mxu0 %v22491_v60 }
 0x28a   : > { %18816 = vmatmul.mubr.bf16.gmra.mrb[20].mxu0 %v23600_v54  ;;  %19091 = vmatprep.subr.bf16.mxu1 %v22492_v35 }
 0x28b   : > { %19076 = vmatmul.mubr.bf16.gmra.mrb[24].mxu1 %v23875_v13  ;;  %18819 = vmatprep.mubr.bf16.mxu0 %v23597_v50  ;;  %v22499_v13 = vld [vmem:[#allocation8 + $0x230] sm:$0xff]  }
 0x28c   : > { %18832 = vmatpush3.bf16.msra.mxu0 %v22491_v60  ;;  %19079 = vmatprep.mubr.bf16.mxu1 %v23981_v2  ;;  %v22500_v2 = vld [vmem:[#allocation8 + $0x200] sm:$0xff]  }
 0x28d   : > { %19092 = vmatpush3.bf16.msra.mxu1 %v22492_v35  ;;  %18833 = vmatprep.subr.bf16.mxu0 %v22493_v62 }
 0x28e   : > { %19093 = vmatprep.subr.bf16.mxu1 %v22494_v52 }
 0x290   : > { %18834 = vmatpush3.bf16.msra.mxu0 %v22493_v62 }
 0x291   : > { %19094 = vmatpush3.bf16.msra.mxu1 %v22494_v52  ;;  %18835 = vmatprep.subr.bf16.mxu0 %v22495_v47 }
 0x292   : > { %18820 = vmatmul.mubr.bf16.gmra.mrb[24].mxu0 %v23620_v27  ;;  %19095 = vmatprep.subr.bf16.mxu1 %v22496_v53 }
 0x293   : > { %19080 = vmatmul.mubr.bf16.gmra.mrb[28].mxu1 %v25900_v33  ;;  %18823 = vmatprep.mubr.bf16.mxu0 %v23617_v24 }
 0x294   : > { %18836 = vmatpush3.bf16.msra.mxu0 %v22495_v47  ;;  %19099 = vmatprep.mubr.bf16.mxu1 %v23575_v12 }
 0x295   : > { %19096 = vmatpush3.bf16.msra.mxu1 %v22496_v53  ;;  %18837 = vmatprep.subr.bf16.mxu0 %v22497_v32 }
 0x296   : > { %19097 = vmatprep.subr.bf16.mxu1 %v22498_v6 }
 0x298   : > { %18838 = vmatpush3.bf16.msra.mxu0 %v22497_v32 }
 0x299   : > { %19098 = vmatpush3.bf16.msra.mxu1 %v22498_v6  ;;  %18839 = vmatprep.subr.bf16.mxu0 %v22499_v13  ;;  %v22521_v6 = vld [vmem:[#allocation8 + $0x248] sm:$0xff]  }
 0x29a   : > { %18824 = vmatmul.mubr.bf16.gmra.mrb[28].mxu0 %v23577_v15  ;;  %19115 = vmatprep.subr.bf16.mxu1 %v22500_v2 }
 0x29b   : > { %18843 = vmatprep.mubr.bf16.mxu0 %v23806_v23  ;;  %v22505_v23 = vld [vmem:[#allocation8 + $0x220] sm:$0xff]  }
 0x29c   : > { %19100 = vmatmul.mubr.bf16.vlgmr.msra.gmra.mrb[16].mxu1 %v23595_v48  ;;  %18840 = vmatpush3.bf16.msra.mxu0 %v22499_v13 }
 0x29d   : > { %19103 = vmatprep.mubr.bf16.mxu1 %v23593_v45  ;;  %19116 = vmatpush3.bf16.msra.mxu1 %v22500_v2 }
 0x29e   : > { %18841 = vmatprep.subr.bf16.mxu0 %v22501_v7  ;;  %19117 = vmatprep.subr.bf16.mxu1 %v22502_v3 }
 0x2a0   : > { %18842 = vmatpush3.bf16.msra.mxu0 %v22501_v7 }
 0x2a1   : > { %19118 = vmatpush3.bf16.msra.mxu1 %v22502_v3  ;;  %19147 = vmatprep.subr.bf16.mxu0 %v22509_v40 }
 0x2a2   : > { %19119 = vmatprep.subr.bf16.mxu1 %v22503_v39 }
 0x2a3   : > { %18844 = vmatmul.mubr.bf16.vlgmr.msra.gmra.mrb[16].mxu0 %v23810_v46  ;;  %v22507_v46 = vld [vmem:[#allocation8 + $0x230] sm:$0xff]  }
 0x2a4   : > { %19104 = vmatmul.mubr.bf16.gmra.mrb[20].mxu1 %v23614_v21  ;;  %18847 = vmatprep.mubr.bf16.mxu0 %v23838_v36  ;;  %v22513_v36 = vld [vmem:[#allocation8 + $0x2a0] sm:$0xff]  }
 0x2a5   : > { %19107 = vmatprep.mubr.bf16.mxu1 %v23612_v16  ;;  %19120 = vmatpush3.bf16.msra.mxu1 %v22503_v39 }
 0x2a6   : > { %19121 = vmatprep.subr.bf16.mxu1 %v22504_v1  ;;  %19148 = vmatpush3.bf16.msra.mxu0 %v22509_v40 }
 0x2a7   : > { %19149 = vmatprep.subr.bf16.mxu0 %v22510_v25 }
 0x2a9   : > { %19122 = vmatpush3.bf16.msra.mxu1 %v22504_v1 }
 0x2aa   : > { %19123 = vmatprep.subr.bf16.mxu1 %v22505_v23  ;;  %19150 = vmatpush3.bf16.msra.mxu0 %v22510_v25  ;;  %v22523_v25 = vld [vmem:[#allocation8 + $0x250] sm:$0xff]  }
 0x2ab   : > { %18848 = vmatmul.mubr.bf16.gmra.mrb[20].mxu0 %v23871_v4  ;;  %19151 = vmatprep.subr.bf16.mxu0 %v22511_v59  ;;  %v22515_v4 = vld [vmem:[#allocation8 + $0x2b0] sm:$0xff]  }
 0x2ac   : > { %19108 = vmatmul.mubr.bf16.gmra.mrb[24].mxu1 %v23649_v58  ;;  %18851 = vmatprep.mubr.bf16.mxu0 %v23879_v9  ;;  %v22516_v9 = vld [vmem:[#allocation8 + $0x280] sm:$0xff]  }
 0x2ad   : > { %19111 = vmatprep.mubr.bf16.mxu1 %v23644_v56  ;;  %19124 = vmatpush3.bf16.msra.mxu1 %v22505_v23  ;;  %v22556_v58 = vld [vmem:[#allocation8 + $0x2e0] sm:$0xff]  }
 0x2ae   : > { %19125 = vmatprep.subr.bf16.mxu1 %v22506_v5  ;;  %19152 = vmatpush3.bf16.msra.mxu0 %v22511_v59 }
 0x2af   : > { %19153 = vmatprep.subr.bf16.mxu0 %v22512_v26 }
 0x2b1   : > { %19126 = vmatpush3.bf16.msra.mxu1 %v22506_v5 }
 0x2b2   : > { %19127 = vmatprep.subr.bf16.mxu1 %v22507_v46  ;;  %19154 = vmatpush3.bf16.msra.mxu0 %v22512_v26 }
 0x2b3   : > { %18852 = vmatmul.mubr.bf16.gmra.mrb[24].mxu0 %v23899_v49  ;;  %19155 = vmatprep.subr.bf16.mxu0 %v22513_v36  ;;  %v22518_v49 = vld [vmem:[#allocation8 + $0x288] sm:$0xff]  }
 0x2b4   : > { %19112 = vmatmul.mubr.bf16.gmra.mrb[28].mxu1 %v25900_v33  ;;  %18855 = vmatprep.mubr.bf16.mxu0 %v23883_v22  ;;  %v22517_v22 = vld [vmem:[#allocation8 + $0x2b8] sm:$0xff]  }
 0x2b5   : > { %19128 = vmatpush3.bf16.msra.mxu1 %v22507_v46  ;;  %19131 = vmatprep.mubr.bf16.mxu1 %v23907_v41  ;;  %v22520_v41 = vld [vmem:[#allocation8 + $0x290] sm:$0xff]  }
 0x2b6   : > { %19129 = vmatprep.subr.bf16.mxu1 %v22508_v34  ;;  %19156 = vmatpush3.bf16.msra.mxu0 %v22513_v36 }
 0x2b7   : > { %19157 = vmatprep.subr.bf16.mxu0 %v22514_v42 }
 0x2b9   : > { %19130 = vmatpush3.bf16.msra.mxu1 %v22508_v34 }
 0x2ba   : > { %19158 = vmatpush3.bf16.msra.mxu0 %v22514_v42  ;;  %19467 = vmatprep.subr.bf16.mxu1 %v22516_v9  ;;  %v22525_v42 = vld [vmem:[#allocation8 + $0x258] sm:$0xff]  }
 0x2bb   : > { %18856 = vmatmul.mubr.bf16.gmra.mrb[28].mxu0 %v23903_v0  ;;  %19159 = vmatprep.subr.bf16.mxu0 %v22515_v4  ;;  %v22519_v0 = vld [vmem:[#allocation8 + $0x240] sm:$0xff]  }
 0x2bc   : > { %19132 = vmatmul.mubr.bf16.vlgmr.msra.gmra.mrb[16].mxu1 %v23925_v18  ;;  %19163 = vmatprep.mubr.bf16.mxu0 %v25900_v33  ;;  %v22522_v18 = vld [vmem:[#allocation8 + $0x298] sm:$0xff]  }
 0x2bd   : > { %19135 = vmatprep.mubr.bf16.mxu1 %v23929_v57  ;;  %19468 = vmatpush3.bf16.msra.mxu1 %v22516_v9  ;;  %v22524_v57 = vld [vmem:[#allocation8 + $0x2a0] sm:$0xff]  }
 0x2be   : > { %19160 = vmatpush3.bf16.msra.mxu0 %v22515_v4  ;;  %19469 = vmatprep.subr.bf16.mxu1 %v22518_v49 }
 0x2bf   : > { %19161 = vmatprep.subr.bf16.mxu0 %v22517_v22 }
 0x2c1   : > { %19470 = vmatpush3.bf16.msra.mxu1 %v22518_v49 }
 0x2c2   : > { %19162 = vmatpush3.bf16.msra.mxu0 %v22517_v22  ;;  %19471 = vmatprep.subr.bf16.mxu1 %v22520_v41 }
 0x2c3   : > { %19179 = vmatprep.subr.bf16.mxu0 %v22519_v0 }
 0x2c4   : > { %19136 = vmatmul.mubr.bf16.gmra.mrb[20].mxu1 %v23941_v43  ;;  %v22526_v43 = vld [vmem:[#allocation8 + $0x2a8] sm:$0xff]  }
 0x2c5   : > { %19139 = vmatprep.mubr.bf16.mxu1 %v23945_v44  ;;  %19472 = vmatpush3.bf16.msra.mxu1 %v22520_v41  ;;  %v22528_v44 = vld [vmem:[#allocation8 + $0x2b0] sm:$0xff]  }
 0x2c6   : > { %19473 = vmatprep.subr.bf16.mxu1 %v22522_v18 }
 0x2c9   : > { %19474 = vmatpush3.bf16.msra.mxu1 %v22522_v18 }
 0x2ca   : > { %19475 = vmatprep.subr.bf16.mxu1 %v22524_v57 }
 0x2cc   : > { %19140 = vmatmul.mubr.bf16.gmra.mrb[24].mxu1 %v23957_v14  ;;  %v22530_v14 = vld [vmem:[#allocation8 + $0x2b8] sm:$0xff]  }
 0x2cd   : > { %19143 = vmatprep.mubr.bf16.mxu1 %v24006_v10  ;;  %19476 = vmatpush3.bf16.msra.mxu1 %v22524_v57  ;;  %v24065_v10 = vld [vmem:[#allocation8 + $0x240] sm:$0xff]  }
 0x2ce   : > { %19477 = vmatprep.subr.bf16.mxu1 %v22526_v43  ;;  %v22527_v57 = vld [vmem:[#allocation8 + $0x260] sm:$0xff]  }
 0x2d1   : > { %19478 = vmatpush3.bf16.msra.mxu1 %v22526_v43 }
 0x2d2   : > { %19479 = vmatprep.subr.bf16.mxu1 %v22528_v44 }
 0x2d4   : > { %19144 = vmatmul.mubr.bf16.gmra.mrb[28].mxu1 %v25900_v33 }
 0x2d5   : > { %19480 = vmatpush3.bf16.msra.mxu1 %v22528_v44 }
 0x2d6   : > { %19481 = vmatprep.subr.bf16.mxu1 %v22530_v14 }
 0x2d9   : > { %19482 = vmatpush3.bf16.msra.mxu1 %v22530_v14 }
 0x2da   : > { %19499 = vmatprep.subr.bf16.mxu1 %v24065_v10 }
 0x376   : > { %v18845_v11 = vpop.f32.mrb[16].mxu0 }
 0x377   : > { %v2804_v63 = vadd.f32 %v18845_v11, %v24068_v38  ;;  %v2715_v31 = vpop.f32.mrb[17].mxu0 }
 0x378   : > { %v2802_v8 = vadd.f32 %v24068_v38, %v2715_v31  ;;  %v18846_v28 = vpop.f32.mrb[18].mxu0 }
 0x379   : > { %v2805_v29 = vadd.f32 %v18846_v28, %v24068_v38  ;;  %v2718_v19 = vpop.f32.mrb[19].mxu0  ;;  %v2820_v60 = vmax.f32 %v2804_v63, 0.0  ;;  %v22529_v28 = vld [vmem:[#allocation8 + $0x268] sm:$0xff]  }
 0x37a   : > { %v2803_v30 = vadd.f32 %v24068_v38, %v2718_v19  ;;  %v2818_v62 = vmax.f32 %v2802_v8, 0.0 }
 0x37b   : > { %v2821_v35 = vmax.f32 %v2805_v29, 0.0 }
 0x37c   : > { %v2819_v52 = vmax.f32 %v2803_v30, 0.0 }
 0x37d   : > { %v24074_v47 = vpack.c.bf16 %v2821_v35, %v2820_v60 }
 0x37e   : > { %v24076_v53 = vpack.c.bf16 %v2819_v52, %v2818_v62  ;;  %v18849_v32 = vpop.f32.mrb[20].mxu0 }
 0x37f   : > { %v2808_v13 = vadd.f32 %v18849_v32, %v24068_v38  ;;  %v2731_v2 = vpop.f32.mrb[21].mxu0 }
 0x380   : > { %v2806_v7 = vadd.f32 %v24068_v38, %v2731_v2  ;;  %v18850_v3 = vpop.f32.mrb[22].mxu0  ;;  %19164 = vmatmul.mubr.bf16.vlgmr.msra.gmra.mrb[32].mxu0 %v24076_v53 }
 0x381   : > { %v2809_v40 = vadd.f32 %v18850_v3, %v24068_v38  ;;  %v2734_v39 = vpop.f32.mrb[23].mxu0  ;;  %19167 = vmatprep.mubr.bf16.mxu0 %v24074_v47  ;;  %19180 = vmatpush3.bf16.msra.mxu0 %v22519_v0  ;;  %v2824_v23 = vmax.f32 %v2808_v13, 0.0 }
 0x382   : > { %v2807_v1 = vadd.f32 %v24068_v38, %v2734_v39  ;;  %19181 = vmatprep.subr.bf16.mxu0 %v22521_v6  ;;  %v2822_v5 = vmax.f32 %v2806_v7, 0.0  ;;  %v22531_v39 = vld [vmem:[#allocation8 + $0x270] sm:$0xff]  }
 0x383   : > { %v2825_v59 = vmax.f32 %v2809_v40, 0.0 }
 0x384   : > { %v2823_v26 = vmax.f32 %v2807_v1, 0.0  ;;  %v25768_v1 = vshrl.u32 %v24074_v47, 16 }
 0x385   : > { %v24084_v46 = vpack.c.bf16 %v2825_v59, %v2824_v23  ;;  %19182 = vmatpush3.bf16.msra.mxu0 %v22521_v6 }
 0x386   : > { %v24086_v36 = vpack.c.bf16 %v2823_v26, %v2822_v5  ;;  %v18853_v34 = vpop.f32.mrb[24].mxu0  ;;  %19183 = vmatprep.subr.bf16.mxu0 %v22523_v25 }
 0x387   : > { %v2812_v4 = vadd.f32 %v18853_v34, %v24068_v38  ;;  %v2747_v9 = vpop.f32.mrb[25].mxu0 }
 0x388   : > { %v2810_v22 = vadd.f32 %v24068_v38, %v2747_v9  ;;  %v18854_v49 = vpop.f32.mrb[26].mxu0  ;;  %19168 = vmatmul.mubr.bf16.gmra.mrb[36].mxu0 %v24086_v36 }
 0x389   : > { %v2813_v0 = vadd.f32 %v18854_v49, %v24068_v38  ;;  %v2750_v41 = vpop.f32.mrb[27].mxu0  ;;  %19171 = vmatprep.mubr.bf16.mxu0 %v24084_v46  ;;  %19184 = vmatpush3.bf16.msra.mxu0 %v22523_v25  ;;  %v2828_v43 = vmax.f32 %v2812_v4, 0.0  ;;  %v4564_v25 = vshrl.u32 %v24076_v53, 16 }
 0x38a   : > { %v2811_v18 = vadd.f32 %v24068_v38, %v2750_v41  ;;  %19185 = vmatprep.subr.bf16.mxu0 %v22525_v42  ;;  %v2826_v14 = vmax.f32 %v2810_v22, 0.0 }
 0x38b   : > { %v2829_v44 = vmax.f32 %v2813_v0, 0.0 }
 0x38c   : > { %v2827_v11 = vmax.f32 %v2811_v18, 0.0 }
 0x38d   : > { %v24094_v63 = vpack.c.bf16 %v2829_v44, %v2828_v43  ;;  %19186 = vmatpush3.bf16.msra.mxu0 %v22525_v42  ;;  %v22533_v43 = vld [vmem:[#allocation8 + $0x278] sm:$0xff]   ;;  %v22534_v44 = vld [vmem:[#allocation8 + $0x248] sm:$0xff]  }
 0x38e   : > { %v24096_v31 = vpack.c.bf16 %v2827_v11, %v2826_v14  ;;  %v18857_v8 = vpop.f32.mrb[28].mxu0  ;;  %19187 = vmatprep.subr.bf16.mxu0 %v22527_v57  ;;  %v4566_v14 = vrot.slane %v4564_v25, 7 }
 0x38f   : > { %v2816_v29 = vadd.f32 %v18857_v8, %v24068_v38  ;;  %v19133_v19 = vpop.f32.mrb[16].mxu1  ;;  %v2763_v30 = vpop.f32.mrb[29].mxu0  ;;  %v25910_v48 = vshrl.u32 %v24094_v63, 16 }
 0x390   : > { %v4501_v60 = vadd.f32 %v19133_v19, %v24068_v38  ;;  %v2814_v35 = vadd.f32 %v24068_v38, %v2763_v30  ;;  %v4413_v62 = vpop.f32.mrb[17].mxu1  ;;  %v18858_v52 = vpop.f32.mrb[30].mxu0  ;;  %19172 = vmatmul.mubr.bf16.gmra.mrb[40].mxu0 %v24096_v31  ;;  %v4567_v30 = vshll.u32 %v24076_v53, 16  ;;  %v25906_v21 = vshll.u32 %v24096_v31, 16 }
 0x391   : > { %v4499_v32 = vadd.f32 %v24068_v38, %v4413_v62  ;;  %v2817_v6 = vadd.f32 %v18858_v52, %v24068_v38  ;;  %v19134_v13 = vpop.f32.mrb[18].mxu1  ;;  %v2766_v2 = vpop.f32.mrb[31].mxu0  ;;  %19175 = vmatprep.mubr.bf16.mxu0 %v24094_v63  ;;  %19188 = vmatpush3.bf16.msra.mxu0 %v22527_v57  ;;  %v2832_v23 = vmax.f32 %v2816_v29, 0.0  ;;  %v22535_v62 = vld [vmem:[#allocation8 + $0x2c0] sm:$0xff]   ;;  %v4574_v52 = vshll.u32 %v24074_v47, 16 }
 0x392   : > { %v4502_v7 = vadd.f32 %v19134_v13, %v24068_v38  ;;  %v2815_v3 = vadd.f32 %v24068_v38, %v2766_v2  ;;  %v4416_v40 = vpop.f32.mrb[19].mxu1  ;;  %19189 = vmatprep.subr.bf16.mxu0 %v22529_v28  ;;  %v4517_v26 = vmax.f32 %v4501_v60, 0.0  ;;  %v2830_v34 = vmax.f32 %v2814_v35, 0.0  ;;  %v22536_v13 = vld [vmem:[#allocation8 + $0x250] sm:$0xff]  }
 0x393   : > { %v2833_v59 = vmax.f32 %v2817_v6, 0.0  ;;  %v4500_v5 = vadd.f32 %v24068_v38, %v4416_v40  ;;  %v4515_v9 = vmax.f32 %v4499_v32, 0.0  ;;  %v4569_v6 = vor.u32 %v4567_v30, %v4566_v14 }
 0x394   : > { %v4518_v42 = vmax.f32 %v4502_v7, 0.0  ;;  %v2831_v4 = vmax.f32 %v2815_v3, 0.0  ;;  %v25765_v2 = vshrl.u32 %v24086_v36, 16  ;;  %v25763_v40 = vshrl.u32 %v24084_v46, 16 }
 0x395   : > { %v24110_v22 = vpack.c.bf16 %v2833_v59, %v2832_v23  ;;  %v4516_v49 = vmax.f32 %v4500_v5, 0.0  ;;  %19190 = vmatpush3.bf16.msra.mxu0 %v22529_v28  ;;  %v4573_v28 = vrot.slane %v25768_v1, 7 }
 0x396   : > { %v24112_v0 = vpack.c.bf16 %v4518_v42, %v4517_v26  ;;  %v24114_v41 = vpack.c.bf16 %v2831_v4, %v2830_v34  ;;  %19191 = vmatprep.subr.bf16.mxu0 %v22531_v39  ;;  %v24146_v34 = vsel %vm23640_vm3, 0, %v4569_v6  ;;  %v22537_v42 = vld [vmem:[#allocation8 + $0x2c8] sm:$0xff]   ;;  %v4580_v4 = vrot.slane %v25765_v2, 7 }
 0x397   : > { %v24116_v18 = vpack.c.bf16 %v4516_v49, %v4515_v9  ;;  %v19137_v57 = vpop.f32.mrb[20].mxu1  ;;  %19483 = vmatprep.mubr.bf16.mxu1 %v24110_v22  ;;  %v25762_v6 = vshrl.u32 %v24096_v31, 16 }
 0x398   : > { %v4505_v11 = vadd.f32 %v19137_v57, %v24068_v38  ;;  %v4429_v8 = vpop.f32.mrb[21].mxu1  ;;  %19176 = vmatmul.mubr.bf16.gmra.mrb[44].mxu0 %v24114_v41 }
 0x399   : > { %v4503_v29 = vadd.f32 %v24068_v38, %v4429_v8  ;;  %v19138_v19 = vpop.f32.mrb[22].mxu1  ;;  %19484 = vmatmul.mubr.bf16.vlgmr.msra.gmra.mrb[32].mxu1 %v24116_v18  ;;  %19192 = vmatpush3.bf16.msra.mxu0 %v22531_v39  ;;  %v25767_v8 = vshll.u32 %v24086_v36, 16 }
 0x39a   : > { %v4506_v60 = vadd.f32 %v19138_v19, %v24068_v38  ;;  %v4432_v35 = vpop.f32.mrb[23].mxu1  ;;  %19487 = vmatprep.mubr.bf16.mxu1 %v24112_v0  ;;  %19500 = vmatpush3.bf16.msra.mxu1 %v24065_v10  ;;  %v4521_v7 = vmax.f32 %v4505_v11, 0.0  ;;  %v4576_v10 = vor.u32 %v4574_v52, %v4573_v28  ;;  %v25766_v19 = vshll.u32 %v24084_v46, 16 }
 0x39b   : > { %v4504_v32 = vadd.f32 %v24068_v38, %v4432_v35  ;;  %19193 = vmatprep.subr.bf16.mxu0 %v22533_v43  ;;  %19501 = vmatprep.subr.bf16.mxu1 %v22534_v44  ;;  %v4519_v39 = vmax.f32 %v4503_v29, 0.0  ;;  %v4583_v35 = vor.u32 %v25767_v8, %v4580_v4 }
 0x39c   : > { %v4522_v3 = vmax.f32 %v4506_v60, 0.0  ;;  %19195 = vmatprep.mubr.bf16.mxu0 %v25900_v33  ;;  %v24154_v57 = vsel %vm23640_vm3, 0, %v4576_v10  ;;  %v22540_v10 = vld [vmem:[#allocation8 + $0x260] sm:$0xff]  }
 0x39d   : > { %v4520_v23 = vmax.f32 %v4504_v32, 0.0  ;;  %19194 = vmatpush3.bf16.msra.mxu0 %v22533_v43  ;;  %v22538_v43 = vld [vmem:[#allocation8 + $0x258] sm:$0xff]   ;;  %v22539_v32 = vld [vmem:[#allocation8 + $0x2d0] sm:$0xff]  }
 0x39e   : > { %v24140_v59 = vpack.c.bf16 %v4522_v3, %v4521_v7  ;;  %19502 = vmatpush3.bf16.msra.mxu1 %v22534_v44  ;;  %19211 = vmatprep.subr.bf16.mxu0 %v22535_v62  ;;  %v4587_v44 = vrot.slane %v25763_v40, 7  ;;  %v25780_v40 = vshll.u32 %v24110_v22, 16 }
 0x39f   : > { %v24142_v5 = vpack.c.bf16 %v4520_v23, %v4519_v39  ;;  %v19141_v26 = vpop.f32.mrb[24].mxu1  ;;  %19503 = vmatprep.subr.bf16.mxu1 %v22536_v13  ;;  %v25761_v39 = vshrl.u32 %v24094_v63, 16 }
 0x3a0   : > { %v4509_v9 = vadd.f32 %v19141_v26, %v24068_v38  ;;  %v4445_v49 = vpop.f32.mrb[25].mxu1  ;;  %19196 = vmatmul.mubr.bf16.vlgmr.msra.gmra.mrb[32].mxu0 %v24146_v34 }
 0x3a1   : > { %v4507_v14 = vadd.f32 %v24068_v38, %v4445_v49  ;;  %v19142_v11 = vpop.f32.mrb[26].mxu1  ;;  %19488 = vmatmul.mubr.bf16.gmra.mrb[36].mxu1 %v24142_v5  ;;  %19199 = vmatprep.mubr.bf16.mxu0 %v24154_v57 }
 0x3a2   : > { %v4510_v28 = vadd.f32 %v19142_v11, %v24068_v38  ;;  %v4448_v29 = vpop.f32.mrb[27].mxu1  ;;  %19212 = vmatpush3.bf16.msra.mxu0 %v22535_v62  ;;  %19491 = vmatprep.mubr.bf16.mxu1 %v24140_v59  ;;  %v4525_v7 = vmax.f32 %v4509_v9, 0.0  ;;  %v4590_v62 = vor.u32 %v25766_v19, %v4587_v44  ;;  %v24179_v9 = vsel %vm23640_vm3, 0, %v4583_v35 }
 0x3a3   : > { %v4508_v60 = vadd.f32 %v24068_v38, %v4448_v29  ;;  %19504 = vmatpush3.bf16.msra.mxu1 %v22536_v13  ;;  %19213 = vmatprep.subr.bf16.mxu0 %v22537_v42  ;;  %v4523_v23 = vmax.f32 %v4507_v14, 0.0  ;;  %v25764_v13 = vshrl.u32 %v24110_v22, 16  ;;  %v4594_v44 = vrot.slane %v25762_v6, 7  ;;  %v22543_v6 = vld [vmem:[#allocation8 + $0x2e0] sm:$0xff]  }
 0x3a4   : > { %v4526_v3 = vmax.f32 %v4510_v28, 0.0  ;;  %19505 = vmatprep.subr.bf16.mxu1 %v22538_v43  ;;  %v22541_v28 = vld [vmem:[#allocation8 + $0x2d8] sm:$0xff]  }
 0x3a5   : > { %v4524_v26 = vmax.f32 %v4508_v60, 0.0  ;;  %v4601_v60 = vrot.slane %v25761_v39, 7 }
 0x3a6   : > { %v24173_v49 = vpack.c.bf16 %v4526_v3, %v4525_v7  ;;  %19214 = vmatpush3.bf16.msra.mxu0 %v22537_v42  ;;  %v24187_v42 = vsel %vm23640_vm3, 0, %v4590_v62  ;;  %v25769_v3 = vshll.u32 %v24096_v31, 16 }
 0x3a7   : > { %v24175_v4 = vpack.c.bf16 %v4524_v26, %v4523_v23  ;;  %19506 = vmatpush3.bf16.msra.mxu1 %v22538_v43  ;;  %v19145_v11 = vpop.f32.mrb[28].mxu1  ;;  %19215 = vmatprep.subr.bf16.mxu0 %v22539_v32  ;;  %v22542_v43 = vld [vmem:[#allocation8 + $0x268] sm:$0xff]   ;;  %v4615_v23 = vrot.slane %v25764_v13, 7  ;;  %v25772_v13 = vshrl.u32 %v24114_v41, 16 }
 0x3a8   : > { %v4513_v14 = vadd.f32 %v19145_v11, %v24068_v38  ;;  %v4461_v29 = vpop.f32.mrb[29].mxu1  ;;  %19200 = vmatmul.mubr.bf16.gmra.mrb[36].mxu0 %v24179_v9  ;;  %19507 = vmatprep.subr.bf16.mxu1 %v22540_v10  ;;  %v25781_v11 = vshll.u32 %v24094_v63, 16  ;;  %v4597_v39 = vor.u32 %v25769_v3, %v4594_v44  ;;  %v25790_v56 = vshll.u32 %v24173_v49, 16 }
 0x3a9   : > { %v4511_v35 = vadd.f32 %v24068_v38, %v4461_v29  ;;  %v19146_v7 = vpop.f32.mrb[30].mxu1  ;;  %19492 = vmatmul.mubr.bf16.gmra.mrb[40].mxu1 %v24175_v4  ;;  %19203 = vmatprep.mubr.bf16.mxu0 %v24187_v42 }
 0x3aa   : > { %v4514_v26 = vadd.f32 %v19146_v7, %v24068_v38  ;;  %v4464_v62 = vpop.f32.mrb[31].mxu1  ;;  %19216 = vmatpush3.bf16.msra.mxu0 %v22539_v32  ;;  %19495 = vmatprep.mubr.bf16.mxu1 %v24173_v49  ;;  %v4529_v2 = vmax.f32 %v4513_v14, 0.0  ;;  %v22544_v32 = vld [vmem:[#allocation8 + $0x270] sm:$0xff]   ;;  %v4604_v19 = vor.u32 %v25781_v11, %v4601_v60  ;;  %v24217_v14 = vsel %vm23640_vm3, 0, %v4597_v39  ;;  %v22545_v60 = vld [vmem:[#allocation8 + $0x2e8] sm:$0xff]  }
 0x3ab   : > { %v4512_v29 = vadd.f32 %v24068_v38, %v4464_v62  ;;  %19508 = vmatpush3.bf16.msra.mxu1 %v22540_v10  ;;  %19217 = vmatprep.subr.bf16.mxu0 %v22541_v28  ;;  %v4527_v8 = vmax.f32 %v4511_v35, 0.0  ;;  %v4618_v38 = vor.u32 %v25780_v40, %v4615_v23  ;;  %v25770_v10 = vshrl.u32 %v24116_v18, 16 }
 0x3ac   : > { %v4530_v7 = vmax.f32 %v4514_v26, 0.0  ;;  %19509 = vmatprep.subr.bf16.mxu1 %v22542_v43  ;;  %v25771_v62 = vshrl.u32 %v24112_v0, 16  ;;  %v4608_v35 = vrot.slane %v25772_v13, 7  ;;  %v25774_v39 = vshll.u32 %v24114_v41, 16 }
 0x3ad   : > { %v4528_v1 = vmax.f32 %v4512_v29, 0.0  ;;  %v25783_v40 = vshrl.u32 %v24175_v4, 16  ;;  %v25787_v11 = vshrl.u32 %v24173_v49, 16 }
 0x3ae   : > { %v24210_v44 = vpack.c.bf16 %v4530_v7, %v4529_v2  ;;  %19218 = vmatpush3.bf16.msra.mxu0 %v22541_v28  ;;  %v24224_v2 = vsel %vm23640_vm3, 0, %v4604_v19  ;;  %v22546_v28 = vld [vmem:[#allocation8 + $0x278] sm:$0xff]   ;;  %v4629_v19 = vrot.slane %v25771_v62, 7  ;;  %v4611_v29 = vor.u32 %v25774_v39, %v4608_v35  ;;  %v22547_v7 = vld [vmem:[#allocation8 + $0x2f0] sm:$0xff]  }
 0x3af   : > { %v24213_v3 = vpack.c.bf16 %v4528_v1, %v4527_v8  ;;  %19510 = vmatpush3.bf16.msra.mxu1 %v22542_v43  ;;  %19219 = vmatprep.subr.bf16.mxu0 %v22543_v6  ;;  %v24231_v8 = vsel %vm23640_vm3, 0, %v4618_v38  ;;  %v4622_v43 = vrot.slane %v25770_v10, 7  ;;  %v25778_v38 = vshll.u32 %v24116_v18, 16 }
 0x3b0   : > { %19204 = vmatmul.mubr.bf16.gmra.mrb[40].mxu0 %v24217_v14  ;;  %19511 = vmatprep.subr.bf16.mxu1 %v22544_v32  ;;  %v25773_v1 = vshll.u32 %v24210_v44, 16  ;;  %v25775_v23 = vshrl.u32 %v24210_v44, 16  ;;  %v25776_v10 = vshll.u32 %v24112_v0, 16  ;;  %v24258_v39 = vsel %vm23640_vm3, 0, %v4611_v29 }
 0x3b1   : > { %19496 = vmatmul.mubr.bf16.gmra.mrb[44].mxu1 %v24213_v3  ;;  %19207 = vmatprep.mubr.bf16.mxu0 %v24224_v2  ;;  %v4625_v13 = vor.u32 %v25778_v38, %v4622_v43  ;;  %v4739_v43 = vrot.slane %v4567_v30, 1  ;;  %v25901_v38 = vshrl.u32 %v24074_v47, 16  ;;  %v25791_v16 = vshrl.u32 %v24213_v3, 16 }
 0x3b2   : > { %19220 = vmatpush3.bf16.msra.mxu0 %v22543_v6  ;;  %19515 = vmatprep.mubr.bf16.mxu1 %v24231_v8  ;;  %v4769_v26 = vrot.slane %v25773_v1, 1  ;;  %v22548_v6 = vld [vmem:[#allocation8 + $0x2c0] sm:$0xff]   ;;  %v4632_v35 = vor.u32 %v25776_v10, %v4629_v19  ;;  %v25779_v1 = vshrl.u32 %v24140_v59, 16  ;;  %v4741_v19 = vrot.slane %v4574_v52, 1 }
 0x3b3   : > { %19512 = vmatpush3.bf16.msra.mxu1 %v22544_v32  ;;  %19221 = vmatprep.subr.bf16.mxu0 %v22545_v60  ;;  %v25777_v32 = vshrl.u32 %v24142_v5, 16  ;;  %v25782_v10 = vshll.u32 %v24142_v5, 16  ;;  %v4740_v52 = vor.u32 %v4739_v43, %v4564_v25  ;;  %v22553_v43 = vld [vmem:[#allocation8 + $0x308] sm:$0xff]  }
 0x3b4   : > { %19513 = vmatprep.subr.bf16.mxu1 %v22546_v28  ;;  %v24248_v62 = vor.u32 %v4769_v26, %v25775_v23  ;;  %v22549_v26 = vld [vmem:[#allocation8 + $0x2f8] sm:$0xff]   ;;  %v22550_v23 = vld [vmem:[#allocation8 + $0x2c8] sm:$0xff]   ;;  %v24275_v29 = vsel %vm23640_vm3, 0, %v4632_v35  ;;  %v4643_v30 = vrot.slane %v25779_v1, 7  ;;  %v4742_v1 = vor.u32 %v4741_v19, %v25901_v38 }
 0x3b5   : > { %v24294_v25 = vsel %vm23724_vm6, %v4740_v52, 0  ;;  %v4650_v19 = vrot.slane %v25783_v40, 7 }
 0x3b6   : > { %19222 = vmatpush3.bf16.msra.mxu0 %v22545_v60  ;;  %v24265_v60 = vsel %vm23640_vm3, 0, %v4625_v13  ;;  %v22551_v13 = vld [vmem:[#allocation8 + $0x300] sm:$0xff]  }
 0x3b7   : > { %19514 = vmatpush3.bf16.msra.mxu1 %v22546_v28  ;;  %19223 = vmatprep.subr.bf16.mxu0 %v22547_v7  ;;  %v4636_v28 = vrot.slane %v25777_v32, 7  ;;  %v22552_v32 = vld [vmem:[#allocation8 + $0x2d0] sm:$0xff]  }
 0x3b8   : > { %19208 = vmatmul.mubr.bf16.gmra.mrb[44].mxu0 %v24258_v39  ;;  %19531 = vmatprep.subr.bf16.mxu1 %v22548_v6 }
 0x3b9   : > { %19227 = vmatprep.mubr.bf16.mxu0 %v25900_v33  ;;  %v4639_v35 = vor.u32 %v25782_v10, %v4636_v28  ;;  %v25902_v28 = vshll.u32 %v24086_v36, 16 }
 0x3ba   : > { %19516 = vmatmul.mubr.bf16.vlgmr.msra.gmra.mrb[32].mxu1 %v24265_v60  ;;  %19224 = vmatpush3.bf16.msra.mxu0 %v22547_v7  ;;  %v25784_v7 = vshll.u32 %v24140_v59, 16 }
 0x3bb   : > { %19519 = vmatprep.mubr.bf16.mxu1 %v24275_v29  ;;  %19532 = vmatpush3.bf16.msra.mxu1 %v22548_v6  ;;  %v4743_v10 = vrot.slane %v25902_v28, 1  ;;  %v24301_v38 = vsel %vm23640_vm3, 0, %v4639_v35  ;;  %v4657_v35 = vrot.slane %v25787_v11, 7  ;;  %v25905_v11 = vshrl.u32 %v24084_v46, 16 }
 0x3bc   : > { %19225 = vmatprep.subr.bf16.mxu0 %v22549_v26  ;;  %19533 = vmatprep.subr.bf16.mxu1 %v22550_v23  ;;  %v4646_v6 = vor.u32 %v25784_v7, %v4643_v30  ;;  %v25903_v30 = vshll.u32 %v24084_v46, 16  ;;  %v22555_v7 = vld [vmem:[#allocation8 + $0x310] sm:$0xff]  }
 0x3be   : > { %19226 = vmatpush3.bf16.msra.mxu0 %v22549_v26  ;;  %v24305_v26 = vsel %vm23724_vm6, %v4742_v1, 0  ;;  %v4745_v52 = vrot.slane %v25903_v30, 1  ;;  %v24315_v28 = vsel %vm23640_vm3, 0, %v4646_v6  ;;  %v25792_v1 = vshll.u32 %v24175_v4, 16 }
 0x3bf   : > { %19534 = vmatpush3.bf16.msra.mxu1 %v22550_v23  ;;  %19243 = vmatprep.subr.bf16.mxu0 %v22551_v13  ;;  %v22554_v23 = vld [vmem:[#allocation8 + $0x2d8] sm:$0xff]   ;;  %v25904_v30 = vshrl.u32 %v24086_v36, 16 }
 0x3c0   : > { %19535 = vmatprep.subr.bf16.mxu1 %v22552_v32  ;;  %v4653_v6 = vor.u32 %v25792_v1, %v4650_v19  ;;  %v4747_v19 = vrot.slane %v25906_v21, 1  ;;  %v22559_v1 = vld [vmem:[#allocation8 + $0x320] sm:$0xff]  }
 0x3c1   : > { %19228 = vmatmul.mubr.bf16.vlgmr.msra.gmra.mrb[32].mxu0 %v24294_v25  ;;  %v4744_v40 = vor.u32 %v4743_v10, %v25904_v30  ;;  %v22557_v30 = vld [vmem:[#allocation8 + $0x318] sm:$0xff]  }
 0x3c2   : > { %19520 = vmatmul.mubr.bf16.gmra.mrb[36].mxu1 %v24301_v38  ;;  %19231 = vmatprep.mubr.bf16.mxu0 %v24305_v26 }
 0x3c3   : > { %19244 = vmatpush3.bf16.msra.mxu0 %v22551_v13  ;;  %19523 = vmatprep.mubr.bf16.mxu1 %v24315_v28  ;;  %v4746_v13 = vor.u32 %v4745_v52, %v25905_v11  ;;  %v24333_v10 = vsel %vm23724_vm6, %v4744_v40, 0  ;;  %v24340_v11 = vsel %vm23640_vm3, 0, %v4653_v6  ;;  %v4664_v40 = vrot.slane %v25791_v16, 7 }
 0x3c4   : > { %19536 = vmatpush3.bf16.msra.mxu1 %v22552_v32  ;;  %19245 = vmatprep.subr.bf16.mxu0 %v22553_v43  ;;  %v4660_v32 = vor.u32 %v25790_v56, %v4657_v35  ;;  %v25907_v52 = vshll.u32 %v24094_v63, 16  ;;  %v25908_v6 = vshll.u32 %v24110_v22, 16 }
 0x3c5   : > { %19537 = vmatprep.subr.bf16.mxu1 %v22554_v23 }
 0x3c6   : > { %v4749_v35 = vrot.slane %v25907_v52, 1  ;;  %v24354_v21 = vsel %vm23640_vm3, 0, %v4660_v32  ;;  %v4753_v56 = vrot.slane %v25908_v6, 1  ;;  %v25909_v52 = vshrl.u32 %v24096_v31, 16  ;;  %v22560_v32 = vld [vmem:[#allocation8 + $0x2f0] sm:$0xff]  }
 0x3c7   : > { %19246 = vmatpush3.bf16.msra.mxu0 %v22553_v43  ;;  %v24344_v43 = vsel %vm23724_vm6, %v4746_v13, 0  ;;  %v25797_v13 = vshll.u32 %v24213_v3, 16 }
 0x3c8   : > { %19538 = vmatpush3.bf16.msra.mxu1 %v22554_v23  ;;  %19247 = vmatprep.subr.bf16.mxu0 %v22555_v7  ;;  %v22558_v23 = vld [vmem:[#allocation8 + $0x2e8] sm:$0xff]   ;;  %v4748_v16 = vor.u32 %v4747_v19, %v25909_v52  ;;  %v4750_v12 = vor.u32 %v4749_v35, %v25910_v48  ;;  %v25912_v52 = vshll.u32 %v24114_v41, 16 }
 0x3c9   : > { %19232 = vmatmul.mubr.bf16.gmra.mrb[36].mxu0 %v24333_v10  ;;  %19539 = vmatprep.subr.bf16.mxu1 %v22556_v58  ;;  %v4667_v45 = vor.u32 %v25797_v13, %v4664_v40  ;;  %v22561_v19 = vld [vmem:[#allocation8 + $0x328] sm:$0xff]   ;;  %v22564_v13 = vld [vmem:[#allocation8 + $0x300] sm:$0xff]  }
 0x3ca   : > { %19524 = vmatmul.mubr.bf16.gmra.mrb[40].mxu1 %v24340_v11  ;;  %19235 = vmatprep.mubr.bf16.mxu0 %v24344_v43  ;;  %v4751_v24 = vrot.slane %v25912_v52, 1  ;;  %v24381_v48 = vsel %vm23724_vm6, %v4750_v12, 0  ;;  %v25915_v12 = vshrl.u32 %v24114_v41, 16  ;;  %v22563_v52 = vld [vmem:[#allocation8 + $0x330] sm:$0xff]  }
 0x3cb   : > { %19248 = vmatpush3.bf16.msra.mxu0 %v22555_v7  ;;  %19527 = vmatprep.mubr.bf16.mxu1 %v24354_v21  ;;  %v25911_v7 = vshrl.u32 %v24110_v22, 16  ;;  %v24377_v40 = vsel %vm23640_vm3, 0, %v4667_v45  ;;  %v25914_v45 = vshll.u32 %v24112_v0, 16 }
 0x3cc   : > { %19540 = vmatpush3.bf16.msra.mxu1 %v22556_v58  ;;  %19249 = vmatprep.subr.bf16.mxu0 %v22557_v30  ;;  %v24370_v58 = vsel %vm23724_vm6, %v4748_v16, 0 }
 0x3cd   : > { %19541 = vmatprep.subr.bf16.mxu1 %v22558_v23  ;;  %v4754_v6 = vor.u32 %v4753_v56, %v25911_v7  ;;  %v22562_v56 = vld [vmem:[#allocation8 + $0x2f8] sm:$0xff]   ;;  %v4757_v35 = vrot.slane %v25914_v45, 1  ;;  %v4752_v7 = vor.u32 %v4751_v24, %v25915_v12 }
 0x3ce   : > { %v22565_v24 = vld [vmem:[#allocation8 + $0x338] sm:$0xff]  }
 0x3cf   : > { %19250 = vmatpush3.bf16.msra.mxu0 %v22557_v30  ;;  %v24387_v16 = vsel %vm23724_vm6, %v4754_v6, 0  ;;  %v25913_v30 = vshll.u32 %v24116_v18, 16  ;;  %v25916_v6 = vshrl.u32 %v24116_v18, 16  ;;  %v24402_v27 = vsel %vm23724_vm6, %v4752_v7, 0 }
 0x3d0   : > { %19542 = vmatpush3.bf16.msra.mxu1 %v22558_v23  ;;  %19251 = vmatprep.subr.bf16.mxu0 %v22559_v1  ;;  %v25920_v7 = vshrl.u32 %v24142_v5, 16 }
 0x3d1   : > { %19236 = vmatmul.mubr.bf16.gmra.mrb[40].mxu0 %v24370_v58  ;;  %19543 = vmatprep.subr.bf16.mxu1 %v22560_v32  ;;  %v4755_v23 = vrot.slane %v25913_v30, 1  ;;  %v25917_v30 = vshrl.u32 %v24112_v0, 16 }
 0x3d2   : > { %19528 = vmatmul.mubr.bf16.gmra.mrb[44].mxu1 %v24377_v40  ;;  %19239 = vmatprep.mubr.bf16.mxu0 %v24381_v48 }
 0x3d3   : > { %19252 = vmatpush3.bf16.msra.mxu0 %v22559_v1  ;;  %19547 = vmatprep.mubr.bf16.mxu1 %v24387_v16  ;;  %v4756_v15 = vor.u32 %v4755_v23, %v25916_v6  ;;  %v4758_v1 = vor.u32 %v4757_v35, %v25917_v30  ;;  %v25919_v35 = vshll.u32 %v24140_v59, 16 }
 0x3d4   : > { %19544 = vmatpush3.bf16.msra.mxu1 %v22560_v32  ;;  %19253 = vmatprep.subr.bf16.mxu0 %v22561_v19  ;;  %v22566_v32 = vld [vmem:[#allocation8 + $0x308] sm:$0xff]  }
 0x3d5   : > { %19545 = vmatprep.subr.bf16.mxu1 %v22562_v56  ;;  %v24407_v45 = vsel %vm23724_vm6, %v4756_v15, 0  ;;  %v4761_v12 = vrot.slane %v25919_v35, 1  ;;  %v22567_v15 = vld [vmem:[#allocation8 + $0x340] sm:$0xff]   ;;  %v25922_v35 = vshll.u32 %v24175_v4, 16 }
 0x3d7   : > { %19254 = vmatpush3.bf16.msra.mxu0 %v22561_v19  ;;  %v25918_v19 = vshll.u32 %v24142_v5, 16  ;;  %v4763_v50 = vrot.slane %v25922_v35, 1  ;;  %v25925_v35 = vshrl.u32 %v24173_v49, 16 }
 0x3d8   : > { %19546 = vmatpush3.bf16.msra.mxu1 %v22562_v56  ;;  %19255 = vmatprep.subr.bf16.mxu0 %v22563_v52  ;;  %v24415_v56 = vsel %vm23724_vm6, %v4758_v1, 0  ;;  %v22569_v1 = vld [vmem:[#allocation8 + $0x348] sm:$0xff]  }
 0x3d9   : > { %19240 = vmatmul.mubr.bf16.gmra.mrb[44].mxu0 %v24402_v27  ;;  %19563 = vmatprep.subr.bf16.mxu1 %v22564_v13  ;;  %v4759_v23 = vrot.slane %v25918_v19, 1  ;;  %v22570_v19 = vld [vmem:[#allocation8 + $0x318] sm:$0xff]  }
 0x3da   : > { %19259 = vmatprep.mubr.bf16.mxu0 %v24146_v34  ;;  %v22568_v34 = vld [vmem:[#allocation8 + $0x310] sm:$0xff]  }
 0x3db   : > { %19548 = vmatmul.mubr.bf16.vlgmr.msra.gmra.mrb[32].mxu1 %v24407_v45  ;;  %19256 = vmatpush3.bf16.msra.mxu0 %v22563_v52  ;;  %v4760_v6 = vor.u32 %v4759_v23, %v25920_v7  ;;  %v25921_v52 = vshrl.u32 %v24140_v59, 16  ;;  %v25924_v7 = vshrl.u32 %v24175_v4, 16 }
 0x3dc   : > { %19551 = vmatprep.mubr.bf16.mxu1 %v24415_v56  ;;  %19564 = vmatpush3.bf16.msra.mxu1 %v22564_v13 }
 0x3dd   : > { %19257 = vmatprep.subr.bf16.mxu0 %v22565_v24  ;;  %19565 = vmatprep.subr.bf16.mxu1 %v22566_v32  ;;  %v4762_v30 = vor.u32 %v4761_v12, %v25921_v52  ;;  %v24427_v13 = vsel %vm23724_vm6, %v4760_v6, 0  ;;  %v22571_v12 = vld [vmem:[#allocation8 + $0x350] sm:$0xff]   ;;  %v4764_v6 = vor.u32 %v4763_v50, %v25924_v7  ;;  %v22572_v52 = vld [vmem:[#allocation8 + $0x320] sm:$0xff]  }
 0x3de   : > { %v22576_v7 = vld [vmem:[#allocation8 + $0x330] sm:$0xff]  }
 0x3df   : > { %19258 = vmatpush3.bf16.msra.mxu0 %v22565_v24  ;;  %v24435_v24 = vsel %vm23724_vm6, %v4762_v30, 0  ;;  %v22573_v30 = vld [vmem:[#allocation8 + $0x358] sm:$0xff]  }
 0x3e0   : > { %19566 = vmatpush3.bf16.msra.mxu1 %v22566_v32  ;;  %19275 = vmatprep.subr.bf16.mxu0 %v22567_v15  ;;  %v25923_v32 = vshll.u32 %v24173_v49, 16 }
 0x3e1   : > { %19567 = vmatprep.subr.bf16.mxu1 %v22568_v34 }
 0x3e2   : > { %19260 = vmatmul.mubr.bf16.vlgmr.msra.gmra.mrb[32].mxu0 %v24154_v57  ;;  %v4765_v23 = vrot.slane %v25923_v32, 1  ;;  %v25926_v32 = vshll.u32 %v24213_v3, 16 }
 0x3e3   : > { %19552 = vmatmul.mubr.bf16.gmra.mrb[36].mxu1 %v24427_v13  ;;  %19263 = vmatprep.mubr.bf16.mxu0 %v24179_v9 }
 0x3e4   : > { %19276 = vmatpush3.bf16.msra.mxu0 %v22567_v15  ;;  %19555 = vmatprep.mubr.bf16.mxu1 %v24435_v24  ;;  %v4766_v54 = vor.u32 %v4765_v23, %v25925_v35  ;;  %v24447_v15 = vsel %vm23724_vm6, %v4764_v6, 0  ;;  %v4767_v17 = vrot.slane %v25926_v32, 1  ;;  %v22577_v6 = vld [vmem:[#allocation8 + $0x368] sm:$0xff]   ;;  %v22581_v35 = vld [vmem:[#allocation8 + $0x378] sm:$0xff]   ;;  %v22584_v32 = vld [vmem:[#allocation8 + $0x350] sm:$0xff]  }
 0x3e5   : > { %19568 = vmatpush3.bf16.msra.mxu1 %v22568_v34  ;;  %19277 = vmatprep.subr.bf16.mxu0 %v22569_v1  ;;  %v22574_v34 = vld [vmem:[#allocation8 + $0x328] sm:$0xff]  }
 0x3e6   : > { %19569 = vmatprep.subr.bf16.mxu1 %v22570_v19  ;;  %v24455_v50 = vsel %vm23724_vm6, %v4766_v54, 0 }
 0x3e8   : > { %19278 = vmatpush3.bf16.msra.mxu0 %v22569_v1  ;;  %v22575_v1 = vld [vmem:[#allocation8 + $0x360] sm:$0xff]  }
 0x3e9   : > { %19570 = vmatpush3.bf16.msra.mxu1 %v22570_v19  ;;  %19279 = vmatprep.subr.bf16.mxu0 %v22571_v12  ;;  %v25927_v19 = vshrl.u32 %v24213_v3, 16 }
 0x3ea   : > { %19264 = vmatmul.mubr.bf16.gmra.mrb[36].mxu0 %v24187_v42  ;;  %19571 = vmatprep.subr.bf16.mxu1 %v22572_v52 }
 0x3eb   : > { %19556 = vmatmul.mubr.bf16.gmra.mrb[40].mxu1 %v24447_v15  ;;  %19267 = vmatprep.mubr.bf16.mxu0 %v24217_v14  ;;  %v4768_v23 = vor.u32 %v4767_v17, %v25927_v19  ;;  %v22579_v17 = vld [vmem:[#allocation8 + $0x370] sm:$0xff]   ;;  %v22586_v19 = vld [vmem:[#allocation8 + $0x358] sm:$0xff]  }
 0x3ec   : > { %19280 = vmatpush3.bf16.msra.mxu0 %v22571_v12  ;;  %19559 = vmatprep.mubr.bf16.mxu1 %v24455_v50  ;;  %v22578_v12 = vld [vmem:[#allocation8 + $0x338] sm:$0xff]  }
 0x3ed   : > { %19572 = vmatpush3.bf16.msra.mxu1 %v22572_v52  ;;  %19281 = vmatprep.subr.bf16.mxu0 %v22573_v30  ;;  %v24463_v54 = vsel %vm23724_vm6, %v4768_v23, 0  ;;  %v22580_v52 = vld [vmem:[#allocation8 + $0x340] sm:$0xff]  }
 0x3ee   : > { %19573 = vmatprep.subr.bf16.mxu1 %v22574_v34  ;;  %v22588_v23 = vld [vmem:[#allocation8 + $0x360] sm:$0xff]  }
 0x3f0   : > { %19282 = vmatpush3.bf16.msra.mxu0 %v22573_v30  ;;  %v22582_v30 = vld [vmem:[#allocation8 + $0x348] sm:$0xff]  }
 0x3f1   : > { %19574 = vmatpush3.bf16.msra.mxu1 %v22574_v34  ;;  %19283 = vmatprep.subr.bf16.mxu0 %v22575_v1  ;;  %v22583_v34 = vld [vmem:[#allocation8 + $0x380] sm:$0xff]  }
 0x3f2   : > { %19268 = vmatmul.mubr.bf16.gmra.mrb[40].mxu0 %v24224_v2  ;;  %19575 = vmatprep.subr.bf16.mxu1 %v22576_v7 }
 0x3f3   : > { %19560 = vmatmul.mubr.bf16.gmra.mrb[44].mxu1 %v24463_v54  ;;  %19271 = vmatprep.mubr.bf16.mxu0 %v24258_v39 }
 0x3f4   : > { %19284 = vmatpush3.bf16.msra.mxu0 %v22575_v1  ;;  %19579 = vmatprep.mubr.bf16.mxu1 %v24265_v60  ;;  %v22585_v1 = vld [vmem:[#allocation8 + $0x388] sm:$0xff]  }
 0x3f5   : > { %19576 = vmatpush3.bf16.msra.mxu1 %v22576_v7  ;;  %19285 = vmatprep.subr.bf16.mxu0 %v22577_v6  ;;  %v22589_v7 = vld [vmem:[#allocation8 + $0x398] sm:$0xff]  }
 0x3f6   : > { %19577 = vmatprep.subr.bf16.mxu1 %v22578_v12 }
 0x3f8   : > { %19286 = vmatpush3.bf16.msra.mxu0 %v22577_v6  ;;  %v22590_v6 = vld [vmem:[#allocation8 + $0x368] sm:$0xff]  }
 0x3f9   : > { %19578 = vmatpush3.bf16.msra.mxu1 %v22578_v12  ;;  %19287 = vmatprep.subr.bf16.mxu0 %v22579_v17  ;;  %v25928_v12 = vshrl.u32 %v24210_v44, 16 }
 0x3fa   : > { %19272 = vmatmul.mubr.bf16.gmra.mrb[44].mxu0 %v24231_v8  ;;  %19595 = vmatprep.subr.bf16.mxu1 %v22580_v52 }
 0x3fb   : > { %19291 = vmatprep.mubr.bf16.mxu0 %v24076_v53  ;;  %v22587_v53 = vld [vmem:[#allocation8 + $0x390] sm:$0xff]  }
 0x3fc   : > { %19580 = vmatmul.mubr.bf16.vlgmr.msra.gmra.mrb[32].mxu1 %v24275_v29  ;;  %19288 = vmatpush3.bf16.msra.mxu0 %v22579_v17  ;;  %v4671_v17 = vrot.slane %v25928_v12, 7  ;;  %v22599_v12 = vld [vmem:[#allocation8 + $0x3c0] sm:$0xff]  }
 0x3fd   : > { %19583 = vmatprep.mubr.bf16.mxu1 %v24301_v38  ;;  %19596 = vmatpush3.bf16.msra.mxu1 %v22580_v52  ;;  %v22591_v52 = vld [vmem:[#allocation8 + $0x3a0] sm:$0xff]  }
 0x3fe   : > { %19289 = vmatprep.subr.bf16.mxu0 %v22581_v35  ;;  %19597 = vmatprep.subr.bf16.mxu1 %v22582_v30 }
 0x400   : > { %19290 = vmatpush3.bf16.msra.mxu0 %v22581_v35  ;;  %v25929_v35 = vshll.u32 %v24210_v44, 16 }
 0x401   : > { %19598 = vmatpush3.bf16.msra.mxu1 %v22582_v30  ;;  %19307 = vmatprep.subr.bf16.mxu0 %v22583_v34 }
 0x402   : > { %19599 = vmatprep.subr.bf16.mxu1 %v22584_v32  ;;  %v4674_v30 = vor.u32 %v25929_v35, %v4671_v17  ;;  %v22600_v17 = vld [vmem:[#allocation8 + $0x390] sm:$0xff]   ;;  %v22602_v35 = vld [vmem:[#allocation8 + $0x398] sm:$0xff]  }
 0x403   : > { %19292 = vmatmul.mubr.bf16.vlgmr.msra.gmra.mrb[32].mxu0 %v24074_v47 }
 0x404   : > { %19584 = vmatmul.mubr.bf16.gmra.mrb[36].mxu1 %v24315_v28  ;;  %19295 = vmatprep.mubr.bf16.mxu0 %v24086_v36 }
 0x405   : > { %19308 = vmatpush3.bf16.msra.mxu0 %v22583_v34  ;;  %19587 = vmatprep.mubr.bf16.mxu1 %v24340_v11  ;;  %v22592_v34 = vld [vmem:[#allocation8 + $0x370] sm:$0xff]  }
 0x406   : > { %19600 = vmatpush3.bf16.msra.mxu1 %v22584_v32  ;;  %19309 = vmatprep.subr.bf16.mxu0 %v22585_v1  ;;  %v22593_v32 = vld [vmem:[#allocation8 + $0x3a8] sm:$0xff]  }
 0x407   : > { %19601 = vmatprep.subr.bf16.mxu1 %v22586_v19 }
 0x409   : > { %19310 = vmatpush3.bf16.msra.mxu0 %v22585_v1  ;;  %v24487_v1 = vsel %vm23640_vm3, 0, %v4674_v30  ;;  %v22604_v30 = vld [vmem:[#allocation8 + $0x3a0] sm:$0xff]  }
 0x40a   : > { %19602 = vmatpush3.bf16.msra.mxu1 %v22586_v19  ;;  %19311 = vmatprep.subr.bf16.mxu0 %v22587_v53  ;;  %v22594_v19 = vld [vmem:[#allocation8 + $0x378] sm:$0xff]  }
 0x40b   : > { %19296 = vmatmul.mubr.bf16.gmra.mrb[36].mxu0 %v24084_v46  ;;  %19603 = vmatprep.subr.bf16.mxu1 %v22588_v23 }
 0x40c   : > { %19588 = vmatmul.mubr.bf16.gmra.mrb[40].mxu1 %v24354_v21  ;;  %19299 = vmatprep.mubr.bf16.mxu0 %v24096_v31 }
 0x40d   : > { %19312 = vmatpush3.bf16.msra.mxu0 %v22587_v53  ;;  %19591 = vmatprep.mubr.bf16.mxu1 %v24377_v40  ;;  %v22595_v53 = vld [vmem:[#allocation8 + $0x3b0] sm:$0xff]  }
 0x40e   : > { %19604 = vmatpush3.bf16.msra.mxu1 %v22588_v23  ;;  %19313 = vmatprep.subr.bf16.mxu0 %v22589_v7  ;;  %v22596_v23 = vld [vmem:[#allocation8 + $0x380] sm:$0xff]  }
 0x40f   : > { %19605 = vmatprep.subr.bf16.mxu1 %v22590_v6 }
 0x411   : > { %19314 = vmatpush3.bf16.msra.mxu0 %v22589_v7  ;;  %v22597_v7 = vld [vmem:[#allocation8 + $0x3b8] sm:$0xff]  }
 0x412   : > { %19606 = vmatpush3.bf16.msra.mxu1 %v22590_v6  ;;  %19315 = vmatprep.subr.bf16.mxu0 %v22591_v52  ;;  %v22598_v6 = vld [vmem:[#allocation8 + $0x388] sm:$0xff]  }
 0x413   : > { %19300 = vmatmul.mubr.bf16.gmra.mrb[40].mxu0 %v24094_v63  ;;  %19607 = vmatprep.subr.bf16.mxu1 %v22592_v34 }
 0x414   : > { %19592 = vmatmul.mubr.bf16.gmra.mrb[44].mxu1 %v24487_v1  ;;  %19303 = vmatprep.mubr.bf16.mxu0 %v24114_v41 }
 0x415   : > { %19316 = vmatpush3.bf16.msra.mxu0 %v22591_v52  ;;  %19611 = vmatprep.mubr.bf16.mxu1 %v24116_v18  ;;  %v22601_v52 = vld [vmem:[#allocation8 + $0x3c8] sm:$0xff]  }
 0x416   : > { %19608 = vmatpush3.bf16.msra.mxu1 %v22592_v34  ;;  %19317 = vmatprep.subr.bf16.mxu0 %v22593_v32  ;;  %v22605_v34 = vld [vmem:[#allocation8 + $0x3d8] sm:$0xff]  }
 0x417   : > { %19609 = vmatprep.subr.bf16.mxu1 %v22594_v19 }
 0x419   : > { %19318 = vmatpush3.bf16.msra.mxu0 %v22593_v32  ;;  %v22606_v32 = vld [vmem:[#allocation8 + $0x3a8] sm:$0xff]  }
 0x41a   : > { %19610 = vmatpush3.bf16.msra.mxu1 %v22594_v19  ;;  %19319 = vmatprep.subr.bf16.mxu0 %v22595_v53  ;;  %v22607_v19 = vld [vmem:[#allocation8 + $0x3e0] sm:$0xff]  }
 0x41b   : > { %19304 = vmatmul.mubr.bf16.gmra.mrb[44].mxu0 %v24110_v22  ;;  %19627 = vmatprep.subr.bf16.mxu1 %v22596_v23 }
 0x41c   : > { %19323 = vmatprep.mubr.bf16.mxu0 %v24294_v25  ;;  %v22603_v25 = vld [vmem:[#allocation8 + $0x3d0] sm:$0xff]  }
 0x41d   : > { %19612 = vmatmul.mubr.bf16.vlgmr.msra.gmra.mrb[32].mxu1 %v24112_v0  ;;  %19320 = vmatpush3.bf16.msra.mxu0 %v22595_v53  ;;  %v22608_v53 = vld [vmem:[#allocation8 + $0x3b0] sm:$0xff]  }
 0x41e   : > { %19615 = vmatprep.mubr.bf16.mxu1 %v24142_v5  ;;  %19628 = vmatpush3.bf16.msra.mxu1 %v22596_v23  ;;  %v22609_v23 = vld [vmem:[#allocation8 + $0x3e8] sm:$0xff]  }
 0x41f   : > { %19321 = vmatprep.subr.bf16.mxu0 %v22597_v7  ;;  %19629 = vmatprep.subr.bf16.mxu1 %v22598_v6 }
 0x421   : > { %19322 = vmatpush3.bf16.msra.mxu0 %v22597_v7  ;;  %v22610_v7 = vld [vmem:[#allocation8 + $0x3b8] sm:$0xff]  }
 0x422   : > { %19630 = vmatpush3.bf16.msra.mxu1 %v22598_v6  ;;  %19339 = vmatprep.subr.bf16.mxu0 %v22599_v12  ;;  %v22611_v6 = vld [vmem:[#allocation8 + $0x3f0] sm:$0xff]  }
 0x423   : > { %19631 = vmatprep.subr.bf16.mxu1 %v22600_v17 }
 0x424   : > { %19324 = vmatmul.mubr.bf16.vlgmr.msra.gmra.mrb[32].mxu0 %v24305_v26 }
 0x425   : > { %19616 = vmatmul.mubr.bf16.gmra.mrb[36].mxu1 %v24140_v59  ;;  %19327 = vmatprep.mubr.bf16.mxu0 %v24333_v10 }
 0x426   : > { %19340 = vmatpush3.bf16.msra.mxu0 %v22599_v12  ;;  %19619 = vmatprep.mubr.bf16.mxu1 %v24175_v4  ;;  %v22612_v12 = vld [vmem:[#allocation8 + $0x3c0] sm:$0xff]  }
 0x427   : > { %19632 = vmatpush3.bf16.msra.mxu1 %v22600_v17  ;;  %19341 = vmatprep.subr.bf16.mxu0 %v22601_v52  ;;  %v22613_v17 = vld [vmem:[#allocation8 + $0x3f8] sm:$0xff]  }
 0x428   : > { %19633 = vmatprep.subr.bf16.mxu1 %v22602_v35 }
 0x42a   : > { %19342 = vmatpush3.bf16.msra.mxu0 %v22601_v52  ;;  %v22614_v52 = vld [vmem:[#allocation8 + $0x3c8] sm:$0xff]  }
 0x42b   : > { %19634 = vmatpush3.bf16.msra.mxu1 %v22602_v35  ;;  %19343 = vmatprep.subr.bf16.mxu0 %v22603_v25  ;;  %v22615_v35 = vld [vmem:[#allocation8 + $0x400] sm:$0xff]  }
 0x42c   : > { %19328 = vmatmul.mubr.bf16.gmra.mrb[36].mxu0 %v24344_v43  ;;  %19635 = vmatprep.subr.bf16.mxu1 %v22604_v30 }
 0x42d   : > { %19620 = vmatmul.mubr.bf16.gmra.mrb[40].mxu1 %v24173_v49  ;;  %19331 = vmatprep.mubr.bf16.mxu0 %v24370_v58 }
 0x42e   : > { %19344 = vmatpush3.bf16.msra.mxu0 %v22603_v25  ;;  %19623 = vmatprep.mubr.bf16.mxu1 %v24213_v3  ;;  %v22616_v25 = vld [vmem:[#allocation8 + $0x3d0] sm:$0xff]  }
 0x42f   : > { %19636 = vmatpush3.bf16.msra.mxu1 %v22604_v30  ;;  %19345 = vmatprep.subr.bf16.mxu0 %v22605_v34  ;;  %v22617_v30 = vld [vmem:[#allocation8 + $0x408] sm:$0xff]  }
 0x430   : > { %19637 = vmatprep.subr.bf16.mxu1 %v22606_v32 }
 0x432   : > { %19346 = vmatpush3.bf16.msra.mxu0 %v22605_v34  ;;  %v22618_v34 = vld [vmem:[#allocation8 + $0x3d8] sm:$0xff]  }
 0x433   : > { %19638 = vmatpush3.bf16.msra.mxu1 %v22606_v32  ;;  %19347 = vmatprep.subr.bf16.mxu0 %v22607_v19  ;;  %v22620_v32 = vld [vmem:[#allocation8 + $0x3e0] sm:$0xff]  }
 0x434   : > { %19332 = vmatmul.mubr.bf16.gmra.mrb[40].mxu0 %v24381_v48  ;;  %19639 = vmatprep.subr.bf16.mxu1 %v22608_v53 }
 0x435   : > { %19624 = vmatmul.mubr.bf16.gmra.mrb[44].mxu1 %v24210_v44  ;;  %19335 = vmatprep.mubr.bf16.mxu0 %v24402_v27 }
 0x436   : > { %19348 = vmatpush3.bf16.msra.mxu0 %v22607_v19  ;;  %19643 = vmatprep.mubr.bf16.mxu1 %v24407_v45  ;;  %v22621_v19 = vld [vmem:[#allocation8 + $0x418] sm:$0xff]  }
 0x437   : > { %19640 = vmatpush3.bf16.msra.mxu1 %v22608_v53  ;;  %19349 = vmatprep.subr.bf16.mxu0 %v22609_v23  ;;  %v22624_v53 = vld [vmem:[#allocation8 + $0x3f0] sm:$0xff]  }
 0x438   : > { %19641 = vmatprep.subr.bf16.mxu1 %v22610_v7 }
 0x43a   : > { %19350 = vmatpush3.bf16.msra.mxu0 %v22609_v23  ;;  %v22625_v23 = vld [vmem:[#allocation8 + $0x428] sm:$0xff]  }
 0x43b   : > { %19642 = vmatpush3.bf16.msra.mxu1 %v22610_v7  ;;  %19351 = vmatprep.subr.bf16.mxu0 %v22611_v6  ;;  %v22627_v7 = vld [vmem:[#allocation8 + $0x430] sm:$0xff]  }
 0x43c   : > { %19336 = vmatmul.mubr.bf16.gmra.mrb[44].mxu0 %v24387_v16  ;;  %19659 = vmatprep.subr.bf16.mxu1 %v22612_v12 }
 0x43d   : > { %19355 = vmatprep.mubr.bf16.mxu0 %v24154_v57  ;;  %v22619_v57 = vld [vmem:[#allocation8 + $0x410] sm:$0xff]  }
 0x43e   : > { %19644 = vmatmul.mubr.bf16.vlgmr.msra.gmra.mrb[32].mxu1 %v24415_v56  ;;  %19352 = vmatpush3.bf16.msra.mxu0 %v22611_v6  ;;  %v22628_v6 = vld [vmem:[#allocation8 + $0x400] sm:$0xff]  }
 0x43f   : > { %19647 = vmatprep.mubr.bf16.mxu1 %v24427_v13  ;;  %19660 = vmatpush3.bf16.msra.mxu1 %v22612_v12  ;;  %v22634_v12 = vld [vmem:[#allocation8 + $0x418] sm:$0xff]  }
 0x440   : > { %19353 = vmatprep.subr.bf16.mxu0 %v22613_v17  ;;  %19661 = vmatprep.subr.bf16.mxu1 %v22614_v52 }
 0x442   : > { %19354 = vmatpush3.bf16.msra.mxu0 %v22613_v17  ;;  %v22650_v17 = vld [vmem:[#allocation8 + $0x458] sm:$0xff]  }
 0x443   : > { %19662 = vmatpush3.bf16.msra.mxu1 %v22614_v52  ;;  %19371 = vmatprep.subr.bf16.mxu0 %v22615_v35  ;;  %v22670_v52 = vld [vmem:[#allocation8 + $0x4c8] sm:$0xff]  }
 0x444   : > { %19663 = vmatprep.subr.bf16.mxu1 %v22616_v25 }
 0x445   : > { %19356 = vmatmul.mubr.bf16.vlgmr.msra.gmra.mrb[32].mxu0 %v24179_v9  ;;  %v22622_v9 = vld [vmem:[#allocation8 + $0x3e8] sm:$0xff]  }
 0x446   : > { %19648 = vmatmul.mubr.bf16.gmra.mrb[36].mxu1 %v24435_v24  ;;  %19359 = vmatprep.mubr.bf16.mxu0 %v24187_v42  ;;  %v22623_v42 = vld [vmem:[#allocation8 + $0x420] sm:$0xff]  }
 0x447   : > { %19372 = vmatpush3.bf16.msra.mxu0 %v22615_v35  ;;  %19651 = vmatprep.mubr.bf16.mxu1 %v24447_v15  ;;  %v25930_v35 = vld [vmem:[#allocation26_spill] sm:$0xff] }
 0x448   : > { %19664 = vmatpush3.bf16.msra.mxu1 %v22616_v25  ;;  %19373 = vmatprep.subr.bf16.mxu0 %v22617_v30  ;;  %v22668_v25 = vld [vmem:[#allocation10 + $0x38] sm:$0xff]  }
 0x449   : > { %19665 = vmatprep.subr.bf16.mxu1 %v22618_v34 }
 0x44b   : > { %19374 = vmatpush3.bf16.msra.mxu0 %v22617_v30  ;;  %v25932_v30 = vld [vmem:[#allocation29_spill] sm:$0xff] }
 0x44c   : > { %19666 = vmatpush3.bf16.msra.mxu1 %v22618_v34  ;;  %19375 = vmatprep.subr.bf16.mxu0 %v22619_v57  ;;  %v22674_v34 = vld [vmem:[#allocation8 + $0x4e8] sm:$0xff]  }
 0x44d   : > { %19360 = vmatmul.mubr.bf16.gmra.mrb[36].mxu0 %v24217_v14  ;;  %19667 = vmatprep.subr.bf16.mxu1 %v22620_v32  ;;  %v24524_v14 = vsel %vm23724_vm6, %v24248_v62, 0  ;;  %v22629_v62 = vld [vmem:[#allocation8 + $0x438] sm:$0xff]  }
 0x44e   : > { %19652 = vmatmul.mubr.bf16.gmra.mrb[40].mxu1 %v24455_v50  ;;  %19363 = vmatprep.mubr.bf16.mxu0 %v24224_v2  ;;  %v22626_v2 = vld [vmem:[#allocation8 + $0x3f8] sm:$0xff]  }
 0x44f   : > { %19376 = vmatpush3.bf16.msra.mxu0 %v22619_v57  ;;  %19655 = vmatprep.mubr.bf16.mxu1 %v24463_v54  ;;  %v25934_v57 = vld [vmem:[#allocation25_spill] sm:$0xff] }
 0x450   : > { %19668 = vmatpush3.bf16.msra.mxu1 %v22620_v32  ;;  %19377 = vmatprep.subr.bf16.mxu0 %v22621_v19  ;;  %v25935_v32 = vld [vmem:[#allocation33_spill] sm:$0xff] }
 0x451   : > { %19669 = vmatprep.subr.bf16.mxu1 %v22622_v9 }
 0x453   : > { %19378 = vmatpush3.bf16.msra.mxu0 %v22621_v19  ;;  %v25936_v19 = vld [vmem:[#allocation24_spill] sm:$0xff] }
 0x454   : > { %19670 = vmatpush3.bf16.msra.mxu1 %v22622_v9  ;;  %19379 = vmatprep.subr.bf16.mxu0 %v22623_v42  ;;  %v25937_v9 = vld [vmem:[#allocation28_spill] sm:$0xff] }
 0x455   : > { %19364 = vmatmul.mubr.bf16.gmra.mrb[40].mxu0 %v24258_v39  ;;  %19671 = vmatprep.subr.bf16.mxu1 %v22624_v53  ;;  %v22630_v39 = vld [vmem:[#allocation8 + $0x408] sm:$0xff]  }
 0x456   : > { %19656 = vmatmul.mubr.bf16.gmra.mrb[44].mxu1 %v24524_v14  ;;  %19367 = vmatprep.mubr.bf16.mxu0 %v24231_v8  ;;  %v22631_v8 = vld [vmem:[#allocation8 + $0x440] sm:$0xff]  }
 0x457   : > { %19380 = vmatpush3.bf16.msra.mxu0 %v22623_v42  ;;  %19675 = vmatprep.mubr.bf16.mxu1 %v24275_v29  ;;  %v22632_v29 = vld [vmem:[#allocation8 + $0x410] sm:$0xff]   ;;  %v25938_v42 = vld [vmem:[#allocation27_spill] sm:$0xff] }
 0x458   : > { %19672 = vmatpush3.bf16.msra.mxu1 %v22624_v53  ;;  %19381 = vmatprep.subr.bf16.mxu0 %v22625_v23  ;;  %v25939_v53 = vld [vmem:[#allocation32_spill] sm:$0xff] }
 0x459   : > { %19673 = vmatprep.subr.bf16.mxu1 %v22626_v2 }
 0x45b   : > { %19382 = vmatpush3.bf16.msra.mxu0 %v22625_v23  ;;  %v25940_v23 = vld [vmem:[#allocation31_spill] sm:$0xff] }
 0x45c   : > { %19674 = vmatpush3.bf16.msra.mxu1 %v22626_v2  ;;  %19383 = vmatprep.subr.bf16.mxu0 %v22627_v7  ;;  %v25942_v2 = vld [vmem:[#allocation35_spill] sm:$0xff] }
 0x45d   : > { %19368 = vmatmul.mubr.bf16.gmra.mrb[44].mxu0 %v24265_v60  ;;  %19691 = vmatprep.subr.bf16.mxu1 %v22628_v6  ;;  %v22633_v60 = vld [vmem:[#allocation8 + $0x448] sm:$0xff]  }
 0x45e   : > { %19387 = vmatprep.mubr.bf16.mxu0 %v24074_v47  ;;  %v22635_v47 = vld [vmem:[#allocation8 + $0x450] sm:$0xff]  }
 0x45f   : > { %19676 = vmatmul.mubr.bf16.vlgmr.msra.gmra.mrb[32].mxu1 %v24301_v38  ;;  %19384 = vmatpush3.bf16.msra.mxu0 %v22627_v7  ;;  %v22636_v38 = vld [vmem:[#allocation8 + $0x420] sm:$0xff]   ;;  %v22675_v7 = vld [vmem:[#allocation8 + $0x4f0] sm:$0xff]  }
 0x460   : > { %19679 = vmatprep.mubr.bf16.mxu1 %v24315_v28  ;;  %19692 = vmatpush3.bf16.msra.mxu1 %v22628_v6  ;;  %v22637_v28 = vld [vmem:[#allocation8 + $0x458] sm:$0xff]   ;;  %v22676_v6 = vld [vmem:[#allocation8 + $0x4c0] sm:$0xff]  }
 0x461   : > { %19385 = vmatprep.subr.bf16.mxu0 %v22629_v62  ;;  %19693 = vmatprep.subr.bf16.mxu1 %v22630_v39 }
 0x463   : > { %19386 = vmatpush3.bf16.msra.mxu0 %v22629_v62  ;;  %v22677_v62 = vld [vmem:[#allocation8 + $0x4f8] sm:$0xff]  }
 0x464   : > { %19694 = vmatpush3.bf16.msra.mxu1 %v22630_v39  ;;  %19403 = vmatprep.subr.bf16.mxu0 %v22631_v8  ;;  %v22678_v39 = vld [vmem:[#allocation8 + $0x4c8] sm:$0xff]  }
 0x465   : > { %19695 = vmatprep.subr.bf16.mxu1 %v22632_v29 }
 0x466   : > { %19388 = vmatmul.mubr.bf16.vlgmr.msra.gmra.mrb[32].mxu0 %v24086_v36  ;;  %v22638_v36 = vld [vmem:[#allocation8 + $0x428] sm:$0xff]  }
 0x467   : > { %19680 = vmatmul.mubr.bf16.gmra.mrb[36].mxu1 %v24340_v11  ;;  %19391 = vmatprep.mubr.bf16.mxu0 %v24084_v46  ;;  %v22639_v46 = vld [vmem:[#allocation8 + $0x460] sm:$0xff]   ;;  %v22640_v11 = vld [vmem:[#allocation8 + $0x430] sm:$0xff]  }
 0x468   : > { %19404 = vmatpush3.bf16.msra.mxu0 %v22631_v8  ;;  %19683 = vmatprep.mubr.bf16.mxu1 %v24354_v21  ;;  %v22641_v21 = vld [vmem:[#allocation8 + $0x468] sm:$0xff]   ;;  %v22679_v8 = vld [vmem:[#allocation8 + $0x480] sm:$0xff]  }
 0x469   : > { %19696 = vmatpush3.bf16.msra.mxu1 %v22632_v29  ;;  %19405 = vmatprep.subr.bf16.mxu0 %v22633_v60  ;;  %v22680_v29 = vld [vmem:[#allocation8 + $0x4d0] sm:$0xff]  }
 0x46a   : > { %19697 = vmatprep.subr.bf16.mxu1 %v22634_v12 }
 0x46c   : > { %19406 = vmatpush3.bf16.msra.mxu0 %v22633_v60  ;;  %v22682_v60 = vld [vmem:[#allocation8 + $0x4d8] sm:$0xff]  }
 0x46d   : > { %19698 = vmatpush3.bf16.msra.mxu1 %v22634_v12  ;;  %19407 = vmatprep.subr.bf16.mxu0 %v22635_v47  ;;  %v22684_v12 = vld [vmem:[#allocation8 + $0x4e0] sm:$0xff]  }
 0x46e   : > { %19392 = vmatmul.mubr.bf16.gmra.mrb[36].mxu0 %v24096_v31  ;;  %19699 = vmatprep.subr.bf16.mxu1 %v22636_v38  ;;  %v22642_v31 = vld [vmem:[#allocation8 + $0x438] sm:$0xff]  }
 0x46f   : > { %19684 = vmatmul.mubr.bf16.gmra.mrb[40].mxu1 %v24377_v40  ;;  %19395 = vmatprep.mubr.bf16.mxu0 %v24094_v63  ;;  %v22643_v63 = vld [vmem:[#allocation8 + $0x470] sm:$0xff]   ;;  %v22644_v40 = vld [vmem:[#allocation8 + $0x440] sm:$0xff]  }
 0x470   : > { %19408 = vmatpush3.bf16.msra.mxu0 %v22635_v47  ;;  %19687 = vmatprep.mubr.bf16.mxu1 %v24487_v1  ;;  %v22646_v1 = vld [vmem:[#allocation8 + $0x448] sm:$0xff]  }
 0x471   : > { %19700 = vmatpush3.bf16.msra.mxu1 %v22636_v38  ;;  %19409 = vmatprep.subr.bf16.mxu0 %v22637_v28  ;;  %v22686_v47 = vld [vmem:[#allocation8 + $0x4e8] sm:$0xff]   ;;  %v22688_v38 = vld [vmem:[#allocation8 + $0x4f0] sm:$0xff]  }
 0x472   : > { %19701 = vmatprep.subr.bf16.mxu1 %v22638_v36 }
 0x474   : > { %19410 = vmatpush3.bf16.msra.mxu0 %v22637_v28  ;;  %v22690_v28 = vld [vmem:[#allocation8 + $0x4f8] sm:$0xff]  }
 0x475   : > { %19702 = vmatpush3.bf16.msra.mxu1 %v22638_v36  ;;  %19411 = vmatprep.subr.bf16.mxu0 %v22639_v46  ;;  %v24586_v36 = vld [vmem:[#allocation8 + $0x480] sm:$0xff]  }
 0x476   : > { %19396 = vmatmul.mubr.bf16.gmra.mrb[40].mxu0 %v24114_v41  ;;  %19703 = vmatprep.subr.bf16.mxu1 %v22640_v11  ;;  %v22645_v41 = vld [vmem:[#allocation8 + $0x478] sm:$0xff]  }
 0x477   : > { %19688 = vmatmul.mubr.bf16.gmra.mrb[44].mxu1 %v25900_v33  ;;  %19399 = vmatprep.mubr.bf16.mxu0 %v24110_v22  ;;  %v22647_v22 = vld [vmem:[#allocation10] sm:$0xff]  }
 0x478   : > { %19412 = vmatpush3.bf16.msra.mxu0 %v22639_v46  ;;  %19707 = vmatprep.mubr.bf16.mxu1 %v24112_v0  ;;  %v22648_v0 = vld [vmem:[#allocation8 + $0x450] sm:$0xff]   ;;  %v24589_v46 = vld [vmem:[#allocation11 + $0x2] ss:$0 sm:$0xff] }
 0x479   : > { %19704 = vmatpush3.bf16.msra.mxu1 %v22640_v11  ;;  %19413 = vmatprep.subr.bf16.mxu0 %v22641_v21  ;;  %v24591_v11 = vld [vmem:[#allocation11 + $0x3] ss:$0 sm:$0xff] }
 0x47a   : > { %19705 = vmatprep.subr.bf16.mxu1 %v22642_v31 }
 0x47c   : > { %19414 = vmatpush3.bf16.msra.mxu0 %v22641_v21  ;;  %v24595_v21 = vadd.f32 %v24591_v11, %v24589_v46 }
 0x47d   : > { %19706 = vmatpush3.bf16.msra.mxu1 %v22642_v31  ;;  %19415 = vmatprep.subr.bf16.mxu0 %v22643_v63 }
 0x47e   : > { %19400 = vmatmul.mubr.bf16.gmra.mrb[44].mxu0 %v24116_v18  ;;  %19723 = vmatprep.subr.bf16.mxu1 %v22644_v40  ;;  %v22649_v18 = vld [vmem:[#allocation10 + $0x8] sm:$0xff]  }
 0x47f   : > { %19419 = vmatprep.mubr.bf16.mxu0 %v24305_v26  ;;  %v22653_v26 = vld [vmem:[#allocation10 + $0x18] sm:$0xff]  }
 0x480   : > { %19708 = vmatmul.mubr.bf16.vlgmr.msra.gmra.mrb[32].mxu1 %v24142_v5  ;;  %19416 = vmatpush3.bf16.msra.mxu0 %v22643_v63  ;;  %v22652_v5 = vld [vmem:[#allocation8 + $0x460] sm:$0xff]  }
 0x481   : > { %19711 = vmatprep.mubr.bf16.mxu1 %v24140_v59  ;;  %19724 = vmatpush3.bf16.msra.mxu1 %v22644_v40  ;;  %v22651_v59 = vld [vmem:[#allocation10 + $0x10] sm:$0xff]  }
 0x482   : > { %19417 = vmatprep.subr.bf16.mxu0 %v22645_v41  ;;  %19725 = vmatprep.subr.bf16.mxu1 %v22646_v1 }
 0x484   : > { %19418 = vmatpush3.bf16.msra.mxu0 %v22645_v41 }
 0x485   : > { %19726 = vmatpush3.bf16.msra.mxu1 %v22646_v1  ;;  %19435 = vmatprep.subr.bf16.mxu0 %v22647_v22 }
 0x486   : > { %19727 = vmatprep.subr.bf16.mxu1 %v22648_v0 }
 0x487   : > { %19420 = vmatmul.mubr.bf16.vlgmr.msra.gmra.mrb[32].mxu0 %v24333_v10  ;;  %v22654_v10 = vld [vmem:[#allocation8 + $0x468] sm:$0xff]  }
 0x488   : > { %19712 = vmatmul.mubr.bf16.gmra.mrb[36].mxu1 %v24175_v4  ;;  %19423 = vmatprep.mubr.bf16.mxu0 %v24344_v43  ;;  %v22656_v4 = vld [vmem:[#allocation8 + $0x470] sm:$0xff]   ;;  %v22657_v43 = vld [vmem:[#allocation10 + $0x28] sm:$0xff]  }
 0x489   : > { %19436 = vmatpush3.bf16.msra.mxu0 %v22647_v22  ;;  %19715 = vmatprep.mubr.bf16.mxu1 %v24173_v49  ;;  %v22655_v49 = vld [vmem:[#allocation10 + $0x20] sm:$0xff]  }
 0x48a   : > { %19728 = vmatpush3.bf16.msra.mxu1 %v22648_v0  ;;  %19437 = vmatprep.subr.bf16.mxu0 %v22649_v18 }
 0x48b   : > { %19729 = vmatprep.subr.bf16.mxu1 %v22650_v17 }
 0x48d   : > { %19438 = vmatpush3.bf16.msra.mxu0 %v22649_v18 }
 0x48e   : > { %19730 = vmatpush3.bf16.msra.mxu1 %v22650_v17  ;;  %19439 = vmatprep.subr.bf16.mxu0 %v22651_v59 }
 0x48f   : > { %19424 = vmatmul.mubr.bf16.gmra.mrb[36].mxu0 %v24370_v58  ;;  %19731 = vmatprep.subr.bf16.mxu1 %v22652_v5  ;;  %v22658_v58 = vld [vmem:[#allocation8 + $0x478] sm:$0xff]  }
 0x490   : > { %19716 = vmatmul.mubr.bf16.gmra.mrb[40].mxu1 %v24213_v3  ;;  %19427 = vmatprep.mubr.bf16.mxu0 %v24381_v48  ;;  %v22659_v3 = vld [vmem:[#allocation10 + $0x30] sm:$0xff]   ;;  %v22662_v48 = vld [vmem:[#allocation10 + $0x8] sm:$0xff]  }
 0x491   : > { %19440 = vmatpush3.bf16.msra.mxu0 %v22651_v59  ;;  %19719 = vmatprep.mubr.bf16.mxu1 %v24210_v44  ;;  %v22660_v44 = vld [vmem:[#allocation10] sm:$0xff]  }
 0x492   : > { %19732 = vmatpush3.bf16.msra.mxu1 %v22652_v5  ;;  %19441 = vmatprep.subr.bf16.mxu0 %v22653_v26 }
 0x493   : > { %19733 = vmatprep.subr.bf16.mxu1 %v22654_v10 }
 0x495   : > { %19442 = vmatpush3.bf16.msra.mxu0 %v22653_v26 }
 0x496   : > { %19734 = vmatpush3.bf16.msra.mxu1 %v22654_v10  ;;  %19443 = vmatprep.subr.bf16.mxu0 %v22655_v49 }
 0x497   : > { %19428 = vmatmul.mubr.bf16.gmra.mrb[40].mxu0 %v24402_v27  ;;  %19735 = vmatprep.subr.bf16.mxu1 %v22656_v4  ;;  %v22661_v27 = vld [vmem:[#allocation10 + $0x38] sm:$0xff]  }
 0x498   : > { %19720 = vmatmul.mubr.bf16.gmra.mrb[44].mxu1 %v25900_v33  ;;  %19431 = vmatprep.mubr.bf16.mxu0 %v24387_v16  ;;  %v22669_v16 = vld [vmem:[#allocation8 + $0x4c0] sm:$0xff]  }
 0x499   : > { %19444 = vmatpush3.bf16.msra.mxu0 %v22655_v49  ;;  %19739 = vmatprep.mubr.bf16.mxu1 %v24415_v56  ;;  %v22663_v56 = vld [vmem:[#allocation10 + $0x10] sm:$0xff]  }
 0x49a   : > { %19736 = vmatpush3.bf16.msra.mxu1 %v22656_v4  ;;  %19445 = vmatprep.subr.bf16.mxu0 %v22657_v43 }
 0x49b   : > { %19737 = vmatprep.subr.bf16.mxu1 %v22658_v58 }
 0x49d   : > { %19446 = vmatpush3.bf16.msra.mxu0 %v22657_v43 }
 0x49e   : > { %19738 = vmatpush3.bf16.msra.mxu1 %v22658_v58  ;;  %19447 = vmatprep.subr.bf16.mxu0 %v22659_v3 }
 0x49f   : > { %19432 = vmatmul.mubr.bf16.gmra.mrb[44].mxu0 %v24407_v45  ;;  %19755 = vmatprep.subr.bf16.mxu1 %v22660_v44  ;;  %v22664_v45 = vld [vmem:[#allocation10 + $0x18] sm:$0xff]  }
 0x4a0   : > { %19451 = vmatprep.mubr.bf16.mxu0 %v23564_v55  ;;  %v22665_v55 = vld [vmem:[#allocation10 + $0x20] sm:$0xff]  }
 0x4a1   : > { %19740 = vmatmul.mubr.bf16.vlgmr.msra.gmra.mrb[32].mxu1 %v24427_v13  ;;  %19448 = vmatpush3.bf16.msra.mxu0 %v22659_v3  ;;  %v22671_v13 = vld [vmem:[#allocation8 + $0x4d0] sm:$0xff]   ;;  %v22681_v3 = vld [vmem:[#allocation8 + $0x488] sm:$0xff]  }
 0x4a2   : > { %19743 = vmatprep.mubr.bf16.mxu1 %v24435_v24  ;;  %19756 = vmatpush3.bf16.msra.mxu1 %v22660_v44  ;;  %v22666_v24 = vld [vmem:[#allocation10 + $0x28] sm:$0xff]  }
 0x4a3   : > { %19449 = vmatprep.subr.bf16.mxu0 %v22661_v27  ;;  %19757 = vmatprep.subr.bf16.mxu1 %v22662_v48 }
 0x4a5   : > { %19450 = vmatpush3.bf16.msra.mxu0 %v22661_v27 }
 0x4a6   : > { %19758 = vmatpush3.bf16.msra.mxu1 %v22662_v48  ;;  %19787 = vmatprep.subr.bf16.mxu0 %v22669_v16 }
 0x4a7   : > { %19759 = vmatprep.subr.bf16.mxu1 %v22663_v56 }
 0x4a8   : > { %19452 = vmatmul.mubr.bf16.vlgmr.msra.gmra.mrb[32].mxu0 %v23561_v51  ;;  %v22672_v51 = vld [vmem:[#allocation8 + $0x4d8] sm:$0xff]  }
 0x4a9   : > { %19744 = vmatmul.mubr.bf16.gmra.mrb[36].mxu1 %v24447_v15  ;;  %19455 = vmatprep.mubr.bf16.mxu0 %v23582_v20  ;;  %v25931_v15 = vld [vmem:[#allocation30_spill] sm:$0xff]  ;;  %v22667_v20 = vld [vmem:[#allocation10 + $0x30] sm:$0xff]  }
 0x4aa   : > { %19747 = vmatprep.mubr.bf16.mxu1 %v24455_v50  ;;  %19760 = vmatpush3.bf16.msra.mxu1 %v22663_v56  ;;  %v22673_v50 = vld [vmem:[#allocation8 + $0x4e0] sm:$0xff]  }
 0x4ab   : > { %19761 = vmatprep.subr.bf16.mxu1 %v22664_v45  ;;  %19788 = vmatpush3.bf16.msra.mxu0 %v22669_v16 }
 0x4ac   : > { %19789 = vmatprep.subr.bf16.mxu0 %v22670_v52 }
 0x4ae   : > { %19762 = vmatpush3.bf16.msra.mxu1 %v22664_v45 }
 0x4af   : > { %19763 = vmatprep.subr.bf16.mxu1 %v22665_v55  ;;  %19790 = vmatpush3.bf16.msra.mxu0 %v22670_v52 }
 0x4b0   : > { %19456 = vmatmul.mubr.bf16.gmra.mrb[36].mxu0 %v25930_v35  ;;  %19791 = vmatprep.subr.bf16.mxu0 %v22671_v13 }
 0x4b1   : > { %19748 = vmatmul.mubr.bf16.gmra.mrb[40].mxu1 %v24463_v54  ;;  %19459 = vmatprep.mubr.bf16.mxu0 %v25931_v15  ;;  %v25933_v54 = vld [vmem:[#allocation34_spill] sm:$0xff] }
 0x4b2   : > { %19751 = vmatprep.mubr.bf16.mxu1 %v24524_v14  ;;  %19764 = vmatpush3.bf16.msra.mxu1 %v22665_v55  ;;  %v25941_v14 = vld [vmem:[#allocation36_spill] sm:$0xff] }
 0x4b3   : > { %19765 = vmatprep.subr.bf16.mxu1 %v22666_v24  ;;  %19792 = vmatpush3.bf16.msra.mxu0 %v22671_v13  ;;  %v22683_v55 = vld [vmem:[#allocation8 + $0x490] sm:$0xff]  }
 0x4b4   : > { %19793 = vmatprep.subr.bf16.mxu0 %v22672_v51 }
 0x4b6   : > { %19766 = vmatpush3.bf16.msra.mxu1 %v22666_v24 }
 0x4b7   : > { %19767 = vmatprep.subr.bf16.mxu1 %v22667_v20  ;;  %19794 = vmatpush3.bf16.msra.mxu0 %v22672_v51 }
 0x4b8   : > { %19460 = vmatmul.mubr.bf16.gmra.mrb[40].mxu0 %v25932_v30  ;;  %19795 = vmatprep.subr.bf16.mxu0 %v22673_v50 }
 0x4b9   : > { %19752 = vmatmul.mubr.bf16.gmra.mrb[44].mxu1 %v25900_v33  ;;  %19463 = vmatprep.mubr.bf16.mxu0 %v25933_v54 }
 0x4ba   : > { %19768 = vmatpush3.bf16.msra.mxu1 %v22667_v20  ;;  %19771 = vmatprep.mubr.bf16.mxu1 %v25934_v57 }
 0x4bb   : > { %19769 = vmatprep.subr.bf16.mxu1 %v22668_v25  ;;  %19796 = vmatpush3.bf16.msra.mxu0 %v22673_v50 }
 0x4bc   : > { %19797 = vmatprep.subr.bf16.mxu0 %v22674_v34 }
 0x4be   : > { %19770 = vmatpush3.bf16.msra.mxu1 %v22668_v25  ;;  %v22685_v25 = vld [vmem:[#allocation8 + $0x498] sm:$0xff]  }
 0x4bf   : > { %19798 = vmatpush3.bf16.msra.mxu0 %v22674_v34  ;;  %20075 = vmatprep.subr.bf16.mxu1 %v22676_v6 }
 0x4c0   : > { %19464 = vmatmul.mubr.bf16.gmra.mrb[44].mxu0 %v25935_v32  ;;  %19799 = vmatprep.subr.bf16.mxu0 %v22675_v7 }
 0x4c1   : > { %19772 = vmatmul.mubr.bf16.vlgmr.msra.gmra.mrb[32].mxu1 %v25936_v19  ;;  %19803 = vmatprep.mubr.bf16.mxu0 %v25900_v33 }
 0x4c2   : > { %19775 = vmatprep.mubr.bf16.mxu1 %v25937_v9  ;;  %20076 = vmatpush3.bf16.msra.mxu1 %v22676_v6 }
 0x4c3   : > { %19800 = vmatpush3.bf16.msra.mxu0 %v22675_v7  ;;  %20077 = vmatprep.subr.bf16.mxu1 %v22678_v39 }
 0x4c4   : > { %19801 = vmatprep.subr.bf16.mxu0 %v22677_v62 }
 0x4c6   : > { %20078 = vmatpush3.bf16.msra.mxu1 %v22678_v39  ;;  %v22689_v39 = vld [vmem:[#allocation8 + $0x4a8] sm:$0xff]  }
 0x4c7   : > { %19802 = vmatpush3.bf16.msra.mxu0 %v22677_v62  ;;  %20079 = vmatprep.subr.bf16.mxu1 %v22680_v29 }
 0x4c8   : > { %19819 = vmatprep.subr.bf16.mxu0 %v22679_v8 }
 0x4c9   : > { %19776 = vmatmul.mubr.bf16.gmra.mrb[36].mxu1 %v25938_v42  ;;  %v22687_v42 = vld [vmem:[#allocation8 + $0x4a0] sm:$0xff]  }
 0x4ca   : > { %19779 = vmatprep.mubr.bf16.mxu1 %v25939_v53  ;;  %20080 = vmatpush3.bf16.msra.mxu1 %v22680_v29 }
 0x4cb   : > { %20081 = vmatprep.subr.bf16.mxu1 %v22682_v60 }
 0x4ce   : > { %20082 = vmatpush3.bf16.msra.mxu1 %v22682_v60 }
 0x4cf   : > { %20083 = vmatprep.subr.bf16.mxu1 %v22684_v12 }
 0x4d1   : > { %19780 = vmatmul.mubr.bf16.gmra.mrb[40].mxu1 %v25940_v23 }
 0x4d2   : > { %19783 = vmatprep.mubr.bf16.mxu1 %v25941_v14  ;;  %20084 = vmatpush3.bf16.msra.mxu1 %v22684_v12 }
 0x4d3   : > { %20085 = vmatprep.subr.bf16.mxu1 %v22686_v47 }
 0x4d6   : > { %20086 = vmatpush3.bf16.msra.mxu1 %v22686_v47 }
 0x4d7   : > { %20087 = vmatprep.subr.bf16.mxu1 %v22688_v38 }
 0x4d9   : > { %19784 = vmatmul.mubr.bf16.gmra.mrb[44].mxu1 %v25942_v2 }
 0x4da   : > { %20088 = vmatpush3.bf16.msra.mxu1 %v22688_v38 }
 0x4db   : > { %20089 = vmatprep.subr.bf16.mxu1 %v22690_v28 }
 0x4de   : > { %20090 = vmatpush3.bf16.msra.mxu1 %v22690_v28 }
 0x4df   : > { %20107 = vmatprep.subr.bf16.mxu1 %v24586_v36 }
 0x57b   : > { %v19453_v31 = vpop.f32.mrb[32].mxu0 }
 0x57c   : > { %v21023_v63 = vadd.f32 %v19453_v31, %v24589_v46  ;;  %v6599_v40 = vpop.f32.mrb[33].mxu0 }
 0x57d   : > { %v21025_v41 = vadd.f32 %v24589_v46, %v6599_v40  ;;  %v19454_v1 = vpop.f32.mrb[34].mxu0 }
 0x57e   : > { %v21024_v22 = vadd.f32 %v21023_v63, %v24591_v11  ;;  %v21028_v0 = vadd.f32 %v24595_v21, %v19454_v1  ;;  %v6602_v18 = vpop.f32.mrb[35].mxu0 }
 0x57f   : > { %v21026_v17 = vadd.f32 %v21025_v41, %v24591_v11  ;;  %v21030_v59 = vadd.f32 %v24595_v21, %v6602_v18 }
 0x580   : > { %v6680_v5 = vmax.f32 %v21024_v22, 0.0  ;;  %v6681_v26 = vmax.f32 %v21028_v0, 0.0 }
 0x581   : > { %v6678_v10 = vmax.f32 %v21026_v17, 0.0  ;;  %v6679_v49 = vmax.f32 %v21030_v59, 0.0  ;;  %v22691_v59 = vld [vmem:[#allocation8 + $0x4b0] sm:$0xff]  }
 0x582   : > { %v24603_v4 = vpack.c.bf16 %v6681_v26, %v6680_v5 }
 0x583   : > { %v24605_v43 = vpack.c.bf16 %v6679_v49, %v6678_v10  ;;  %v19457_v58 = vpop.f32.mrb[36].mxu0 }
 0x584   : > { %v21032_v44 = vadd.f32 %v24595_v21, %v19457_v58  ;;  %v6615_v27 = vpop.f32.mrb[37].mxu0  ;;  %v8614_v1 = vshrl.u32 %v24603_v4, 16 }
 0x585   : > { %v21034_v48 = vadd.f32 %v24595_v21, %v6615_v27  ;;  %v19458_v16 = vpop.f32.mrb[38].mxu0  ;;  %19804 = vmatmul.mubr.bf16.vlgmr.msra.gmra.mrb[48].mxu0 %v24605_v43 }
 0x586   : > { %v21036_v56 = vadd.f32 %v24595_v21, %v19458_v16  ;;  %v6618_v45 = vpop.f32.mrb[39].mxu0  ;;  %19807 = vmatprep.mubr.bf16.mxu0 %v24603_v4  ;;  %19820 = vmatpush3.bf16.msra.mxu0 %v22679_v8  ;;  %v6684_v13 = vmax.f32 %v21032_v44, 0.0 }
 0x587   : > { %v21038_v52 = vadd.f32 %v24595_v21, %v6618_v45  ;;  %19821 = vmatprep.subr.bf16.mxu0 %v22681_v3  ;;  %v6682_v35 = vmax.f32 %v21034_v48, 0.0 }
 0x588   : > { %v6685_v24 = vmax.f32 %v21036_v56, 0.0 }
 0x589   : > { %v6683_v51 = vmax.f32 %v21038_v52, 0.0 }
 0x58a   : > { %v24613_v15 = vpack.c.bf16 %v6685_v24, %v6684_v13  ;;  %19822 = vmatpush3.bf16.msra.mxu0 %v22681_v3  ;;  %v22693_v13 = vld [vmem:[#allocation8 + $0x4b8] sm:$0xff]   ;;  %v22694_v24 = vld [vmem:[#allocation8 + $0x488] sm:$0xff]  }
 0x58b   : > { %v24615_v20 = vpack.c.bf16 %v6683_v51, %v6682_v35  ;;  %v19461_v50 = vpop.f32.mrb[40].mxu0  ;;  %19823 = vmatprep.subr.bf16.mxu0 %v22683_v55 }
 0x58c   : > { %25943 = vst [vmem:[#allocation26_spill] sm:$0xff] %v24613_v15  ;;  %v21040_v30 = vadd.f32 %v24595_v21, %v19461_v50  ;;  %v6631_v34 = vpop.f32.mrb[41].mxu0 }
 0x58d   : > { %v21042_v54 = vadd.f32 %v24595_v21, %v6631_v34  ;;  %v19462_v57 = vpop.f32.mrb[42].mxu0  ;;  %19808 = vmatmul.mubr.bf16.gmra.mrb[52].mxu0 %v24615_v20 }
 0x58e   : > { %v21044_v32 = vadd.f32 %v24595_v21, %v19462_v57  ;;  %v6634_v19 = vpop.f32.mrb[43].mxu0  ;;  %19811 = vmatprep.mubr.bf16.mxu0 %v24613_v15  ;;  %19824 = vmatpush3.bf16.msra.mxu0 %v22683_v55  ;;  %v6688_v53 = vmax.f32 %v21040_v30, 0.0 }
 0x58f   : > { %v21046_v9 = vadd.f32 %v24595_v21, %v6634_v19  ;;  %19825 = vmatprep.subr.bf16.mxu0 %v22685_v25  ;;  %v6686_v14 = vmax.f32 %v21042_v54, 0.0  ;;  %v8610_v54 = vshll.u32 %v24605_v43, 16  ;;  %v22695_v19 = vld [vmem:[#allocation8 + $0x500] sm:$0xff]  }
 0x590   : > { %v6689_v23 = vmax.f32 %v21044_v32, 0.0 }
 0x591   : > { %v6687_v2 = vmax.f32 %v21046_v9, 0.0  ;;  %v8617_v9 = vshll.u32 %v24603_v4, 16 }
 0x592   : > { %v24623_v7 = vpack.c.bf16 %v6689_v23, %v6688_v53  ;;  %19826 = vmatpush3.bf16.msra.mxu0 %v22685_v25  ;;  %v8616_v25 = vrot.slane %v8614_v1, 7  ;;  %v22696_v23 = vld [vmem:[#allocation8 + $0x490] sm:$0xff]  }
 0x593   : > { %v24625_v6 = vpack.c.bf16 %v6687_v2, %v6686_v14  ;;  %v19465_v62 = vpop.f32.mrb[44].mxu0  ;;  %19827 = vmatprep.subr.bf16.mxu0 %v22687_v42  ;;  %v8621_v14 = vshrl.u32 %v24615_v20, 16 }
 0x594   : > { %25944 = vst [vmem:[#allocation30_spill] sm:$0xff] %v24623_v7  ;;  %v21048_v8 = vadd.f32 %v24595_v21, %v19465_v62  ;;  %v19773_v29 = vpop.f32.mrb[32].mxu1  ;;  %v6647_v60 = vpop.f32.mrb[45].mxu0 }
 0x595   : > { %25945 = vst [vmem:[#allocation29_spill] sm:$0xff] %v24625_v6  ;;  %v21055_v12 = vadd.f32 %v19773_v29, %v24589_v46  ;;  %v21050_v47 = vadd.f32 %v24595_v21, %v6647_v60  ;;  %v8479_v38 = vpop.f32.mrb[33].mxu1  ;;  %v19466_v28 = vpop.f32.mrb[46].mxu0  ;;  %19812 = vmatmul.mubr.bf16.gmra.mrb[56].mxu0 %v24625_v6 }
 0x596   : > { %v21057_v31 = vadd.f32 %v24589_v46, %v8479_v38  ;;  %v21052_v63 = vadd.f32 %v24595_v21, %v19466_v28  ;;  %v19774_v40 = vpop.f32.mrb[34].mxu1  ;;  %v6650_v41 = vpop.f32.mrb[47].mxu0  ;;  %19815 = vmatprep.mubr.bf16.mxu0 %v24623_v7  ;;  %19828 = vmatpush3.bf16.msra.mxu0 %v22687_v42  ;;  %v8607_v46 = vshrl.u32 %v24605_v43, 16  ;;  %v6692_v5 = vmax.f32 %v21048_v8, 0.0  ;;  %v22697_v28 = vld [vmem:[#allocation8 + $0x508] sm:$0xff]  }
 0x597   : > { %v21056_v22 = vadd.f32 %v21055_v12, %v24591_v11  ;;  %v21060_v0 = vadd.f32 %v24595_v21, %v19774_v40  ;;  %v21054_v18 = vadd.f32 %v24595_v21, %v6650_v41  ;;  %v8482_v17 = vpop.f32.mrb[35].mxu1  ;;  %19829 = vmatprep.subr.bf16.mxu0 %v22689_v39  ;;  %v6690_v3 = vmax.f32 %v21050_v47, 0.0 }
 0x598   : > { %v21058_v26 = vadd.f32 %v21057_v31, %v24591_v11  ;;  %v6693_v10 = vmax.f32 %v21052_v63, 0.0  ;;  %v21062_v49 = vadd.f32 %v24595_v21, %v8482_v17  ;;  %v8609_v35 = vrot.slane %v8607_v46, 7 }
 0x599   : > { %v8560_v58 = vmax.f32 %v21056_v22, 0.0  ;;  %v8561_v44 = vmax.f32 %v21060_v0, 0.0  ;;  %v6691_v27 = vmax.f32 %v21054_v18, 0.0  ;;  %v8623_v31 = vrot.slane %v8621_v14, 7  ;;  %v22698_v22 = vld [vmem:[#allocation8 + $0x498] sm:$0xff]  }
 0x59a   : > { %v8558_v48 = vmax.f32 %v21058_v26, 0.0  ;;  %v24641_v16 = vpack.c.bf16 %v6693_v10, %v6692_v5  ;;  %v8559_v56 = vmax.f32 %v21062_v49, 0.0  ;;  %19830 = vmatpush3.bf16.msra.mxu0 %v22689_v39  ;;  %v8612_v53 = vor.u32 %v8610_v54, %v8609_v35 }
 0x59b   : > { %v24643_v45 = vpack.c.bf16 %v8561_v44, %v8560_v58  ;;  %v24645_v52 = vpack.c.bf16 %v6691_v27, %v6690_v3  ;;  %19831 = vmatprep.subr.bf16.mxu0 %v22691_v59  ;;  %v8628_v39 = vshrl.u32 %v24613_v15, 16  ;;  %v8631_v10 = vshll.u32 %v24613_v15, 16  ;;  %v22699_v3 = vld [vmem:[#allocation8 + $0x510] sm:$0xff]  }
 0x59c   : > { %25946 = vst [vmem:[#allocation34_spill] sm:$0xff] %v24641_v16  ;;  %v24647_v55 = vpack.c.bf16 %v8559_v56, %v8558_v48  ;;  %v19777_v11 = vpop.f32.mrb[36].mxu1  ;;  %20091 = vmatprep.mubr.bf16.mxu1 %v24641_v16  ;;  %v24677_v38 = vsel %vm23640_vm3, 0, %v8612_v53  ;;  %v8635_v44 = vshrl.u32 %v24625_v6, 16  ;;  %v22700_v56 = vld [vmem:[#allocation8 + $0x4a0] sm:$0xff]  }
 0x59d   : > { %25947 = vst [vmem:[#allocation25_spill] sm:$0xff] %v24643_v45  ;;  %25948 = vst [vmem:[#allocation33_spill] sm:$0xff] %v24645_v52  ;;  %v21064_v51 = vadd.f32 %v24595_v21, %v19777_v11  ;;  %v8495_v50 = vpop.f32.mrb[37].mxu1  ;;  %19816 = vmatmul.mubr.bf16.gmra.mrb[60].mxu0 %v24645_v52  ;;  %v8630_v0 = vrot.slane %v8628_v39, 7 }
 0x59e   : > { %25949 = vst [vmem:[#allocation24_spill] sm:$0xff] %v24647_v55  ;;  %v21066_v30 = vadd.f32 %v24595_v21, %v8495_v50  ;;  %v19778_v34 = vpop.f32.mrb[38].mxu1  ;;  %20092 = vmatmul.mubr.bf16.vlgmr.msra.gmra.mrb[48].mxu1 %v24647_v55  ;;  %19832 = vmatpush3.bf16.msra.mxu0 %v22691_v59  ;;  %v8624_v59 = vshll.u32 %v24615_v20, 16 }
 0x59f   : > { %v21068_v57 = vadd.f32 %v24595_v21, %v19778_v34  ;;  %v8498_v32 = vpop.f32.mrb[39].mxu1  ;;  %20095 = vmatprep.mubr.bf16.mxu1 %v24643_v45  ;;  %20108 = vmatpush3.bf16.msra.mxu1 %v24586_v36  ;;  %v8564_v2 = vmax.f32 %v21064_v51, 0.0  ;;  %v8619_v36 = vor.u32 %v8617_v9, %v8616_v25  ;;  %v8633_v11 = vor.u32 %v8631_v10, %v8630_v0 }
 0x5a0   : > { %v21070_v42 = vadd.f32 %v24595_v21, %v8498_v32  ;;  %19833 = vmatprep.subr.bf16.mxu0 %v22693_v13  ;;  %20109 = vmatprep.subr.bf16.mxu1 %v22694_v24  ;;  %v8562_v8 = vmax.f32 %v21066_v30, 0.0  ;;  %v8626_v58 = vor.u32 %v8624_v59, %v8623_v31  ;;  %v8656_v51 = vshrl.u32 %v24641_v16, 16 }
 0x5a1   : > { %v8565_v62 = vmax.f32 %v21068_v57, 0.0  ;;  %19835 = vmatprep.mubr.bf16.mxu0 %v25900_v33  ;;  %v24685_v41 = vsel %vm23640_vm3, 0, %v8619_v36  ;;  %v22701_v57 = vld [vmem:[#allocation8 + $0x518] sm:$0xff]   ;;  %v8637_v32 = vrot.slane %v8635_v44, 7  ;;  %v24718_v53 = vsel %vm23640_vm3, 0, %v8633_v11 }
 0x5a2   : > { %v8563_v29 = vmax.f32 %v21070_v42, 0.0  ;;  %19834 = vmatpush3.bf16.msra.mxu0 %v22693_v13  ;;  %v8642_v13 = vshrl.u32 %v24623_v7, 16  ;;  %v24710_v34 = vsel %vm23640_vm3, 0, %v8626_v58  ;;  %v8645_v31 = vshll.u32 %v24623_v7, 16 }
 0x5a3   : > { %v24671_v60 = vpack.c.bf16 %v8565_v62, %v8564_v2  ;;  %20110 = vmatpush3.bf16.msra.mxu1 %v22694_v24  ;;  %19851 = vmatprep.subr.bf16.mxu0 %v22695_v19  ;;  %v8659_v0 = vshll.u32 %v24641_v16, 16 }
 0x5a4   : > { %v24673_v12 = vpack.c.bf16 %v8563_v29, %v8562_v8  ;;  %v19781_v47 = vpop.f32.mrb[40].mxu1  ;;  %20111 = vmatprep.subr.bf16.mxu1 %v22696_v23  ;;  %v8644_v2 = vrot.slane %v8642_v13, 7  ;;  %v8638_v8 = vshll.u32 %v24625_v6, 16  ;;  %v8658_v29 = vrot.slane %v8656_v51, 7 }
 0x5a5   : > { %25950 = vst [vmem:[#allocation28_spill] sm:$0xff] %v24671_v60  ;;  %v21072_v63 = vadd.f32 %v24595_v21, %v19781_v47  ;;  %v8511_v40 = vpop.f32.mrb[41].mxu1  ;;  %19836 = vmatmul.mubr.bf16.vlgmr.msra.gmra.mrb[48].mxu0 %v24677_v38 }
 0x5a6   : > { %25951 = vst [vmem:[#allocation27_spill] sm:$0xff] %v24673_v12  ;;  %v21074_v18 = vadd.f32 %v24595_v21, %v8511_v40  ;;  %v19782_v17 = vpop.f32.mrb[42].mxu1  ;;  %20096 = vmatmul.mubr.bf16.gmra.mrb[52].mxu1 %v24673_v12  ;;  %19839 = vmatprep.mubr.bf16.mxu0 %v24685_v41  ;;  %v8640_v40 = vor.u32 %v8638_v8, %v8637_v32  ;;  %v22706_v32 = vld [vmem:[#allocation8 + $0x4b8] sm:$0xff]  }
 0x5a7   : > { %v21076_v5 = vadd.f32 %v24595_v21, %v19782_v17  ;;  %v8514_v26 = vpop.f32.mrb[43].mxu1  ;;  %19852 = vmatpush3.bf16.msra.mxu0 %v22695_v19  ;;  %20099 = vmatprep.mubr.bf16.mxu1 %v24671_v60  ;;  %v8568_v27 = vmax.f32 %v21072_v63, 0.0 }
 0x5a8   : > { %v21078_v49 = vadd.f32 %v24595_v21, %v8514_v26  ;;  %20112 = vmatpush3.bf16.msra.mxu1 %v22696_v23  ;;  %19853 = vmatprep.subr.bf16.mxu0 %v22697_v28  ;;  %v8566_v24 = vmax.f32 %v21074_v18, 0.0  ;;  %v22702_v23 = vld [vmem:[#allocation8 + $0x4a8] sm:$0xff]   ;;  %v8649_v18 = vshrl.u32 %v24645_v52, 16  ;;  %v22704_v26 = vld [vmem:[#allocation8 + $0x4b0] sm:$0xff]  }
 0x5a9   : > { %v8569_v48 = vmax.f32 %v21076_v5, 0.0  ;;  %20113 = vmatprep.subr.bf16.mxu1 %v22698_v22 }
 0x5aa   : > { %v8567_v35 = vmax.f32 %v21078_v49, 0.0  ;;  %v8647_v49 = vor.u32 %v8645_v31, %v8644_v2 }
 0x5ab   : > { %v24704_v50 = vpack.c.bf16 %v8569_v48, %v8568_v27  ;;  %19854 = vmatpush3.bf16.msra.mxu0 %v22697_v28  ;;  %v8663_v27 = vshrl.u32 %v24647_v55, 16 }
 0x5ac   : > { %v24706_v25 = vpack.c.bf16 %v8567_v35, %v8566_v24  ;;  %20114 = vmatpush3.bf16.msra.mxu1 %v22698_v22  ;;  %v19785_v30 = vpop.f32.mrb[44].mxu1  ;;  %19855 = vmatprep.subr.bf16.mxu0 %v22699_v3  ;;  %v22703_v22 = vld [vmem:[#allocation8 + $0x520] sm:$0xff]   ;;  %v24748_v24 = vsel %vm23640_vm3, 0, %v8640_v40  ;;  %v22705_v35 = vld [vmem:[#allocation8 + $0x528] sm:$0xff]  }
 0x5ad   : > { %25952 = vst [vmem:[#allocation32_spill] sm:$0xff] %v24704_v50  ;;  %v21080_v19 = vadd.f32 %v24595_v21, %v19785_v30  ;;  %v8527_v42 = vpop.f32.mrb[45].mxu1  ;;  %19840 = vmatmul.mubr.bf16.gmra.mrb[52].mxu0 %v24710_v34  ;;  %20115 = vmatprep.subr.bf16.mxu1 %v22700_v56  ;;  %v8651_v30 = vrot.slane %v8649_v18, 7  ;;  %v8665_v2 = vrot.slane %v8663_v27, 7  ;;  %v22708_v40 = vld [vmem:[#allocation8 + $0x500] sm:$0xff]  }
 0x5ae   : > { %25953 = vst [vmem:[#allocation31_spill] sm:$0xff] %v24706_v25  ;;  %v21082_v62 = vadd.f32 %v24595_v21, %v8527_v42  ;;  %v19786_v36 = vpop.f32.mrb[46].mxu1  ;;  %20100 = vmatmul.mubr.bf16.gmra.mrb[56].mxu1 %v24706_v25  ;;  %19843 = vmatprep.mubr.bf16.mxu0 %v24718_v53 }
 0x5af   : > { %v21084_v47 = vadd.f32 %v24595_v21, %v19786_v36  ;;  %v8530_v28 = vpop.f32.mrb[47].mxu1  ;;  %19856 = vmatpush3.bf16.msra.mxu0 %v22699_v3  ;;  %20103 = vmatprep.mubr.bf16.mxu1 %v24704_v50  ;;  %v8572_v17 = vmax.f32 %v21080_v19, 0.0 }
 0x5b0   : > { %v21086_v63 = vadd.f32 %v24595_v21, %v8530_v28  ;;  %20116 = vmatpush3.bf16.msra.mxu1 %v22700_v56  ;;  %19857 = vmatprep.subr.bf16.mxu0 %v22701_v57  ;;  %v8570_v58 = vmax.f32 %v21082_v62, 0.0  ;;  %v8661_v21 = vor.u32 %v8659_v0, %v8658_v29  ;;  %v8670_v56 = vshrl.u32 %v24643_v45, 16  ;;  %v22707_v28 = vld [vmem:[#allocation8 + $0x530] sm:$0xff]  }
 0x5b1   : > { %v8573_v5 = vmax.f32 %v21084_v47, 0.0  ;;  %20117 = vmatprep.subr.bf16.mxu1 %v22702_v23 }
 0x5b2   : > { %v8571_v3 = vmax.f32 %v21086_v63, 0.0  ;;  %v24762_v42 = vsel %vm23640_vm3, 0, %v8661_v21  ;;  %v8672_v62 = vrot.slane %v8670_v56, 7  ;;  %v8666_v63 = vshll.u32 %v24647_v55, 16  ;;  %v22709_v21 = vld [vmem:[#allocation8 + $0x538] sm:$0xff]  }
 0x5b3   : > { %v24741_v48 = vpack.c.bf16 %v8573_v5, %v8572_v17  ;;  %19858 = vmatpush3.bf16.msra.mxu0 %v22701_v57  ;;  %v24755_v57 = vsel %vm23640_vm3, 0, %v8647_v49 }
 0x5b4   : > { %v24744_v11 = vpack.c.bf16 %v8571_v3, %v8570_v58  ;;  %20118 = vmatpush3.bf16.msra.mxu1 %v22702_v23  ;;  %19859 = vmatprep.subr.bf16.mxu0 %v22703_v22  ;;  %v8652_v23 = vshll.u32 %v24645_v52, 16  ;;  %v8668_v5 = vor.u32 %v8666_v63, %v8665_v2  ;;  %v25805_v58 = vshrl.u32 %v24671_v60, 16 }
 0x5b5   : > { %25954 = vst [vmem:[#allocation36_spill] sm:$0xff] %v24741_v48  ;;  %19844 = vmatmul.mubr.bf16.gmra.mrb[56].mxu0 %v24748_v24  ;;  %20119 = vmatprep.subr.bf16.mxu1 %v22704_v26  ;;  %v25803_v19 = vshll.u32 %v24741_v48, 16  ;;  %v25804_v36 = vshrl.u32 %v24741_v48, 16  ;;  %v8782_v2 = vrot.slane %v8610_v54, 1 }
 0x5b6   : > { %25955 = vst [vmem:[#allocation35_spill] sm:$0xff] %v24744_v11  ;;  %20104 = vmatmul.mubr.bf16.gmra.mrb[60].mxu1 %v24744_v11  ;;  %19847 = vmatprep.mubr.bf16.mxu0 %v24755_v57  ;;  %v8654_v47 = vor.u32 %v8652_v23, %v8651_v30  ;;  %v22710_v30 = vld [vmem:[#allocation8 + $0x508] sm:$0xff]   ;;  %v8686_v54 = vrot.slane %v25805_v58, 7  ;;  %v25807_v58 = vshrl.u32 %v24706_v25, 16 }
 0x5b7   : > { %19860 = vmatpush3.bf16.msra.mxu0 %v22703_v22  ;;  %20123 = vmatprep.mubr.bf16.mxu1 %v24762_v42  ;;  %v8812_v29 = vrot.slane %v25803_v19, 1  ;;  %v8673_v22 = vshll.u32 %v24643_v45, 16  ;;  %v22712_v19 = vld [vmem:[#allocation8 + $0x510] sm:$0xff]  }
 0x5b8   : > { %20120 = vmatpush3.bf16.msra.mxu1 %v22704_v26  ;;  %19861 = vmatprep.subr.bf16.mxu0 %v22705_v35  ;;  %v25806_v26 = vshrl.u32 %v24673_v12, 16  ;;  %v24789_v3 = vsel %vm23640_vm3, 0, %v8654_v47  ;;  %v22711_v47 = vld [vmem:[#allocation8 + $0x540] sm:$0xff]  }
 0x5b9   : > { %20121 = vmatprep.subr.bf16.mxu1 %v22706_v32  ;;  %v24779_v17 = vor.u32 %v8812_v29, %v25804_v36  ;;  %v8675_v49 = vor.u32 %v8673_v22, %v8672_v62  ;;  %v8784_v62 = vrot.slane %v8617_v9, 1  ;;  %v8783_v9 = vor.u32 %v8782_v2, %v8607_v46  ;;  %v22713_v2 = vld [vmem:[#allocation8 + $0x548] sm:$0xff]  }
 0x5bb   : > { %19862 = vmatpush3.bf16.msra.mxu0 %v22705_v35  ;;  %v24796_v35 = vsel %vm23640_vm3, 0, %v8668_v5  ;;  %v24806_v29 = vsel %vm23640_vm3, 0, %v8675_v49  ;;  %v8680_v5 = vshll.u32 %v24673_v12, 16  ;;  %v8785_v36 = vor.u32 %v8784_v62, %v8614_v1 }
 0x5bc   : > { %20122 = vmatpush3.bf16.msra.mxu1 %v22706_v32  ;;  %19863 = vmatprep.subr.bf16.mxu0 %v22707_v28  ;;  %v8679_v32 = vrot.slane %v25806_v26, 7  ;;  %v25809_v26 = vshrl.u32 %v24704_v50, 16  ;;  %v24825_v46 = vsel %vm23724_vm6, %v8783_v9, 0  ;;  %v8693_v62 = vrot.slane %v25807_v58, 7 }
 0x5bd   : > { %19848 = vmatmul.mubr.bf16.gmra.mrb[60].mxu0 %v24789_v3  ;;  %20139 = vmatprep.subr.bf16.mxu1 %v22708_v40  ;;  %v25811_v58 = vshll.u32 %v24704_v50, 16 }
 0x5be   : > { %19867 = vmatprep.mubr.bf16.mxu0 %v25900_v33  ;;  %v8682_v49 = vor.u32 %v8680_v5, %v8679_v32  ;;  %v8786_v32 = vrot.slane %v8624_v59, 1  ;;  %v8700_v9 = vrot.slane %v25809_v26, 7  ;;  %v25810_v26 = vshrl.u32 %v24744_v11, 16 }
 0x5bf   : > { %20124 = vmatmul.mubr.bf16.vlgmr.msra.gmra.mrb[48].mxu1 %v24796_v35  ;;  %19864 = vmatpush3.bf16.msra.mxu0 %v22707_v28  ;;  %v25808_v28 = vshll.u32 %v24671_v60, 16 }
 0x5c0   : > { %20127 = vmatprep.mubr.bf16.mxu1 %v24806_v29  ;;  %20140 = vmatpush3.bf16.msra.mxu1 %v22708_v40  ;;  %v24832_v1 = vsel %vm23640_vm3, 0, %v8682_v49  ;;  %v22715_v49 = vld [vmem:[#allocation8 + $0x550] sm:$0xff]  }
 0x5c1   : > { %19865 = vmatprep.subr.bf16.mxu0 %v22709_v21  ;;  %20141 = vmatprep.subr.bf16.mxu1 %v22710_v30  ;;  %v8689_v40 = vor.u32 %v25808_v28, %v8686_v54  ;;  %v8788_v54 = vrot.slane %v8631_v10, 1  ;;  %v8787_v10 = vor.u32 %v8786_v32, %v8621_v14  ;;  %v22716_v28 = vld [vmem:[#allocation8 + $0x520] sm:$0xff]   ;;  %v22717_v32 = vld [vmem:[#allocation8 + $0x558] sm:$0xff]  }
 0x5c3   : > { %19866 = vmatpush3.bf16.msra.mxu0 %v22709_v21  ;;  %v24836_v21 = vsel %vm23724_vm6, %v8785_v36, 0  ;;  %v24846_v59 = vsel %vm23640_vm3, 0, %v8689_v40  ;;  %v8694_v36 = vshll.u32 %v24706_v25, 16  ;;  %v24864_v14 = vsel %vm23724_vm6, %v8787_v10, 0 }
 0x5c4   : > { %20142 = vmatpush3.bf16.msra.mxu1 %v22710_v30  ;;  %19883 = vmatprep.subr.bf16.mxu0 %v22711_v47  ;;  %v22714_v30 = vld [vmem:[#allocation8 + $0x518] sm:$0xff]   ;;  %v8796_v10 = vrot.slane %v8659_v0, 1 }
 0x5c5   : > { %20143 = vmatprep.subr.bf16.mxu1 %v22712_v19  ;;  %v8696_v40 = vor.u32 %v8694_v36, %v8693_v62  ;;  %v8790_v62 = vrot.slane %v8638_v8, 1 }
 0x5c6   : > { %19868 = vmatmul.mubr.bf16.vlgmr.msra.gmra.mrb[48].mxu0 %v24825_v46  ;;  %v8797_v0 = vor.u32 %v8796_v10, %v8656_v51  ;;  %v22722_v51 = vld [vmem:[#allocation8 + $0x538] sm:$0xff]  }
 0x5c7   : > { %20128 = vmatmul.mubr.bf16.gmra.mrb[52].mxu1 %v24832_v1  ;;  %19871 = vmatprep.mubr.bf16.mxu0 %v24836_v21 }
 0x5c8   : > { %19884 = vmatpush3.bf16.msra.mxu0 %v22711_v47  ;;  %20131 = vmatprep.mubr.bf16.mxu1 %v24846_v59  ;;  %v8789_v47 = vor.u32 %v8788_v54, %v8628_v39  ;;  %v24871_v39 = vsel %vm23640_vm3, 0, %v8696_v40  ;;  %v8707_v54 = vrot.slane %v25810_v26, 7  ;;  %v8708_v40 = vshll.u32 %v24744_v11, 16 }
 0x5c9   : > { %20144 = vmatpush3.bf16.msra.mxu1 %v22712_v19  ;;  %19885 = vmatprep.subr.bf16.mxu0 %v22713_v2  ;;  %v8703_v19 = vor.u32 %v25811_v58, %v8700_v9  ;;  %v8792_v9 = vrot.slane %v8645_v31, 1  ;;  %v8791_v31 = vor.u32 %v8790_v62, %v8635_v44  ;;  %v22721_v44 = vld [vmem:[#allocation8 + $0x568] sm:$0xff]  }
 0x5ca   : > { %20145 = vmatprep.subr.bf16.mxu1 %v22714_v30  ;;  %v8710_v26 = vor.u32 %v8708_v40, %v8707_v54  ;;  %v22724_v54 = vld [vmem:[#allocation8 + $0x540] sm:$0xff]  }
 0x5cb   : > { %v24885_v8 = vsel %vm23640_vm3, 0, %v8703_v19  ;;  %v22720_v19 = vld [vmem:[#allocation8 + $0x530] sm:$0xff]   ;;  %v8793_v58 = vor.u32 %v8792_v9, %v8642_v13 }
 0x5cc   : > { %19886 = vmatpush3.bf16.msra.mxu0 %v22713_v2  ;;  %v24875_v2 = vsel %vm23724_vm6, %v8789_v47, 0  ;;  %v22719_v47 = vld [vmem:[#allocation8 + $0x560] sm:$0xff]   ;;  %v24908_v62 = vsel %vm23640_vm3, 0, %v8710_v26  ;;  %v8800_v26 = vrot.slane %v8673_v22, 1  ;;  %v22726_v22 = vld [vmem:[#allocation8 + $0x548] sm:$0xff]  }
 0x5cd   : > { %20146 = vmatpush3.bf16.msra.mxu1 %v22714_v30  ;;  %19887 = vmatprep.subr.bf16.mxu0 %v22715_v49  ;;  %v22718_v30 = vld [vmem:[#allocation8 + $0x528] sm:$0xff]   ;;  %v24912_v13 = vsel %vm23724_vm6, %v8793_v58, 0 }
 0x5ce   : > { %19872 = vmatmul.mubr.bf16.gmra.mrb[52].mxu0 %v24864_v14  ;;  %20147 = vmatprep.subr.bf16.mxu1 %v22716_v28 }
 0x5cf   : > { %20132 = vmatmul.mubr.bf16.gmra.mrb[56].mxu1 %v24871_v39  ;;  %19875 = vmatprep.mubr.bf16.mxu0 %v24875_v2 }
 0x5d0   : > { %19888 = vmatpush3.bf16.msra.mxu0 %v22715_v49  ;;  %20135 = vmatprep.mubr.bf16.mxu1 %v24885_v8  ;;  %v8794_v49 = vrot.slane %v8652_v23, 1  ;;  %v8798_v23 = vrot.slane %v8666_v63, 1  ;;  %v8801_v63 = vor.u32 %v8800_v26, %v8670_v56 }
 0x5d1   : > { %20148 = vmatpush3.bf16.msra.mxu1 %v22716_v28  ;;  %19889 = vmatprep.subr.bf16.mxu0 %v22717_v32  ;;  %v24901_v28 = vsel %vm23724_vm6, %v8791_v31, 0 }
 0x5d2   : > { %20149 = vmatprep.subr.bf16.mxu1 %v22718_v30  ;;  %v8795_v58 = vor.u32 %v8794_v49, %v8649_v18  ;;  %v8799_v9 = vor.u32 %v8798_v23, %v8663_v27  ;;  %v22725_v18 = vld [vmem:[#allocation8 + $0x578] sm:$0xff]   ;;  %v8802_v27 = vrot.slane %v8680_v5, 1  ;;  %v24946_v56 = vsel %vm23724_vm6, %v8801_v63, 0  ;;  %v22729_v23 = vld [vmem:[#allocation8 + $0x588] sm:$0xff]  }
 0x5d3   : > { %v25958_v49 = vshrl.u32 %v24671_v60, 16 }
 0x5d4   : > { %19890 = vmatpush3.bf16.msra.mxu0 %v22717_v32  ;;  %v24918_v32 = vsel %vm23724_vm6, %v8797_v0, 0  ;;  %v24933_v10 = vsel %vm23724_vm6, %v8795_v58, 0  ;;  %v24938_v31 = vsel %vm23724_vm6, %v8799_v9, 0  ;;  %v22727_v0 = vld [vmem:[#allocation8 + $0x580] sm:$0xff]   ;;  %v22730_v58 = vld [vmem:[#allocation8 + $0x558] sm:$0xff]   ;;  %v25959_v9 = vshll.u32 %v24704_v50, 16 }
 0x5d5   : > { %20150 = vmatpush3.bf16.msra.mxu1 %v22718_v30  ;;  %19891 = vmatprep.subr.bf16.mxu0 %v22719_v47  ;;  %v22723_v30 = vld [vmem:[#allocation8 + $0x570] sm:$0xff]  }
 0x5d6   : > { %19876 = vmatmul.mubr.bf16.gmra.mrb[56].mxu0 %v24901_v28  ;;  %20151 = vmatprep.subr.bf16.mxu1 %v22720_v19  ;;  %v8808_v63 = vrot.slane %v25959_v9, 1 }
 0x5d7   : > { %20136 = vmatmul.mubr.bf16.gmra.mrb[60].mxu1 %v24908_v62  ;;  %19879 = vmatprep.mubr.bf16.mxu0 %v24912_v13 }
 0x5d8   : > { %19892 = vmatpush3.bf16.msra.mxu0 %v22719_v47  ;;  %20155 = vmatprep.mubr.bf16.mxu1 %v24918_v32  ;;  %v25956_v47 = vshll.u32 %v24671_v60, 16 }
 0x5d9   : > { %20152 = vmatpush3.bf16.msra.mxu1 %v22720_v19  ;;  %19893 = vmatprep.subr.bf16.mxu0 %v22721_v44 }
 0x5da   : > { %20153 = vmatprep.subr.bf16.mxu1 %v22722_v51  ;;  %v8804_v19 = vrot.slane %v25956_v47, 1  ;;  %v25961_v47 = vshrl.u32 %v24704_v50, 16 }
 0x5dc   : > { %19894 = vmatpush3.bf16.msra.mxu0 %v22721_v44  ;;  %v25957_v44 = vshrl.u32 %v24673_v12, 16 }
 0x5dd   : > { %20154 = vmatpush3.bf16.msra.mxu1 %v22722_v51  ;;  %19895 = vmatprep.subr.bf16.mxu0 %v22723_v30  ;;  %v8805_v51 = vor.u32 %v8804_v19, %v25958_v49  ;;  %v8809_v19 = vor.u32 %v8808_v63, %v25961_v47  ;;  %v22738_v63 = vld [vmem:[#allocation8 + $0x578] sm:$0xff]   ;;  %v22743_v47 = vld [vmem:[#allocation8 + $0x5c0] sm:$0xff]  }
 0x5de   : > { %19880 = vmatmul.mubr.bf16.gmra.mrb[60].mxu0 %v24933_v10  ;;  %20171 = vmatprep.subr.bf16.mxu1 %v22724_v54  ;;  %v8803_v5 = vor.u32 %v8802_v27, %v25957_v44  ;;  %v22732_v27 = vld [vmem:[#allocation8 + $0x560] sm:$0xff]   ;;  %v22733_v44 = vld [vmem:[#allocation8 + $0x598] sm:$0xff]  }
 0x5df   : > { %19899 = vmatprep.mubr.bf16.mxu0 %v24677_v38  ;;  %v22728_v38 = vld [vmem:[#allocation8 + $0x550] sm:$0xff]   ;;  %v24986_v49 = vsel %vm23724_vm6, %v8809_v19, 0 }
 0x5e0   : > { %20156 = vmatmul.mubr.bf16.vlgmr.msra.gmra.mrb[48].mxu1 %v24938_v31  ;;  %19896 = vmatpush3.bf16.msra.mxu0 %v22723_v30  ;;  %v24958_v26 = vsel %vm23724_vm6, %v8803_v5, 0  ;;  %v8806_v30 = vrot.slane %v8694_v36, 1  ;;  %v25960_v36 = vshrl.u32 %v24706_v25, 16  ;;  %v8810_v5 = vrot.slane %v8708_v40, 1  ;;  %v22737_v40 = vld [vmem:[#allocation8 + $0x5a8] sm:$0xff]   ;;  %v22744_v19 = vld [vmem:[#allocation8 + $0x590] sm:$0xff]  }
 0x5e1   : > { %20159 = vmatprep.mubr.bf16.mxu1 %v24946_v56  ;;  %20172 = vmatpush3.bf16.msra.mxu1 %v22724_v54  ;;  %v24966_v54 = vsel %vm23724_vm6, %v8805_v51, 0  ;;  %v22735_v51 = vld [vmem:[#allocation8 + $0x5a0] sm:$0xff]  }
 0x5e2   : > { %19897 = vmatprep.subr.bf16.mxu0 %v22725_v18  ;;  %20173 = vmatprep.subr.bf16.mxu1 %v22726_v22 }
 0x5e4   : > { %19898 = vmatpush3.bf16.msra.mxu0 %v22725_v18  ;;  %v22731_v18 = vld [vmem:[#allocation8 + $0x590] sm:$0xff]  }
 0x5e5   : > { %20174 = vmatpush3.bf16.msra.mxu1 %v22726_v22  ;;  %19915 = vmatprep.subr.bf16.mxu0 %v22727_v0  ;;  %v8807_v22 = vor.u32 %v8806_v30, %v25960_v36  ;;  %v22736_v30 = vld [vmem:[#allocation8 + $0x570] sm:$0xff]   ;;  %v22740_v36 = vld [vmem:[#allocation8 + $0x580] sm:$0xff]  }
 0x5e6   : > { %20175 = vmatprep.subr.bf16.mxu1 %v22728_v38 }
 0x5e7   : > { %19900 = vmatmul.mubr.bf16.vlgmr.msra.gmra.mrb[48].mxu0 %v24685_v41 }
 0x5e8   : > { %20160 = vmatmul.mubr.bf16.gmra.mrb[52].mxu1 %v24958_v26  ;;  %19903 = vmatprep.mubr.bf16.mxu0 %v24710_v34 }
 0x5e9   : > { %19916 = vmatpush3.bf16.msra.mxu0 %v22727_v0  ;;  %20163 = vmatprep.mubr.bf16.mxu1 %v24966_v54  ;;  %v24978_v0 = vsel %vm23724_vm6, %v8807_v22, 0  ;;  %v22741_v22 = vld [vmem:[#allocation8 + $0x5b8] sm:$0xff]  }
 0x5ea   : > { %20176 = vmatpush3.bf16.msra.mxu1 %v22728_v38  ;;  %19917 = vmatprep.subr.bf16.mxu0 %v22729_v23  ;;  %v22734_v38 = vld [vmem:[#allocation8 + $0x568] sm:$0xff]  }
 0x5eb   : > { %20177 = vmatprep.subr.bf16.mxu1 %v22730_v58 }
 0x5ed   : > { %19918 = vmatpush3.bf16.msra.mxu0 %v22729_v23  ;;  %v25962_v23 = vshrl.u32 %v24744_v11, 16 }
 0x5ee   : > { %20178 = vmatpush3.bf16.msra.mxu1 %v22730_v58  ;;  %19919 = vmatprep.subr.bf16.mxu0 %v22731_v18 }
 0x5ef   : > { %19904 = vmatmul.mubr.bf16.gmra.mrb[52].mxu0 %v24718_v53  ;;  %20179 = vmatprep.subr.bf16.mxu1 %v22732_v27  ;;  %v8811_v58 = vor.u32 %v8810_v5, %v25962_v23  ;;  %v22747_v5 = vld [vmem:[#allocation8 + $0x5d0] sm:$0xff]   ;;  %v22749_v23 = vld [vmem:[#allocation8 + $0x5d8] sm:$0xff]  }
 0x5f0   : > { %20164 = vmatmul.mubr.bf16.gmra.mrb[56].mxu1 %v24978_v0  ;;  %19907 = vmatprep.mubr.bf16.mxu0 %v24748_v24 }
 0x5f1   : > { %19920 = vmatpush3.bf16.msra.mxu0 %v22731_v18  ;;  %20167 = vmatprep.mubr.bf16.mxu1 %v24986_v49  ;;  %v24994_v9 = vsel %vm23724_vm6, %v8811_v58, 0  ;;  %v22739_v18 = vld [vmem:[#allocation8 + $0x5b0] sm:$0xff]   ;;  %v22750_v58 = vld [vmem:[#allocation8 + $0x5a8] sm:$0xff]  }
 0x5f2   : > { %20180 = vmatpush3.bf16.msra.mxu1 %v22732_v27  ;;  %19921 = vmatprep.subr.bf16.mxu0 %v22733_v44  ;;  %v22742_v27 = vld [vmem:[#allocation8 + $0x588] sm:$0xff]  }
 0x5f3   : > { %20181 = vmatprep.subr.bf16.mxu1 %v22734_v38 }
 0x5f5   : > { %19922 = vmatpush3.bf16.msra.mxu0 %v22733_v44  ;;  %v22745_v44 = vld [vmem:[#allocation8 + $0x5c8] sm:$0xff]  }
 0x5f6   : > { %20182 = vmatpush3.bf16.msra.mxu1 %v22734_v38  ;;  %19923 = vmatprep.subr.bf16.mxu0 %v22735_v51  ;;  %v22746_v38 = vld [vmem:[#allocation8 + $0x598] sm:$0xff]  }
 0x5f7   : > { %19908 = vmatmul.mubr.bf16.gmra.mrb[56].mxu0 %v24755_v57  ;;  %20183 = vmatprep.subr.bf16.mxu1 %v22736_v30 }
 0x5f8   : > { %20168 = vmatmul.mubr.bf16.gmra.mrb[60].mxu1 %v24994_v9  ;;  %19911 = vmatprep.mubr.bf16.mxu0 %v24789_v3 }
 0x5f9   : > { %19924 = vmatpush3.bf16.msra.mxu0 %v22735_v51  ;;  %20187 = vmatprep.mubr.bf16.mxu1 %v24796_v35  ;;  %v22748_v51 = vld [vmem:[#allocation8 + $0x5a0] sm:$0xff]  }
 0x5fa   : > { %20184 = vmatpush3.bf16.msra.mxu1 %v22736_v30  ;;  %19925 = vmatprep.subr.bf16.mxu0 %v22737_v40  ;;  %v25963_v30 = vshrl.u32 %v24741_v48, 16 }
 0x5fb   : > { %20185 = vmatprep.subr.bf16.mxu1 %v22738_v63 }
 0x5fd   : > { %19926 = vmatpush3.bf16.msra.mxu0 %v22737_v40  ;;  %v8714_v40 = vrot.slane %v25963_v30, 7  ;;  %v22761_v30 = vld [vmem:[#allocation8 + $0x608] sm:$0xff]  }
 0x5fe   : > { %20186 = vmatpush3.bf16.msra.mxu1 %v22738_v63  ;;  %19927 = vmatprep.subr.bf16.mxu0 %v22739_v18  ;;  %v22751_v63 = vld [vmem:[#allocation8 + $0x5e0] sm:$0xff]  }
 0x5ff   : > { %19912 = vmatmul.mubr.bf16.gmra.mrb[60].mxu0 %v24762_v42  ;;  %20203 = vmatprep.subr.bf16.mxu1 %v22740_v36 }
 0x600   : > { %19931 = vmatprep.mubr.bf16.mxu0 %v24605_v43 }
 0x601   : > { %20188 = vmatmul.mubr.bf16.vlgmr.msra.gmra.mrb[48].mxu1 %v24806_v29  ;;  %19928 = vmatpush3.bf16.msra.mxu0 %v22739_v18  ;;  %v25964_v18 = vshll.u32 %v24741_v48, 16 }
 0x602   : > { %20191 = vmatprep.mubr.bf16.mxu1 %v24832_v1  ;;  %20204 = vmatpush3.bf16.msra.mxu1 %v22740_v36 }
 0x603   : > { %19929 = vmatprep.subr.bf16.mxu0 %v22741_v22  ;;  %20205 = vmatprep.subr.bf16.mxu1 %v22742_v27  ;;  %v8717_v36 = vor.u32 %v25964_v18, %v8714_v40  ;;  %v22762_v40 = vld [vmem:[#allocation8 + $0x5d8] sm:$0xff]  }
 0x604   : > { %v22765_v18 = vld [vmem:[#allocation8 + $0x618] sm:$0xff]  }
 0x605   : > { %19930 = vmatpush3.bf16.msra.mxu0 %v22741_v22  ;;  %v22752_v22 = vld [vmem:[#allocation8 + $0x5b0] sm:$0xff]  }
 0x606   : > { %20206 = vmatpush3.bf16.msra.mxu1 %v22742_v27  ;;  %19947 = vmatprep.subr.bf16.mxu0 %v22743_v47  ;;  %v22753_v27 = vld [vmem:[#allocation8 + $0x5e8] sm:$0xff]  }
 0x607   : > { %20207 = vmatprep.subr.bf16.mxu1 %v22744_v19 }
 0x608   : > { %19932 = vmatmul.mubr.bf16.vlgmr.msra.gmra.mrb[48].mxu0 %v24603_v4 }
 0x609   : > { %20192 = vmatmul.mubr.bf16.gmra.mrb[52].mxu1 %v24846_v59  ;;  %19935 = vmatprep.mubr.bf16.mxu0 %v24615_v20 }
 0x60a   : > { %19948 = vmatpush3.bf16.msra.mxu0 %v22743_v47  ;;  %20195 = vmatprep.mubr.bf16.mxu1 %v24871_v39  ;;  %v25018_v47 = vsel %vm23640_vm3, 0, %v8717_v36  ;;  %v22766_v36 = vld [vmem:[#allocation8 + $0x5e8] sm:$0xff]  }
 0x60b   : > { %20208 = vmatpush3.bf16.msra.mxu1 %v22744_v19  ;;  %19949 = vmatprep.subr.bf16.mxu0 %v22745_v44  ;;  %v22754_v19 = vld [vmem:[#allocation8 + $0x5b8] sm:$0xff]  }
 0x60c   : > { %20209 = vmatprep.subr.bf16.mxu1 %v22746_v38 }
 0x60e   : > { %19950 = vmatpush3.bf16.msra.mxu0 %v22745_v44  ;;  %v22755_v44 = vld [vmem:[#allocation8 + $0x5f0] sm:$0xff]  }
 0x60f   : > { %20210 = vmatpush3.bf16.msra.mxu1 %v22746_v38  ;;  %19951 = vmatprep.subr.bf16.mxu0 %v22747_v5  ;;  %v22756_v38 = vld [vmem:[#allocation8 + $0x5c0] sm:$0xff]  }
 0x610   : > { %19936 = vmatmul.mubr.bf16.gmra.mrb[52].mxu0 %v24613_v15  ;;  %20211 = vmatprep.subr.bf16.mxu1 %v22748_v51 }
 0x611   : > { %20196 = vmatmul.mubr.bf16.gmra.mrb[56].mxu1 %v24885_v8  ;;  %19939 = vmatprep.mubr.bf16.mxu0 %v24625_v6 }
 0x612   : > { %19952 = vmatpush3.bf16.msra.mxu0 %v22747_v5  ;;  %20199 = vmatprep.mubr.bf16.mxu1 %v24908_v62  ;;  %v22757_v5 = vld [vmem:[#allocation8 + $0x5f8] sm:$0xff]  }
 0x613   : > { %20212 = vmatpush3.bf16.msra.mxu1 %v22748_v51  ;;  %19953 = vmatprep.subr.bf16.mxu0 %v22749_v23  ;;  %v22758_v51 = vld [vmem:[#allocation8 + $0x5c8] sm:$0xff]  }
 0x614   : > { %20213 = vmatprep.subr.bf16.mxu1 %v22750_v58 }
 0x616   : > { %19954 = vmatpush3.bf16.msra.mxu0 %v22749_v23  ;;  %v22759_v23 = vld [vmem:[#allocation8 + $0x600] sm:$0xff]  }
 0x617   : > { %20214 = vmatpush3.bf16.msra.mxu1 %v22750_v58  ;;  %19955 = vmatprep.subr.bf16.mxu0 %v22751_v63  ;;  %v22760_v58 = vld [vmem:[#allocation8 + $0x5d0] sm:$0xff]  }
 0x618   : > { %19940 = vmatmul.mubr.bf16.gmra.mrb[56].mxu0 %v24623_v7  ;;  %20215 = vmatprep.subr.bf16.mxu1 %v22752_v22 }
 0x619   : > { %20200 = vmatmul.mubr.bf16.gmra.mrb[60].mxu1 %v25018_v47  ;;  %19943 = vmatprep.mubr.bf16.mxu0 %v24645_v52 }
 0x61a   : > { %19956 = vmatpush3.bf16.msra.mxu0 %v22751_v63  ;;  %20219 = vmatprep.mubr.bf16.mxu1 %v24647_v55  ;;  %v22764_v63 = vld [vmem:[#allocation8 + $0x5e0] sm:$0xff]  }
 0x61b   : > { %20216 = vmatpush3.bf16.msra.mxu1 %v22752_v22  ;;  %19957 = vmatprep.subr.bf16.mxu0 %v22753_v27  ;;  %v22767_v22 = vld [vmem:[#allocation8 + $0x620] sm:$0xff]  }
 0x61c   : > { %20217 = vmatprep.subr.bf16.mxu1 %v22754_v19 }
 0x61e   : > { %19958 = vmatpush3.bf16.msra.mxu0 %v22753_v27  ;;  %v22768_v27 = vld [vmem:[#allocation8 + $0x5f0] sm:$0xff]  }
 0x61f   : > { %20218 = vmatpush3.bf16.msra.mxu1 %v22754_v19  ;;  %19959 = vmatprep.subr.bf16.mxu0 %v22755_v44  ;;  %v22769_v19 = vld [vmem:[#allocation8 + $0x628] sm:$0xff]  }
 0x620   : > { %19944 = vmatmul.mubr.bf16.gmra.mrb[60].mxu0 %v24641_v16  ;;  %20235 = vmatprep.subr.bf16.mxu1 %v22756_v38 }
 0x621   : > { %19963 = vmatprep.mubr.bf16.mxu0 %v24825_v46  ;;  %v22763_v46 = vld [vmem:[#allocation8 + $0x610] sm:$0xff]  }
 0x622   : > { %20220 = vmatmul.mubr.bf16.vlgmr.msra.gmra.mrb[48].mxu1 %v24643_v45  ;;  %19960 = vmatpush3.bf16.msra.mxu0 %v22755_v44  ;;  %v22770_v44 = vld [vmem:[#allocation8 + $0x5f8] sm:$0xff]  }
 0x623   : > { %20223 = vmatprep.mubr.bf16.mxu1 %v24673_v12  ;;  %20236 = vmatpush3.bf16.msra.mxu1 %v22756_v38  ;;  %v22771_v38 = vld [vmem:[#allocation8 + $0x630] sm:$0xff]  }
 0x624   : > { %19961 = vmatprep.subr.bf16.mxu0 %v22757_v5  ;;  %20237 = vmatprep.subr.bf16.mxu1 %v22758_v51 }
 0x626   : > { %19962 = vmatpush3.bf16.msra.mxu0 %v22757_v5  ;;  %v22772_v5 = vld [vmem:[#allocation8 + $0x600] sm:$0xff]  }
 0x627   : > { %20238 = vmatpush3.bf16.msra.mxu1 %v22758_v51  ;;  %19979 = vmatprep.subr.bf16.mxu0 %v22759_v23  ;;  %v22773_v51 = vld [vmem:[#allocation8 + $0x638] sm:$0xff]  }
 0x628   : > { %20239 = vmatprep.subr.bf16.mxu1 %v22760_v58 }
 0x629   : > { %19964 = vmatmul.mubr.bf16.vlgmr.msra.gmra.mrb[48].mxu0 %v24836_v21 }
 0x62a   : > { %20224 = vmatmul.mubr.bf16.gmra.mrb[52].mxu1 %v24671_v60  ;;  %19967 = vmatprep.mubr.bf16.mxu0 %v24864_v14 }
 0x62b   : > { %19980 = vmatpush3.bf16.msra.mxu0 %v22759_v23  ;;  %20227 = vmatprep.mubr.bf16.mxu1 %v24706_v25  ;;  %v22774_v23 = vld [vmem:[#allocation8 + $0x608] sm:$0xff]  }
 0x62c   : > { %20240 = vmatpush3.bf16.msra.mxu1 %v22760_v58  ;;  %19981 = vmatprep.subr.bf16.mxu0 %v22761_v30  ;;  %v22775_v58 = vld [vmem:[#allocation8 + $0x640] sm:$0xff]  }
 0x62d   : > { %20241 = vmatprep.subr.bf16.mxu1 %v22762_v40 }
 0x62f   : > { %19982 = vmatpush3.bf16.msra.mxu0 %v22761_v30  ;;  %v22776_v30 = vld [vmem:[#allocation8 + $0x610] sm:$0xff]  }
 0x630   : > { %20242 = vmatpush3.bf16.msra.mxu1 %v22762_v40  ;;  %19983 = vmatprep.subr.bf16.mxu0 %v22763_v46  ;;  %v22777_v40 = vld [vmem:[#allocation8 + $0x648] sm:$0xff]  }
 0x631   : > { %19968 = vmatmul.mubr.bf16.gmra.mrb[52].mxu0 %v24875_v2  ;;  %20243 = vmatprep.subr.bf16.mxu1 %v22764_v63 }
 0x632   : > { %20228 = vmatmul.mubr.bf16.gmra.mrb[56].mxu1 %v24704_v50  ;;  %19971 = vmatprep.mubr.bf16.mxu0 %v24901_v28 }
 0x633   : > { %19984 = vmatpush3.bf16.msra.mxu0 %v22763_v46  ;;  %20231 = vmatprep.mubr.bf16.mxu1 %v24744_v11  ;;  %v22778_v46 = vld [vmem:[#allocation8 + $0x618] sm:$0xff]  }
 0x634   : > { %20244 = vmatpush3.bf16.msra.mxu1 %v22764_v63  ;;  %19985 = vmatprep.subr.bf16.mxu0 %v22765_v18  ;;  %v22780_v63 = vld [vmem:[#allocation8 + $0x620] sm:$0xff]  }
 0x635   : > { %20245 = vmatprep.subr.bf16.mxu1 %v22766_v36 }
 0x637   : > { %19986 = vmatpush3.bf16.msra.mxu0 %v22765_v18  ;;  %v22781_v18 = vld [vmem:[#allocation8 + $0x658] sm:$0xff]  }
 0x638   : > { %20246 = vmatpush3.bf16.msra.mxu1 %v22766_v36  ;;  %19987 = vmatprep.subr.bf16.mxu0 %v22767_v22  ;;  %v22784_v36 = vld [vmem:[#allocation8 + $0x630] sm:$0xff]  }
 0x639   : > { %19972 = vmatmul.mubr.bf16.gmra.mrb[56].mxu0 %v24912_v13  ;;  %20247 = vmatprep.subr.bf16.mxu1 %v22768_v27 }
 0x63a   : > { %20232 = vmatmul.mubr.bf16.gmra.mrb[60].mxu1 %v24741_v48  ;;  %19975 = vmatprep.mubr.bf16.mxu0 %v24933_v10 }
 0x63b   : > { %19988 = vmatpush3.bf16.msra.mxu0 %v22767_v22  ;;  %20251 = vmatprep.mubr.bf16.mxu1 %v24938_v31  ;;  %v22785_v22 = vld [vmem:[#allocation8 + $0x668] sm:$0xff]  }
 0x63c   : > { %20248 = vmatpush3.bf16.msra.mxu1 %v22768_v27  ;;  %19989 = vmatprep.subr.bf16.mxu0 %v22769_v19  ;;  %v22787_v27 = vld [vmem:[#allocation8 + $0x670] sm:$0xff]  }
 0x63d   : > { %20249 = vmatprep.subr.bf16.mxu1 %v22770_v44 }
 0x63f   : > { %19990 = vmatpush3.bf16.msra.mxu0 %v22769_v19  ;;  %v22788_v19 = vld [vmem:[#allocation8 + $0x640] sm:$0xff]  }
 0x640   : > { %20250 = vmatpush3.bf16.msra.mxu1 %v22770_v44  ;;  %19991 = vmatprep.subr.bf16.mxu0 %v22771_v38  ;;  %v22794_v44 = vld [vmem:[#allocation8 + $0x658] sm:$0xff]  }
 0x641   : > { %19976 = vmatmul.mubr.bf16.gmra.mrb[60].mxu0 %v24918_v32  ;;  %20267 = vmatprep.subr.bf16.mxu1 %v22772_v5 }
 0x642   : > { %19995 = vmatprep.mubr.bf16.mxu0 %v24685_v41  ;;  %v22779_v41 = vld [vmem:[#allocation8 + $0x650] sm:$0xff]  }
 0x643   : > { %20252 = vmatmul.mubr.bf16.vlgmr.msra.gmra.mrb[48].mxu1 %v24946_v56  ;;  %19992 = vmatpush3.bf16.msra.mxu0 %v22771_v38  ;;  %v22797_v38 = vld [vmem:[#allocation8 + $0x698] sm:$0xff]  }
 0x644   : > { %20255 = vmatprep.mubr.bf16.mxu1 %v24958_v26  ;;  %20268 = vmatpush3.bf16.msra.mxu1 %v22772_v5  ;;  %v22798_v5 = vld [vmem:[#allocation8 + $0x668] sm:$0xff]  }
 0x645   : > { %19993 = vmatprep.subr.bf16.mxu0 %v22773_v51  ;;  %20269 = vmatprep.subr.bf16.mxu1 %v22774_v23 }
 0x647   : > { %19994 = vmatpush3.bf16.msra.mxu0 %v22773_v51  ;;  %v22801_v51 = vld [vmem:[#allocation8 + $0x6a8] sm:$0xff]  }
 0x648   : > { %20270 = vmatpush3.bf16.msra.mxu1 %v22774_v23  ;;  %20011 = vmatprep.subr.bf16.mxu0 %v22775_v58  ;;  %v22802_v23 = vld [vmem:[#allocation8 + $0x678] sm:$0xff]  }
 0x649   : > { %20271 = vmatprep.subr.bf16.mxu1 %v22776_v30 }
 0x64a   : > { %19996 = vmatmul.mubr.bf16.vlgmr.msra.gmra.mrb[48].mxu0 %v24710_v34  ;;  %v22782_v34 = vld [vmem:[#allocation8 + $0x628] sm:$0xff]  }
 0x64b   : > { %20256 = vmatmul.mubr.bf16.gmra.mrb[52].mxu1 %v24966_v54  ;;  %19999 = vmatprep.mubr.bf16.mxu0 %v24718_v53  ;;  %v22783_v53 = vld [vmem:[#allocation8 + $0x660] sm:$0xff]  }
 0x64c   : > { %20012 = vmatpush3.bf16.msra.mxu0 %v22775_v58  ;;  %20259 = vmatprep.mubr.bf16.mxu1 %v24978_v0  ;;  %v22805_v58 = vld [vmem:[#allocation8 + $0x6b8] sm:$0xff]  }
 0x64d   : > { %20272 = vmatpush3.bf16.msra.mxu1 %v22776_v30  ;;  %20013 = vmatprep.subr.bf16.mxu0 %v22777_v40  ;;  %v22806_v30 = vld [vmem:[#allocation8 + $0x688] sm:$0xff]  }
 0x64e   : > { %20273 = vmatprep.subr.bf16.mxu1 %v22778_v46 }
 0x650   : > { %20014 = vmatpush3.bf16.msra.mxu0 %v22777_v40  ;;  %v22813_v40 = vld [vmem:[#allocation8 + $0x700] sm:$0xff]  }
 0x651   : > { %20274 = vmatpush3.bf16.msra.mxu1 %v22778_v46  ;;  %20015 = vmatprep.subr.bf16.mxu0 %v22779_v41  ;;  %v22807_v46 = vld [vmem:[#allocation8 + $0x690] sm:$0xff]  }
 0x652   : > { %20000 = vmatmul.mubr.bf16.gmra.mrb[52].mxu0 %v24748_v24  ;;  %20275 = vmatprep.subr.bf16.mxu1 %v22780_v63  ;;  %v25055_v24 = vsel %vm23724_vm6, %v24779_v17, 0  ;;  %v22789_v17 = vld [vmem:[#allocation8 + $0x678] sm:$0xff]  }
 0x653   : > { %20260 = vmatmul.mubr.bf16.gmra.mrb[56].mxu1 %v24986_v49  ;;  %20003 = vmatprep.mubr.bf16.mxu0 %v24755_v57  ;;  %v22786_v57 = vld [vmem:[#allocation8 + $0x638] sm:$0xff]  }
 0x654   : > { %20016 = vmatpush3.bf16.msra.mxu0 %v22779_v41  ;;  %20263 = vmatprep.mubr.bf16.mxu1 %v24994_v9  ;;  %v22808_v41 = vld [vmem:[#allocation8 + $0x698] sm:$0xff]  }
 0x655   : > { %20276 = vmatpush3.bf16.msra.mxu1 %v22780_v63  ;;  %20017 = vmatprep.subr.bf16.mxu0 %v22781_v18  ;;  %v22814_v63 = vld [vmem:[#allocation8 + $0x708] sm:$0xff]  }
 0x656   : > { %20277 = vmatprep.subr.bf16.mxu1 %v22782_v34 }
 0x658   : > { %20018 = vmatpush3.bf16.msra.mxu0 %v22781_v18  ;;  %v22815_v18 = vld [vmem:[#allocation8 + $0x710] sm:$0xff]  }
 0x659   : > { %20278 = vmatpush3.bf16.msra.mxu1 %v22782_v34  ;;  %20019 = vmatprep.subr.bf16.mxu0 %v22783_v53  ;;  %v22810_v34 = vld [vmem:[#allocation8 + $0x6a8] sm:$0xff]  }
 0x65a   : > { %20004 = vmatmul.mubr.bf16.gmra.mrb[56].mxu0 %v24789_v3  ;;  %20279 = vmatprep.subr.bf16.mxu1 %v22784_v36  ;;  %v22790_v3 = vld [vmem:[#allocation8 + $0x648] sm:$0xff]  }
 0x65b   : > { %20264 = vmatmul.mubr.bf16.gmra.mrb[60].mxu1 %v25055_v24  ;;  %20007 = vmatprep.mubr.bf16.mxu0 %v24762_v42  ;;  %v22791_v42 = vld [vmem:[#allocation8 + $0x680] sm:$0xff]  }
 0x65c   : > { %20020 = vmatpush3.bf16.msra.mxu0 %v22783_v53  ;;  %20283 = vmatprep.mubr.bf16.mxu1 %v24806_v29  ;;  %v22792_v29 = vld [vmem:[#allocation8 + $0x650] sm:$0xff]   ;;  %v22817_v53 = vld [vmem:[#allocation8 + $0x720] sm:$0xff]  }
 0x65d   : > { %20280 = vmatpush3.bf16.msra.mxu1 %v22784_v36  ;;  %20021 = vmatprep.subr.bf16.mxu0 %v22785_v22  ;;  %v22812_v36 = vld [vmem:[#allocation8 + $0x6b8] sm:$0xff]  }
 0x65e   : > { %20281 = vmatprep.subr.bf16.mxu1 %v22786_v57 }
 0x660   : > { %20022 = vmatpush3.bf16.msra.mxu0 %v22785_v22  ;;  %v22834_v22 = vld [vmem:[#allocation8 + $0x738] sm:$0xff]  }
 0x661   : > { %20282 = vmatpush3.bf16.msra.mxu1 %v22786_v57  ;;  %20023 = vmatprep.subr.bf16.mxu0 %v22787_v27  ;;  %v25104_v57 = vld [vmem:[#allocation11 + $0x4] ss:$0 sm:$0xff] }
 0x662   : > { %20008 = vmatmul.mubr.bf16.gmra.mrb[60].mxu0 %v24796_v35  ;;  %20299 = vmatprep.subr.bf16.mxu1 %v22788_v19  ;;  %v22793_v35 = vld [vmem:[#allocation8 + $0x688] sm:$0xff]  }
 0x663   : > { %20027 = vmatprep.mubr.bf16.mxu0 %v24603_v4 }
 0x664   : > { %20284 = vmatmul.mubr.bf16.vlgmr.msra.gmra.mrb[48].mxu1 %v24832_v1  ;;  %20024 = vmatpush3.bf16.msra.mxu0 %v22787_v27  ;;  %v22795_v1 = vld [vmem:[#allocation8 + $0x690] sm:$0xff]  }
 0x665   : > { %20287 = vmatprep.mubr.bf16.mxu1 %v24846_v59  ;;  %20300 = vmatpush3.bf16.msra.mxu1 %v22788_v19  ;;  %v22796_v59 = vld [vmem:[#allocation8 + $0x660] sm:$0xff]  }
 0x666   : > { %20025 = vmatprep.subr.bf16.mxu0 %v22789_v17  ;;  %20301 = vmatprep.subr.bf16.mxu1 %v22790_v3 }
 0x668   : > { %20026 = vmatpush3.bf16.msra.mxu0 %v22789_v17 }
 0x669   : > { %20302 = vmatpush3.bf16.msra.mxu1 %v22790_v3  ;;  %20043 = vmatprep.subr.bf16.mxu0 %v22791_v42 }
 0x66a   : > { %20303 = vmatprep.subr.bf16.mxu1 %v22792_v29 }
 0x66b   : > { %20028 = vmatmul.mubr.bf16.vlgmr.msra.gmra.mrb[48].mxu0 %v24615_v20 }
 0x66c   : > { %20288 = vmatmul.mubr.bf16.gmra.mrb[52].mxu1 %v24871_v39  ;;  %20031 = vmatprep.mubr.bf16.mxu0 %v24613_v15  ;;  %v22799_v39 = vld [vmem:[#allocation8 + $0x6a0] sm:$0xff]  }
 0x66d   : > { %20044 = vmatpush3.bf16.msra.mxu0 %v22791_v42  ;;  %20291 = vmatprep.mubr.bf16.mxu1 %v24885_v8  ;;  %v22800_v8 = vld [vmem:[#allocation8 + $0x670] sm:$0xff]  }
 0x66e   : > { %20304 = vmatpush3.bf16.msra.mxu1 %v22792_v29  ;;  %20045 = vmatprep.subr.bf16.mxu0 %v22793_v35 }
 0x66f   : > { %20305 = vmatprep.subr.bf16.mxu1 %v22794_v44 }
 0x671   : > { %20046 = vmatpush3.bf16.msra.mxu0 %v22793_v35 }
 0x672   : > { %20306 = vmatpush3.bf16.msra.mxu1 %v22794_v44  ;;  %20047 = vmatprep.subr.bf16.mxu0 %v22795_v1 }
 0x673   : > { %20032 = vmatmul.mubr.bf16.gmra.mrb[52].mxu0 %v24625_v6  ;;  %20307 = vmatprep.subr.bf16.mxu1 %v22796_v59 }
 0x674   : > { %20292 = vmatmul.mubr.bf16.gmra.mrb[56].mxu1 %v24908_v62  ;;  %20035 = vmatprep.mubr.bf16.mxu0 %v24623_v7  ;;  %v22803_v62 = vld [vmem:[#allocation8 + $0x6b0] sm:$0xff]  }
 0x675   : > { %20048 = vmatpush3.bf16.msra.mxu0 %v22795_v1  ;;  %20295 = vmatprep.mubr.bf16.mxu1 %v25018_v47  ;;  %v22804_v47 = vld [vmem:[#allocation8 + $0x680] sm:$0xff]  }
 0x676   : > { %20308 = vmatpush3.bf16.msra.mxu1 %v22796_v59  ;;  %20049 = vmatprep.subr.bf16.mxu0 %v22797_v38 }
 0x677   : > { %20309 = vmatprep.subr.bf16.mxu1 %v22798_v5 }
 0x679   : > { %20050 = vmatpush3.bf16.msra.mxu0 %v22797_v38 }
 0x67a   : > { %20310 = vmatpush3.bf16.msra.mxu1 %v22798_v5  ;;  %20051 = vmatprep.subr.bf16.mxu0 %v22799_v39 }
 0x67b   : > { %20036 = vmatmul.mubr.bf16.gmra.mrb[56].mxu0 %v24645_v52  ;;  %20311 = vmatprep.subr.bf16.mxu1 %v22800_v8 }
 0x67c   : > { %20296 = vmatmul.mubr.bf16.gmra.mrb[60].mxu1 %v25900_v33  ;;  %20039 = vmatprep.mubr.bf16.mxu0 %v24641_v16 }
 0x67d   : > { %20052 = vmatpush3.bf16.msra.mxu0 %v22799_v39  ;;  %20315 = vmatprep.mubr.bf16.mxu1 %v24643_v45 }
 0x67e   : > { %20312 = vmatpush3.bf16.msra.mxu1 %v22800_v8  ;;  %20053 = vmatprep.subr.bf16.mxu0 %v22801_v51 }
 0x67f   : > { %20313 = vmatprep.subr.bf16.mxu1 %v22802_v23 }
 0x681   : > { %20054 = vmatpush3.bf16.msra.mxu0 %v22801_v51 }
 0x682   : > { %20314 = vmatpush3.bf16.msra.mxu1 %v22802_v23  ;;  %20055 = vmatprep.subr.bf16.mxu0 %v22803_v62  ;;  %v22825_v23 = vld [vmem:[#allocation8 + $0x6c8] sm:$0xff]  }
 0x683   : > { %20040 = vmatmul.mubr.bf16.gmra.mrb[60].mxu0 %v24647_v55  ;;  %20331 = vmatprep.subr.bf16.mxu1 %v22804_v47 }
 0x684   : > { %20059 = vmatprep.mubr.bf16.mxu0 %v24836_v21  ;;  %v22809_v21 = vld [vmem:[#allocation8 + $0x6a0] sm:$0xff]  }
 0x685   : > { %20316 = vmatmul.mubr.bf16.vlgmr.msra.gmra.mrb[48].mxu1 %v24673_v12  ;;  %20056 = vmatpush3.bf16.msra.mxu0 %v22803_v62 }
 0x686   : > { %20319 = vmatprep.mubr.bf16.mxu1 %v24671_v60  ;;  %20332 = vmatpush3.bf16.msra.mxu1 %v22804_v47 }
 0x687   : > { %20057 = vmatprep.subr.bf16.mxu0 %v22805_v58  ;;  %20333 = vmatprep.subr.bf16.mxu1 %v22806_v30 }
 0x689   : > { %20058 = vmatpush3.bf16.msra.mxu0 %v22805_v58 }
 0x68a   : > { %20334 = vmatpush3.bf16.msra.mxu1 %v22806_v30  ;;  %20363 = vmatprep.subr.bf16.mxu0 %v22813_v40 }
 0x68b   : > { %20335 = vmatprep.subr.bf16.mxu1 %v22807_v46 }
 0x68c   : > { %20060 = vmatmul.mubr.bf16.vlgmr.msra.gmra.mrb[48].mxu0 %v24864_v14  ;;  %v22816_v14 = vld [vmem:[#allocation8 + $0x718] sm:$0xff]  }
 0x68d   : > { %20320 = vmatmul.mubr.bf16.gmra.mrb[52].mxu1 %v24706_v25  ;;  %20063 = vmatprep.mubr.bf16.mxu0 %v24875_v2  ;;  %v22811_v2 = vld [vmem:[#allocation8 + $0x6b0] sm:$0xff]  }
 0x68e   : > { %20323 = vmatprep.mubr.bf16.mxu1 %v24704_v50  ;;  %20336 = vmatpush3.bf16.msra.mxu1 %v22807_v46 }
 0x68f   : > { %20337 = vmatprep.subr.bf16.mxu1 %v22808_v41  ;;  %20364 = vmatpush3.bf16.msra.mxu0 %v22813_v40 }
 0x690   : > { %20365 = vmatprep.subr.bf16.mxu0 %v22814_v63 }
 0x692   : > { %20338 = vmatpush3.bf16.msra.mxu1 %v22808_v41 }
 0x693   : > { %20339 = vmatprep.subr.bf16.mxu1 %v22809_v21  ;;  %20366 = vmatpush3.bf16.msra.mxu0 %v22814_v63  ;;  %v22827_v63 = vld [vmem:[#allocation8 + $0x6d0] sm:$0xff]  }
 0x694   : > { %20064 = vmatmul.mubr.bf16.gmra.mrb[52].mxu0 %v24901_v28  ;;  %20367 = vmatprep.subr.bf16.mxu0 %v22815_v18  ;;  %v22818_v28 = vld [vmem:[#allocation8 + $0x728] sm:$0xff]  }
 0x695   : > { %20324 = vmatmul.mubr.bf16.gmra.mrb[56].mxu1 %v24744_v11  ;;  %20067 = vmatprep.mubr.bf16.mxu0 %v24912_v13  ;;  %v22819_v13 = vld [vmem:[#allocation8 + $0x730] sm:$0xff]   ;;  %v22860_v11 = vld [vmem:[#allocation8 + $0x760] sm:$0xff]  }
 0x696   : > { %20327 = vmatprep.mubr.bf16.mxu1 %v24741_v48  ;;  %20340 = vmatpush3.bf16.msra.mxu1 %v22809_v21 }
 0x697   : > { %20341 = vmatprep.subr.bf16.mxu1 %v22810_v34  ;;  %20368 = vmatpush3.bf16.msra.mxu0 %v22815_v18 }
 0x698   : > { %20369 = vmatprep.subr.bf16.mxu0 %v22816_v14 }
 0x69a   : > { %20342 = vmatpush3.bf16.msra.mxu1 %v22810_v34 }
 0x69b   : > { %20343 = vmatprep.subr.bf16.mxu1 %v22811_v2  ;;  %20370 = vmatpush3.bf16.msra.mxu0 %v22816_v14 }
 0x69c   : > { %20068 = vmatmul.mubr.bf16.gmra.mrb[56].mxu0 %v24933_v10  ;;  %20371 = vmatprep.subr.bf16.mxu0 %v22817_v53  ;;  %v22821_v10 = vld [vmem:[#allocation8 + $0x738] sm:$0xff]  }
 0x69d   : > { %20328 = vmatmul.mubr.bf16.gmra.mrb[60].mxu1 %v25900_v33  ;;  %20071 = vmatprep.mubr.bf16.mxu0 %v24918_v32  ;;  %v22820_v32 = vld [vmem:[#allocation8 + $0x700] sm:$0xff]  }
 0x69e   : > { %20344 = vmatpush3.bf16.msra.mxu1 %v22811_v2  ;;  %20347 = vmatprep.mubr.bf16.mxu1 %v24946_v56  ;;  %v22823_v56 = vld [vmem:[#allocation8 + $0x6c0] sm:$0xff]  }
 0x69f   : > { %20345 = vmatprep.subr.bf16.mxu1 %v22812_v36  ;;  %20372 = vmatpush3.bf16.msra.mxu0 %v22817_v53 }
 0x6a0   : > { %20373 = vmatprep.subr.bf16.mxu0 %v22818_v28 }
 0x6a2   : > { %20346 = vmatpush3.bf16.msra.mxu1 %v22812_v36 }
 0x6a3   : > { %20374 = vmatpush3.bf16.msra.mxu0 %v22818_v28  ;;  %20683 = vmatprep.subr.bf16.mxu1 %v22820_v32  ;;  %v22829_v28 = vld [vmem:[#allocation8 + $0x6d8] sm:$0xff]  }
 0x6a4   : > { %20072 = vmatmul.mubr.bf16.gmra.mrb[60].mxu0 %v24938_v31  ;;  %20375 = vmatprep.subr.bf16.mxu0 %v22819_v13  ;;  %v22822_v31 = vld [vmem:[#allocation8 + $0x708] sm:$0xff]  }
 0x6a5   : > { %20348 = vmatmul.mubr.bf16.vlgmr.msra.gmra.mrb[48].mxu1 %v24958_v26  ;;  %20379 = vmatprep.mubr.bf16.mxu0 %v25900_v33  ;;  %v22824_v26 = vld [vmem:[#allocation8 + $0x710] sm:$0xff]  }
 0x6a6   : > { %20351 = vmatprep.mubr.bf16.mxu1 %v24966_v54  ;;  %20684 = vmatpush3.bf16.msra.mxu1 %v22820_v32  ;;  %v22826_v54 = vld [vmem:[#allocation8 + $0x718] sm:$0xff]  }
 0x6a7   : > { %20376 = vmatpush3.bf16.msra.mxu0 %v22819_v13  ;;  %20685 = vmatprep.subr.bf16.mxu1 %v22822_v31 }
 0x6a8   : > { %20377 = vmatprep.subr.bf16.mxu0 %v22821_v10 }
 0x6aa   : > { %20686 = vmatpush3.bf16.msra.mxu1 %v22822_v31 }
 0x6ab   : > { %20378 = vmatpush3.bf16.msra.mxu0 %v22821_v10  ;;  %20687 = vmatprep.subr.bf16.mxu1 %v22824_v26 }
 0x6ac   : > { %20395 = vmatprep.subr.bf16.mxu0 %v22823_v56 }
 0x6ad   : > { %20352 = vmatmul.mubr.bf16.gmra.mrb[52].mxu1 %v24978_v0  ;;  %v22828_v0 = vld [vmem:[#allocation8 + $0x720] sm:$0xff]  }
 0x6ae   : > { %20355 = vmatprep.mubr.bf16.mxu1 %v24986_v49  ;;  %20688 = vmatpush3.bf16.msra.mxu1 %v22824_v26  ;;  %v22830_v49 = vld [vmem:[#allocation8 + $0x728] sm:$0xff]  }
 0x6af   : > { %20689 = vmatprep.subr.bf16.mxu1 %v22826_v54 }
 0x6b2   : > { %20690 = vmatpush3.bf16.msra.mxu1 %v22826_v54 }
 0x6b3   : > { %20691 = vmatprep.subr.bf16.mxu1 %v22828_v0 }
 0x6b5   : > { %20356 = vmatmul.mubr.bf16.gmra.mrb[56].mxu1 %v24994_v9  ;;  %v22832_v9 = vld [vmem:[#allocation8 + $0x730] sm:$0xff]  }
 0x6b6   : > { %20359 = vmatprep.mubr.bf16.mxu1 %v25055_v24  ;;  %20692 = vmatpush3.bf16.msra.mxu1 %v22828_v0  ;;  %v25101_v24 = vld [vmem:[#allocation8 + $0x6c0] sm:$0xff]  }
 0x6b7   : > { %20693 = vmatprep.subr.bf16.mxu1 %v22830_v49  ;;  %v22831_v0 = vld [vmem:[#allocation8 + $0x6e0] sm:$0xff]  }
 0x6ba   : > { %20694 = vmatpush3.bf16.msra.mxu1 %v22830_v49 }
 0x6bb   : > { %20695 = vmatprep.subr.bf16.mxu1 %v22832_v9 }
 0x6bd   : > { %20360 = vmatmul.mubr.bf16.gmra.mrb[60].mxu1 %v25900_v33 }
 0x6be   : > { %20696 = vmatpush3.bf16.msra.mxu1 %v22832_v9 }
 0x6bf   : > { %20697 = vmatprep.subr.bf16.mxu1 %v22834_v22 }
 0x6c2   : > { %20698 = vmatpush3.bf16.msra.mxu1 %v22834_v22 }
 0x6c3   : > { %20715 = vmatprep.subr.bf16.mxu1 %v25101_v24 }
 0x75f   : > { %v20061_v27 = vpop.f32.mrb[48].mxu0 }
 0x760   : > { %v10514_v19 = vadd.f32 %v20061_v27, %v25104_v57  ;;  %v10425_v17 = vpop.f32.mrb[49].mxu0 }
 0x761   : > { %v10512_v3 = vadd.f32 %v25104_v57, %v10425_v17  ;;  %v20062_v42 = vpop.f32.mrb[50].mxu0 }
 0x762   : > { %v10515_v29 = vadd.f32 %v20062_v42, %v25104_v57  ;;  %v10428_v35 = vpop.f32.mrb[51].mxu0  ;;  %v10530_v1 = vmax.f32 %v10514_v19, 0.0  ;;  %v22833_v42 = vld [vmem:[#allocation8 + $0x6e8] sm:$0xff]  }
 0x763   : > { %v10513_v44 = vadd.f32 %v25104_v57, %v10428_v35  ;;  %v10528_v38 = vmax.f32 %v10512_v3, 0.0 }
 0x764   : > { %v10531_v59 = vmax.f32 %v10515_v29, 0.0 }
 0x765   : > { %v10529_v5 = vmax.f32 %v10513_v44, 0.0 }
 0x766   : > { %v25110_v39 = vpack.c.bf16 %v10531_v59, %v10530_v1 }
 0x767   : > { %v25112_v8 = vpack.c.bf16 %v10529_v5, %v10528_v38  ;;  %v20065_v51 = vpop.f32.mrb[52].mxu0 }
 0x768   : > { %v10518_v62 = vadd.f32 %v20065_v51, %v25104_v57  ;;  %v10441_v47 = vpop.f32.mrb[53].mxu0 }
 0x769   : > { %v10516_v58 = vadd.f32 %v25104_v57, %v10441_v47  ;;  %v20066_v30 = vpop.f32.mrb[54].mxu0  ;;  %20380 = vmatmul.mubr.bf16.vlgmr.msra.gmra.mrb[64].mxu0 %v25112_v8 }
 0x76a   : > { %v10519_v40 = vadd.f32 %v20066_v30, %v25104_v57  ;;  %v10444_v46 = vpop.f32.mrb[55].mxu0  ;;  %20383 = vmatprep.mubr.bf16.mxu0 %v25110_v39  ;;  %20396 = vmatpush3.bf16.msra.mxu0 %v22823_v56  ;;  %v10534_v21 = vmax.f32 %v10518_v62, 0.0 }
 0x76b   : > { %v10517_v41 = vadd.f32 %v25104_v57, %v10444_v46  ;;  %20397 = vmatprep.subr.bf16.mxu0 %v22825_v23  ;;  %v10532_v34 = vmax.f32 %v10516_v58, 0.0  ;;  %v22835_v46 = vld [vmem:[#allocation8 + $0x6f0] sm:$0xff]  }
 0x76c   : > { %v10535_v18 = vmax.f32 %v10519_v40, 0.0 }
 0x76d   : > { %v10533_v14 = vmax.f32 %v10517_v41, 0.0  ;;  %v25819_v41 = vshrl.u32 %v25110_v39, 16 }
 0x76e   : > { %v25120_v2 = vpack.c.bf16 %v10535_v18, %v10534_v21  ;;  %20398 = vmatpush3.bf16.msra.mxu0 %v22825_v23 }
 0x76f   : > { %v25122_v53 = vpack.c.bf16 %v10533_v14, %v10532_v34  ;;  %v20069_v36 = vpop.f32.mrb[56].mxu0  ;;  %20399 = vmatprep.subr.bf16.mxu0 %v22827_v63 }
 0x770   : > { %v10522_v13 = vadd.f32 %v20069_v36, %v25104_v57  ;;  %v10457_v32 = vpop.f32.mrb[57].mxu0 }
 0x771   : > { %v10520_v10 = vadd.f32 %v25104_v57, %v10457_v32  ;;  %v20070_v31 = vpop.f32.mrb[58].mxu0  ;;  %20384 = vmatmul.mubr.bf16.gmra.mrb[68].mxu0 %v25122_v53 }
 0x772   : > { %v10523_v56 = vadd.f32 %v20070_v31, %v25104_v57  ;;  %v10460_v26 = vpop.f32.mrb[59].mxu0  ;;  %20387 = vmatprep.mubr.bf16.mxu0 %v25120_v2  ;;  %20400 = vmatpush3.bf16.msra.mxu0 %v22827_v63  ;;  %v10538_v49 = vmax.f32 %v10522_v13, 0.0  ;;  %v12265_v63 = vshrl.u32 %v25112_v8, 16 }
 0x773   : > { %v10521_v54 = vadd.f32 %v25104_v57, %v10460_v26  ;;  %20401 = vmatprep.subr.bf16.mxu0 %v22829_v28  ;;  %v10536_v22 = vmax.f32 %v10520_v10, 0.0 }
 0x774   : > { %v10539_v9 = vmax.f32 %v10523_v56, 0.0 }
 0x775   : > { %v10537_v27 = vmax.f32 %v10521_v54, 0.0 }
 0x776   : > { %v25130_v19 = vpack.c.bf16 %v10539_v9, %v10538_v49  ;;  %20402 = vmatpush3.bf16.msra.mxu0 %v22829_v28  ;;  %v22837_v49 = vld [vmem:[#allocation8 + $0x6f8] sm:$0xff]   ;;  %v22838_v9 = vld [vmem:[#allocation8 + $0x6c8] sm:$0xff]  }
 0x777   : > { %v25132_v17 = vpack.c.bf16 %v10537_v27, %v10536_v22  ;;  %v20073_v3 = vpop.f32.mrb[60].mxu0  ;;  %20403 = vmatprep.subr.bf16.mxu0 %v22831_v0  ;;  %v12267_v22 = vrot.slane %v12265_v63, 7 }
 0x778   : > { %v10526_v29 = vadd.f32 %v20073_v3, %v25104_v57  ;;  %v20349_v35 = vpop.f32.mrb[48].mxu1  ;;  %v10473_v44 = vpop.f32.mrb[61].mxu0  ;;  %v25974_v12 = vshrl.u32 %v25130_v19, 16 }
 0x779   : > { %v12202_v1 = vadd.f32 %v20349_v35, %v25104_v57  ;;  %v10524_v59 = vadd.f32 %v25104_v57, %v10473_v44  ;;  %v12114_v38 = vpop.f32.mrb[49].mxu1  ;;  %v20074_v5 = vpop.f32.mrb[62].mxu0  ;;  %20388 = vmatmul.mubr.bf16.gmra.mrb[72].mxu0 %v25132_v17  ;;  %v12268_v44 = vshll.u32 %v25112_v8, 16  ;;  %v25970_v25 = vshll.u32 %v25132_v17, 16 }
 0x77a   : > { %v12200_v51 = vadd.f32 %v25104_v57, %v12114_v38  ;;  %v10527_v23 = vadd.f32 %v20074_v5, %v25104_v57  ;;  %v20350_v62 = vpop.f32.mrb[50].mxu1  ;;  %v10476_v47 = vpop.f32.mrb[63].mxu0  ;;  %20391 = vmatprep.mubr.bf16.mxu0 %v25130_v19  ;;  %20404 = vmatpush3.bf16.msra.mxu0 %v22831_v0  ;;  %v10542_v21 = vmax.f32 %v10526_v29, 0.0  ;;  %v22839_v38 = vld [vmem:[#allocation8 + $0x740] sm:$0xff]   ;;  %v12275_v5 = vshll.u32 %v25110_v39, 16 }
 0x77b   : > { %v12203_v58 = vadd.f32 %v20350_v62, %v25104_v57  ;;  %v10525_v30 = vadd.f32 %v25104_v57, %v10476_v47  ;;  %v12117_v40 = vpop.f32.mrb[51].mxu1  ;;  %20405 = vmatprep.subr.bf16.mxu0 %v22833_v42  ;;  %v12218_v14 = vmax.f32 %v12202_v1, 0.0  ;;  %v10540_v36 = vmax.f32 %v10524_v59, 0.0  ;;  %v22840_v62 = vld [vmem:[#allocation8 + $0x6d0] sm:$0xff]  }
 0x77c   : > { %v10543_v18 = vmax.f32 %v10527_v23, 0.0  ;;  %v12201_v34 = vadd.f32 %v25104_v57, %v12117_v40  ;;  %v12216_v32 = vmax.f32 %v12200_v51, 0.0  ;;  %v12270_v23 = vor.u32 %v12268_v44, %v12267_v22 }
 0x77d   : > { %v12219_v28 = vmax.f32 %v12203_v58, 0.0  ;;  %v10541_v13 = vmax.f32 %v10525_v30, 0.0  ;;  %v25816_v47 = vshrl.u32 %v25122_v53, 16  ;;  %v25814_v40 = vshrl.u32 %v25120_v2, 16 }
 0x77e   : > { %v25146_v10 = vpack.c.bf16 %v10543_v18, %v10542_v21  ;;  %v12217_v31 = vmax.f32 %v12201_v34, 0.0  ;;  %20406 = vmatpush3.bf16.msra.mxu0 %v22833_v42  ;;  %v12274_v42 = vrot.slane %v25819_v41, 7 }
 0x77f   : > { %v25148_v56 = vpack.c.bf16 %v12219_v28, %v12218_v14  ;;  %v25150_v26 = vpack.c.bf16 %v10541_v13, %v10540_v36  ;;  %20407 = vmatprep.subr.bf16.mxu0 %v22835_v46  ;;  %v25182_v36 = vsel %vm23640_vm3, 0, %v12270_v23  ;;  %v22841_v28 = vld [vmem:[#allocation8 + $0x748] sm:$0xff]   ;;  %v12281_v13 = vrot.slane %v25816_v47, 7 }
 0x780   : > { %v25152_v54 = vpack.c.bf16 %v12217_v31, %v12216_v32  ;;  %v20353_v0 = vpop.f32.mrb[52].mxu1  ;;  %20699 = vmatprep.mubr.bf16.mxu1 %v25146_v10  ;;  %v25813_v23 = vshrl.u32 %v25132_v17, 16 }
 0x781   : > { %v12206_v27 = vadd.f32 %v20353_v0, %v25104_v57  ;;  %v12130_v3 = vpop.f32.mrb[53].mxu1  ;;  %20392 = vmatmul.mubr.bf16.gmra.mrb[76].mxu0 %v25150_v26 }
 0x782   : > { %v12204_v29 = vadd.f32 %v25104_v57, %v12130_v3  ;;  %v20354_v35 = vpop.f32.mrb[54].mxu1  ;;  %20700 = vmatmul.mubr.bf16.vlgmr.msra.gmra.mrb[64].mxu1 %v25152_v54  ;;  %20408 = vmatpush3.bf16.msra.mxu0 %v22835_v46  ;;  %v25818_v3 = vshll.u32 %v25122_v53, 16 }
 0x783   : > { %v12207_v1 = vadd.f32 %v20354_v35, %v25104_v57  ;;  %v12133_v59 = vpop.f32.mrb[55].mxu1  ;;  %20703 = vmatprep.mubr.bf16.mxu1 %v25148_v56  ;;  %20716 = vmatpush3.bf16.msra.mxu1 %v25101_v24  ;;  %v12222_v58 = vmax.f32 %v12206_v27, 0.0  ;;  %v12277_v24 = vor.u32 %v12275_v5, %v12274_v42  ;;  %v25817_v35 = vshll.u32 %v25120_v2, 16 }
 0x784   : > { %v12205_v51 = vadd.f32 %v25104_v57, %v12133_v59  ;;  %20409 = vmatprep.subr.bf16.mxu0 %v22837_v49  ;;  %20717 = vmatprep.subr.bf16.mxu1 %v22838_v9  ;;  %v12220_v46 = vmax.f32 %v12204_v29, 0.0  ;;  %v12284_v59 = vor.u32 %v25818_v3, %v12281_v13 }
 0x785   : > { %v12223_v30 = vmax.f32 %v12207_v1, 0.0  ;;  %20411 = vmatprep.mubr.bf16.mxu0 %v25900_v33  ;;  %v25190_v0 = vsel %vm23640_vm3, 0, %v12277_v24  ;;  %v22844_v24 = vld [vmem:[#allocation8 + $0x6e0] sm:$0xff]  }
 0x786   : > { %v12221_v21 = vmax.f32 %v12205_v51, 0.0  ;;  %20410 = vmatpush3.bf16.msra.mxu0 %v22837_v49  ;;  %v22842_v49 = vld [vmem:[#allocation8 + $0x6d8] sm:$0xff]   ;;  %v22843_v51 = vld [vmem:[#allocation8 + $0x750] sm:$0xff]  }
 0x787   : > { %v25176_v18 = vpack.c.bf16 %v12223_v30, %v12222_v58  ;;  %20718 = vmatpush3.bf16.msra.mxu1 %v22838_v9  ;;  %20427 = vmatprep.subr.bf16.mxu0 %v22839_v38  ;;  %v12288_v9 = vrot.slane %v25814_v40, 7  ;;  %v25831_v40 = vshll.u32 %v25146_v10, 16 }
 0x788   : > { %v25178_v34 = vpack.c.bf16 %v12221_v21, %v12220_v46  ;;  %v20357_v14 = vpop.f32.mrb[56].mxu1  ;;  %20719 = vmatprep.subr.bf16.mxu1 %v22840_v62  ;;  %v25812_v46 = vshrl.u32 %v25130_v19, 16 }
 0x789   : > { %v12210_v32 = vadd.f32 %v20357_v14, %v25104_v57  ;;  %v12146_v31 = vpop.f32.mrb[57].mxu1  ;;  %20412 = vmatmul.mubr.bf16.vlgmr.msra.gmra.mrb[64].mxu0 %v25182_v36 }
 0x78a   : > { %v12208_v22 = vadd.f32 %v25104_v57, %v12146_v31  ;;  %v20358_v27 = vpop.f32.mrb[58].mxu1  ;;  %20704 = vmatmul.mubr.bf16.gmra.mrb[68].mxu1 %v25178_v34  ;;  %20415 = vmatprep.mubr.bf16.mxu0 %v25190_v0 }
 0x78b   : > { %v12211_v42 = vadd.f32 %v20358_v27, %v25104_v57  ;;  %v12149_v29 = vpop.f32.mrb[59].mxu1  ;;  %20428 = vmatpush3.bf16.msra.mxu0 %v22839_v38  ;;  %20707 = vmatprep.mubr.bf16.mxu1 %v25176_v18  ;;  %v12226_v58 = vmax.f32 %v12210_v32, 0.0  ;;  %v12291_v38 = vor.u32 %v25817_v35, %v12288_v9  ;;  %v25215_v32 = vsel %vm23640_vm3, 0, %v12284_v59 }
 0x78c   : > { %v12209_v1 = vadd.f32 %v25104_v57, %v12149_v29  ;;  %20720 = vmatpush3.bf16.msra.mxu1 %v22840_v62  ;;  %20429 = vmatprep.subr.bf16.mxu0 %v22841_v28  ;;  %v12224_v21 = vmax.f32 %v12208_v22, 0.0  ;;  %v25815_v62 = vshrl.u32 %v25146_v10, 16  ;;  %v12295_v9 = vrot.slane %v25813_v23, 7  ;;  %v22847_v23 = vld [vmem:[#allocation8 + $0x760] sm:$0xff]  }
 0x78d   : > { %v12227_v30 = vmax.f32 %v12211_v42, 0.0  ;;  %20721 = vmatprep.subr.bf16.mxu1 %v22842_v49  ;;  %v22845_v42 = vld [vmem:[#allocation8 + $0x758] sm:$0xff]  }
 0x78e   : > { %v12225_v14 = vmax.f32 %v12209_v1, 0.0  ;;  %v12302_v1 = vrot.slane %v25812_v46, 7 }
 0x78f   : > { %v25209_v31 = vpack.c.bf16 %v12227_v30, %v12226_v58  ;;  %20430 = vmatpush3.bf16.msra.mxu0 %v22841_v28  ;;  %v25223_v28 = vsel %vm23640_vm3, 0, %v12291_v38  ;;  %v25820_v30 = vshll.u32 %v25132_v17, 16 }
 0x790   : > { %v25211_v13 = vpack.c.bf16 %v12225_v14, %v12224_v21  ;;  %20722 = vmatpush3.bf16.msra.mxu1 %v22842_v49  ;;  %v20361_v27 = vpop.f32.mrb[60].mxu1  ;;  %20431 = vmatprep.subr.bf16.mxu0 %v22843_v51  ;;  %v22846_v49 = vld [vmem:[#allocation8 + $0x6e8] sm:$0xff]   ;;  %v12316_v21 = vrot.slane %v25815_v62, 7  ;;  %v25823_v62 = vshrl.u32 %v25150_v26, 16 }
 0x791   : > { %v12214_v22 = vadd.f32 %v20361_v27, %v25104_v57  ;;  %v12162_v29 = vpop.f32.mrb[61].mxu1  ;;  %20416 = vmatmul.mubr.bf16.gmra.mrb[68].mxu0 %v25215_v32  ;;  %20723 = vmatprep.subr.bf16.mxu1 %v22844_v24  ;;  %v25832_v27 = vshll.u32 %v25130_v19, 16  ;;  %v12298_v46 = vor.u32 %v25820_v30, %v12295_v9  ;;  %v25841_v48 = vshll.u32 %v25209_v31, 16 }
 0x792   : > { %v12212_v59 = vadd.f32 %v25104_v57, %v12162_v29  ;;  %v20362_v58 = vpop.f32.mrb[62].mxu1  ;;  %20708 = vmatmul.mubr.bf16.gmra.mrb[72].mxu1 %v25211_v13  ;;  %20419 = vmatprep.mubr.bf16.mxu0 %v25223_v28 }
 0x793   : > { %v12215_v14 = vadd.f32 %v20362_v58, %v25104_v57  ;;  %v12165_v38 = vpop.f32.mrb[63].mxu1  ;;  %20432 = vmatpush3.bf16.msra.mxu0 %v22843_v51  ;;  %20711 = vmatprep.mubr.bf16.mxu1 %v25209_v31  ;;  %v12230_v47 = vmax.f32 %v12214_v22, 0.0  ;;  %v22848_v51 = vld [vmem:[#allocation8 + $0x6f0] sm:$0xff]   ;;  %v12305_v35 = vor.u32 %v25832_v27, %v12302_v1  ;;  %v25253_v22 = vsel %vm23640_vm3, 0, %v12298_v46  ;;  %v22849_v1 = vld [vmem:[#allocation8 + $0x768] sm:$0xff]  }
 0x794   : > { %v12213_v29 = vadd.f32 %v25104_v57, %v12165_v38  ;;  %20724 = vmatpush3.bf16.msra.mxu1 %v22844_v24  ;;  %20433 = vmatprep.subr.bf16.mxu0 %v22845_v42  ;;  %v12228_v3 = vmax.f32 %v12212_v59, 0.0  ;;  %v12319_v57 = vor.u32 %v25831_v40, %v12316_v21  ;;  %v25821_v24 = vshrl.u32 %v25152_v54, 16 }
 0x795   : > { %v12231_v58 = vmax.f32 %v12215_v14, 0.0  ;;  %20725 = vmatprep.subr.bf16.mxu1 %v22846_v49  ;;  %v25822_v38 = vshrl.u32 %v25148_v56, 16  ;;  %v12309_v59 = vrot.slane %v25823_v62, 7  ;;  %v25825_v46 = vshll.u32 %v25150_v26, 16 }
 0x796   : > { %v12229_v41 = vmax.f32 %v12213_v29, 0.0  ;;  %v25834_v40 = vshrl.u32 %v25211_v13, 16  ;;  %v25838_v27 = vshrl.u32 %v25209_v31, 16 }
 0x797   : > { %v25246_v9 = vpack.c.bf16 %v12231_v58, %v12230_v47  ;;  %20434 = vmatpush3.bf16.msra.mxu0 %v22845_v42  ;;  %v25260_v47 = vsel %vm23640_vm3, 0, %v12305_v35  ;;  %v22850_v42 = vld [vmem:[#allocation8 + $0x6f8] sm:$0xff]   ;;  %v12330_v35 = vrot.slane %v25822_v38, 7  ;;  %v12312_v29 = vor.u32 %v25825_v46, %v12309_v59  ;;  %v22851_v58 = vld [vmem:[#allocation8 + $0x770] sm:$0xff]  }
 0x798   : > { %v25249_v30 = vpack.c.bf16 %v12229_v41, %v12228_v3  ;;  %20726 = vmatpush3.bf16.msra.mxu1 %v22846_v49  ;;  %20435 = vmatprep.subr.bf16.mxu0 %v22847_v23  ;;  %v25267_v3 = vsel %vm23640_vm3, 0, %v12319_v57  ;;  %v12323_v49 = vrot.slane %v25821_v24, 7  ;;  %v25829_v57 = vshll.u32 %v25152_v54, 16 }
 0x799   : > { %20420 = vmatmul.mubr.bf16.gmra.mrb[72].mxu0 %v25253_v22  ;;  %20727 = vmatprep.subr.bf16.mxu1 %v22848_v51  ;;  %v25824_v41 = vshll.u32 %v25246_v9, 16  ;;  %v25826_v21 = vshrl.u32 %v25246_v9, 16  ;;  %v25827_v24 = vshll.u32 %v25148_v56, 16  ;;  %v25294_v46 = vsel %vm23640_vm3, 0, %v12312_v29 }
 0x79a   : > { %20712 = vmatmul.mubr.bf16.gmra.mrb[76].mxu1 %v25249_v30  ;;  %20423 = vmatprep.mubr.bf16.mxu0 %v25260_v47  ;;  %v12326_v62 = vor.u32 %v25829_v57, %v12323_v49  ;;  %v12440_v49 = vrot.slane %v12268_v44, 1  ;;  %v25965_v57 = vshrl.u32 %v25110_v39, 16  ;;  %v25842_v50 = vshrl.u32 %v25249_v30, 16 }
 0x79b   : > { %20436 = vmatpush3.bf16.msra.mxu0 %v22847_v23  ;;  %20731 = vmatprep.mubr.bf16.mxu1 %v25267_v3  ;;  %v12470_v14 = vrot.slane %v25824_v41, 1  ;;  %v22852_v23 = vld [vmem:[#allocation8 + $0x740] sm:$0xff]   ;;  %v12333_v59 = vor.u32 %v25827_v24, %v12330_v35  ;;  %v25830_v41 = vshrl.u32 %v25176_v18, 16  ;;  %v12442_v35 = vrot.slane %v12275_v5, 1 }
 0x79c   : > { %20728 = vmatpush3.bf16.msra.mxu1 %v22848_v51  ;;  %20437 = vmatprep.subr.bf16.mxu0 %v22849_v1  ;;  %v25828_v51 = vshrl.u32 %v25178_v34, 16  ;;  %v25833_v24 = vshll.u32 %v25178_v34, 16  ;;  %v12441_v5 = vor.u32 %v12440_v49, %v12265_v63  ;;  %v22857_v49 = vld [vmem:[#allocation8 + $0x788] sm:$0xff]  }
 0x79d   : > { %20729 = vmatprep.subr.bf16.mxu1 %v22850_v42  ;;  %v25284_v38 = vor.u32 %v12470_v14, %v25826_v21  ;;  %v22853_v14 = vld [vmem:[#allocation8 + $0x778] sm:$0xff]   ;;  %v22854_v21 = vld [vmem:[#allocation8 + $0x748] sm:$0xff]   ;;  %v25311_v29 = vsel %vm23640_vm3, 0, %v12333_v59  ;;  %v12344_v44 = vrot.slane %v25830_v41, 7  ;;  %v12443_v41 = vor.u32 %v12442_v35, %v25965_v57 }
 0x79e   : > { %v25330_v63 = vsel %vm23724_vm6, %v12441_v5, 0  ;;  %v12351_v35 = vrot.slane %v25834_v40, 7 }
 0x79f   : > { %20438 = vmatpush3.bf16.msra.mxu0 %v22849_v1  ;;  %v25301_v1 = vsel %vm23640_vm3, 0, %v12326_v62  ;;  %v22855_v62 = vld [vmem:[#allocation8 + $0x780] sm:$0xff]  }
 0x7a0   : > { %20730 = vmatpush3.bf16.msra.mxu1 %v22850_v42  ;;  %20439 = vmatprep.subr.bf16.mxu0 %v22851_v58  ;;  %v12337_v42 = vrot.slane %v25828_v51, 7  ;;  %v22856_v51 = vld [vmem:[#allocation8 + $0x750] sm:$0xff]  }
 0x7a1   : > { %20424 = vmatmul.mubr.bf16.gmra.mrb[76].mxu0 %v25294_v46  ;;  %20747 = vmatprep.subr.bf16.mxu1 %v22852_v23 }
 0x7a2   : > { %20443 = vmatprep.mubr.bf16.mxu0 %v25900_v33  ;;  %v12340_v59 = vor.u32 %v25833_v24, %v12337_v42  ;;  %v25966_v42 = vshll.u32 %v25122_v53, 16 }
 0x7a3   : > { %20732 = vmatmul.mubr.bf16.vlgmr.msra.gmra.mrb[64].mxu1 %v25301_v1  ;;  %20440 = vmatpush3.bf16.msra.mxu0 %v22851_v58  ;;  %v25835_v58 = vshll.u32 %v25176_v18, 16 }
 0x7a4   : > { %20735 = vmatprep.mubr.bf16.mxu1 %v25311_v29  ;;  %20748 = vmatpush3.bf16.msra.mxu1 %v22852_v23  ;;  %v12444_v24 = vrot.slane %v25966_v42, 1  ;;  %v25337_v57 = vsel %vm23640_vm3, 0, %v12340_v59  ;;  %v12358_v59 = vrot.slane %v25838_v27, 7  ;;  %v25969_v27 = vshrl.u32 %v25120_v2, 16 }
 0x7a5   : > { %20441 = vmatprep.subr.bf16.mxu0 %v22853_v14  ;;  %20749 = vmatprep.subr.bf16.mxu1 %v22854_v21  ;;  %v12347_v23 = vor.u32 %v25835_v58, %v12344_v44  ;;  %v25967_v44 = vshll.u32 %v25120_v2, 16  ;;  %v22859_v58 = vld [vmem:[#allocation8 + $0x790] sm:$0xff]  }
 0x7a7   : > { %20442 = vmatpush3.bf16.msra.mxu0 %v22853_v14  ;;  %v25341_v14 = vsel %vm23724_vm6, %v12443_v41, 0  ;;  %v12446_v5 = vrot.slane %v25967_v44, 1  ;;  %v25351_v42 = vsel %vm23640_vm3, 0, %v12347_v23  ;;  %v25843_v41 = vshll.u32 %v25211_v13, 16 }
 0x7a8   : > { %20750 = vmatpush3.bf16.msra.mxu1 %v22854_v21  ;;  %20459 = vmatprep.subr.bf16.mxu0 %v22855_v62  ;;  %v22858_v21 = vld [vmem:[#allocation8 + $0x758] sm:$0xff]   ;;  %v25968_v44 = vshrl.u32 %v25122_v53, 16 }
 0x7a9   : > { %20751 = vmatprep.subr.bf16.mxu1 %v22856_v51  ;;  %v12354_v23 = vor.u32 %v25843_v41, %v12351_v35  ;;  %v12448_v35 = vrot.slane %v25970_v25, 1  ;;  %v22863_v41 = vld [vmem:[#allocation8 + $0x7a0] sm:$0xff]  }
 0x7aa   : > { %20444 = vmatmul.mubr.bf16.vlgmr.msra.gmra.mrb[64].mxu0 %v25330_v63  ;;  %v12445_v40 = vor.u32 %v12444_v24, %v25968_v44  ;;  %v22861_v44 = vld [vmem:[#allocation8 + $0x798] sm:$0xff]  }
 0x7ab   : > { %20736 = vmatmul.mubr.bf16.gmra.mrb[68].mxu1 %v25337_v57  ;;  %20447 = vmatprep.mubr.bf16.mxu0 %v25341_v14 }
 0x7ac   : > { %20460 = vmatpush3.bf16.msra.mxu0 %v22855_v62  ;;  %20739 = vmatprep.mubr.bf16.mxu1 %v25351_v42  ;;  %v12447_v62 = vor.u32 %v12446_v5, %v25969_v27  ;;  %v25369_v24 = vsel %vm23724_vm6, %v12445_v40, 0  ;;  %v25376_v27 = vsel %vm23640_vm3, 0, %v12354_v23  ;;  %v12365_v40 = vrot.slane %v25842_v50, 7 }
 0x7ad   : > { %20752 = vmatpush3.bf16.msra.mxu1 %v22856_v51  ;;  %20461 = vmatprep.subr.bf16.mxu0 %v22857_v49  ;;  %v12361_v51 = vor.u32 %v25841_v48, %v12358_v59  ;;  %v25971_v5 = vshll.u32 %v25130_v19, 16  ;;  %v25972_v23 = vshll.u32 %v25146_v10, 16 }
 0x7ae   : > { %20753 = vmatprep.subr.bf16.mxu1 %v22858_v21 }
 0x7af   : > { %v12450_v59 = vrot.slane %v25971_v5, 1  ;;  %v25390_v25 = vsel %vm23640_vm3, 0, %v12361_v51  ;;  %v12454_v48 = vrot.slane %v25972_v23, 1  ;;  %v25973_v5 = vshrl.u32 %v25132_v17, 16  ;;  %v22864_v51 = vld [vmem:[#allocation8 + $0x770] sm:$0xff]  }
 0x7b0   : > { %20462 = vmatpush3.bf16.msra.mxu0 %v22857_v49  ;;  %v25380_v49 = vsel %vm23724_vm6, %v12447_v62, 0  ;;  %v25848_v62 = vshll.u32 %v25249_v30, 16 }
 0x7b1   : > { %20754 = vmatpush3.bf16.msra.mxu1 %v22858_v21  ;;  %20463 = vmatprep.subr.bf16.mxu0 %v22859_v58  ;;  %v22862_v21 = vld [vmem:[#allocation8 + $0x768] sm:$0xff]   ;;  %v12449_v50 = vor.u32 %v12448_v35, %v25973_v5  ;;  %v12451_v45 = vor.u32 %v12450_v59, %v25974_v12  ;;  %v25976_v5 = vshll.u32 %v25150_v26, 16 }
 0x7b2   : > { %20448 = vmatmul.mubr.bf16.gmra.mrb[68].mxu0 %v25369_v24  ;;  %20755 = vmatprep.subr.bf16.mxu1 %v22860_v11  ;;  %v12368_v60 = vor.u32 %v25848_v62, %v12365_v40  ;;  %v22865_v35 = vld [vmem:[#allocation8 + $0x7a8] sm:$0xff]   ;;  %v22868_v62 = vld [vmem:[#allocation8 + $0x780] sm:$0xff]  }
 0x7b3   : > { %20740 = vmatmul.mubr.bf16.gmra.mrb[72].mxu1 %v25376_v27  ;;  %20451 = vmatprep.mubr.bf16.mxu0 %v25380_v49  ;;  %v12452_v16 = vrot.slane %v25976_v5, 1  ;;  %v25417_v12 = vsel %vm23724_vm6, %v12451_v45, 0  ;;  %v25979_v45 = vshrl.u32 %v25150_v26, 16  ;;  %v22867_v5 = vld [vmem:[#allocation8 + $0x7b0] sm:$0xff]  }
 0x7b4   : > { %20464 = vmatpush3.bf16.msra.mxu0 %v22859_v58  ;;  %20743 = vmatprep.mubr.bf16.mxu1 %v25390_v25  ;;  %v25975_v58 = vshrl.u32 %v25146_v10, 16  ;;  %v25413_v40 = vsel %vm23640_vm3, 0, %v12368_v60  ;;  %v25978_v60 = vshll.u32 %v25148_v56, 16 }
 0x7b5   : > { %20756 = vmatpush3.bf16.msra.mxu1 %v22860_v11  ;;  %20465 = vmatprep.subr.bf16.mxu0 %v22861_v44  ;;  %v25406_v11 = vsel %vm23724_vm6, %v12449_v50, 0 }
 0x7b6   : > { %20757 = vmatprep.subr.bf16.mxu1 %v22862_v21  ;;  %v12455_v23 = vor.u32 %v12454_v48, %v25975_v58  ;;  %v22866_v48 = vld [vmem:[#allocation8 + $0x778] sm:$0xff]   ;;  %v12458_v59 = vrot.slane %v25978_v60, 1  ;;  %v12453_v58 = vor.u32 %v12452_v16, %v25979_v45 }
 0x7b7   : > { %v22869_v16 = vld [vmem:[#allocation8 + $0x7b8] sm:$0xff]  }
 0x7b8   : > { %20466 = vmatpush3.bf16.msra.mxu0 %v22861_v44  ;;  %v25423_v50 = vsel %vm23724_vm6, %v12455_v23, 0  ;;  %v25977_v44 = vshll.u32 %v25152_v54, 16  ;;  %v25980_v23 = vshrl.u32 %v25152_v54, 16  ;;  %v25438_v52 = vsel %vm23724_vm6, %v12453_v58, 0 }
 0x7b9   : > { %20758 = vmatpush3.bf16.msra.mxu1 %v22862_v21  ;;  %20467 = vmatprep.subr.bf16.mxu0 %v22863_v41  ;;  %v25984_v58 = vshrl.u32 %v25178_v34, 16 }
 0x7ba   : > { %20452 = vmatmul.mubr.bf16.gmra.mrb[72].mxu0 %v25406_v11  ;;  %20759 = vmatprep.subr.bf16.mxu1 %v22864_v51  ;;  %v12456_v21 = vrot.slane %v25977_v44, 1  ;;  %v25981_v44 = vshrl.u32 %v25148_v56, 16 }
 0x7bb   : > { %20744 = vmatmul.mubr.bf16.gmra.mrb[76].mxu1 %v25413_v40  ;;  %20455 = vmatprep.mubr.bf16.mxu0 %v25417_v12 }
 0x7bc   : > { %20468 = vmatpush3.bf16.msra.mxu0 %v22863_v41  ;;  %20763 = vmatprep.mubr.bf16.mxu1 %v25423_v50  ;;  %v12457_v55 = vor.u32 %v12456_v21, %v25980_v23  ;;  %v12459_v41 = vor.u32 %v12458_v59, %v25981_v44  ;;  %v25983_v59 = vshll.u32 %v25176_v18, 16 }
 0x7bd   : > { %20760 = vmatpush3.bf16.msra.mxu1 %v22864_v51  ;;  %20469 = vmatprep.subr.bf16.mxu0 %v22865_v35  ;;  %v22870_v51 = vld [vmem:[#allocation8 + $0x788] sm:$0xff]  }
 0x7be   : > { %20761 = vmatprep.subr.bf16.mxu1 %v22866_v48  ;;  %v25443_v60 = vsel %vm23724_vm6, %v12457_v55, 0  ;;  %v12462_v45 = vrot.slane %v25983_v59, 1  ;;  %v22871_v55 = vld [vmem:[#allocation8 + $0x7c0] sm:$0xff]   ;;  %v25986_v59 = vshll.u32 %v25211_v13, 16 }
 0x7c0   : > { %20470 = vmatpush3.bf16.msra.mxu0 %v22865_v35  ;;  %v25982_v35 = vshll.u32 %v25178_v34, 16  ;;  %v12464_v7 = vrot.slane %v25986_v59, 1  ;;  %v25989_v59 = vshrl.u32 %v25209_v31, 16 }
 0x7c1   : > { %20762 = vmatpush3.bf16.msra.mxu1 %v22866_v48  ;;  %20471 = vmatprep.subr.bf16.mxu0 %v22867_v5  ;;  %v25451_v48 = vsel %vm23724_vm6, %v12459_v41, 0  ;;  %v22873_v41 = vld [vmem:[#allocation8 + $0x7c8] sm:$0xff]  }
 0x7c2   : > { %20456 = vmatmul.mubr.bf16.gmra.mrb[76].mxu0 %v25438_v52  ;;  %20779 = vmatprep.subr.bf16.mxu1 %v22868_v62  ;;  %v12460_v21 = vrot.slane %v25982_v35, 1  ;;  %v22874_v35 = vld [vmem:[#allocation8 + $0x798] sm:$0xff]  }
 0x7c3   : > { %20475 = vmatprep.mubr.bf16.mxu0 %v25182_v36  ;;  %v22872_v36 = vld [vmem:[#allocation8 + $0x790] sm:$0xff]  }
 0x7c4   : > { %20764 = vmatmul.mubr.bf16.vlgmr.msra.gmra.mrb[64].mxu1 %v25443_v60  ;;  %20472 = vmatpush3.bf16.msra.mxu0 %v22867_v5  ;;  %v12461_v23 = vor.u32 %v12460_v21, %v25984_v58  ;;  %v25985_v5 = vshrl.u32 %v25176_v18, 16  ;;  %v25988_v58 = vshrl.u32 %v25211_v13, 16 }
 0x7c5   : > { %20767 = vmatprep.mubr.bf16.mxu1 %v25451_v48  ;;  %20780 = vmatpush3.bf16.msra.mxu1 %v22868_v62 }
 0x7c6   : > { %20473 = vmatprep.subr.bf16.mxu0 %v22869_v16  ;;  %20781 = vmatprep.subr.bf16.mxu1 %v22870_v51  ;;  %v12463_v44 = vor.u32 %v12462_v45, %v25985_v5  ;;  %v25463_v62 = vsel %vm23724_vm6, %v12461_v23, 0  ;;  %v22875_v45 = vld [vmem:[#allocation8 + $0x7d0] sm:$0xff]   ;;  %v12465_v23 = vor.u32 %v12464_v7, %v25988_v58  ;;  %v22876_v5 = vld [vmem:[#allocation8 + $0x7a0] sm:$0xff]  }
 0x7c7   : > { %v22880_v58 = vld [vmem:[#allocation8 + $0x7b0] sm:$0xff]  }
 0x7c8   : > { %20474 = vmatpush3.bf16.msra.mxu0 %v22869_v16  ;;  %v25471_v16 = vsel %vm23724_vm6, %v12463_v44, 0  ;;  %v22877_v44 = vld [vmem:[#allocation8 + $0x7d8] sm:$0xff]  }
 0x7c9   : > { %20782 = vmatpush3.bf16.msra.mxu1 %v22870_v51  ;;  %20491 = vmatprep.subr.bf16.mxu0 %v22871_v55  ;;  %v25987_v51 = vshll.u32 %v25209_v31, 16 }
 0x7ca   : > { %20783 = vmatprep.subr.bf16.mxu1 %v22872_v36 }
 0x7cb   : > { %20476 = vmatmul.mubr.bf16.vlgmr.msra.gmra.mrb[64].mxu0 %v25190_v0  ;;  %v12466_v21 = vrot.slane %v25987_v51, 1  ;;  %v25990_v51 = vshll.u32 %v25249_v30, 16 }
 0x7cc   : > { %20768 = vmatmul.mubr.bf16.gmra.mrb[68].mxu1 %v25463_v62  ;;  %20479 = vmatprep.mubr.bf16.mxu0 %v25215_v32 }
 0x7cd   : > { %20492 = vmatpush3.bf16.msra.mxu0 %v22871_v55  ;;  %20771 = vmatprep.mubr.bf16.mxu1 %v25471_v16  ;;  %v12467_v6 = vor.u32 %v12466_v21, %v25989_v59  ;;  %v25483_v55 = vsel %vm23724_vm6, %v12465_v23, 0  ;;  %v12468_v15 = vrot.slane %v25990_v51, 1  ;;  %v22881_v23 = vld [vmem:[#allocation8 + $0x7e8] sm:$0xff]   ;;  %v22885_v59 = vld [vmem:[#allocation8 + $0x7f8] sm:$0xff]   ;;  %v22888_v51 = vld [vmem:[#allocation8 + $0x7d0] sm:$0xff]  }
 0x7ce   : > { %20784 = vmatpush3.bf16.msra.mxu1 %v22872_v36  ;;  %20493 = vmatprep.subr.bf16.mxu0 %v22873_v41  ;;  %v22878_v36 = vld [vmem:[#allocation8 + $0x7a8] sm:$0xff]  }
 0x7cf   : > { %20785 = vmatprep.subr.bf16.mxu1 %v22874_v35  ;;  %v25491_v7 = vsel %vm23724_vm6, %v12467_v6, 0 }
 0x7d1   : > { %20494 = vmatpush3.bf16.msra.mxu0 %v22873_v41  ;;  %v22879_v41 = vld [vmem:[#allocation8 + $0x7e0] sm:$0xff]  }
 0x7d2   : > { %20786 = vmatpush3.bf16.msra.mxu1 %v22874_v35  ;;  %20495 = vmatprep.subr.bf16.mxu0 %v22875_v45  ;;  %v25991_v35 = vshrl.u32 %v25249_v30, 16 }
 0x7d3   : > { %20480 = vmatmul.mubr.bf16.gmra.mrb[68].mxu0 %v25223_v28  ;;  %20787 = vmatprep.subr.bf16.mxu1 %v22876_v5 }
 0x7d4   : > { %20772 = vmatmul.mubr.bf16.gmra.mrb[72].mxu1 %v25483_v55  ;;  %20483 = vmatprep.mubr.bf16.mxu0 %v25253_v22  ;;  %v12469_v21 = vor.u32 %v12468_v15, %v25991_v35  ;;  %v22883_v15 = vld [vmem:[#allocation8 + $0x7f0] sm:$0xff]   ;;  %v22890_v35 = vld [vmem:[#allocation8 + $0x7d8] sm:$0xff]  }
 0x7d5   : > { %20496 = vmatpush3.bf16.msra.mxu0 %v22875_v45  ;;  %20775 = vmatprep.mubr.bf16.mxu1 %v25491_v7  ;;  %v22882_v45 = vld [vmem:[#allocation8 + $0x7b8] sm:$0xff]  }
 0x7d6   : > { %20788 = vmatpush3.bf16.msra.mxu1 %v22876_v5  ;;  %20497 = vmatprep.subr.bf16.mxu0 %v22877_v44  ;;  %v25499_v6 = vsel %vm23724_vm6, %v12469_v21, 0  ;;  %v22884_v5 = vld [vmem:[#allocation8 + $0x7c0] sm:$0xff]  }
 0x7d7   : > { %20789 = vmatprep.subr.bf16.mxu1 %v22878_v36  ;;  %v22892_v21 = vld [vmem:[#allocation8 + $0x7e0] sm:$0xff]  }
 0x7d9   : > { %20498 = vmatpush3.bf16.msra.mxu0 %v22877_v44  ;;  %v22886_v44 = vld [vmem:[#allocation8 + $0x7c8] sm:$0xff]  }
 0x7da   : > { %20790 = vmatpush3.bf16.msra.mxu1 %v22878_v36  ;;  %20499 = vmatprep.subr.bf16.mxu0 %v22879_v41  ;;  %v22887_v36 = vld [vmem:[#allocation8 + $0x800] sm:$0xff]  }
 0x7db   : > { %20484 = vmatmul.mubr.bf16.gmra.mrb[72].mxu0 %v25260_v47  ;;  %20791 = vmatprep.subr.bf16.mxu1 %v22880_v58 }
 0x7dc   : > { %20776 = vmatmul.mubr.bf16.gmra.mrb[76].mxu1 %v25499_v6  ;;  %20487 = vmatprep.mubr.bf16.mxu0 %v25294_v46 }
 0x7dd   : > { %20500 = vmatpush3.bf16.msra.mxu0 %v22879_v41  ;;  %20795 = vmatprep.mubr.bf16.mxu1 %v25301_v1  ;;  %v22889_v41 = vld [vmem:[#allocation8 + $0x808] sm:$0xff]  }
 0x7de   : > { %20792 = vmatpush3.bf16.msra.mxu1 %v22880_v58  ;;  %20501 = vmatprep.subr.bf16.mxu0 %v22881_v23  ;;  %v22893_v58 = vld [vmem:[#allocation8 + $0x818] sm:$0xff]  }
 0x7df   : > { %20793 = vmatprep.subr.bf16.mxu1 %v22882_v45 }
 0x7e1   : > { %20502 = vmatpush3.bf16.msra.mxu0 %v22881_v23  ;;  %v22894_v23 = vld [vmem:[#allocation8 + $0x7e8] sm:$0xff]  }
 0x7e2   : > { %20794 = vmatpush3.bf16.msra.mxu1 %v22882_v45  ;;  %20503 = vmatprep.subr.bf16.mxu0 %v22883_v15  ;;  %v25992_v45 = vshrl.u32 %v25246_v9, 16 }
 0x7e3   : > { %20488 = vmatmul.mubr.bf16.gmra.mrb[76].mxu0 %v25267_v3  ;;  %20811 = vmatprep.subr.bf16.mxu1 %v22884_v5 }
 0x7e4   : > { %20507 = vmatprep.mubr.bf16.mxu0 %v25112_v8  ;;  %v22891_v8 = vld [vmem:[#allocation8 + $0x810] sm:$0xff]  }
 0x7e5   : > { %20796 = vmatmul.mubr.bf16.vlgmr.msra.gmra.mrb[64].mxu1 %v25311_v29  ;;  %20504 = vmatpush3.bf16.msra.mxu0 %v22883_v15  ;;  %v12372_v15 = vrot.slane %v25992_v45, 7  ;;  %v22904_v45 = vld [vmem:[#allocation8 + $0x810] sm:$0xff]  }
 0x7e6   : > { %20799 = vmatprep.mubr.bf16.mxu1 %v25337_v57  ;;  %20812 = vmatpush3.bf16.msra.mxu1 %v22884_v5  ;;  %v22895_v5 = vld [vmem:[#allocation8 + $0x820] sm:$0xff]  }
 0x7e7   : > { %20505 = vmatprep.subr.bf16.mxu0 %v22885_v59  ;;  %20813 = vmatprep.subr.bf16.mxu1 %v22886_v44 }
 0x7e9   : > { %20506 = vmatpush3.bf16.msra.mxu0 %v22885_v59  ;;  %v25993_v59 = vshll.u32 %v25246_v9, 16 }
 0x7ea   : > { %20814 = vmatpush3.bf16.msra.mxu1 %v22886_v44  ;;  %20523 = vmatprep.subr.bf16.mxu0 %v22887_v36 }
 0x7eb   : > { %20815 = vmatprep.subr.bf16.mxu1 %v22888_v51  ;;  %v12375_v44 = vor.u32 %v25993_v59, %v12372_v15  ;;  %v22905_v15 = vld [vmem:[#allocation8 + $0x848] sm:$0xff]   ;;  %v22908_v59 = vld [vmem:[#allocation8 + $0x820] sm:$0xff]  }
 0x7ec   : > { %20508 = vmatmul.mubr.bf16.vlgmr.msra.gmra.mrb[64].mxu0 %v25110_v39 }
 0x7ed   : > { %20800 = vmatmul.mubr.bf16.gmra.mrb[68].mxu1 %v25351_v42  ;;  %20511 = vmatprep.mubr.bf16.mxu0 %v25122_v53 }
 0x7ee   : > { %20524 = vmatpush3.bf16.msra.mxu0 %v22887_v36  ;;  %20803 = vmatprep.mubr.bf16.mxu1 %v25376_v27  ;;  %v22896_v36 = vld [vmem:[#allocation8 + $0x7f0] sm:$0xff]  }
 0x7ef   : > { %20816 = vmatpush3.bf16.msra.mxu1 %v22888_v51  ;;  %20525 = vmatprep.subr.bf16.mxu0 %v22889_v41  ;;  %v22897_v51 = vld [vmem:[#allocation8 + $0x828] sm:$0xff]  }
 0x7f0   : > { %20817 = vmatprep.subr.bf16.mxu1 %v22890_v35 }
 0x7f2   : > { %20526 = vmatpush3.bf16.msra.mxu0 %v22889_v41  ;;  %v25523_v41 = vsel %vm23640_vm3, 0, %v12375_v44  ;;  %v22909_v44 = vld [vmem:[#allocation8 + $0x858] sm:$0xff]  }
 0x7f3   : > { %20818 = vmatpush3.bf16.msra.mxu1 %v22890_v35  ;;  %20527 = vmatprep.subr.bf16.mxu0 %v22891_v8  ;;  %v22898_v35 = vld [vmem:[#allocation8 + $0x7f8] sm:$0xff]  }
 0x7f4   : > { %20512 = vmatmul.mubr.bf16.gmra.mrb[68].mxu0 %v25120_v2  ;;  %20819 = vmatprep.subr.bf16.mxu1 %v22892_v21 }
 0x7f5   : > { %20804 = vmatmul.mubr.bf16.gmra.mrb[72].mxu1 %v25390_v25  ;;  %20515 = vmatprep.mubr.bf16.mxu0 %v25132_v17 }
 0x7f6   : > { %20528 = vmatpush3.bf16.msra.mxu0 %v22891_v8  ;;  %20807 = vmatprep.mubr.bf16.mxu1 %v25413_v40  ;;  %v22899_v8 = vld [vmem:[#allocation8 + $0x830] sm:$0xff]  }
 0x7f7   : > { %20820 = vmatpush3.bf16.msra.mxu1 %v22892_v21  ;;  %20529 = vmatprep.subr.bf16.mxu0 %v22893_v58  ;;  %v22900_v21 = vld [vmem:[#allocation8 + $0x800] sm:$0xff]  }
 0x7f8   : > { %20821 = vmatprep.subr.bf16.mxu1 %v22894_v23 }
 0x7fa   : > { %20530 = vmatpush3.bf16.msra.mxu0 %v22893_v58  ;;  %v22902_v58 = vld [vmem:[#allocation8 + $0x808] sm:$0xff]  }
 0x7fb   : > { %20822 = vmatpush3.bf16.msra.mxu1 %v22894_v23  ;;  %20531 = vmatprep.subr.bf16.mxu0 %v22895_v5  ;;  %v22903_v23 = vld [vmem:[#allocation8 + $0x840] sm:$0xff]  }
 0x7fc   : > { %20516 = vmatmul.mubr.bf16.gmra.mrb[72].mxu0 %v25130_v19  ;;  %20823 = vmatprep.subr.bf16.mxu1 %v22896_v36 }
 0x7fd   : > { %20808 = vmatmul.mubr.bf16.gmra.mrb[76].mxu1 %v25523_v41  ;;  %20519 = vmatprep.mubr.bf16.mxu0 %v25150_v26 }
 0x7fe   : > { %20532 = vmatpush3.bf16.msra.mxu0 %v22895_v5  ;;  %20827 = vmatprep.mubr.bf16.mxu1 %v25152_v54  ;;  %v22906_v5 = vld [vmem:[#allocation8 + $0x818] sm:$0xff]  }
 0x7ff   : > { %20824 = vmatpush3.bf16.msra.mxu1 %v22896_v36  ;;  %20533 = vmatprep.subr.bf16.mxu0 %v22897_v51  ;;  %v22910_v36 = vld [vmem:[#allocation8 + $0x828] sm:$0xff]  }
 0x800   : > { %20825 = vmatprep.subr.bf16.mxu1 %v22898_v35 }
 0x802   : > { %20534 = vmatpush3.bf16.msra.mxu0 %v22897_v51  ;;  %v22911_v51 = vld [vmem:[#allocation8 + $0x860] sm:$0xff]  }
 0x803   : > { %20826 = vmatpush3.bf16.msra.mxu1 %v22898_v35  ;;  %20535 = vmatprep.subr.bf16.mxu0 %v22899_v8  ;;  %v22912_v35 = vld [vmem:[#allocation8 + $0x830] sm:$0xff]  }
 0x804   : > { %20520 = vmatmul.mubr.bf16.gmra.mrb[76].mxu0 %v25146_v10  ;;  %20843 = vmatprep.subr.bf16.mxu1 %v22900_v21 }
 0x805   : > { %20539 = vmatprep.mubr.bf16.mxu0 %v25330_v63  ;;  %v22907_v63 = vld [vmem:[#allocation8 + $0x850] sm:$0xff]  }
 0x806   : > { %20828 = vmatmul.mubr.bf16.vlgmr.msra.gmra.mrb[64].mxu1 %v25148_v56  ;;  %20536 = vmatpush3.bf16.msra.mxu0 %v22899_v8  ;;  %v22913_v8 = vld [vmem:[#allocation8 + $0x868] sm:$0xff]  }
 0x807   : > { %20831 = vmatprep.mubr.bf16.mxu1 %v25178_v34  ;;  %20844 = vmatpush3.bf16.msra.mxu1 %v22900_v21  ;;  %v22914_v21 = vld [vmem:[#allocation8 + $0x838] sm:$0xff]  }
 0x808   : > { %20537 = vmatprep.subr.bf16.mxu0 %v22901_v37  ;;  %20845 = vmatprep.subr.bf16.mxu1 %v22902_v58 }
 0x80a   : > { %20538 = vmatpush3.bf16.msra.mxu0 %v22901_v37  ;;  %v22915_v37 = vld [vmem:[#allocation8 + $0x870] sm:$0xff]  }
 0x80b   : > { %20846 = vmatpush3.bf16.msra.mxu1 %v22902_v58  ;;  %20555 = vmatprep.subr.bf16.mxu0 %v22903_v23  ;;  %v22916_v58 = vld [vmem:[#allocation8 + $0x840] sm:$0xff]  }
 0x80c   : > { %20847 = vmatprep.subr.bf16.mxu1 %v22904_v45 }
 0x80d   : > { %20540 = vmatmul.mubr.bf16.vlgmr.msra.gmra.mrb[64].mxu0 %v25341_v14 }
 0x80e   : > { %20832 = vmatmul.mubr.bf16.gmra.mrb[68].mxu1 %v25176_v18  ;;  %20543 = vmatprep.mubr.bf16.mxu0 %v25369_v24 }
 0x80f   : > { %20556 = vmatpush3.bf16.msra.mxu0 %v22903_v23  ;;  %20835 = vmatprep.mubr.bf16.mxu1 %v25211_v13  ;;  %v22917_v23 = vld [vmem:[#allocation8 + $0x878] sm:$0xff]  }
 0x810   : > { %20848 = vmatpush3.bf16.msra.mxu1 %v22904_v45  ;;  %20557 = vmatprep.subr.bf16.mxu0 %v22905_v15  ;;  %v22918_v45 = vld [vmem:[#allocation8 + $0x848] sm:$0xff]  }
 0x811   : > { %20849 = vmatprep.subr.bf16.mxu1 %v22906_v5 }
 0x813   : > { %20558 = vmatpush3.bf16.msra.mxu0 %v22905_v15  ;;  %v22919_v15 = vld [vmem:[#allocation8 + $0x880] sm:$0xff]  }
 0x814   : > { %20850 = vmatpush3.bf16.msra.mxu1 %v22906_v5  ;;  %20559 = vmatprep.subr.bf16.mxu0 %v22907_v63  ;;  %v22920_v5 = vld [vmem:[#allocation8 + $0x850] sm:$0xff]  }
 0x815   : > { %20544 = vmatmul.mubr.bf16.gmra.mrb[68].mxu0 %v25380_v49  ;;  %20851 = vmatprep.subr.bf16.mxu1 %v22908_v59 }
 0x816   : > { %20836 = vmatmul.mubr.bf16.gmra.mrb[72].mxu1 %v25209_v31  ;;  %20547 = vmatprep.mubr.bf16.mxu0 %v25406_v11 }
 0x817   : > { %20560 = vmatpush3.bf16.msra.mxu0 %v22907_v63  ;;  %20839 = vmatprep.mubr.bf16.mxu1 %v25249_v30  ;;  %v22921_v63 = vld [vmem:[#allocation8 + $0x888] sm:$0xff]  }
 0x818   : > { %20852 = vmatpush3.bf16.msra.mxu1 %v22908_v59  ;;  %20561 = vmatprep.subr.bf16.mxu0 %v22909_v44  ;;  %v22922_v59 = vld [vmem:[#allocation8 + $0x858] sm:$0xff]  }
 0x819   : > { %20853 = vmatprep.subr.bf16.mxu1 %v22910_v36 }
 0x81b   : > { %20562 = vmatpush3.bf16.msra.mxu0 %v22909_v44  ;;  %v22924_v44 = vld [vmem:[#allocation8 + $0x860] sm:$0xff]  }
 0x81c   : > { %20854 = vmatpush3.bf16.msra.mxu1 %v22910_v36  ;;  %20563 = vmatprep.subr.bf16.mxu0 %v22911_v51  ;;  %v22925_v36 = vld [vmem:[#allocation8 + $0x898] sm:$0xff]  }
 0x81d   : > { %20548 = vmatmul.mubr.bf16.gmra.mrb[72].mxu0 %v25417_v12  ;;  %20855 = vmatprep.subr.bf16.mxu1 %v22912_v35 }
 0x81e   : > { %20840 = vmatmul.mubr.bf16.gmra.mrb[76].mxu1 %v25246_v9  ;;  %20551 = vmatprep.mubr.bf16.mxu0 %v25438_v52 }
 0x81f   : > { %20564 = vmatpush3.bf16.msra.mxu0 %v22911_v51  ;;  %20859 = vmatprep.mubr.bf16.mxu1 %v25443_v60  ;;  %v22928_v51 = vld [vmem:[#allocation8 + $0x870] sm:$0xff]  }
 0x820   : > { %20856 = vmatpush3.bf16.msra.mxu1 %v22912_v35  ;;  %20565 = vmatprep.subr.bf16.mxu0 %v22913_v8  ;;  %v22929_v35 = vld [vmem:[#allocation8 + $0x8a8] sm:$0xff]  }
 0x821   : > { %20857 = vmatprep.subr.bf16.mxu1 %v22914_v21 }
 0x823   : > { %20566 = vmatpush3.bf16.msra.mxu0 %v22913_v8  ;;  %v22931_v8 = vld [vmem:[#allocation8 + $0x8b0] sm:$0xff]  }
 0x824   : > { %20858 = vmatpush3.bf16.msra.mxu1 %v22914_v21  ;;  %20567 = vmatprep.subr.bf16.mxu0 %v22915_v37  ;;  %v22932_v21 = vld [vmem:[#allocation8 + $0x880] sm:$0xff]  }
 0x825   : > { %20552 = vmatmul.mubr.bf16.gmra.mrb[76].mxu0 %v25423_v50  ;;  %20875 = vmatprep.subr.bf16.mxu1 %v22916_v58 }
 0x826   : > { %20571 = vmatprep.mubr.bf16.mxu0 %v25190_v0  ;;  %v22923_v0 = vld [vmem:[#allocation8 + $0x890] sm:$0xff]  }
 0x827   : > { %20860 = vmatmul.mubr.bf16.vlgmr.msra.gmra.mrb[64].mxu1 %v25451_v48  ;;  %20568 = vmatpush3.bf16.msra.mxu0 %v22915_v37  ;;  %v22954_v37 = vld [vmem:[#allocation8 + $0x8d8] sm:$0xff]  }
 0x828   : > { %20863 = vmatprep.mubr.bf16.mxu1 %v25463_v62  ;;  %20876 = vmatpush3.bf16.msra.mxu1 %v22916_v58  ;;  %v25998_v58 = vld [vmem:[#allocation24_spill] sm:$0xff] }
 0x829   : > { %20569 = vmatprep.subr.bf16.mxu0 %v22917_v23  ;;  %20877 = vmatprep.subr.bf16.mxu1 %v22918_v45 }
 0x82b   : > { %20570 = vmatpush3.bf16.msra.mxu0 %v22917_v23  ;;  %v26000_v23 = vld [vmem:[#allocation25_spill] sm:$0xff] }
 0x82c   : > { %20878 = vmatpush3.bf16.msra.mxu1 %v22918_v45  ;;  %20587 = vmatprep.subr.bf16.mxu0 %v22919_v15  ;;  %v26001_v45 = vld [vmem:[#allocation27_spill] sm:$0xff] }
 0x82d   : > { %20879 = vmatprep.subr.bf16.mxu1 %v22920_v5 }
 0x82e   : > { %20572 = vmatmul.mubr.bf16.vlgmr.msra.gmra.mrb[64].mxu0 %v25215_v32  ;;  %v22926_v32 = vld [vmem:[#allocation8 + $0x868] sm:$0xff]  }
 0x82f   : > { %20864 = vmatmul.mubr.bf16.gmra.mrb[68].mxu1 %v25471_v16  ;;  %20575 = vmatprep.mubr.bf16.mxu0 %v25223_v28  ;;  %v22927_v28 = vld [vmem:[#allocation8 + $0x8a0] sm:$0xff]  }
 0x830   : > { %20588 = vmatpush3.bf16.msra.mxu0 %v22919_v15  ;;  %20867 = vmatprep.mubr.bf16.mxu1 %v25483_v55  ;;  %v26002_v15 = vld [vmem:[#allocation28_spill] sm:$0xff] }
 0x831   : > { %20880 = vmatpush3.bf16.msra.mxu1 %v22920_v5  ;;  %20589 = vmatprep.subr.bf16.mxu0 %v22921_v63  ;;  %v26003_v5 = vld [vmem:[#allocation31_spill] sm:$0xff] }
 0x832   : > { %20881 = vmatprep.subr.bf16.mxu1 %v22922_v59 }
 0x834   : > { %20590 = vmatpush3.bf16.msra.mxu0 %v22921_v63  ;;  %v26004_v63 = vld [vmem:[#allocation32_spill] sm:$0xff] }
 0x835   : > { %20882 = vmatpush3.bf16.msra.mxu1 %v22922_v59  ;;  %20591 = vmatprep.subr.bf16.mxu0 %v22923_v0  ;;  %v26006_v59 = vld [vmem:[#allocation36_spill] sm:$0xff] }
 0x836   : > { %20576 = vmatmul.mubr.bf16.gmra.mrb[68].mxu0 %v25253_v22  ;;  %20883 = vmatprep.subr.bf16.mxu1 %v22924_v44  ;;  %v25560_v22 = vsel %vm23724_vm6, %v25284_v38, 0  ;;  %v22934_v38 = vld [vmem:[#allocation8 + $0x888] sm:$0xff]  }
 0x837   : > { %20868 = vmatmul.mubr.bf16.gmra.mrb[72].mxu1 %v25491_v7  ;;  %20579 = vmatprep.mubr.bf16.mxu0 %v25260_v47  ;;  %v22930_v47 = vld [vmem:[#allocation8 + $0x878] sm:$0xff]  }
 0x838   : > { %20592 = vmatpush3.bf16.msra.mxu0 %v22923_v0  ;;  %20871 = vmatprep.mubr.bf16.mxu1 %v25499_v6  ;;  %v23240_v0 = vmov 1065369472  }
 0x839   : > { %20884 = vmatpush3.bf16.msra.mxu1 %v22924_v44  ;;  %20593 = vmatprep.subr.bf16.mxu0 %v22925_v36  ;;  %v22973_v44 = vld [vmem:[#allocation13] sm:$0xff]  }
 0x83a   : > { %20885 = vmatprep.subr.bf16.mxu1 %v22926_v32 }
 0x83c   : > { %20594 = vmatpush3.bf16.msra.mxu0 %v22925_v36  ;;  %v23241_v36 = vmov 0.0  }
 0x83d   : > { %20886 = vmatpush3.bf16.msra.mxu1 %v22926_v32  ;;  %20595 = vmatprep.subr.bf16.mxu0 %v22927_v28  ;;  %v22974_v32 = vld [vmem:[#allocation13 + $0x8] sm:$0xff]  }
 0x83e   : > { %20580 = vmatmul.mubr.bf16.gmra.mrb[72].mxu0 %v25294_v46  ;;  %20887 = vmatprep.subr.bf16.mxu1 %v22928_v51  ;;  %v22936_v46 = vld [vmem:[#allocation8 + $0x890] sm:$0xff]  }
 0x83f   : > { %20872 = vmatmul.mubr.bf16.gmra.mrb[76].mxu1 %v25560_v22  ;;  %20583 = vmatprep.mubr.bf16.mxu0 %v25267_v3  ;;  %v22935_v3 = vld [vmem:[#allocation8 + $0x8c0] sm:$0xff]  }
 0x840   : > { %20596 = vmatpush3.bf16.msra.mxu0 %v22927_v28  ;;  %20891 = vmatprep.mubr.bf16.mxu1 %v25311_v29  ;;  %v22938_v29 = vld [vmem:[#allocation8 + $0x898] sm:$0xff]  }
 0x841   : > { %20888 = vmatpush3.bf16.msra.mxu1 %v22928_v51  ;;  %20597 = vmatprep.subr.bf16.mxu0 %v22929_v35  ;;  %v22975_v28 = vld [vmem:[#allocation13 + $0x10] sm:$0xff]   ;;  %v22976_v51 = vld [vmem:[#allocation13 + $0x18] sm:$0xff]  }
 0x842   : > { %20889 = vmatprep.subr.bf16.mxu1 %v22930_v47 }
 0x844   : > { %20598 = vmatpush3.bf16.msra.mxu0 %v22929_v35  ;;  %v22977_v35 = vld [vmem:[#allocation13 + $0x20] sm:$0xff]  }
 0x845   : > { %20890 = vmatpush3.bf16.msra.mxu1 %v22930_v47  ;;  %20599 = vmatprep.subr.bf16.mxu0 %v22931_v8  ;;  %v17166_v47 = vld [vmem:[#allocation11 + $0x5] ss:$0 sm:$0xff] }
 0x846   : > { %20584 = vmatmul.mubr.bf16.gmra.mrb[76].mxu0 %v25301_v1  ;;  %20907 = vmatprep.subr.bf16.mxu1 %v22932_v21  ;;  %v22937_v1 = vld [vmem:[#allocation8 + $0x8c8] sm:$0xff]  }
 0x847   : > { %20603 = vmatprep.mubr.bf16.mxu0 %v25110_v39  ;;  %v22939_v39 = vld [vmem:[#allocation8 + $0x8d0] sm:$0xff]  }
 0x848   : > { %20892 = vmatmul.mubr.bf16.vlgmr.msra.gmra.mrb[64].mxu1 %v25337_v57  ;;  %20600 = vmatpush3.bf16.msra.mxu0 %v22931_v8  ;;  %v22940_v57 = vld [vmem:[#allocation8 + $0x8a0] sm:$0xff]  }
 0x849   : > { %20895 = vmatprep.mubr.bf16.mxu1 %v25351_v42  ;;  %20908 = vmatpush3.bf16.msra.mxu1 %v22932_v21  ;;  %v22941_v42 = vld [vmem:[#allocation8 + $0x8d8] sm:$0xff]   ;;  %v25629_v8 = vld [vmem:[#allocation11 + $0x6] ss:$0 sm:$0xff] }
 0x84a   : > { %20601 = vmatprep.subr.bf16.mxu0 %v22933_v61  ;;  %20909 = vmatprep.subr.bf16.mxu1 %v22934_v38  ;;  %v25632_v21 = vadd.f32 %v25629_v8, %v17166_v47 }
 0x84c   : > { %20602 = vmatpush3.bf16.msra.mxu0 %v22933_v61 }
 0x84d   : > { %20910 = vmatpush3.bf16.msra.mxu1 %v22934_v38  ;;  %20619 = vmatprep.subr.bf16.mxu0 %v22935_v3 }
 0x84e   : > { %20911 = vmatprep.subr.bf16.mxu1 %v22936_v46 }
 0x84f   : > { %20604 = vmatmul.mubr.bf16.vlgmr.msra.gmra.mrb[64].mxu0 %v25122_v53  ;;  %v22942_v53 = vld [vmem:[#allocation8 + $0x8a8] sm:$0xff]  }
 0x850   : > { %20896 = vmatmul.mubr.bf16.gmra.mrb[68].mxu1 %v25376_v27  ;;  %20607 = vmatprep.mubr.bf16.mxu0 %v25120_v2  ;;  %v22943_v2 = vld [vmem:[#allocation8 + $0x8e0] sm:$0xff]   ;;  %v22944_v27 = vld [vmem:[#allocation8 + $0x8b0] sm:$0xff]  }
 0x851   : > { %20620 = vmatpush3.bf16.msra.mxu0 %v22935_v3  ;;  %20899 = vmatprep.mubr.bf16.mxu1 %v25390_v25  ;;  %v22945_v25 = vld [vmem:[#allocation8 + $0x8e8] sm:$0xff]  }
 0x852   : > { %20912 = vmatpush3.bf16.msra.mxu1 %v22936_v46  ;;  %20621 = vmatprep.subr.bf16.mxu0 %v22937_v1 }
 0x853   : > { %20913 = vmatprep.subr.bf16.mxu1 %v22938_v29 }
 0x855   : > { %20622 = vmatpush3.bf16.msra.mxu0 %v22937_v1 }
 0x856   : > { %20914 = vmatpush3.bf16.msra.mxu1 %v22938_v29  ;;  %20623 = vmatprep.subr.bf16.mxu0 %v22939_v39 }
 0x857   : > { %20608 = vmatmul.mubr.bf16.gmra.mrb[68].mxu0 %v25132_v17  ;;  %20915 = vmatprep.subr.bf16.mxu1 %v22940_v57  ;;  %v22946_v17 = vld [vmem:[#allocation8 + $0x8b8] sm:$0xff]  }
 0x858   : > { %20900 = vmatmul.mubr.bf16.gmra.mrb[72].mxu1 %v25413_v40  ;;  %20611 = vmatprep.mubr.bf16.mxu0 %v25130_v19  ;;  %v22947_v19 = vld [vmem:[#allocation8 + $0x8f0] sm:$0xff]   ;;  %v22948_v40 = vld [vmem:[#allocation8 + $0x8c0] sm:$0xff]  }
 0x859   : > { %20624 = vmatpush3.bf16.msra.mxu0 %v22939_v39  ;;  %20903 = vmatprep.mubr.bf16.mxu1 %v25523_v41  ;;  %v22950_v41 = vld [vmem:[#allocation8 + $0x8c8] sm:$0xff]  }
 0x85a   : > { %20916 = vmatpush3.bf16.msra.mxu1 %v22940_v57  ;;  %20625 = vmatprep.subr.bf16.mxu0 %v22941_v42 }
 0x85b   : > { %20917 = vmatprep.subr.bf16.mxu1 %v22942_v53 }
 0x85d   : > { %20626 = vmatpush3.bf16.msra.mxu0 %v22941_v42 }
 0x85e   : > { %20918 = vmatpush3.bf16.msra.mxu1 %v22942_v53  ;;  %20627 = vmatprep.subr.bf16.mxu0 %v22943_v2 }
 0x85f   : > { %20612 = vmatmul.mubr.bf16.gmra.mrb[72].mxu0 %v25150_v26  ;;  %20919 = vmatprep.subr.bf16.mxu1 %v22944_v27  ;;  %v22949_v26 = vld [vmem:[#allocation8 + $0x8f8] sm:$0xff]  }
 0x860   : > { %20904 = vmatmul.mubr.bf16.gmra.mrb[76].mxu1 %v25900_v33  ;;  %20615 = vmatprep.mubr.bf16.mxu0 %v25146_v10  ;;  %v22951_v10 = vld [vmem:[#allocation10 + $0x40] sm:$0xff]  }
 0x861   : > { %20628 = vmatpush3.bf16.msra.mxu0 %v22943_v2  ;;  %20923 = vmatprep.mubr.bf16.mxu1 %v25148_v56  ;;  %v22952_v56 = vld [vmem:[#allocation8 + $0x8d0] sm:$0xff]  }
 0x862   : > { %20920 = vmatpush3.bf16.msra.mxu1 %v22944_v27  ;;  %20629 = vmatprep.subr.bf16.mxu0 %v22945_v25 }
 0x863   : > { %20921 = vmatprep.subr.bf16.mxu1 %v22946_v17 }
 0x865   : > { %20630 = vmatpush3.bf16.msra.mxu0 %v22945_v25 }
 0x866   : > { %20922 = vmatpush3.bf16.msra.mxu1 %v22946_v17  ;;  %20631 = vmatprep.subr.bf16.mxu0 %v22947_v19 }
 0x867   : > { %20616 = vmatmul.mubr.bf16.gmra.mrb[76].mxu0 %v25152_v54  ;;  %20939 = vmatprep.subr.bf16.mxu1 %v22948_v40  ;;  %v22953_v54 = vld [vmem:[#allocation10 + $0x48] sm:$0xff]  }
 0x868   : > { %20635 = vmatprep.mubr.bf16.mxu0 %v25341_v14  ;;  %v22957_v14 = vld [vmem:[#allocation10 + $0x58] sm:$0xff]  }
 0x869   : > { %20924 = vmatmul.mubr.bf16.vlgmr.msra.gmra.mrb[64].mxu1 %v25178_v34  ;;  %20632 = vmatpush3.bf16.msra.mxu0 %v22947_v19  ;;  %v22956_v34 = vld [vmem:[#allocation8 + $0x8e0] sm:$0xff]  }
 0x86a   : > { %20927 = vmatprep.mubr.bf16.mxu1 %v25176_v18  ;;  %20940 = vmatpush3.bf16.msra.mxu1 %v22948_v40  ;;  %v22955_v18 = vld [vmem:[#allocation10 + $0x50] sm:$0xff]  }
 0x86b   : > { %20633 = vmatprep.subr.bf16.mxu0 %v22949_v26  ;;  %20941 = vmatprep.subr.bf16.mxu1 %v22950_v41 }
 0x86d   : > { %20634 = vmatpush3.bf16.msra.mxu0 %v22949_v26 }
 0x86e   : > { %20942 = vmatpush3.bf16.msra.mxu1 %v22950_v41  ;;  %20651 = vmatprep.subr.bf16.mxu0 %v22951_v10 }
 0x86f   : > { %20943 = vmatprep.subr.bf16.mxu1 %v22952_v56 }
 0x870   : > { %20636 = vmatmul.mubr.bf16.vlgmr.msra.gmra.mrb[64].mxu0 %v25369_v24  ;;  %v22958_v24 = vld [vmem:[#allocation8 + $0x8e8] sm:$0xff]  }
 0x871   : > { %20928 = vmatmul.mubr.bf16.gmra.mrb[68].mxu1 %v25211_v13  ;;  %20639 = vmatprep.mubr.bf16.mxu0 %v25380_v49  ;;  %v22960_v13 = vld [vmem:[#allocation8 + $0x8f0] sm:$0xff]   ;;  %v22961_v49 = vld [vmem:[#allocation10 + $0x68] sm:$0xff]  }
 0x872   : > { %20652 = vmatpush3.bf16.msra.mxu0 %v22951_v10  ;;  %20931 = vmatprep.mubr.bf16.mxu1 %v25209_v31  ;;  %v22959_v31 = vld [vmem:[#allocation10 + $0x60] sm:$0xff]  }
 0x873   : > { %20944 = vmatpush3.bf16.msra.mxu1 %v22952_v56  ;;  %20653 = vmatprep.subr.bf16.mxu0 %v22953_v54 }
 0x874   : > { %20945 = vmatprep.subr.bf16.mxu1 %v22954_v37 }
 0x876   : > { %20654 = vmatpush3.bf16.msra.mxu0 %v22953_v54 }
 0x877   : > { %20946 = vmatpush3.bf16.msra.mxu1 %v22954_v37  ;;  %20655 = vmatprep.subr.bf16.mxu0 %v22955_v18 }
 0x878   : > { %20640 = vmatmul.mubr.bf16.gmra.mrb[68].mxu0 %v25406_v11  ;;  %20947 = vmatprep.subr.bf16.mxu1 %v22956_v34  ;;  %v22962_v11 = vld [vmem:[#allocation8 + $0x8f8] sm:$0xff]  }
 0x879   : > { %20932 = vmatmul.mubr.bf16.gmra.mrb[72].mxu1 %v25249_v30  ;;  %20643 = vmatprep.mubr.bf16.mxu0 %v25417_v12  ;;  %v22963_v30 = vld [vmem:[#allocation10 + $0x70] sm:$0xff]   ;;  %v22966_v12 = vld [vmem:[#allocation10 + $0x48] sm:$0xff]  }
 0x87a   : > { %20656 = vmatpush3.bf16.msra.mxu0 %v22955_v18  ;;  %20935 = vmatprep.mubr.bf16.mxu1 %v25246_v9  ;;  %v22964_v9 = vld [vmem:[#allocation10 + $0x40] sm:$0xff]  }
 0x87b   : > { %20948 = vmatpush3.bf16.msra.mxu1 %v22956_v34  ;;  %20657 = vmatprep.subr.bf16.mxu0 %v22957_v14 }
 0x87c   : > { %20949 = vmatprep.subr.bf16.mxu1 %v22958_v24 }
 0x87e   : > { %20658 = vmatpush3.bf16.msra.mxu0 %v22957_v14 }
 0x87f   : > { %20950 = vmatpush3.bf16.msra.mxu1 %v22958_v24  ;;  %20659 = vmatprep.subr.bf16.mxu0 %v22959_v31 }
 0x880   : > { %20644 = vmatmul.mubr.bf16.gmra.mrb[72].mxu0 %v25438_v52  ;;  %20951 = vmatprep.subr.bf16.mxu1 %v22960_v13  ;;  %v22965_v52 = vld [vmem:[#allocation10 + $0x78] sm:$0xff]  }
 0x881   : > { %20936 = vmatmul.mubr.bf16.gmra.mrb[76].mxu1 %v25900_v33  ;;  %20647 = vmatprep.mubr.bf16.mxu0 %v25423_v50  ;;  %v22967_v50 = vld [vmem:[#allocation10 + $0x50] sm:$0xff]  }
 0x882   : > { %20660 = vmatpush3.bf16.msra.mxu0 %v22959_v31  ;;  %20955 = vmatprep.mubr.bf16.mxu1 %v25451_v48  ;;  %v22968_v48 = vld [vmem:[#allocation10 + $0x58] sm:$0xff]  }
 0x883   : > { %20952 = vmatpush3.bf16.msra.mxu1 %v22960_v13  ;;  %20661 = vmatprep.subr.bf16.mxu0 %v22961_v49 }
 0x884   : > { %20953 = vmatprep.subr.bf16.mxu1 %v22962_v11 }
 0x886   : > { %20662 = vmatpush3.bf16.msra.mxu0 %v22961_v49 }
 0x887   : > { %20954 = vmatpush3.bf16.msra.mxu1 %v22962_v11  ;;  %20663 = vmatprep.subr.bf16.mxu0 %v22963_v30 }
 0x888   : > { %20648 = vmatmul.mubr.bf16.gmra.mrb[76].mxu0 %v25443_v60  ;;  %20971 = vmatprep.subr.bf16.mxu1 %v22964_v9  ;;  %v22970_v60 = vld [vmem:[#allocation10 + $0x68] sm:$0xff]  }
 0x889   : > { %20667 = vmatprep.mubr.bf16.mxu0 %v24605_v43  ;;  %v22969_v43 = vld [vmem:[#allocation10 + $0x60] sm:$0xff]  }
 0x88a   : > { %20956 = vmatmul.mubr.bf16.vlgmr.msra.gmra.mrb[64].mxu1 %v25463_v62  ;;  %20664 = vmatpush3.bf16.msra.mxu0 %v22963_v30  ;;  %v25994_v62 = vld [vmem:[#allocation26_spill] sm:$0xff] }
 0x88b   : > { %20959 = vmatprep.mubr.bf16.mxu1 %v25471_v16  ;;  %20972 = vmatpush3.bf16.msra.mxu1 %v22964_v9  ;;  %v25995_v16 = vld [vmem:[#allocation29_spill] sm:$0xff] }
 0x88c   : > { %20665 = vmatprep.subr.bf16.mxu0 %v22965_v52  ;;  %20973 = vmatprep.subr.bf16.mxu1 %v22966_v12 }
 0x88e   : > { %20666 = vmatpush3.bf16.msra.mxu0 %v22965_v52 }
 0x88f   : > { %20974 = vmatpush3.bf16.msra.mxu1 %v22966_v12 }
 0x890   : > { %20975 = vmatprep.subr.bf16.mxu1 %v22967_v50 }
 0x891   : > { %20668 = vmatmul.mubr.bf16.vlgmr.msra.gmra.mrb[64].mxu0 %v24603_v4  ;;  %v22971_v4 = vld [vmem:[#allocation10 + $0x70] sm:$0xff]  }
 0x892   : > { %20960 = vmatmul.mubr.bf16.gmra.mrb[68].mxu1 %v25483_v55  ;;  %20671 = vmatprep.mubr.bf16.mxu0 %v24615_v20  ;;  %v22972_v20 = vld [vmem:[#allocation10 + $0x78] sm:$0xff]  }
 0x893   : > { %20963 = vmatprep.mubr.bf16.mxu1 %v25491_v7  ;;  %20976 = vmatpush3.bf16.msra.mxu1 %v22967_v50  ;;  %v25996_v55 = vld [vmem:[#allocation30_spill] sm:$0xff]  ;;  %v25997_v7 = vld [vmem:[#allocation33_spill] sm:$0xff] }
 0x894   : > { %20977 = vmatprep.subr.bf16.mxu1 %v22968_v48 }
 0x897   : > { %20978 = vmatpush3.bf16.msra.mxu1 %v22968_v48 }
 0x898   : > { %20979 = vmatprep.subr.bf16.mxu1 %v22969_v43 }
 0x899   : > { %20672 = vmatmul.mubr.bf16.gmra.mrb[68].mxu0 %v25994_v62 }
 0x89a   : > { %20964 = vmatmul.mubr.bf16.gmra.mrb[72].mxu1 %v25499_v6  ;;  %20675 = vmatprep.mubr.bf16.mxu0 %v25995_v16  ;;  %v25999_v6 = vld [vmem:[#allocation34_spill] sm:$0xff] }
 0x89b   : > { %20967 = vmatprep.mubr.bf16.mxu1 %v25560_v22  ;;  %20980 = vmatpush3.bf16.msra.mxu1 %v22969_v43  ;;  %v22978_v22 = vld [vmem:[#allocation13 + $0x28] sm:$0xff]  }
 0x89c   : > { %20981 = vmatprep.subr.bf16.mxu1 %v22970_v60 }
 0x89f   : > { %20982 = vmatpush3.bf16.msra.mxu1 %v22970_v60 }
 0x8a0   : > { %20983 = vmatprep.subr.bf16.mxu1 %v22971_v4 }
 0x8a1   : > { %20676 = vmatmul.mubr.bf16.gmra.mrb[72].mxu0 %v25996_v55 }
 0x8a2   : > { %20968 = vmatmul.mubr.bf16.gmra.mrb[76].mxu1 %v25900_v33  ;;  %20679 = vmatprep.mubr.bf16.mxu0 %v25997_v7  ;;  %v26005_v33 = vld [vmem:[#allocation35_spill] sm:$0xff] }
 0x8a3   : > { %20984 = vmatpush3.bf16.msra.mxu1 %v22971_v4  ;;  %20987 = vmatprep.mubr.bf16.mxu1 %v25998_v58 }
 0x8a4   : > { %20985 = vmatprep.subr.bf16.mxu1 %v22972_v20 }
 0x8a7   : > { %20986 = vmatpush3.bf16.msra.mxu1 %v22972_v20 }
 0x8a8   : > { %21003 = vmatprep.subr.bf16.mxu1 %v23241_v36 }
 0x8a9   : > { %20680 = vmatmul.mubr.bf16.gmra.mrb[76].mxu0 %v25999_v6 }
 0x8aa   : > { %20988 = vmatmul.mubr.bf16.vlgmr.msra.gmra.mrb[64].mxu1 %v26000_v23  ;;  %16340 = vmatprep.mubr.bf16.mxu0 %v23240_v0 }
 0x8ab   : > { %20991 = vmatprep.mubr.bf16.mxu1 %v26001_v45  ;;  %21004 = vmatpush3.bf16.msra.mxu1 %v22973_v44 }
 0x8ac   : > { %21005 = vmatprep.subr.bf16.mxu1 %v23241_v36 }
 0x8af   : > { %21006 = vmatpush3.bf16.msra.mxu1 %v22974_v32 }
 0x8b0   : > { %21007 = vmatprep.subr.bf16.mxu1 %v23241_v36 }
 0x8b2   : > { %20992 = vmatmul.mubr.bf16.gmra.mrb[68].mxu1 %v26002_v15 }
 0x8b3   : > { %20995 = vmatprep.mubr.bf16.mxu1 %v26003_v5  ;;  %21008 = vmatpush3.bf16.msra.mxu1 %v22975_v28 }
 0x8b4   : > { %21009 = vmatprep.subr.bf16.mxu1 %v23241_v36 }
 0x8b7   : > { %21010 = vmatpush3.bf16.msra.mxu1 %v22976_v51 }
 0x8b8   : > { %21011 = vmatprep.subr.bf16.mxu1 %v23241_v36 }
 0x8ba   : > { %20996 = vmatmul.mubr.bf16.gmra.mrb[72].mxu1 %v26004_v63 }
 0x8bb   : > { %20999 = vmatprep.mubr.bf16.mxu1 %v26005_v33  ;;  %21012 = vmatpush3.bf16.msra.mxu1 %v22977_v35 }
 0x8bc   : > { %21013 = vmatprep.subr.bf16.mxu1 %v23241_v36 }
 0x8bf   : > { %21014 = vmatpush3.bf16.msra.mxu1 %v22978_v22 }
 0x8c0   : > { %21015 = vmatprep.subr.bf16.mxu1 %v23241_v36 }
 0x8c2   : > { %21000 = vmatmul.mubr.bf16.gmra.mrb[76].mxu1 %v26006_v59 }
 0x8c3   : > { %21019 = vmatprep.mubr.msk.bf16.mxu1 %vm23242_vm7, %v23241_v36 }
 0x964   : > { %v20669_v61 = vpop.f32.mrb[64].mxu0 }
 0x965   : > { %v21087_v38 = vadd.f32 %v20669_v61, %v17166_v47  ;;  %v14301_v3 = vpop.f32.mrb[65].mxu0 }
 0x966   : > { %v21089_v46 = vadd.f32 %v17166_v47, %v14301_v3  ;;  %v20670_v1 = vpop.f32.mrb[66].mxu0 }
 0x967   : > { %v21088_v29 = vadd.f32 %v21087_v38, %v25629_v8  ;;  %v21092_v39 = vadd.f32 %v25632_v21, %v20670_v1  ;;  %v14304_v57 = vpop.f32.mrb[67].mxu0 }
 0x968   : > { %v21090_v42 = vadd.f32 %v21089_v46, %v25629_v8  ;;  %v21094_v53 = vadd.f32 %v25632_v21, %v14304_v57 }
 0x969   : > { %v14382_v2 = vmax.f32 %v21088_v29, 0.0  ;;  %v14383_v27 = vmax.f32 %v21092_v39, 0.0 }
 0x96a   : > { %v14380_v25 = vmax.f32 %v21090_v42, 0.0  ;;  %v14381_v17 = vmax.f32 %v21094_v53, 0.0 }
 0x96b   : > { %v25638_v19 = vpack.c.bf16 %v14383_v27, %v14382_v2 }
 0x96c   : > { %v25640_v40 = vpack.c.bf16 %v14381_v17, %v14380_v25  ;;  %v20673_v26 = vpop.f32.mrb[68].mxu0 }
 0x96d   : > { %v21096_v41 = vadd.f32 %v25632_v21, %v20673_v26  ;;  %v14317_v10 = vpop.f32.mrb[69].mxu0 }
 0x96e   : > { %v21098_v56 = vadd.f32 %v25632_v21, %v14317_v10  ;;  %v20674_v54 = vpop.f32.mrb[70].mxu0 }
 0x96f   : > { %v21100_v37 = vadd.f32 %v25632_v21, %v20674_v54  ;;  %v14320_v18 = vpop.f32.mrb[71].mxu0  ;;  %v14386_v14 = vmax.f32 %v21096_v41, 0.0 }
 0x970   : > { %v21102_v34 = vadd.f32 %v25632_v21, %v14320_v18  ;;  %v14384_v31 = vmax.f32 %v21098_v56, 0.0 }
 0x971   : > { %v14387_v24 = vmax.f32 %v21100_v37, 0.0 }
 0x972   : > { %v14385_v13 = vmax.f32 %v21102_v34, 0.0 }
 0x973   : > { %v25646_v49 = vpack.c.bf16 %v14387_v24, %v14386_v14 }
 0x974   : > { %v25648_v11 = vpack.c.bf16 %v14385_v13, %v14384_v31  ;;  %v20677_v30 = vpop.f32.mrb[72].mxu0 }
 0x975   : > { %v21104_v9 = vadd.f32 %v25632_v21, %v20677_v30  ;;  %v14333_v52 = vpop.f32.mrb[73].mxu0 }
 0x976   : > { %v21106_v12 = vadd.f32 %v25632_v21, %v14333_v52  ;;  %v20678_v50 = vpop.f32.mrb[74].mxu0 }
 0x977   : > { %v21108_v48 = vadd.f32 %v25632_v21, %v20678_v50  ;;  %v14336_v43 = vpop.f32.mrb[75].mxu0  ;;  %v14390_v62 = vmax.f32 %v21104_v9, 0.0 }
 0x978   : > { %v21110_v60 = vadd.f32 %v25632_v21, %v14336_v43  ;;  %v14388_v4 = vmax.f32 %v21106_v12, 0.0 }
 0x979   : > { %v14391_v16 = vmax.f32 %v21108_v48, 0.0 }
 0x97a   : > { %v14389_v20 = vmax.f32 %v21110_v60, 0.0 }
 0x97b   : > { %v25654_v55 = vpack.c.bf16 %v14391_v16, %v14390_v62 }
 0x97c   : > { %v25656_v7 = vpack.c.bf16 %v14389_v20, %v14388_v4  ;;  %v20681_v58 = vpop.f32.mrb[76].mxu0 }
 0x97d   : > { %v21112_v6 = vadd.f32 %v25632_v21, %v20681_v58  ;;  %v20989_v23 = vpop.f32.mrb[64].mxu1  ;;  %v14349_v45 = vpop.f32.mrb[77].mxu0 }
 0x97e   : > { %v21119_v15 = vadd.f32 %v20989_v23, %v17166_v47  ;;  %v21114_v5 = vadd.f32 %v25632_v21, %v14349_v45  ;;  %v16181_v63 = vpop.f32.mrb[65].mxu1  ;;  %v20682_v33 = vpop.f32.mrb[78].mxu0 }
 0x97f   : > { %v21121_v59 = vadd.f32 %v17166_v47, %v16181_v63  ;;  %v21116_v44 = vadd.f32 %v25632_v21, %v20682_v33  ;;  %v20990_v32 = vpop.f32.mrb[66].mxu1  ;;  %v14352_v28 = vpop.f32.mrb[79].mxu0  ;;  %v14394_v38 = vmax.f32 %v21112_v6, 0.0 }
 0x980   : > { %v21120_v51 = vadd.f32 %v21119_v15, %v25629_v8  ;;  %v21124_v35 = vadd.f32 %v25632_v21, %v20990_v32  ;;  %v21118_v22 = vadd.f32 %v25632_v21, %v14352_v28  ;;  %v16184_v61 = vpop.f32.mrb[67].mxu1  ;;  %v14392_v39 = vmax.f32 %v21114_v5, 0.0 }
 0x981   : > { %v21122_v3 = vadd.f32 %v21121_v59, %v25629_v8  ;;  %v14395_v46 = vmax.f32 %v21116_v44, 0.0  ;;  %v21126_v1 = vadd.f32 %v25632_v21, %v16184_v61 }
 0x982   : > { %v16262_v29 = vmax.f32 %v21120_v51, 0.0  ;;  %v16263_v47 = vmax.f32 %v21124_v35, 0.0  ;;  %v14393_v57 = vmax.f32 %v21118_v22, 0.0  ;;  %v22979_v35 = vld [vmem:[#allocation13 + $0x30] sm:$0xff]  }
 0x983   : > { %v16260_v42 = vmax.f32 %v21122_v3, 0.0  ;;  %v14403_v53 = vpack.c.bf16 %v14395_v46, %v14394_v38  ;;  %v16261_v2 = vmax.f32 %v21126_v1, 0.0  ;;  %21016 = vmatpush3.bf16.msra.mxu1 %v22979_v35 }
 0x984   : > { %v16277_v27 = vpack.c.bf16 %v16263_v47, %v16262_v29  ;;  %v14402_v25 = vpack.c.bf16 %v14393_v57, %v14392_v39  ;;  %21017 = vmatprep.subr.bf16.mxu1 %v23241_v36 }
 0x985   : > { %v16276_v17 = vpack.c.bf16 %v16261_v2, %v16260_v42  ;;  %v20993_v26 = vpop.f32.mrb[68].mxu1 }
 0x986   : > { %v21128_v41 = vadd.f32 %v25632_v21, %v20993_v26  ;;  %v16197_v10 = vpop.f32.mrb[69].mxu1 }
 0x987   : > { %v21130_v56 = vadd.f32 %v25632_v21, %v16197_v10  ;;  %v20994_v8 = vpop.f32.mrb[70].mxu1  ;;  %18504 = vmatprep.subr.bf16.mxu0 %v16276_v17 }
 0x988   : > { %v21132_v54 = vadd.f32 %v25632_v21, %v20994_v8  ;;  %v16200_v37 = vpop.f32.mrb[71].mxu1  ;;  %18505 = vmatpush3.bf16.msra.mxu0 %v25640_v40  ;;  %v16266_v34 = vmax.f32 %v21128_v41, 0.0 }
 0x989   : > { %v21134_v18 = vadd.f32 %v25632_v21, %v16200_v37  ;;  %18506 = vmatprep.subr.bf16.mxu0 %v16277_v27  ;;  %v16264_v24 = vmax.f32 %v21130_v56, 0.0 }
 0x98a   : > { %v16267_v14 = vmax.f32 %v21132_v54, 0.0 }
 0x98b   : > { %v16265_v31 = vmax.f32 %v21134_v18, 0.0 }
 0x98c   : > { %v16279_v13 = vpack.c.bf16 %v16267_v14, %v16266_v34  ;;  %18507 = vmatpush3.bf16.msra.mxu0 %v25638_v19 }
 0x98d   : > { %v16278_v30 = vpack.c.bf16 %v16265_v31, %v16264_v24  ;;  %v20997_v9 = vpop.f32.mrb[72].mxu1 }
 0x98e   : > { %v21136_v52 = vadd.f32 %v25632_v21, %v20997_v9  ;;  %v16213_v12 = vpop.f32.mrb[73].mxu1 }
 0x98f   : > { %v21138_v50 = vadd.f32 %v25632_v21, %v16213_v12  ;;  %v20998_v48 = vpop.f32.mrb[74].mxu1  ;;  %18508 = vmatprep.subr.bf16.mxu0 %v16278_v30 }
 0x990   : > { %v21140_v40 = vadd.f32 %v25632_v21, %v20998_v48  ;;  %v16216_v43 = vpop.f32.mrb[75].mxu1  ;;  %18509 = vmatpush3.bf16.msra.mxu0 %v25648_v11  ;;  %v16270_v62 = vmax.f32 %v21136_v52, 0.0 }
 0x991   : > { %v21142_v60 = vadd.f32 %v25632_v21, %v16216_v43  ;;  %18510 = vmatprep.subr.bf16.mxu0 %v16279_v13  ;;  %v16268_v19 = vmax.f32 %v21138_v50, 0.0 }
 0x992   : > { %v16271_v16 = vmax.f32 %v21140_v40, 0.0 }
 0x993   : > { %v16269_v4 = vmax.f32 %v21142_v60, 0.0 }
 0x994   : > { %v16281_v20 = vpack.c.bf16 %v16271_v16, %v16270_v62  ;;  %18511 = vmatpush3.bf16.msra.mxu0 %v25646_v49 }
 0x995   : > { %v16280_v58 = vpack.c.bf16 %v16269_v4, %v16268_v19  ;;  %v21001_v6 = vpop.f32.mrb[76].mxu1 }
 0x996   : > { %v21144_v23 = vadd.f32 %v25632_v21, %v21001_v6  ;;  %v16229_v45 = vpop.f32.mrb[77].mxu1 }
 0x997   : > { %v21146_v15 = vadd.f32 %v25632_v21, %v16229_v45  ;;  %v21002_v5 = vpop.f32.mrb[78].mxu1  ;;  %18512 = vmatprep.subr.bf16.mxu0 %v16280_v58 }
 0x998   : > { %v21148_v11 = vadd.f32 %v25632_v21, %v21002_v5  ;;  %v16232_v63 = vpop.f32.mrb[79].mxu1  ;;  %18513 = vmatpush3.bf16.msra.mxu0 %v25656_v7  ;;  %v16274_v59 = vmax.f32 %v21144_v23, 0.0 }
 0x999   : > { %v21150_v33 = vadd.f32 %v25632_v21, %v16232_v63  ;;  %18514 = vmatprep.subr.bf16.mxu0 %v16281_v20  ;;  %v16272_v49 = vmax.f32 %v21146_v15, 0.0  ;;  %v22980_v21 = vld [vmem:[#allocation13 + $0x38] sm:$0xff]  }
 0x99a   : > { %v16275_v44 = vmax.f32 %v21148_v11, 0.0  ;;  %21018 = vmatpush3.bf16.msra.mxu1 %v22980_v21 }
 0x99b   : > { %v16273_v32 = vmax.f32 %v21150_v33, 0.0 }
 0x99c   : > { %v16283_v28 = vpack.c.bf16 %v16275_v44, %v16274_v59  ;;  %18515 = vmatpush3.bf16.msra.mxu0 %v25654_v55 }
 0x99d   : > { %v16282_v51 = vpack.c.bf16 %v16273_v32, %v16272_v49 }
 0x99f   : > { %18516 = vmatprep.subr.bf16.mxu0 %v16282_v51 }
 0x9a0   : > { %18517 = vmatpush3.bf16.msra.mxu0 %v14402_v25 }
 0x9a1   : > { %18518 = vmatprep.subr.bf16.mxu0 %v16283_v28 }
 0x9a4   : > { %18519 = vmatpush3.bf16.msra.mxu0 %v14403_v53 }
 0x9a7   : > { %16341 = vmatmul.mubr.bf16.vlgmr.msra.gmra.mrb[80].mxu0 %v23240_v0  ;;  %v16366_v0 = vld [vmem:[#allocation14] sm:$0x1] }
 0xa7a   : > { %v18520_v7 = vpop.f32.mrb[80].mxu0 }
 0xa7b   : > { %v18521_v55 = vpop.f32.mrb[81].mxu0 }
 0xa7c   : > { %v18522_v22 = vadd.f32 %v18521_v55, %v18520_v7  ;;  %v18523_v61 = vpop.f32.mrb[82].mxu0 }
 0xa7d   : > { %v18524_v38 = vpop.f32.mrb[83].mxu0 }
 0xa7e   : > { %v16348_v3 = vmul.f32 0.00390625, %v18522_v22 }
 0xa80   : > { %v16349_v46 = vpack.c.bf16 %v16348_v3, %v16348_v3 }
 0xa82   : > { %21020 = vmatmul.mubr.bf16.vlgmr.msra.gmra.mrb[80].mxu1 %v16349_v46 }
 0xb55   : > { %v16449_v1 = vpop.f32.mrb[80].mxu1 }
 0xb56   : > { %v16450_v29 = vadd.f32 %v16449_v1, %v16366_v0  ;;  %v21021_v39 = vpop.f32.mrb[81].mxu1 }
 0xb57   : > { %v16452_v36 = vpop.f32.mrb[82].mxu1 }
 0xb58   : > { %16455 = vst [vmem:[%s356_s20] sm:$0x1] %v16450_v29  ;;  %v21022_v47 = vpop.f32.mrb[83].mxu1 }
 0xb59   : > { %23162 = shalt.err (!%p23159_p9)
}
 0xb5a   : > { %s23163_s10 = scalar_lea.hbm %s25692_s26, 16  ;;  %s23167_s29 = scalar_lea.hbm %s25741_s7, 32 }
 0xb5b   : > { %p23164_p10 = scmp.ne.s32.totalorder %s25692_s26, %s23163_s10  ;;  %p23168_p1 = scmp.lt.u32.totalorder %s25692_s26, %s25741_s7 }
 0xb5c   : > { %p23169_p2 = scmp.lt.u32.totalorder %s23167_s29, %s23163_s10  ;;  %p23171_p4 = scmp.lt.u32.totalorder %s23163_s10, %s25692_s26 }
 0xb5d   : > { %p23165_p13 = pnand %p23164_p10, %p26007_p7 }
 0xb5e   : > { %p23170_p3 = por %p23169_p2, %p23168_p1 }
 0xb5f   : > { %p23166_p12 = pneg %p23165_p13 }
 0xb60   : > { %p23172_p8 = por %p23171_p4, %p23170_p3 }
 0xb62   : > { %p23173_p11 = pnand %p23172_p8, %p23166_p12 }
 0xb64   : > { %23176 = shalt.err (!%p23173_p11)
}
 0xb65   : > { %22263 = dma.vmem_to_hbm [thread:$0]  (%p26007_p7), %s25694_s21, 16, %s25692_s26, %s16457_s14  }
 0xb66 PF: > { %p22300_p5 = scmp.ge.s32.totalorder %s23227_s27, 2  ;;  %s16481_s23 = sand.u32 1, %s23215_s24  }
 0xb67   : > { %p26008_p0 = scmp.ne.s32.totalorder %s25858_s12, 0  ;;  %s16482_s15 = scalar_lea.sflag [#allocation7], %s16481_s23 }
 0xb69   : > { %p22285_p6 = pnand %p22300_p5, %p26008_p0 }
 0xb6b   : > { %23210 = dma.done.wait (!%p22285_p6), %s16482_s15, 16  }
 0xb6c   : > { %23212 = vsyncadd (!%p22285_p6), %s16482_s15, 4294967280  ;;  %s26009_s20 = sld [smem:[#allocation22_spill]]  ;;  %s26010_s26 = sld [smem:[#allocation23_spill]] }
 0xb6d   : > { %p21_p9 = scmp.ge.s32.totalorder %s23309_s30, 4   ;;  %s26011_s24 = smov %s23219_s25 }
 0xb6e   : > { %s26013_s27 = smov %s23309_s30 }
 0xb6f   :  { %23 = sbr.rel (!%p21_p9) target bundleno = 9 (0x9), region = 167 }
 0xb72   : > { %s26012_s25 = smov %s26009_s20 }
 0xb76   :  { %16486 = vsyncpa [#allocation6], 1 }
 0xb77   :  { %16488 = vsyncpa [#allocation6 + $0x1], 1 }
 0xb78   :  { %16489 = vsyncpa [#allocation9], 1 }
 0xb79   :  { %16490 = vsyncpa [#allocation12], 1 }
 0xb7a   :  { %16491 = vsyncpa [#allocation15], 1 }
 0xb7b   :  { %16492 = vsyncpa [#allocation7], 1 }
 0xb7c   :  { %16494 = vsyncpa [#allocation7 + $0x1], 1 }

</bundles_post_ra>
